<compile_context>
chip_gen: v7x
topology: tpu7x:2x2x1
jax: 0.10.0
libtpu: 0.0.40
codegen_flags: <defaults>
</compile_context>

<pallas_src>
import functools
import math

import jax
import jax.numpy as jnp
from jax.experimental import pallas as pl
from jax.experimental.pallas import tpu as pltpu

_VMEM = pltpu.MemorySpace.VMEM
NEG_INF = -1e30
_LN_EPS = 1e-5

_N_HEAD_REFS = 7      # x, state_emb_w, state_emb_b, pe, act_row, self_mask, cross_mask
_N_LAYER_REFS = 20    # per decoder layer
_N_TAIL_REFS = 2      # out_w, out_b


# ----------------------------------------------------------------------------
# In-kernel helpers (trace-time functions, all rank-2 math)
# ----------------------------------------------------------------------------
def _layernorm(h, g, b):
    mu = jnp.mean(h, axis=-1, keepdims=True)
    var = jnp.mean(jnp.square(h - mu), axis=-1, keepdims=True)
    return (h - mu) * jax.lax.rsqrt(var + _LN_EPS) * g + b


def _attention(q, k, v, mask, wo, bo, nhead):
    """Per-head scaled-dot attention + output projection.

    q: (Mq, D) (query scale already folded into W_q/b_q), k, v: (Mk, D),
    mask: (Mq, Mk) additive mask encoding batch-block (+ causal) structure,
    wo: (D, D), bo: (1, D).  Heads are static lane slices of width Dh; the
    concat-then-project step is folded into per-head partial output
    projections accumulated in f32 (mathematically identical).
    """
    D = q.shape[1]
    Dh = D // nhead
    o = jnp.zeros((q.shape[0], D), jnp.float32) + bo
    for h in range(nhead):
        sl = slice(h * Dh, (h + 1) * Dh)
        qh, kh, vh = q[:, sl], k[:, sl], v[:, sl]
        s = jax.lax.dot_general(qh, kh, (((1,), (1,)), ((), ())),
                                preferred_element_type=jnp.float32)
        s = s + mask
        s = s - jnp.max(s, axis=-1, keepdims=True)
        p = jnp.exp(s)
        p = p * pl.reciprocal(jnp.sum(p, axis=-1, keepdims=True), approx=True)
        oh = jnp.dot(p, vh, preferred_element_type=jnp.float32)          # (Mq, Dh)
        o = o + jnp.dot(oh, wo[sl, :], preferred_element_type=jnp.float32)
    return o


# ----------------------------------------------------------------------------
# Fused forward kernel (entire DEC_GPT_IDM forward in one pallas_call)
# ----------------------------------------------------------------------------
def _fused_forward_kernel(*refs, nhead, num_layers):
    it = iter(refs)
    x_ref = next(it)
    semb_w_ref = next(it)
    semb_b_ref = next(it)
    pe_ref = next(it)
    act_ref = next(it)
    self_mask_ref = next(it)
    cross_mask_ref = next(it)
    layer_refs = [tuple(next(it) for _ in range(_N_LAYER_REFS))
                  for _ in range(num_layers)]
    out_w_ref = next(it)
    out_b_ref = next(it)
    o_ref = next(it)

    D = semb_w_ref.shape[1]
    M = x_ref.shape[0]

    # memory = PositionalEncoding(state_emb(x))   (dropout identity in eval)
    mem = jnp.dot(x_ref[...], semb_w_ref[...],
                  preferred_element_type=jnp.float32) + semb_b_ref[...]
    mem = mem + pe_ref[...]

    self_mask = self_mask_ref[...]
    cross_mask = cross_mask_ref[...]

    # tgt = act_emb(zeros): frozen embedding row 0 broadcast over all (t, b) rows
    tgt = jnp.broadcast_to(act_ref[...], (M, D))

    for (sa_wqkv, sa_bqkv, sa_wo, sa_bo,
         ca_wq, ca_bq, ca_wkv, ca_bkv, ca_wo, ca_bo,
         ln1_g, ln1_b, ln2_g, ln2_b, ln3_g, ln3_b,
         ff1_w, ff1_b, ff2_w, ff2_b) in layer_refs:

        # --- self-attention (fused QKV projection, causal + batch-block mask) ---
        qkv = jnp.dot(tgt, sa_wqkv[...],
                      preferred_element_type=jnp.float32) + sa_bqkv[...]
        a = _attention(qkv[:, :D], qkv[:, D:2 * D], qkv[:, 2 * D:], self_mask,
                       sa_wo[...], sa_bo[...], nhead)
        tgt = _layernorm(tgt + a, ln1_g[...], ln1_b[...])

        # --- cross-attention (queries from tgt, fused K/V from memory) ---
        q = jnp.dot(tgt, ca_wq[...],
                    preferred_element_type=jnp.float32) + ca_bq[...]
        kv = jnp.dot(mem, ca_wkv[...],
                     preferred_element_type=jnp.float32) + ca_bkv[...]
        a = _attention(q, kv[:, :D], kv[:, D:], cross_mask,
                       ca_wo[...], ca_bo[...], nhead)
        tgt = _layernorm(tgt + a, ln2_g[...], ln2_b[...])

        # --- feed-forward (ReLU) ---
        hff = jnp.maximum(
            jnp.dot(tgt, ff1_w[...],
                    preferred_element_type=jnp.float32) + ff1_b[...], 0.0)
        hff = jnp.dot(hff, ff2_w[...],
                      preferred_element_type=jnp.float32) + ff2_b[...]
        tgt = _layernorm(tgt + hff, ln3_g[...], ln3_b[...])

    y = jnp.dot(tgt, out_w_ref[...],
                preferred_element_type=jnp.float32) + out_b_ref[...]
    o_ref[...] = y.astype(o_ref.dtype)


# ----------------------------------------------------------------------------
# Host wrapper
# ----------------------------------------------------------------------------
def dec_gpt_idm_forward(params, X, nhead, mask=None):
    """Forward of DEC_GPT_IDM.  X: (B, T, 8).  Returns (T, B, dim_out)."""
    B, T, F = X.shape
    D = params["state_emb_w_t"].shape[1]
    dim_out = params["out_w_t"].shape[1]
    M = T * B

    # einops.rearrange('b t h -> t b h'), flattened rows as (t, b) -> t*B + b.
    x2d = jnp.transpose(X, (1, 0, 2)).reshape(M, F).astype(jnp.float32)
    pe2d = jnp.broadcast_to(params["pe"][:T], (T, B, D)).reshape(M, D)

    # Combined additive masks over flattened (t, b) rows: different batch
    # elements never attend to each other; self-attention is also causal in t.
    # TODO(synk): generate_restrictive_square_subsequent_mask source is not in
    # the provided snippet; assumed standard causal (lower-triangular) mask.
    row_t = jnp.arange(M, dtype=jnp.int32) // B
    row_b = jnp.arange(M, dtype=jnp.int32) % B
    same_b = row_b[:, None] == row_b[None, :]
    causal = row_t[:, None] >= row_t[None, :]
    self_mask = jnp.where(same_b & causal, 0.0, NEG_INF).astype(jnp.float32)
    if mask is None:
        cross_mask = jnp.where(same_b, 0.0, NEG_INF).astype(jnp.float32)
    else:
        mask_big = mask.astype(jnp.float32)[row_t[:, None], row_t[None, :]]
        cross_mask = jnp.where(same_b, mask_big, NEG_INF).astype(jnp.float32)

    flat = [x2d, params["state_emb_w_t"], params["state_emb_b"], pe2d,
            params["act_emb"], self_mask, cross_mask]
    for lp in params["layers"]:
        flat += [lp["sa_wqkv_t"], lp["sa_bqkv"], lp["sa_wo_t"], lp["sa_bo"],
                 lp["ca_wq_t"], lp["ca_bq"], lp["ca_wkv_t"], lp["ca_bkv"],
                 lp["ca_wo_t"], lp["ca_bo"],
                 lp["ln1_g"], lp["ln1_b"], lp["ln2_g"], lp["ln2_b"],
                 lp["ln3_g"], lp["ln3_b"],
                 lp["ff1_w_t"], lp["ff1_b"], lp["ff2_w_t"], lp["ff2_b"]]
    flat += [params["out_w_t"], params["out_b"]]

    # TODO(synk): for large T*B add an M-tiled grid (weights resident, rows
    # pipelined) so the (M, dim_ff) FFN hidden does not exceed VMEM.
    out2d = pl.pallas_call(
        functools.partial(_fused_forward_kernel, nhead=nhead,
                          num_layers=len(params["layers"])),
        out_shape=jax.ShapeDtypeStruct((M, dim_out), jnp.float32),
        in_specs=[pl.BlockSpec(memory_space=_VMEM)] * len(flat),
        out_specs=pl.BlockSpec(memory_space=_VMEM),
    )(*flat)
    return out2d.reshape(T, B, dim_out)


# ----------------------------------------------------------------------------
# Deterministic parameter initialization (synthetic weights, no checkpoint)
# ----------------------------------------------------------------------------
def init_params(key, *, state_feat, d_model, nhead, num_layers, dim_ff,
                dim_out, max_len):
    scale = 1.0 / math.sqrt(d_model // nhead)   # folded into W_q / b_q

    def dense(k, n_in, n_out, s=0.02):
        kw, kb = jax.random.split(k)
        w = jax.random.normal(kw, (n_out, n_in), jnp.float32) * s
        b = jax.random.normal(kb, (n_out,), jnp.float32) * s
        return w.T, b.reshape(1, n_out)          # store W^T (K, N), bias (1, N)

    keys = jax.random.split(key, 3 + num_layers)
    params = {}
    params["state_emb_w_t"], params["state_emb_b"] = dense(keys[0], state_feat, d_model)
    params["out_w_t"], params["out_b"] = dense(keys[1], d_model, dim_out)
    params["act_emb"] = jax.random.normal(keys[2], (1, d_model), jnp.float32) * 0.02

    # sinusoidal positional encoding table, (max_len, 1, d_model)
    pos = jnp.arange(max_len, dtype=jnp.float32)[:, None]
    div = jnp.exp(jnp.arange(0, d_model, 2, dtype=jnp.float32)
                  * (-math.log(10000.0) / d_model))
    pe = jnp.zeros((max_len, d_model), jnp.float32)
    pe = pe.at[:, 0::2].set(jnp.sin(pos * div))
    pe = pe.at[:, 1::2].set(jnp.cos(pos * div))
    params["pe"] = pe[:, None, :]

    layers = []
    for li in range(num_layers):
        lk = jax.random.split(keys[3 + li], 10)
        lp = {}
        # self-attention: per-projection weights fused into one (D, 3D) matmul;
        # the 1/sqrt(head_dim) query scale is folded into W_q / b_q.
        wq_t, bq = dense(lk[0], d_model, d_model)
        wk_t, bk = dense(lk[1], d_model, d_model)
        wv_t, bv = dense(lk[2], d_model, d_model)
        lp["sa_wqkv_t"] = jnp.concatenate([wq_t * scale, wk_t, wv_t], axis=1)
        lp["sa_bqkv"] = jnp.concatenate([bq * scale, bk, bv], axis=1)
        lp["sa_wo_t"], lp["sa_bo"] = dense(lk[3], d_model, d_model)
        # cross-attention: Q from tgt (scaled), fused K/V from memory.
        wq_t, bq = dense(lk[4], d_model, d_model)
        wk_t, bk = dense(lk[5], d_model, d_model)
        wv_t, bv = dense(lk[6], d_model, d_model)
        lp["ca_wq_t"], lp["ca_bq"] = wq_t * scale, bq * scale
        lp["ca_wkv_t"] = jnp.concatenate([wk_t, wv_t], axis=1)
        lp["ca_bkv"] = jnp.concatenate([bk, bv], axis=1)
        lp["ca_wo_t"], lp["ca_bo"] = dense(lk[7], d_model, d_model)
        lp["ff1_w_t"], lp["ff1_b"] = dense(lk[8], d_model, dim_ff)
        lp["ff2_w_t"], lp["ff2_b"] = dense(lk[9], dim_ff, d_model)
        for nm in ("ln1", "ln2", "ln3"):
            lp[nm + "_g"] = jnp.ones((1, d_model), jnp.float32)
            lp[nm + "_b"] = jnp.zeros((1, d_model), jnp.float32)
        layers.append(lp)
    params["layers"] = layers
    return params


# ----------------------------------------------------------------------------
# Pure-JAX reference (same semantics, (T, B, D) layout) for verification
# ----------------------------------------------------------------------------
def _reference_forward(params, X, nhead, mask=None):
    B, T, F = X.shape
    D = params["state_emb_w_t"].shape[1]
    H = nhead
    Dh = D // H

    x = jnp.transpose(X, (1, 0, 2)).astype(jnp.float32)          # (T, B, F)
    mem = jnp.einsum("tbf,fd->tbd", x, params["state_emb_w_t"]) + params["state_emb_b"][0]
    mem = mem + params["pe"][:T]
    tgt = jnp.broadcast_to(params["act_emb"][0], (T, B, D))

    causal = jnp.tril(jnp.ones((T, T), dtype=bool))
    tgt_mask = jnp.where(causal, 0.0, NEG_INF)
    mem_mask = jnp.zeros((T, T), jnp.float32) if mask is None else mask.astype(jnp.float32)

    def ln(h, g, b):
        mu = jnp.mean(h, -1, keepdims=True)
        var = jnp.mean((h - mu) ** 2, -1, keepdims=True)
        return (h - mu) / jnp.sqrt(var + _LN_EPS) * g[0] + b[0]

    def mha(q_in, kv_in, wq_t, bq, wkv_t, bkv, wo_t, bo, amask):
        q = jnp.einsum("tbd,de->tbe", q_in, wq_t) + bq[0]
        kv = jnp.einsum("tbd,de->tbe", kv_in, wkv_t) + bkv[0]
        k, v = kv[..., :D], kv[..., D:]
        Tq, Tk = q.shape[0], k.shape[0]
        qh = q.reshape(Tq, B, H, Dh)
        kh = k.reshape(Tk, B, H, Dh)
        vh = v.reshape(Tk, B, H, Dh)
        s = jnp.einsum("qbhd,kbhd->bhqk", qh, kh) + amask
        p = jax.nn.softmax(s, axis=-1)
        o = jnp.einsum("bhqk,kbhd->qbhd", p, vh).reshape(Tq, B, D)
        return jnp.einsum("tbd,de->tbe", o, wo_t) + bo[0]

    for lp in params["layers"]:
        a = mha(tgt, tgt,
                lp["sa_wqkv_t"][:, :D], lp["sa_bqkv"][:, :D],
                lp["sa_wqkv_t"][:, D:], lp["sa_bqkv"][:, D:],
                lp["sa_wo_t"], lp["sa_bo"], tgt_mask)
        tgt = ln(tgt + a, lp["ln1_g"], lp["ln1_b"])
        a = mha(tgt, mem,
                lp["ca_wq_t"], lp["ca_bq"], lp["ca_wkv_t"], lp["ca_bkv"],
                lp["ca_wo_t"], lp["ca_bo"], mem_mask)
        tgt = ln(tgt + a, lp["ln2_g"], lp["ln2_b"])
        hff = jax.nn.relu(jnp.einsum("tbd,df->tbf", tgt, lp["ff1_w_t"]) + lp["ff1_b"][0])
        hff = jnp.einsum("tbf,fd->tbd", hff, lp["ff2_w_t"]) + lp["ff2_b"][0]
        tgt = ln(tgt + hff, lp["ln3_g"], lp["ln3_b"])

    return jnp.einsum("tbd,do->tbo", tgt, params["out_w_t"]) + params["out_b"][0]


# ----------------------------------------------------------------------------
if __name__ == "__main__":
    # Shapes implied by the module: X is (batch, seq, 8) since
    # state_emb = nn.Linear(8, d_model).
    B, T, STATE_FEAT = 2, 8, 8
    D_MODEL, NHEAD, LAYERS = 32, 4, 2
    DIM_FF = 2048            # PyTorch nn.TransformerDecoderLayer default
    DIM_OUT = 6              # env.action_space.n
    MAX_LEN = 64             # args.max_len

    key = jax.random.PRNGKey(0)
    pkey, xkey = jax.random.split(key)
    params = init_params(pkey, state_feat=STATE_FEAT, d_model=D_MODEL,
                         nhead=NHEAD, num_layers=LAYERS, dim_ff=DIM_FF,
                         dim_out=DIM_OUT, max_len=MAX_LEN)
    X = jax.random.normal(xkey, (B, T, STATE_FEAT), jnp.float32)

    y = dec_gpt_idm_forward(params, X, NHEAD, mask=None)
    y = jax.block_until_ready(y)

    assert y.shape == (T, B, DIM_OUT), y.shape
    assert bool(jnp.all(jnp.isfinite(y)))

    y_ref = _reference_forward(params, X, NHEAD, mask=None)
    assert bool(jnp.allclose(y, y_ref, rtol=2e-2, atol=2e-3)), (
        float(jnp.max(jnp.abs(y - y_ref))))

    print("KERNEL_OK")
</pallas_src>

<mosaic_0001>
module attributes {stable_mosaic.version = 11 : i64} {
  func.func @_fused_forward_kernel(%arg0: memref<16x8xf32, #tpu.memory_space<vmem>>, %arg1: memref<8x32xf32, #tpu.memory_space<vmem>>, %arg2: memref<1x32xf32, #tpu.memory_space<vmem>>, %arg3: memref<16x32xf32, #tpu.memory_space<vmem>>, %arg4: memref<1x32xf32, #tpu.memory_space<vmem>>, %arg5: memref<16x16xf32, #tpu.memory_space<vmem>>, %arg6: memref<16x16xf32, #tpu.memory_space<vmem>>, %arg7: memref<32x96xf32, #tpu.memory_space<vmem>>, %arg8: memref<1x96xf32, #tpu.memory_space<vmem>>, %arg9: memref<32x32xf32, #tpu.memory_space<vmem>>, %arg10: memref<1x32xf32, #tpu.memory_space<vmem>>, %arg11: memref<32x32xf32, #tpu.memory_space<vmem>>, %arg12: memref<1x32xf32, #tpu.memory_space<vmem>>, %arg13: memref<32x64xf32, #tpu.memory_space<vmem>>, %arg14: memref<1x64xf32, #tpu.memory_space<vmem>>, %arg15: memref<32x32xf32, #tpu.memory_space<vmem>>, %arg16: memref<1x32xf32, #tpu.memory_space<vmem>>, %arg17: memref<1x32xf32, #tpu.memory_space<vmem>>, %arg18: memref<1x32xf32, #tpu.memory_space<vmem>>, %arg19: memref<1x32xf32, #tpu.memory_space<vmem>>, %arg20: memref<1x32xf32, #tpu.memory_space<vmem>>, %arg21: memref<1x32xf32, #tpu.memory_space<vmem>>, %arg22: memref<1x32xf32, #tpu.memory_space<vmem>>, %arg23: memref<32x2048xf32, #tpu.memory_space<vmem>>, %arg24: memref<1x2048xf32, #tpu.memory_space<vmem>>, %arg25: memref<2048x32xf32, #tpu.memory_space<vmem>>, %arg26: memref<1x32xf32, #tpu.memory_space<vmem>>, %arg27: memref<32x96xf32, #tpu.memory_space<vmem>>, %arg28: memref<1x96xf32, #tpu.memory_space<vmem>>, %arg29: memref<32x32xf32, #tpu.memory_space<vmem>>, %arg30: memref<1x32xf32, #tpu.memory_space<vmem>>, %arg31: memref<32x32xf32, #tpu.memory_space<vmem>>, %arg32: memref<1x32xf32, #tpu.memory_space<vmem>>, %arg33: memref<32x64xf32, #tpu.memory_space<vmem>>, %arg34: memref<1x64xf32, #tpu.memory_space<vmem>>, %arg35: memref<32x32xf32, #tpu.memory_space<vmem>>, %arg36: memref<1x32xf32, #tpu.memory_space<vmem>>, %arg37: memref<1x32xf32, #tpu.memory_space<vmem>>, %arg38: memref<1x32xf32, #tpu.memory_space<vmem>>, %arg39: memref<1x32xf32, #tpu.memory_space<vmem>>, %arg40: memref<1x32xf32, #tpu.memory_space<vmem>>, %arg41: memref<1x32xf32, #tpu.memory_space<vmem>>, %arg42: memref<1x32xf32, #tpu.memory_space<vmem>>, %arg43: memref<32x2048xf32, #tpu.memory_space<vmem>>, %arg44: memref<1x2048xf32, #tpu.memory_space<vmem>>, %arg45: memref<2048x32xf32, #tpu.memory_space<vmem>>, %arg46: memref<1x32xf32, #tpu.memory_space<vmem>>, %arg47: memref<32x6xf32, #tpu.memory_space<vmem>>, %arg48: memref<1x6xf32, #tpu.memory_space<vmem>>, %arg49: memref<16x6xf32, #tpu.memory_space<vmem>>) attributes {dimension_semantics = [], scalar_prefetch = 0 : i64, scratch_operands = 0 : i64, tpu.core_type = #tpu.core_type<tc>} {
    %c0 = arith.constant 0 : index
    %c0_0 = arith.constant 0 : index
    %0 = vector.load %arg0[%c0, %c0_0] : memref<16x8xf32, #tpu.memory_space<vmem>>, vector<16x8xf32>
    %c0_1 = arith.constant 0 : index
    %c0_2 = arith.constant 0 : index
    %1 = vector.load %arg1[%c0_1, %c0_2] : memref<8x32xf32, #tpu.memory_space<vmem>>, vector<8x32xf32>
    %cst = arith.constant dense<0.000000e+00> : vector<16x32xf32>
    %2 = tpu.matmul %0, %1, %cst {dimension_numbers = #tpu.dot_dimension_numbers<[1], [0], [0], [1], [0, 0, 1, 1], [], []>} : vector<16x8xf32>, vector<8x32xf32>, vector<16x32xf32> -> vector<16x32xf32>
    %c0_3 = arith.constant 0 : index
    %c0_4 = arith.constant 0 : index
    %3 = vector.load %arg2[%c0_3, %c0_4] : memref<1x32xf32, #tpu.memory_space<vmem>>, vector<1x32xf32>
    %4 = vector.broadcast %3 : vector<1x32xf32> to vector<16x32xf32>
    %5 = arith.addf %2, %4 : vector<16x32xf32>
    %c0_5 = arith.constant 0 : index
    %c0_6 = arith.constant 0 : index
    %6 = vector.load %arg3[%c0_5, %c0_6] : memref<16x32xf32, #tpu.memory_space<vmem>>, vector<16x32xf32>
    %7 = arith.addf %5, %6 : vector<16x32xf32>
    %c0_7 = arith.constant 0 : index
    %c0_8 = arith.constant 0 : index
    %8 = vector.load %arg5[%c0_7, %c0_8] : memref<16x16xf32, #tpu.memory_space<vmem>>, vector<16x16xf32>
    %c0_9 = arith.constant 0 : index
    %c0_10 = arith.constant 0 : index
    %9 = vector.load %arg6[%c0_9, %c0_10] : memref<16x16xf32, #tpu.memory_space<vmem>>, vector<16x16xf32>
    %c0_11 = arith.constant 0 : index
    %c0_12 = arith.constant 0 : index
    %10 = vector.load %arg4[%c0_11, %c0_12] : memref<1x32xf32, #tpu.memory_space<vmem>>, vector<1x32xf32>
    %11 = vector.shape_cast %10 : vector<1x32xf32> to vector<1x32xf32>
    %12 = vector.broadcast %11 : vector<1x32xf32> to vector<16x32xf32>
    %c0_13 = arith.constant 0 : index
    %c0_14 = arith.constant 0 : index
    %13 = vector.load %arg7[%c0_13, %c0_14] : memref<32x96xf32, #tpu.memory_space<vmem>>, vector<32x96xf32>
    %cst_15 = arith.constant dense<0.000000e+00> : vector<16x96xf32>
    %14 = tpu.matmul %12, %13, %cst_15 {dimension_numbers = #tpu.dot_dimension_numbers<[1], [0], [0], [1], [0, 0, 1, 1], [], []>} : vector<16x32xf32>, vector<32x96xf32>, vector<16x96xf32> -> vector<16x96xf32>
    %c0_16 = arith.constant 0 : index
    %c0_17 = arith.constant 0 : index
    %15 = vector.load %arg8[%c0_16, %c0_17] : memref<1x96xf32, #tpu.memory_space<vmem>>, vector<1x96xf32>
    %16 = vector.broadcast %15 : vector<1x96xf32> to vector<16x96xf32>
    %17 = arith.addf %14, %16 : vector<16x96xf32>
    %18 = vector.extract_strided_slice %17 {offsets = [0, 0], sizes = [16, 32], strides = [1, 1]} : vector<16x96xf32> to vector<16x32xf32>
    %19 = vector.extract_strided_slice %17 {offsets = [0, 32], sizes = [16, 32], strides = [1, 1]} : vector<16x96xf32> to vector<16x32xf32>
    %20 = vector.extract_strided_slice %17 {offsets = [0, 64], sizes = [16, 32], strides = [1, 1]} : vector<16x96xf32> to vector<16x32xf32>
    %c0_18 = arith.constant 0 : index
    %c0_19 = arith.constant 0 : index
    %21 = vector.load %arg9[%c0_18, %c0_19] : memref<32x32xf32, #tpu.memory_space<vmem>>, vector<32x32xf32>
    %c0_20 = arith.constant 0 : index
    %c0_21 = arith.constant 0 : index
    %22 = vector.load %arg10[%c0_20, %c0_21] : memref<1x32xf32, #tpu.memory_space<vmem>>, vector<1x32xf32>
    %cst_22 = arith.constant 0.000000e+00 : f32
    %23 = vector.broadcast %cst_22 : f32 to vector<16x32xf32>
    %24 = vector.broadcast %22 : vector<1x32xf32> to vector<16x32xf32>
    %25 = arith.addf %23, %24 : vector<16x32xf32>
    %26 = vector.extract_strided_slice %18 {offsets = [0, 0], sizes = [16, 8], strides = [1, 1]} : vector<16x32xf32> to vector<16x8xf32>
    %27 = vector.extract_strided_slice %19 {offsets = [0, 0], sizes = [16, 8], strides = [1, 1]} : vector<16x32xf32> to vector<16x8xf32>
    %28 = vector.extract_strided_slice %20 {offsets = [0, 0], sizes = [16, 8], strides = [1, 1]} : vector<16x32xf32> to vector<16x8xf32>
    %cst_23 = arith.constant dense<0.000000e+00> : vector<16x16xf32>
    %29 = tpu.matmul %26, %27, %cst_23 {dimension_numbers = #tpu.dot_dimension_numbers<[1], [1], [0], [0], [0, 0, 1, 0], [], []>} : vector<16x8xf32>, vector<16x8xf32>, vector<16x16xf32> -> vector<16x16xf32>
    %30 = arith.addf %29, %8 : vector<16x16xf32>
    %cst_24 = arith.constant dense<0xFF800000> : vector<16xf32>
    %31 = vector.multi_reduction <maximumf>, %30, %cst_24 [1] : vector<16x16xf32> to vector<16xf32>
    %32 = vector.shape_cast %31 : vector<16xf32> to vector<16x1xf32>
    %33 = vector.broadcast %32 : vector<16x1xf32> to vector<16x16xf32>
    %34 = arith.subf %30, %33 : vector<16x16xf32>
    %35 = math.exp %34 : vector<16x16xf32>
    %cst_25 = arith.constant dense<0.000000e+00> : vector<16xf32>
    %36 = vector.multi_reduction <add>, %35, %cst_25 [1] : vector<16x16xf32> to vector<16xf32>
    %37 = vector.shape_cast %36 : vector<16xf32> to vector<16x1xf32>
    %38 = tpu.reciprocal %37 {approx = true} : vector<16x1xf32> -> vector<16x1xf32>
    %39 = vector.broadcast %38 : vector<16x1xf32> to vector<16x16xf32>
    %40 = arith.mulf %35, %39 : vector<16x16xf32>
    %cst_26 = arith.constant dense<0.000000e+00> : vector<16x8xf32>
    %41 = tpu.matmul %40, %28, %cst_26 {dimension_numbers = #tpu.dot_dimension_numbers<[1], [0], [0], [1], [0, 0, 1, 1], [], []>} : vector<16x16xf32>, vector<16x8xf32>, vector<16x8xf32> -> vector<16x8xf32>
    %42 = vector.extract_strided_slice %21 {offsets = [0, 0], sizes = [8, 32], strides = [1, 1]} : vector<32x32xf32> to vector<8x32xf32>
    %cst_27 = arith.constant dense<0.000000e+00> : vector<16x32xf32>
    %43 = tpu.matmul %41, %42, %cst_27 {dimension_numbers = #tpu.dot_dimension_numbers<[1], [0], [0], [1], [0, 0, 1, 1], [], []>} : vector<16x8xf32>, vector<8x32xf32>, vector<16x32xf32> -> vector<16x32xf32>
    %44 = arith.addf %25, %43 : vector<16x32xf32>
    %45 = vector.extract_strided_slice %18 {offsets = [0, 8], sizes = [16, 8], strides = [1, 1]} : vector<16x32xf32> to vector<16x8xf32>
    %46 = vector.extract_strided_slice %19 {offsets = [0, 8], sizes = [16, 8], strides = [1, 1]} : vector<16x32xf32> to vector<16x8xf32>
    %47 = vector.extract_strided_slice %20 {offsets = [0, 8], sizes = [16, 8], strides = [1, 1]} : vector<16x32xf32> to vector<16x8xf32>
    %cst_28 = arith.constant dense<0.000000e+00> : vector<16x16xf32>
    %48 = tpu.matmul %45, %46, %cst_28 {dimension_numbers = #tpu.dot_dimension_numbers<[1], [1], [0], [0], [0, 0, 1, 0], [], []>} : vector<16x8xf32>, vector<16x8xf32>, vector<16x16xf32> -> vector<16x16xf32>
    %49 = arith.addf %48, %8 : vector<16x16xf32>
    %cst_29 = arith.constant dense<0xFF800000> : vector<16xf32>
    %50 = vector.multi_reduction <maximumf>, %49, %cst_29 [1] : vector<16x16xf32> to vector<16xf32>
    %51 = vector.shape_cast %50 : vector<16xf32> to vector<16x1xf32>
    %52 = vector.broadcast %51 : vector<16x1xf32> to vector<16x16xf32>
    %53 = arith.subf %49, %52 : vector<16x16xf32>
    %54 = math.exp %53 : vector<16x16xf32>
    %cst_30 = arith.constant dense<0.000000e+00> : vector<16xf32>
    %55 = vector.multi_reduction <add>, %54, %cst_30 [1] : vector<16x16xf32> to vector<16xf32>
    %56 = vector.shape_cast %55 : vector<16xf32> to vector<16x1xf32>
    %57 = tpu.reciprocal %56 {approx = true} : vector<16x1xf32> -> vector<16x1xf32>
    %58 = vector.broadcast %57 : vector<16x1xf32> to vector<16x16xf32>
    %59 = arith.mulf %54, %58 : vector<16x16xf32>
    %cst_31 = arith.constant dense<0.000000e+00> : vector<16x8xf32>
    %60 = tpu.matmul %59, %47, %cst_31 {dimension_numbers = #tpu.dot_dimension_numbers<[1], [0], [0], [1], [0, 0, 1, 1], [], []>} : vector<16x16xf32>, vector<16x8xf32>, vector<16x8xf32> -> vector<16x8xf32>
    %61 = vector.extract_strided_slice %21 {offsets = [8, 0], sizes = [8, 32], strides = [1, 1]} : vector<32x32xf32> to vector<8x32xf32>
    %cst_32 = arith.constant dense<0.000000e+00> : vector<16x32xf32>
    %62 = tpu.matmul %60, %61, %cst_32 {dimension_numbers = #tpu.dot_dimension_numbers<[1], [0], [0], [1], [0, 0, 1, 1], [], []>} : vector<16x8xf32>, vector<8x32xf32>, vector<16x32xf32> -> vector<16x32xf32>
    %63 = arith.addf %44, %62 : vector<16x32xf32>
    %64 = vector.extract_strided_slice %18 {offsets = [0, 16], sizes = [16, 8], strides = [1, 1]} : vector<16x32xf32> to vector<16x8xf32>
    %65 = vector.extract_strided_slice %19 {offsets = [0, 16], sizes = [16, 8], strides = [1, 1]} : vector<16x32xf32> to vector<16x8xf32>
    %66 = vector.extract_strided_slice %20 {offsets = [0, 16], sizes = [16, 8], strides = [1, 1]} : vector<16x32xf32> to vector<16x8xf32>
    %cst_33 = arith.constant dense<0.000000e+00> : vector<16x16xf32>
    %67 = tpu.matmul %64, %65, %cst_33 {dimension_numbers = #tpu.dot_dimension_numbers<[1], [1], [0], [0], [0, 0, 1, 0], [], []>} : vector<16x8xf32>, vector<16x8xf32>, vector<16x16xf32> -> vector<16x16xf32>
    %68 = arith.addf %67, %8 : vector<16x16xf32>
    %cst_34 = arith.constant dense<0xFF800000> : vector<16xf32>
    %69 = vector.multi_reduction <maximumf>, %68, %cst_34 [1] : vector<16x16xf32> to vector<16xf32>
    %70 = vector.shape_cast %69 : vector<16xf32> to vector<16x1xf32>
    %71 = vector.broadcast %70 : vector<16x1xf32> to vector<16x16xf32>
    %72 = arith.subf %68, %71 : vector<16x16xf32>
    %73 = math.exp %72 : vector<16x16xf32>
    %cst_35 = arith.constant dense<0.000000e+00> : vector<16xf32>
    %74 = vector.multi_reduction <add>, %73, %cst_35 [1] : vector<16x16xf32> to vector<16xf32>
    %75 = vector.shape_cast %74 : vector<16xf32> to vector<16x1xf32>
    %76 = tpu.reciprocal %75 {approx = true} : vector<16x1xf32> -> vector<16x1xf32>
    %77 = vector.broadcast %76 : vector<16x1xf32> to vector<16x16xf32>
    %78 = arith.mulf %73, %77 : vector<16x16xf32>
    %cst_36 = arith.constant dense<0.000000e+00> : vector<16x8xf32>
    %79 = tpu.matmul %78, %66, %cst_36 {dimension_numbers = #tpu.dot_dimension_numbers<[1], [0], [0], [1], [0, 0, 1, 1], [], []>} : vector<16x16xf32>, vector<16x8xf32>, vector<16x8xf32> -> vector<16x8xf32>
    %80 = vector.extract_strided_slice %21 {offsets = [16, 0], sizes = [8, 32], strides = [1, 1]} : vector<32x32xf32> to vector<8x32xf32>
    %cst_37 = arith.constant dense<0.000000e+00> : vector<16x32xf32>
    %81 = tpu.matmul %79, %80, %cst_37 {dimension_numbers = #tpu.dot_dimension_numbers<[1], [0], [0], [1], [0, 0, 1, 1], [], []>} : vector<16x8xf32>, vector<8x32xf32>, vector<16x32xf32> -> vector<16x32xf32>
    %82 = arith.addf %63, %81 : vector<16x32xf32>
    %83 = vector.extract_strided_slice %18 {offsets = [0, 24], sizes = [16, 8], strides = [1, 1]} : vector<16x32xf32> to vector<16x8xf32>
    %84 = vector.extract_strided_slice %19 {offsets = [0, 24], sizes = [16, 8], strides = [1, 1]} : vector<16x32xf32> to vector<16x8xf32>
    %85 = vector.extract_strided_slice %20 {offsets = [0, 24], sizes = [16, 8], strides = [1, 1]} : vector<16x32xf32> to vector<16x8xf32>
    %cst_38 = arith.constant dense<0.000000e+00> : vector<16x16xf32>
    %86 = tpu.matmul %83, %84, %cst_38 {dimension_numbers = #tpu.dot_dimension_numbers<[1], [1], [0], [0], [0, 0, 1, 0], [], []>} : vector<16x8xf32>, vector<16x8xf32>, vector<16x16xf32> -> vector<16x16xf32>
    %87 = arith.addf %86, %8 : vector<16x16xf32>
    %cst_39 = arith.constant dense<0xFF800000> : vector<16xf32>
    %88 = vector.multi_reduction <maximumf>, %87, %cst_39 [1] : vector<16x16xf32> to vector<16xf32>
    %89 = vector.shape_cast %88 : vector<16xf32> to vector<16x1xf32>
    %90 = vector.broadcast %89 : vector<16x1xf32> to vector<16x16xf32>
    %91 = arith.subf %87, %90 : vector<16x16xf32>
    %92 = math.exp %91 : vector<16x16xf32>
    %cst_40 = arith.constant dense<0.000000e+00> : vector<16xf32>
    %93 = vector.multi_reduction <add>, %92, %cst_40 [1] : vector<16x16xf32> to vector<16xf32>
    %94 = vector.shape_cast %93 : vector<16xf32> to vector<16x1xf32>
    %95 = tpu.reciprocal %94 {approx = true} : vector<16x1xf32> -> vector<16x1xf32>
    %96 = vector.broadcast %95 : vector<16x1xf32> to vector<16x16xf32>
    %97 = arith.mulf %92, %96 : vector<16x16xf32>
    %cst_41 = arith.constant dense<0.000000e+00> : vector<16x8xf32>
    %98 = tpu.matmul %97, %85, %cst_41 {dimension_numbers = #tpu.dot_dimension_numbers<[1], [0], [0], [1], [0, 0, 1, 1], [], []>} : vector<16x16xf32>, vector<16x8xf32>, vector<16x8xf32> -> vector<16x8xf32>
    %99 = vector.extract_strided_slice %21 {offsets = [24, 0], sizes = [8, 32], strides = [1, 1]} : vector<32x32xf32> to vector<8x32xf32>
    %cst_42 = arith.constant dense<0.000000e+00> : vector<16x32xf32>
    %100 = tpu.matmul %98, %99, %cst_42 {dimension_numbers = #tpu.dot_dimension_numbers<[1], [0], [0], [1], [0, 0, 1, 1], [], []>} : vector<16x8xf32>, vector<8x32xf32>, vector<16x32xf32> -> vector<16x32xf32>
    %101 = arith.addf %82, %100 : vector<16x32xf32>
    %102 = arith.addf %12, %101 : vector<16x32xf32>
    %c0_43 = arith.constant 0 : index
    %c0_44 = arith.constant 0 : index
    %103 = vector.load %arg17[%c0_43, %c0_44] : memref<1x32xf32, #tpu.memory_space<vmem>>, vector<1x32xf32>
    %c0_45 = arith.constant 0 : index
    %c0_46 = arith.constant 0 : index
    %104 = vector.load %arg18[%c0_45, %c0_46] : memref<1x32xf32, #tpu.memory_space<vmem>>, vector<1x32xf32>
    %cst_47 = arith.constant dense<0.000000e+00> : vector<16xf32>
    %105 = vector.multi_reduction <add>, %102, %cst_47 [1] : vector<16x32xf32> to vector<16xf32>
    %106 = vector.shape_cast %105 : vector<16xf32> to vector<16x1xf32>
    %cst_48 = arith.constant 3.200000e+01 : f32
    %107 = vector.broadcast %cst_48 : f32 to vector<16x1xf32>
    %108 = arith.divf %106, %107 : vector<16x1xf32>
    %109 = vector.broadcast %108 : vector<16x1xf32> to vector<16x32xf32>
    %110 = arith.subf %102, %109 : vector<16x32xf32>
    %111 = arith.mulf %110, %110 : vector<16x32xf32>
    %cst_49 = arith.constant dense<0.000000e+00> : vector<16xf32>
    %112 = vector.multi_reduction <add>, %111, %cst_49 [1] : vector<16x32xf32> to vector<16xf32>
    %113 = vector.shape_cast %112 : vector<16xf32> to vector<16x1xf32>
    %cst_50 = arith.constant 3.200000e+01 : f32
    %114 = vector.broadcast %cst_50 : f32 to vector<16x1xf32>
    %115 = arith.divf %113, %114 : vector<16x1xf32>
    %116 = vector.broadcast %108 : vector<16x1xf32> to vector<16x32xf32>
    %117 = arith.subf %102, %116 : vector<16x32xf32>
    %cst_51 = arith.constant 9.99999974E-6 : f32
    %118 = vector.broadcast %cst_51 : f32 to vector<16x1xf32>
    %119 = arith.addf %115, %118 : vector<16x1xf32>
    %120 = math.rsqrt %119 : vector<16x1xf32>
    %121 = vector.broadcast %120 : vector<16x1xf32> to vector<16x32xf32>
    %122 = arith.mulf %117, %121 : vector<16x32xf32>
    %123 = vector.broadcast %103 : vector<1x32xf32> to vector<16x32xf32>
    %124 = arith.mulf %122, %123 : vector<16x32xf32>
    %125 = vector.broadcast %104 : vector<1x32xf32> to vector<16x32xf32>
    %126 = arith.addf %124, %125 : vector<16x32xf32>
    %c0_52 = arith.constant 0 : index
    %c0_53 = arith.constant 0 : index
    %127 = vector.load %arg11[%c0_52, %c0_53] : memref<32x32xf32, #tpu.memory_space<vmem>>, vector<32x32xf32>
    %cst_54 = arith.constant dense<0.000000e+00> : vector<16x32xf32>
    %128 = tpu.matmul %126, %127, %cst_54 {dimension_numbers = #tpu.dot_dimension_numbers<[1], [0], [0], [1], [0, 0, 1, 1], [], []>} : vector<16x32xf32>, vector<32x32xf32>, vector<16x32xf32> -> vector<16x32xf32>
    %c0_55 = arith.constant 0 : index
    %c0_56 = arith.constant 0 : index
    %129 = vector.load %arg12[%c0_55, %c0_56] : memref<1x32xf32, #tpu.memory_space<vmem>>, vector<1x32xf32>
    %130 = vector.broadcast %129 : vector<1x32xf32> to vector<16x32xf32>
    %131 = arith.addf %128, %130 : vector<16x32xf32>
    %c0_57 = arith.constant 0 : index
    %c0_58 = arith.constant 0 : index
    %132 = vector.load %arg13[%c0_57, %c0_58] : memref<32x64xf32, #tpu.memory_space<vmem>>, vector<32x64xf32>
    %cst_59 = arith.constant dense<0.000000e+00> : vector<16x64xf32>
    %133 = tpu.matmul %7, %132, %cst_59 {dimension_numbers = #tpu.dot_dimension_numbers<[1], [0], [0], [1], [0, 0, 1, 1], [], []>} : vector<16x32xf32>, vector<32x64xf32>, vector<16x64xf32> -> vector<16x64xf32>
    %c0_60 = arith.constant 0 : index
    %c0_61 = arith.constant 0 : index
    %134 = vector.load %arg14[%c0_60, %c0_61] : memref<1x64xf32, #tpu.memory_space<vmem>>, vector<1x64xf32>
    %135 = vector.broadcast %134 : vector<1x64xf32> to vector<16x64xf32>
    %136 = arith.addf %133, %135 : vector<16x64xf32>
    %137 = vector.extract_strided_slice %136 {offsets = [0, 0], sizes = [16, 32], strides = [1, 1]} : vector<16x64xf32> to vector<16x32xf32>
    %138 = vector.extract_strided_slice %136 {offsets = [0, 32], sizes = [16, 32], strides = [1, 1]} : vector<16x64xf32> to vector<16x32xf32>
    %c0_62 = arith.constant 0 : index
    %c0_63 = arith.constant 0 : index
    %139 = vector.load %arg15[%c0_62, %c0_63] : memref<32x32xf32, #tpu.memory_space<vmem>>, vector<32x32xf32>
    %c0_64 = arith.constant 0 : index
    %c0_65 = arith.constant 0 : index
    %140 = vector.load %arg16[%c0_64, %c0_65] : memref<1x32xf32, #tpu.memory_space<vmem>>, vector<1x32xf32>
    %cst_66 = arith.constant 0.000000e+00 : f32
    %141 = vector.broadcast %cst_66 : f32 to vector<16x32xf32>
    %142 = vector.broadcast %140 : vector<1x32xf32> to vector<16x32xf32>
    %143 = arith.addf %141, %142 : vector<16x32xf32>
    %144 = vector.extract_strided_slice %131 {offsets = [0, 0], sizes = [16, 8], strides = [1, 1]} : vector<16x32xf32> to vector<16x8xf32>
    %145 = vector.extract_strided_slice %137 {offsets = [0, 0], sizes = [16, 8], strides = [1, 1]} : vector<16x32xf32> to vector<16x8xf32>
    %146 = vector.extract_strided_slice %138 {offsets = [0, 0], sizes = [16, 8], strides = [1, 1]} : vector<16x32xf32> to vector<16x8xf32>
    %cst_67 = arith.constant dense<0.000000e+00> : vector<16x16xf32>
    %147 = tpu.matmul %144, %145, %cst_67 {dimension_numbers = #tpu.dot_dimension_numbers<[1], [1], [0], [0], [0, 0, 1, 0], [], []>} : vector<16x8xf32>, vector<16x8xf32>, vector<16x16xf32> -> vector<16x16xf32>
    %148 = arith.addf %147, %9 : vector<16x16xf32>
    %cst_68 = arith.constant dense<0xFF800000> : vector<16xf32>
    %149 = vector.multi_reduction <maximumf>, %148, %cst_68 [1] : vector<16x16xf32> to vector<16xf32>
    %150 = vector.shape_cast %149 : vector<16xf32> to vector<16x1xf32>
    %151 = vector.broadcast %150 : vector<16x1xf32> to vector<16x16xf32>
    %152 = arith.subf %148, %151 : vector<16x16xf32>
    %153 = math.exp %152 : vector<16x16xf32>
    %cst_69 = arith.constant dense<0.000000e+00> : vector<16xf32>
    %154 = vector.multi_reduction <add>, %153, %cst_69 [1] : vector<16x16xf32> to vector<16xf32>
    %155 = vector.shape_cast %154 : vector<16xf32> to vector<16x1xf32>
    %156 = tpu.reciprocal %155 {approx = true} : vector<16x1xf32> -> vector<16x1xf32>
    %157 = vector.broadcast %156 : vector<16x1xf32> to vector<16x16xf32>
    %158 = arith.mulf %153, %157 : vector<16x16xf32>
    %cst_70 = arith.constant dense<0.000000e+00> : vector<16x8xf32>
    %159 = tpu.matmul %158, %146, %cst_70 {dimension_numbers = #tpu.dot_dimension_numbers<[1], [0], [0], [1], [0, 0, 1, 1], [], []>} : vector<16x16xf32>, vector<16x8xf32>, vector<16x8xf32> -> vector<16x8xf32>
    %160 = vector.extract_strided_slice %139 {offsets = [0, 0], sizes = [8, 32], strides = [1, 1]} : vector<32x32xf32> to vector<8x32xf32>
    %cst_71 = arith.constant dense<0.000000e+00> : vector<16x32xf32>
    %161 = tpu.matmul %159, %160, %cst_71 {dimension_numbers = #tpu.dot_dimension_numbers<[1], [0], [0], [1], [0, 0, 1, 1], [], []>} : vector<16x8xf32>, vector<8x32xf32>, vector<16x32xf32> -> vector<16x32xf32>
    %162 = arith.addf %143, %161 : vector<16x32xf32>
    %163 = vector.extract_strided_slice %131 {offsets = [0, 8], sizes = [16, 8], strides = [1, 1]} : vector<16x32xf32> to vector<16x8xf32>
    %164 = vector.extract_strided_slice %137 {offsets = [0, 8], sizes = [16, 8], strides = [1, 1]} : vector<16x32xf32> to vector<16x8xf32>
    %165 = vector.extract_strided_slice %138 {offsets = [0, 8], sizes = [16, 8], strides = [1, 1]} : vector<16x32xf32> to vector<16x8xf32>
    %cst_72 = arith.constant dense<0.000000e+00> : vector<16x16xf32>
    %166 = tpu.matmul %163, %164, %cst_72 {dimension_numbers = #tpu.dot_dimension_numbers<[1], [1], [0], [0], [0, 0, 1, 0], [], []>} : vector<16x8xf32>, vector<16x8xf32>, vector<16x16xf32> -> vector<16x16xf32>
    %167 = arith.addf %166, %9 : vector<16x16xf32>
    %cst_73 = arith.constant dense<0xFF800000> : vector<16xf32>
    %168 = vector.multi_reduction <maximumf>, %167, %cst_73 [1] : vector<16x16xf32> to vector<16xf32>
    %169 = vector.shape_cast %168 : vector<16xf32> to vector<16x1xf32>
    %170 = vector.broadcast %169 : vector<16x1xf32> to vector<16x16xf32>
    %171 = arith.subf %167, %170 : vector<16x16xf32>
    %172 = math.exp %171 : vector<16x16xf32>
    %cst_74 = arith.constant dense<0.000000e+00> : vector<16xf32>
    %173 = vector.multi_reduction <add>, %172, %cst_74 [1] : vector<16x16xf32> to vector<16xf32>
    %174 = vector.shape_cast %173 : vector<16xf32> to vector<16x1xf32>
    %175 = tpu.reciprocal %174 {approx = true} : vector<16x1xf32> -> vector<16x1xf32>
    %176 = vector.broadcast %175 : vector<16x1xf32> to vector<16x16xf32>
    %177 = arith.mulf %172, %176 : vector<16x16xf32>
    %cst_75 = arith.constant dense<0.000000e+00> : vector<16x8xf32>
    %178 = tpu.matmul %177, %165, %cst_75 {dimension_numbers = #tpu.dot_dimension_numbers<[1], [0], [0], [1], [0, 0, 1, 1], [], []>} : vector<16x16xf32>, vector<16x8xf32>, vector<16x8xf32> -> vector<16x8xf32>
    %179 = vector.extract_strided_slice %139 {offsets = [8, 0], sizes = [8, 32], strides = [1, 1]} : vector<32x32xf32> to vector<8x32xf32>
    %cst_76 = arith.constant dense<0.000000e+00> : vector<16x32xf32>
    %180 = tpu.matmul %178, %179, %cst_76 {dimension_numbers = #tpu.dot_dimension_numbers<[1], [0], [0], [1], [0, 0, 1, 1], [], []>} : vector<16x8xf32>, vector<8x32xf32>, vector<16x32xf32> -> vector<16x32xf32>
    %181 = arith.addf %162, %180 : vector<16x32xf32>
    %182 = vector.extract_strided_slice %131 {offsets = [0, 16], sizes = [16, 8], strides = [1, 1]} : vector<16x32xf32> to vector<16x8xf32>
    %183 = vector.extract_strided_slice %137 {offsets = [0, 16], sizes = [16, 8], strides = [1, 1]} : vector<16x32xf32> to vector<16x8xf32>
    %184 = vector.extract_strided_slice %138 {offsets = [0, 16], sizes = [16, 8], strides = [1, 1]} : vector<16x32xf32> to vector<16x8xf32>
    %cst_77 = arith.constant dense<0.000000e+00> : vector<16x16xf32>
    %185 = tpu.matmul %182, %183, %cst_77 {dimension_numbers = #tpu.dot_dimension_numbers<[1], [1], [0], [0], [0, 0, 1, 0], [], []>} : vector<16x8xf32>, vector<16x8xf32>, vector<16x16xf32> -> vector<16x16xf32>
    %186 = arith.addf %185, %9 : vector<16x16xf32>
    %cst_78 = arith.constant dense<0xFF800000> : vector<16xf32>
    %187 = vector.multi_reduction <maximumf>, %186, %cst_78 [1] : vector<16x16xf32> to vector<16xf32>
    %188 = vector.shape_cast %187 : vector<16xf32> to vector<16x1xf32>
    %189 = vector.broadcast %188 : vector<16x1xf32> to vector<16x16xf32>
    %190 = arith.subf %186, %189 : vector<16x16xf32>
    %191 = math.exp %190 : vector<16x16xf32>
    %cst_79 = arith.constant dense<0.000000e+00> : vector<16xf32>
    %192 = vector.multi_reduction <add>, %191, %cst_79 [1] : vector<16x16xf32> to vector<16xf32>
    %193 = vector.shape_cast %192 : vector<16xf32> to vector<16x1xf32>
    %194 = tpu.reciprocal %193 {approx = true} : vector<16x1xf32> -> vector<16x1xf32>
    %195 = vector.broadcast %194 : vector<16x1xf32> to vector<16x16xf32>
    %196 = arith.mulf %191, %195 : vector<16x16xf32>
    %cst_80 = arith.constant dense<0.000000e+00> : vector<16x8xf32>
    %197 = tpu.matmul %196, %184, %cst_80 {dimension_numbers = #tpu.dot_dimension_numbers<[1], [0], [0], [1], [0, 0, 1, 1], [], []>} : vector<16x16xf32>, vector<16x8xf32>, vector<16x8xf32> -> vector<16x8xf32>
    %198 = vector.extract_strided_slice %139 {offsets = [16, 0], sizes = [8, 32], strides = [1, 1]} : vector<32x32xf32> to vector<8x32xf32>
    %cst_81 = arith.constant dense<0.000000e+00> : vector<16x32xf32>
    %199 = tpu.matmul %197, %198, %cst_81 {dimension_numbers = #tpu.dot_dimension_numbers<[1], [0], [0], [1], [0, 0, 1, 1], [], []>} : vector<16x8xf32>, vector<8x32xf32>, vector<16x32xf32> -> vector<16x32xf32>
    %200 = arith.addf %181, %199 : vector<16x32xf32>
    %201 = vector.extract_strided_slice %131 {offsets = [0, 24], sizes = [16, 8], strides = [1, 1]} : vector<16x32xf32> to vector<16x8xf32>
    %202 = vector.extract_strided_slice %137 {offsets = [0, 24], sizes = [16, 8], strides = [1, 1]} : vector<16x32xf32> to vector<16x8xf32>
    %203 = vector.extract_strided_slice %138 {offsets = [0, 24], sizes = [16, 8], strides = [1, 1]} : vector<16x32xf32> to vector<16x8xf32>
    %cst_82 = arith.constant dense<0.000000e+00> : vector<16x16xf32>
    %204 = tpu.matmul %201, %202, %cst_82 {dimension_numbers = #tpu.dot_dimension_numbers<[1], [1], [0], [0], [0, 0, 1, 0], [], []>} : vector<16x8xf32>, vector<16x8xf32>, vector<16x16xf32> -> vector<16x16xf32>
    %205 = arith.addf %204, %9 : vector<16x16xf32>
    %cst_83 = arith.constant dense<0xFF800000> : vector<16xf32>
    %206 = vector.multi_reduction <maximumf>, %205, %cst_83 [1] : vector<16x16xf32> to vector<16xf32>
    %207 = vector.shape_cast %206 : vector<16xf32> to vector<16x1xf32>
    %208 = vector.broadcast %207 : vector<16x1xf32> to vector<16x16xf32>
    %209 = arith.subf %205, %208 : vector<16x16xf32>
    %210 = math.exp %209 : vector<16x16xf32>
    %cst_84 = arith.constant dense<0.000000e+00> : vector<16xf32>
    %211 = vector.multi_reduction <add>, %210, %cst_84 [1] : vector<16x16xf32> to vector<16xf32>
    %212 = vector.shape_cast %211 : vector<16xf32> to vector<16x1xf32>
    %213 = tpu.reciprocal %212 {approx = true} : vector<16x1xf32> -> vector<16x1xf32>
    %214 = vector.broadcast %213 : vector<16x1xf32> to vector<16x16xf32>
    %215 = arith.mulf %210, %214 : vector<16x16xf32>
    %cst_85 = arith.constant dense<0.000000e+00> : vector<16x8xf32>
    %216 = tpu.matmul %215, %203, %cst_85 {dimension_numbers = #tpu.dot_dimension_numbers<[1], [0], [0], [1], [0, 0, 1, 1], [], []>} : vector<16x16xf32>, vector<16x8xf32>, vector<16x8xf32> -> vector<16x8xf32>
    %217 = vector.extract_strided_slice %139 {offsets = [24, 0], sizes = [8, 32], strides = [1, 1]} : vector<32x32xf32> to vector<8x32xf32>
    %cst_86 = arith.constant dense<0.000000e+00> : vector<16x32xf32>
    %218 = tpu.matmul %216, %217, %cst_86 {dimension_numbers = #tpu.dot_dimension_numbers<[1], [0], [0], [1], [0, 0, 1, 1], [], []>} : vector<16x8xf32>, vector<8x32xf32>, vector<16x32xf32> -> vector<16x32xf32>
    %219 = arith.addf %200, %218 : vector<16x32xf32>
    %220 = arith.addf %126, %219 : vector<16x32xf32>
    %c0_87 = arith.constant 0 : index
    %c0_88 = arith.constant 0 : index
    %221 = vector.load %arg19[%c0_87, %c0_88] : memref<1x32xf32, #tpu.memory_space<vmem>>, vector<1x32xf32>
    %c0_89 = arith.constant 0 : index
    %c0_90 = arith.constant 0 : index
    %222 = vector.load %arg20[%c0_89, %c0_90] : memref<1x32xf32, #tpu.memory_space<vmem>>, vector<1x32xf32>
    %cst_91 = arith.constant dense<0.000000e+00> : vector<16xf32>
    %223 = vector.multi_reduction <add>, %220, %cst_91 [1] : vector<16x32xf32> to vector<16xf32>
    %224 = vector.shape_cast %223 : vector<16xf32> to vector<16x1xf32>
    %cst_92 = arith.constant 3.200000e+01 : f32
    %225 = vector.broadcast %cst_92 : f32 to vector<16x1xf32>
    %226 = arith.divf %224, %225 : vector<16x1xf32>
    %227 = vector.broadcast %226 : vector<16x1xf32> to vector<16x32xf32>
    %228 = arith.subf %220, %227 : vector<16x32xf32>
    %229 = arith.mulf %228, %228 : vector<16x32xf32>
    %cst_93 = arith.constant dense<0.000000e+00> : vector<16xf32>
    %230 = vector.multi_reduction <add>, %229, %cst_93 [1] : vector<16x32xf32> to vector<16xf32>
    %231 = vector.shape_cast %230 : vector<16xf32> to vector<16x1xf32>
    %cst_94 = arith.constant 3.200000e+01 : f32
    %232 = vector.broadcast %cst_94 : f32 to vector<16x1xf32>
    %233 = arith.divf %231, %232 : vector<16x1xf32>
    %234 = vector.broadcast %226 : vector<16x1xf32> to vector<16x32xf32>
    %235 = arith.subf %220, %234 : vector<16x32xf32>
    %cst_95 = arith.constant 9.99999974E-6 : f32
    %236 = vector.broadcast %cst_95 : f32 to vector<16x1xf32>
    %237 = arith.addf %233, %236 : vector<16x1xf32>
    %238 = math.rsqrt %237 : vector<16x1xf32>
    %239 = vector.broadcast %238 : vector<16x1xf32> to vector<16x32xf32>
    %240 = arith.mulf %235, %239 : vector<16x32xf32>
    %241 = vector.broadcast %221 : vector<1x32xf32> to vector<16x32xf32>
    %242 = arith.mulf %240, %241 : vector<16x32xf32>
    %243 = vector.broadcast %222 : vector<1x32xf32> to vector<16x32xf32>
    %244 = arith.addf %242, %243 : vector<16x32xf32>
    %c0_96 = arith.constant 0 : index
    %c0_97 = arith.constant 0 : index
    %245 = vector.load %arg23[%c0_96, %c0_97] : memref<32x2048xf32, #tpu.memory_space<vmem>>, vector<32x2048xf32>
    %cst_98 = arith.constant dense<0.000000e+00> : vector<16x2048xf32>
    %246 = tpu.matmul %244, %245, %cst_98 {dimension_numbers = #tpu.dot_dimension_numbers<[1], [0], [0], [1], [0, 0, 1, 1], [], []>} : vector<16x32xf32>, vector<32x2048xf32>, vector<16x2048xf32> -> vector<16x2048xf32>
    %c0_99 = arith.constant 0 : index
    %c0_100 = arith.constant 0 : index
    %247 = vector.load %arg24[%c0_99, %c0_100] : memref<1x2048xf32, #tpu.memory_space<vmem>>, vector<1x2048xf32>
    %248 = vector.broadcast %247 : vector<1x2048xf32> to vector<16x2048xf32>
    %249 = arith.addf %246, %248 : vector<16x2048xf32>
    %cst_101 = arith.constant 0.000000e+00 : f32
    %250 = vector.broadcast %cst_101 : f32 to vector<16x2048xf32>
    %251 = arith.maximumf %249, %250 : vector<16x2048xf32>
    %c0_102 = arith.constant 0 : index
    %c0_103 = arith.constant 0 : index
    %252 = vector.load %arg25[%c0_102, %c0_103] : memref<2048x32xf32, #tpu.memory_space<vmem>>, vector<2048x32xf32>
    %cst_104 = arith.constant dense<0.000000e+00> : vector<16x32xf32>
    %253 = tpu.matmul %251, %252, %cst_104 {dimension_numbers = #tpu.dot_dimension_numbers<[1], [0], [0], [1], [0, 0, 1, 1], [], []>} : vector<16x2048xf32>, vector<2048x32xf32>, vector<16x32xf32> -> vector<16x32xf32>
    %c0_105 = arith.constant 0 : index
    %c0_106 = arith.constant 0 : index
    %254 = vector.load %arg26[%c0_105, %c0_106] : memref<1x32xf32, #tpu.memory_space<vmem>>, vector<1x32xf32>
    %255 = vector.broadcast %254 : vector<1x32xf32> to vector<16x32xf32>
    %256 = arith.addf %253, %255 : vector<16x32xf32>
    %257 = arith.addf %244, %256 : vector<16x32xf32>
    %c0_107 = arith.constant 0 : index
    %c0_108 = arith.constant 0 : index
    %258 = vector.load %arg21[%c0_107, %c0_108] : memref<1x32xf32, #tpu.memory_space<vmem>>, vector<1x32xf32>
    %c0_109 = arith.constant 0 : index
    %c0_110 = arith.constant 0 : index
    %259 = vector.load %arg22[%c0_109, %c0_110] : memref<1x32xf32, #tpu.memory_space<vmem>>, vector<1x32xf32>
    %cst_111 = arith.constant dense<0.000000e+00> : vector<16xf32>
    %260 = vector.multi_reduction <add>, %257, %cst_111 [1] : vector<16x32xf32> to vector<16xf32>
    %261 = vector.shape_cast %260 : vector<16xf32> to vector<16x1xf32>
    %cst_112 = arith.constant 3.200000e+01 : f32
    %262 = vector.broadcast %cst_112 : f32 to vector<16x1xf32>
    %263 = arith.divf %261, %262 : vector<16x1xf32>
    %264 = vector.broadcast %263 : vector<16x1xf32> to vector<16x32xf32>
    %265 = arith.subf %257, %264 : vector<16x32xf32>
    %266 = arith.mulf %265, %265 : vector<16x32xf32>
    %cst_113 = arith.constant dense<0.000000e+00> : vector<16xf32>
    %267 = vector.multi_reduction <add>, %266, %cst_113 [1] : vector<16x32xf32> to vector<16xf32>
    %268 = vector.shape_cast %267 : vector<16xf32> to vector<16x1xf32>
    %cst_114 = arith.constant 3.200000e+01 : f32
    %269 = vector.broadcast %cst_114 : f32 to vector<16x1xf32>
    %270 = arith.divf %268, %269 : vector<16x1xf32>
    %271 = vector.broadcast %263 : vector<16x1xf32> to vector<16x32xf32>
    %272 = arith.subf %257, %271 : vector<16x32xf32>
    %cst_115 = arith.constant 9.99999974E-6 : f32
    %273 = vector.broadcast %cst_115 : f32 to vector<16x1xf32>
    %274 = arith.addf %270, %273 : vector<16x1xf32>
    %275 = math.rsqrt %274 : vector<16x1xf32>
    %276 = vector.broadcast %275 : vector<16x1xf32> to vector<16x32xf32>
    %277 = arith.mulf %272, %276 : vector<16x32xf32>
    %278 = vector.broadcast %258 : vector<1x32xf32> to vector<16x32xf32>
    %279 = arith.mulf %277, %278 : vector<16x32xf32>
    %280 = vector.broadcast %259 : vector<1x32xf32> to vector<16x32xf32>
    %281 = arith.addf %279, %280 : vector<16x32xf32>
    %c0_116 = arith.constant 0 : index
    %c0_117 = arith.constant 0 : index
    %282 = vector.load %arg27[%c0_116, %c0_117] : memref<32x96xf32, #tpu.memory_space<vmem>>, vector<32x96xf32>
    %cst_118 = arith.constant dense<0.000000e+00> : vector<16x96xf32>
    %283 = tpu.matmul %281, %282, %cst_118 {dimension_numbers = #tpu.dot_dimension_numbers<[1], [0], [0], [1], [0, 0, 1, 1], [], []>} : vector<16x32xf32>, vector<32x96xf32>, vector<16x96xf32> -> vector<16x96xf32>
    %c0_119 = arith.constant 0 : index
    %c0_120 = arith.constant 0 : index
    %284 = vector.load %arg28[%c0_119, %c0_120] : memref<1x96xf32, #tpu.memory_space<vmem>>, vector<1x96xf32>
    %285 = vector.broadcast %284 : vector<1x96xf32> to vector<16x96xf32>
    %286 = arith.addf %283, %285 : vector<16x96xf32>
    %287 = vector.extract_strided_slice %286 {offsets = [0, 0], sizes = [16, 32], strides = [1, 1]} : vector<16x96xf32> to vector<16x32xf32>
    %288 = vector.extract_strided_slice %286 {offsets = [0, 32], sizes = [16, 32], strides = [1, 1]} : vector<16x96xf32> to vector<16x32xf32>
    %289 = vector.extract_strided_slice %286 {offsets = [0, 64], sizes = [16, 32], strides = [1, 1]} : vector<16x96xf32> to vector<16x32xf32>
    %c0_121 = arith.constant 0 : index
    %c0_122 = arith.constant 0 : index
    %290 = vector.load %arg29[%c0_121, %c0_122] : memref<32x32xf32, #tpu.memory_space<vmem>>, vector<32x32xf32>
    %c0_123 = arith.constant 0 : index
    %c0_124 = arith.constant 0 : index
    %291 = vector.load %arg30[%c0_123, %c0_124] : memref<1x32xf32, #tpu.memory_space<vmem>>, vector<1x32xf32>
    %cst_125 = arith.constant 0.000000e+00 : f32
    %292 = vector.broadcast %cst_125 : f32 to vector<16x32xf32>
    %293 = vector.broadcast %291 : vector<1x32xf32> to vector<16x32xf32>
    %294 = arith.addf %292, %293 : vector<16x32xf32>
    %295 = vector.extract_strided_slice %287 {offsets = [0, 0], sizes = [16, 8], strides = [1, 1]} : vector<16x32xf32> to vector<16x8xf32>
    %296 = vector.extract_strided_slice %288 {offsets = [0, 0], sizes = [16, 8], strides = [1, 1]} : vector<16x32xf32> to vector<16x8xf32>
    %297 = vector.extract_strided_slice %289 {offsets = [0, 0], sizes = [16, 8], strides = [1, 1]} : vector<16x32xf32> to vector<16x8xf32>
    %cst_126 = arith.constant dense<0.000000e+00> : vector<16x16xf32>
    %298 = tpu.matmul %295, %296, %cst_126 {dimension_numbers = #tpu.dot_dimension_numbers<[1], [1], [0], [0], [0, 0, 1, 0], [], []>} : vector<16x8xf32>, vector<16x8xf32>, vector<16x16xf32> -> vector<16x16xf32>
    %299 = arith.addf %298, %8 : vector<16x16xf32>
    %cst_127 = arith.constant dense<0xFF800000> : vector<16xf32>
    %300 = vector.multi_reduction <maximumf>, %299, %cst_127 [1] : vector<16x16xf32> to vector<16xf32>
    %301 = vector.shape_cast %300 : vector<16xf32> to vector<16x1xf32>
    %302 = vector.broadcast %301 : vector<16x1xf32> to vector<16x16xf32>
    %303 = arith.subf %299, %302 : vector<16x16xf32>
    %304 = math.exp %303 : vector<16x16xf32>
    %cst_128 = arith.constant dense<0.000000e+00> : vector<16xf32>
    %305 = vector.multi_reduction <add>, %304, %cst_128 [1] : vector<16x16xf32> to vector<16xf32>
    %306 = vector.shape_cast %305 : vector<16xf32> to vector<16x1xf32>
    %307 = tpu.reciprocal %306 {approx = true} : vector<16x1xf32> -> vector<16x1xf32>
    %308 = vector.broadcast %307 : vector<16x1xf32> to vector<16x16xf32>
    %309 = arith.mulf %304, %308 : vector<16x16xf32>
    %cst_129 = arith.constant dense<0.000000e+00> : vector<16x8xf32>
    %310 = tpu.matmul %309, %297, %cst_129 {dimension_numbers = #tpu.dot_dimension_numbers<[1], [0], [0], [1], [0, 0, 1, 1], [], []>} : vector<16x16xf32>, vector<16x8xf32>, vector<16x8xf32> -> vector<16x8xf32>
    %311 = vector.extract_strided_slice %290 {offsets = [0, 0], sizes = [8, 32], strides = [1, 1]} : vector<32x32xf32> to vector<8x32xf32>
    %cst_130 = arith.constant dense<0.000000e+00> : vector<16x32xf32>
    %312 = tpu.matmul %310, %311, %cst_130 {dimension_numbers = #tpu.dot_dimension_numbers<[1], [0], [0], [1], [0, 0, 1, 1], [], []>} : vector<16x8xf32>, vector<8x32xf32>, vector<16x32xf32> -> vector<16x32xf32>
    %313 = arith.addf %294, %312 : vector<16x32xf32>
    %314 = vector.extract_strided_slice %287 {offsets = [0, 8], sizes = [16, 8], strides = [1, 1]} : vector<16x32xf32> to vector<16x8xf32>
    %315 = vector.extract_strided_slice %288 {offsets = [0, 8], sizes = [16, 8], strides = [1, 1]} : vector<16x32xf32> to vector<16x8xf32>
    %316 = vector.extract_strided_slice %289 {offsets = [0, 8], sizes = [16, 8], strides = [1, 1]} : vector<16x32xf32> to vector<16x8xf32>
    %cst_131 = arith.constant dense<0.000000e+00> : vector<16x16xf32>
    %317 = tpu.matmul %314, %315, %cst_131 {dimension_numbers = #tpu.dot_dimension_numbers<[1], [1], [0], [0], [0, 0, 1, 0], [], []>} : vector<16x8xf32>, vector<16x8xf32>, vector<16x16xf32> -> vector<16x16xf32>
    %318 = arith.addf %317, %8 : vector<16x16xf32>
    %cst_132 = arith.constant dense<0xFF800000> : vector<16xf32>
    %319 = vector.multi_reduction <maximumf>, %318, %cst_132 [1] : vector<16x16xf32> to vector<16xf32>
    %320 = vector.shape_cast %319 : vector<16xf32> to vector<16x1xf32>
    %321 = vector.broadcast %320 : vector<16x1xf32> to vector<16x16xf32>
    %322 = arith.subf %318, %321 : vector<16x16xf32>
    %323 = math.exp %322 : vector<16x16xf32>
    %cst_133 = arith.constant dense<0.000000e+00> : vector<16xf32>
    %324 = vector.multi_reduction <add>, %323, %cst_133 [1] : vector<16x16xf32> to vector<16xf32>
    %325 = vector.shape_cast %324 : vector<16xf32> to vector<16x1xf32>
    %326 = tpu.reciprocal %325 {approx = true} : vector<16x1xf32> -> vector<16x1xf32>
    %327 = vector.broadcast %326 : vector<16x1xf32> to vector<16x16xf32>
    %328 = arith.mulf %323, %327 : vector<16x16xf32>
    %cst_134 = arith.constant dense<0.000000e+00> : vector<16x8xf32>
    %329 = tpu.matmul %328, %316, %cst_134 {dimension_numbers = #tpu.dot_dimension_numbers<[1], [0], [0], [1], [0, 0, 1, 1], [], []>} : vector<16x16xf32>, vector<16x8xf32>, vector<16x8xf32> -> vector<16x8xf32>
    %330 = vector.extract_strided_slice %290 {offsets = [8, 0], sizes = [8, 32], strides = [1, 1]} : vector<32x32xf32> to vector<8x32xf32>
    %cst_135 = arith.constant dense<0.000000e+00> : vector<16x32xf32>
    %331 = tpu.matmul %329, %330, %cst_135 {dimension_numbers = #tpu.dot_dimension_numbers<[1], [0], [0], [1], [0, 0, 1, 1], [], []>} : vector<16x8xf32>, vector<8x32xf32>, vector<16x32xf32> -> vector<16x32xf32>
    %332 = arith.addf %313, %331 : vector<16x32xf32>
    %333 = vector.extract_strided_slice %287 {offsets = [0, 16], sizes = [16, 8], strides = [1, 1]} : vector<16x32xf32> to vector<16x8xf32>
    %334 = vector.extract_strided_slice %288 {offsets = [0, 16], sizes = [16, 8], strides = [1, 1]} : vector<16x32xf32> to vector<16x8xf32>
    %335 = vector.extract_strided_slice %289 {offsets = [0, 16], sizes = [16, 8], strides = [1, 1]} : vector<16x32xf32> to vector<16x8xf32>
    %cst_136 = arith.constant dense<0.000000e+00> : vector<16x16xf32>
    %336 = tpu.matmul %333, %334, %cst_136 {dimension_numbers = #tpu.dot_dimension_numbers<[1], [1], [0], [0], [0, 0, 1, 0], [], []>} : vector<16x8xf32>, vector<16x8xf32>, vector<16x16xf32> -> vector<16x16xf32>
    %337 = arith.addf %336, %8 : vector<16x16xf32>
    %cst_137 = arith.constant dense<0xFF800000> : vector<16xf32>
    %338 = vector.multi_reduction <maximumf>, %337, %cst_137 [1] : vector<16x16xf32> to vector<16xf32>
    %339 = vector.shape_cast %338 : vector<16xf32> to vector<16x1xf32>
    %340 = vector.broadcast %339 : vector<16x1xf32> to vector<16x16xf32>
    %341 = arith.subf %337, %340 : vector<16x16xf32>
    %342 = math.exp %341 : vector<16x16xf32>
    %cst_138 = arith.constant dense<0.000000e+00> : vector<16xf32>
    %343 = vector.multi_reduction <add>, %342, %cst_138 [1] : vector<16x16xf32> to vector<16xf32>
    %344 = vector.shape_cast %343 : vector<16xf32> to vector<16x1xf32>
    %345 = tpu.reciprocal %344 {approx = true} : vector<16x1xf32> -> vector<16x1xf32>
    %346 = vector.broadcast %345 : vector<16x1xf32> to vector<16x16xf32>
    %347 = arith.mulf %342, %346 : vector<16x16xf32>
    %cst_139 = arith.constant dense<0.000000e+00> : vector<16x8xf32>
    %348 = tpu.matmul %347, %335, %cst_139 {dimension_numbers = #tpu.dot_dimension_numbers<[1], [0], [0], [1], [0, 0, 1, 1], [], []>} : vector<16x16xf32>, vector<16x8xf32>, vector<16x8xf32> -> vector<16x8xf32>
    %349 = vector.extract_strided_slice %290 {offsets = [16, 0], sizes = [8, 32], strides = [1, 1]} : vector<32x32xf32> to vector<8x32xf32>
    %cst_140 = arith.constant dense<0.000000e+00> : vector<16x32xf32>
    %350 = tpu.matmul %348, %349, %cst_140 {dimension_numbers = #tpu.dot_dimension_numbers<[1], [0], [0], [1], [0, 0, 1, 1], [], []>} : vector<16x8xf32>, vector<8x32xf32>, vector<16x32xf32> -> vector<16x32xf32>
    %351 = arith.addf %332, %350 : vector<16x32xf32>
    %352 = vector.extract_strided_slice %287 {offsets = [0, 24], sizes = [16, 8], strides = [1, 1]} : vector<16x32xf32> to vector<16x8xf32>
    %353 = vector.extract_strided_slice %288 {offsets = [0, 24], sizes = [16, 8], strides = [1, 1]} : vector<16x32xf32> to vector<16x8xf32>
    %354 = vector.extract_strided_slice %289 {offsets = [0, 24], sizes = [16, 8], strides = [1, 1]} : vector<16x32xf32> to vector<16x8xf32>
    %cst_141 = arith.constant dense<0.000000e+00> : vector<16x16xf32>
    %355 = tpu.matmul %352, %353, %cst_141 {dimension_numbers = #tpu.dot_dimension_numbers<[1], [1], [0], [0], [0, 0, 1, 0], [], []>} : vector<16x8xf32>, vector<16x8xf32>, vector<16x16xf32> -> vector<16x16xf32>
    %356 = arith.addf %355, %8 : vector<16x16xf32>
    %cst_142 = arith.constant dense<0xFF800000> : vector<16xf32>
    %357 = vector.multi_reduction <maximumf>, %356, %cst_142 [1] : vector<16x16xf32> to vector<16xf32>
    %358 = vector.shape_cast %357 : vector<16xf32> to vector<16x1xf32>
    %359 = vector.broadcast %358 : vector<16x1xf32> to vector<16x16xf32>
    %360 = arith.subf %356, %359 : vector<16x16xf32>
    %361 = math.exp %360 : vector<16x16xf32>
    %cst_143 = arith.constant dense<0.000000e+00> : vector<16xf32>
    %362 = vector.multi_reduction <add>, %361, %cst_143 [1] : vector<16x16xf32> to vector<16xf32>
    %363 = vector.shape_cast %362 : vector<16xf32> to vector<16x1xf32>
    %364 = tpu.reciprocal %363 {approx = true} : vector<16x1xf32> -> vector<16x1xf32>
    %365 = vector.broadcast %364 : vector<16x1xf32> to vector<16x16xf32>
    %366 = arith.mulf %361, %365 : vector<16x16xf32>
    %cst_144 = arith.constant dense<0.000000e+00> : vector<16x8xf32>
    %367 = tpu.matmul %366, %354, %cst_144 {dimension_numbers = #tpu.dot_dimension_numbers<[1], [0], [0], [1], [0, 0, 1, 1], [], []>} : vector<16x16xf32>, vector<16x8xf32>, vector<16x8xf32> -> vector<16x8xf32>
    %368 = vector.extract_strided_slice %290 {offsets = [24, 0], sizes = [8, 32], strides = [1, 1]} : vector<32x32xf32> to vector<8x32xf32>
    %cst_145 = arith.constant dense<0.000000e+00> : vector<16x32xf32>
    %369 = tpu.matmul %367, %368, %cst_145 {dimension_numbers = #tpu.dot_dimension_numbers<[1], [0], [0], [1], [0, 0, 1, 1], [], []>} : vector<16x8xf32>, vector<8x32xf32>, vector<16x32xf32> -> vector<16x32xf32>
    %370 = arith.addf %351, %369 : vector<16x32xf32>
    %371 = arith.addf %281, %370 : vector<16x32xf32>
    %c0_146 = arith.constant 0 : index
    %c0_147 = arith.constant 0 : index
    %372 = vector.load %arg37[%c0_146, %c0_147] : memref<1x32xf32, #tpu.memory_space<vmem>>, vector<1x32xf32>
    %c0_148 = arith.constant 0 : index
    %c0_149 = arith.constant 0 : index
    %373 = vector.load %arg38[%c0_148, %c0_149] : memref<1x32xf32, #tpu.memory_space<vmem>>, vector<1x32xf32>
    %cst_150 = arith.constant dense<0.000000e+00> : vector<16xf32>
    %374 = vector.multi_reduction <add>, %371, %cst_150 [1] : vector<16x32xf32> to vector<16xf32>
    %375 = vector.shape_cast %374 : vector<16xf32> to vector<16x1xf32>
    %cst_151 = arith.constant 3.200000e+01 : f32
    %376 = vector.broadcast %cst_151 : f32 to vector<16x1xf32>
    %377 = arith.divf %375, %376 : vector<16x1xf32>
    %378 = vector.broadcast %377 : vector<16x1xf32> to vector<16x32xf32>
    %379 = arith.subf %371, %378 : vector<16x32xf32>
    %380 = arith.mulf %379, %379 : vector<16x32xf32>
    %cst_152 = arith.constant dense<0.000000e+00> : vector<16xf32>
    %381 = vector.multi_reduction <add>, %380, %cst_152 [1] : vector<16x32xf32> to vector<16xf32>
    %382 = vector.shape_cast %381 : vector<16xf32> to vector<16x1xf32>
    %cst_153 = arith.constant 3.200000e+01 : f32
    %383 = vector.broadcast %cst_153 : f32 to vector<16x1xf32>
    %384 = arith.divf %382, %383 : vector<16x1xf32>
    %385 = vector.broadcast %377 : vector<16x1xf32> to vector<16x32xf32>
    %386 = arith.subf %371, %385 : vector<16x32xf32>
    %cst_154 = arith.constant 9.99999974E-6 : f32
    %387 = vector.broadcast %cst_154 : f32 to vector<16x1xf32>
    %388 = arith.addf %384, %387 : vector<16x1xf32>
    %389 = math.rsqrt %388 : vector<16x1xf32>
    %390 = vector.broadcast %389 : vector<16x1xf32> to vector<16x32xf32>
    %391 = arith.mulf %386, %390 : vector<16x32xf32>
    %392 = vector.broadcast %372 : vector<1x32xf32> to vector<16x32xf32>
    %393 = arith.mulf %391, %392 : vector<16x32xf32>
    %394 = vector.broadcast %373 : vector<1x32xf32> to vector<16x32xf32>
    %395 = arith.addf %393, %394 : vector<16x32xf32>
    %c0_155 = arith.constant 0 : index
    %c0_156 = arith.constant 0 : index
    %396 = vector.load %arg31[%c0_155, %c0_156] : memref<32x32xf32, #tpu.memory_space<vmem>>, vector<32x32xf32>
    %cst_157 = arith.constant dense<0.000000e+00> : vector<16x32xf32>
    %397 = tpu.matmul %395, %396, %cst_157 {dimension_numbers = #tpu.dot_dimension_numbers<[1], [0], [0], [1], [0, 0, 1, 1], [], []>} : vector<16x32xf32>, vector<32x32xf32>, vector<16x32xf32> -> vector<16x32xf32>
    %c0_158 = arith.constant 0 : index
    %c0_159 = arith.constant 0 : index
    %398 = vector.load %arg32[%c0_158, %c0_159] : memref<1x32xf32, #tpu.memory_space<vmem>>, vector<1x32xf32>
    %399 = vector.broadcast %398 : vector<1x32xf32> to vector<16x32xf32>
    %400 = arith.addf %397, %399 : vector<16x32xf32>
    %c0_160 = arith.constant 0 : index
    %c0_161 = arith.constant 0 : index
    %401 = vector.load %arg33[%c0_160, %c0_161] : memref<32x64xf32, #tpu.memory_space<vmem>>, vector<32x64xf32>
    %cst_162 = arith.constant dense<0.000000e+00> : vector<16x64xf32>
    %402 = tpu.matmul %7, %401, %cst_162 {dimension_numbers = #tpu.dot_dimension_numbers<[1], [0], [0], [1], [0, 0, 1, 1], [], []>} : vector<16x32xf32>, vector<32x64xf32>, vector<16x64xf32> -> vector<16x64xf32>
    %c0_163 = arith.constant 0 : index
    %c0_164 = arith.constant 0 : index
    %403 = vector.load %arg34[%c0_163, %c0_164] : memref<1x64xf32, #tpu.memory_space<vmem>>, vector<1x64xf32>
    %404 = vector.broadcast %403 : vector<1x64xf32> to vector<16x64xf32>
    %405 = arith.addf %402, %404 : vector<16x64xf32>
    %406 = vector.extract_strided_slice %405 {offsets = [0, 0], sizes = [16, 32], strides = [1, 1]} : vector<16x64xf32> to vector<16x32xf32>
    %407 = vector.extract_strided_slice %405 {offsets = [0, 32], sizes = [16, 32], strides = [1, 1]} : vector<16x64xf32> to vector<16x32xf32>
    %c0_165 = arith.constant 0 : index
    %c0_166 = arith.constant 0 : index
    %408 = vector.load %arg35[%c0_165, %c0_166] : memref<32x32xf32, #tpu.memory_space<vmem>>, vector<32x32xf32>
    %c0_167 = arith.constant 0 : index
    %c0_168 = arith.constant 0 : index
    %409 = vector.load %arg36[%c0_167, %c0_168] : memref<1x32xf32, #tpu.memory_space<vmem>>, vector<1x32xf32>
    %cst_169 = arith.constant 0.000000e+00 : f32
    %410 = vector.broadcast %cst_169 : f32 to vector<16x32xf32>
    %411 = vector.broadcast %409 : vector<1x32xf32> to vector<16x32xf32>
    %412 = arith.addf %410, %411 : vector<16x32xf32>
    %413 = vector.extract_strided_slice %400 {offsets = [0, 0], sizes = [16, 8], strides = [1, 1]} : vector<16x32xf32> to vector<16x8xf32>
    %414 = vector.extract_strided_slice %406 {offsets = [0, 0], sizes = [16, 8], strides = [1, 1]} : vector<16x32xf32> to vector<16x8xf32>
    %415 = vector.extract_strided_slice %407 {offsets = [0, 0], sizes = [16, 8], strides = [1, 1]} : vector<16x32xf32> to vector<16x8xf32>
    %cst_170 = arith.constant dense<0.000000e+00> : vector<16x16xf32>
    %416 = tpu.matmul %413, %414, %cst_170 {dimension_numbers = #tpu.dot_dimension_numbers<[1], [1], [0], [0], [0, 0, 1, 0], [], []>} : vector<16x8xf32>, vector<16x8xf32>, vector<16x16xf32> -> vector<16x16xf32>
    %417 = arith.addf %416, %9 : vector<16x16xf32>
    %cst_171 = arith.constant dense<0xFF800000> : vector<16xf32>
    %418 = vector.multi_reduction <maximumf>, %417, %cst_171 [1] : vector<16x16xf32> to vector<16xf32>
    %419 = vector.shape_cast %418 : vector<16xf32> to vector<16x1xf32>
    %420 = vector.broadcast %419 : vector<16x1xf32> to vector<16x16xf32>
    %421 = arith.subf %417, %420 : vector<16x16xf32>
    %422 = math.exp %421 : vector<16x16xf32>
    %cst_172 = arith.constant dense<0.000000e+00> : vector<16xf32>
    %423 = vector.multi_reduction <add>, %422, %cst_172 [1] : vector<16x16xf32> to vector<16xf32>
    %424 = vector.shape_cast %423 : vector<16xf32> to vector<16x1xf32>
    %425 = tpu.reciprocal %424 {approx = true} : vector<16x1xf32> -> vector<16x1xf32>
    %426 = vector.broadcast %425 : vector<16x1xf32> to vector<16x16xf32>
    %427 = arith.mulf %422, %426 : vector<16x16xf32>
    %cst_173 = arith.constant dense<0.000000e+00> : vector<16x8xf32>
    %428 = tpu.matmul %427, %415, %cst_173 {dimension_numbers = #tpu.dot_dimension_numbers<[1], [0], [0], [1], [0, 0, 1, 1], [], []>} : vector<16x16xf32>, vector<16x8xf32>, vector<16x8xf32> -> vector<16x8xf32>
    %429 = vector.extract_strided_slice %408 {offsets = [0, 0], sizes = [8, 32], strides = [1, 1]} : vector<32x32xf32> to vector<8x32xf32>
    %cst_174 = arith.constant dense<0.000000e+00> : vector<16x32xf32>
    %430 = tpu.matmul %428, %429, %cst_174 {dimension_numbers = #tpu.dot_dimension_numbers<[1], [0], [0], [1], [0, 0, 1, 1], [], []>} : vector<16x8xf32>, vector<8x32xf32>, vector<16x32xf32> -> vector<16x32xf32>
    %431 = arith.addf %412, %430 : vector<16x32xf32>
    %432 = vector.extract_strided_slice %400 {offsets = [0, 8], sizes = [16, 8], strides = [1, 1]} : vector<16x32xf32> to vector<16x8xf32>
    %433 = vector.extract_strided_slice %406 {offsets = [0, 8], sizes = [16, 8], strides = [1, 1]} : vector<16x32xf32> to vector<16x8xf32>
    %434 = vector.extract_strided_slice %407 {offsets = [0, 8], sizes = [16, 8], strides = [1, 1]} : vector<16x32xf32> to vector<16x8xf32>
    %cst_175 = arith.constant dense<0.000000e+00> : vector<16x16xf32>
    %435 = tpu.matmul %432, %433, %cst_175 {dimension_numbers = #tpu.dot_dimension_numbers<[1], [1], [0], [0], [0, 0, 1, 0], [], []>} : vector<16x8xf32>, vector<16x8xf32>, vector<16x16xf32> -> vector<16x16xf32>
    %436 = arith.addf %435, %9 : vector<16x16xf32>
    %cst_176 = arith.constant dense<0xFF800000> : vector<16xf32>
    %437 = vector.multi_reduction <maximumf>, %436, %cst_176 [1] : vector<16x16xf32> to vector<16xf32>
    %438 = vector.shape_cast %437 : vector<16xf32> to vector<16x1xf32>
    %439 = vector.broadcast %438 : vector<16x1xf32> to vector<16x16xf32>
    %440 = arith.subf %436, %439 : vector<16x16xf32>
    %441 = math.exp %440 : vector<16x16xf32>
    %cst_177 = arith.constant dense<0.000000e+00> : vector<16xf32>
    %442 = vector.multi_reduction <add>, %441, %cst_177 [1] : vector<16x16xf32> to vector<16xf32>
    %443 = vector.shape_cast %442 : vector<16xf32> to vector<16x1xf32>
    %444 = tpu.reciprocal %443 {approx = true} : vector<16x1xf32> -> vector<16x1xf32>
    %445 = vector.broadcast %444 : vector<16x1xf32> to vector<16x16xf32>
    %446 = arith.mulf %441, %445 : vector<16x16xf32>
    %cst_178 = arith.constant dense<0.000000e+00> : vector<16x8xf32>
    %447 = tpu.matmul %446, %434, %cst_178 {dimension_numbers = #tpu.dot_dimension_numbers<[1], [0], [0], [1], [0, 0, 1, 1], [], []>} : vector<16x16xf32>, vector<16x8xf32>, vector<16x8xf32> -> vector<16x8xf32>
    %448 = vector.extract_strided_slice %408 {offsets = [8, 0], sizes = [8, 32], strides = [1, 1]} : vector<32x32xf32> to vector<8x32xf32>
    %cst_179 = arith.constant dense<0.000000e+00> : vector<16x32xf32>
    %449 = tpu.matmul %447, %448, %cst_179 {dimension_numbers = #tpu.dot_dimension_numbers<[1], [0], [0], [1], [0, 0, 1, 1], [], []>} : vector<16x8xf32>, vector<8x32xf32>, vector<16x32xf32> -> vector<16x32xf32>
    %450 = arith.addf %431, %449 : vector<16x32xf32>
    %451 = vector.extract_strided_slice %400 {offsets = [0, 16], sizes = [16, 8], strides = [1, 1]} : vector<16x32xf32> to vector<16x8xf32>
    %452 = vector.extract_strided_slice %406 {offsets = [0, 16], sizes = [16, 8], strides = [1, 1]} : vector<16x32xf32> to vector<16x8xf32>
    %453 = vector.extract_strided_slice %407 {offsets = [0, 16], sizes = [16, 8], strides = [1, 1]} : vector<16x32xf32> to vector<16x8xf32>
    %cst_180 = arith.constant dense<0.000000e+00> : vector<16x16xf32>
    %454 = tpu.matmul %451, %452, %cst_180 {dimension_numbers = #tpu.dot_dimension_numbers<[1], [1], [0], [0], [0, 0, 1, 0], [], []>} : vector<16x8xf32>, vector<16x8xf32>, vector<16x16xf32> -> vector<16x16xf32>
    %455 = arith.addf %454, %9 : vector<16x16xf32>
    %cst_181 = arith.constant dense<0xFF800000> : vector<16xf32>
    %456 = vector.multi_reduction <maximumf>, %455, %cst_181 [1] : vector<16x16xf32> to vector<16xf32>
    %457 = vector.shape_cast %456 : vector<16xf32> to vector<16x1xf32>
    %458 = vector.broadcast %457 : vector<16x1xf32> to vector<16x16xf32>
    %459 = arith.subf %455, %458 : vector<16x16xf32>
    %460 = math.exp %459 : vector<16x16xf32>
    %cst_182 = arith.constant dense<0.000000e+00> : vector<16xf32>
    %461 = vector.multi_reduction <add>, %460, %cst_182 [1] : vector<16x16xf32> to vector<16xf32>
    %462 = vector.shape_cast %461 : vector<16xf32> to vector<16x1xf32>
    %463 = tpu.reciprocal %462 {approx = true} : vector<16x1xf32> -> vector<16x1xf32>
    %464 = vector.broadcast %463 : vector<16x1xf32> to vector<16x16xf32>
    %465 = arith.mulf %460, %464 : vector<16x16xf32>
    %cst_183 = arith.constant dense<0.000000e+00> : vector<16x8xf32>
    %466 = tpu.matmul %465, %453, %cst_183 {dimension_numbers = #tpu.dot_dimension_numbers<[1], [0], [0], [1], [0, 0, 1, 1], [], []>} : vector<16x16xf32>, vector<16x8xf32>, vector<16x8xf32> -> vector<16x8xf32>
    %467 = vector.extract_strided_slice %408 {offsets = [16, 0], sizes = [8, 32], strides = [1, 1]} : vector<32x32xf32> to vector<8x32xf32>
    %cst_184 = arith.constant dense<0.000000e+00> : vector<16x32xf32>
    %468 = tpu.matmul %466, %467, %cst_184 {dimension_numbers = #tpu.dot_dimension_numbers<[1], [0], [0], [1], [0, 0, 1, 1], [], []>} : vector<16x8xf32>, vector<8x32xf32>, vector<16x32xf32> -> vector<16x32xf32>
    %469 = arith.addf %450, %468 : vector<16x32xf32>
    %470 = vector.extract_strided_slice %400 {offsets = [0, 24], sizes = [16, 8], strides = [1, 1]} : vector<16x32xf32> to vector<16x8xf32>
    %471 = vector.extract_strided_slice %406 {offsets = [0, 24], sizes = [16, 8], strides = [1, 1]} : vector<16x32xf32> to vector<16x8xf32>
    %472 = vector.extract_strided_slice %407 {offsets = [0, 24], sizes = [16, 8], strides = [1, 1]} : vector<16x32xf32> to vector<16x8xf32>
    %cst_185 = arith.constant dense<0.000000e+00> : vector<16x16xf32>
    %473 = tpu.matmul %470, %471, %cst_185 {dimension_numbers = #tpu.dot_dimension_numbers<[1], [1], [0], [0], [0, 0, 1, 0], [], []>} : vector<16x8xf32>, vector<16x8xf32>, vector<16x16xf32> -> vector<16x16xf32>
    %474 = arith.addf %473, %9 : vector<16x16xf32>
    %cst_186 = arith.constant dense<0xFF800000> : vector<16xf32>
    %475 = vector.multi_reduction <maximumf>, %474, %cst_186 [1] : vector<16x16xf32> to vector<16xf32>
    %476 = vector.shape_cast %475 : vector<16xf32> to vector<16x1xf32>
    %477 = vector.broadcast %476 : vector<16x1xf32> to vector<16x16xf32>
    %478 = arith.subf %474, %477 : vector<16x16xf32>
    %479 = math.exp %478 : vector<16x16xf32>
    %cst_187 = arith.constant dense<0.000000e+00> : vector<16xf32>
    %480 = vector.multi_reduction <add>, %479, %cst_187 [1] : vector<16x16xf32> to vector<16xf32>
    %481 = vector.shape_cast %480 : vector<16xf32> to vector<16x1xf32>
    %482 = tpu.reciprocal %481 {approx = true} : vector<16x1xf32> -> vector<16x1xf32>
    %483 = vector.broadcast %482 : vector<16x1xf32> to vector<16x16xf32>
    %484 = arith.mulf %479, %483 : vector<16x16xf32>
    %cst_188 = arith.constant dense<0.000000e+00> : vector<16x8xf32>
    %485 = tpu.matmul %484, %472, %cst_188 {dimension_numbers = #tpu.dot_dimension_numbers<[1], [0], [0], [1], [0, 0, 1, 1], [], []>} : vector<16x16xf32>, vector<16x8xf32>, vector<16x8xf32> -> vector<16x8xf32>
    %486 = vector.extract_strided_slice %408 {offsets = [24, 0], sizes = [8, 32], strides = [1, 1]} : vector<32x32xf32> to vector<8x32xf32>
    %cst_189 = arith.constant dense<0.000000e+00> : vector<16x32xf32>
    %487 = tpu.matmul %485, %486, %cst_189 {dimension_numbers = #tpu.dot_dimension_numbers<[1], [0], [0], [1], [0, 0, 1, 1], [], []>} : vector<16x8xf32>, vector<8x32xf32>, vector<16x32xf32> -> vector<16x32xf32>
    %488 = arith.addf %469, %487 : vector<16x32xf32>
    %489 = arith.addf %395, %488 : vector<16x32xf32>
    %c0_190 = arith.constant 0 : index
    %c0_191 = arith.constant 0 : index
    %490 = vector.load %arg39[%c0_190, %c0_191] : memref<1x32xf32, #tpu.memory_space<vmem>>, vector<1x32xf32>
    %c0_192 = arith.constant 0 : index
    %c0_193 = arith.constant 0 : index
    %491 = vector.load %arg40[%c0_192, %c0_193] : memref<1x32xf32, #tpu.memory_space<vmem>>, vector<1x32xf32>
    %cst_194 = arith.constant dense<0.000000e+00> : vector<16xf32>
    %492 = vector.multi_reduction <add>, %489, %cst_194 [1] : vector<16x32xf32> to vector<16xf32>
    %493 = vector.shape_cast %492 : vector<16xf32> to vector<16x1xf32>
    %cst_195 = arith.constant 3.200000e+01 : f32
    %494 = vector.broadcast %cst_195 : f32 to vector<16x1xf32>
    %495 = arith.divf %493, %494 : vector<16x1xf32>
    %496 = vector.broadcast %495 : vector<16x1xf32> to vector<16x32xf32>
    %497 = arith.subf %489, %496 : vector<16x32xf32>
    %498 = arith.mulf %497, %497 : vector<16x32xf32>
    %cst_196 = arith.constant dense<0.000000e+00> : vector<16xf32>
    %499 = vector.multi_reduction <add>, %498, %cst_196 [1] : vector<16x32xf32> to vector<16xf32>
    %500 = vector.shape_cast %499 : vector<16xf32> to vector<16x1xf32>
    %cst_197 = arith.constant 3.200000e+01 : f32
    %501 = vector.broadcast %cst_197 : f32 to vector<16x1xf32>
    %502 = arith.divf %500, %501 : vector<16x1xf32>
    %503 = vector.broadcast %495 : vector<16x1xf32> to vector<16x32xf32>
    %504 = arith.subf %489, %503 : vector<16x32xf32>
    %cst_198 = arith.constant 9.99999974E-6 : f32
    %505 = vector.broadcast %cst_198 : f32 to vector<16x1xf32>
    %506 = arith.addf %502, %505 : vector<16x1xf32>
    %507 = math.rsqrt %506 : vector<16x1xf32>
    %508 = vector.broadcast %507 : vector<16x1xf32> to vector<16x32xf32>
    %509 = arith.mulf %504, %508 : vector<16x32xf32>
    %510 = vector.broadcast %490 : vector<1x32xf32> to vector<16x32xf32>
    %511 = arith.mulf %509, %510 : vector<16x32xf32>
    %512 = vector.broadcast %491 : vector<1x32xf32> to vector<16x32xf32>
    %513 = arith.addf %511, %512 : vector<16x32xf32>
    %c0_199 = arith.constant 0 : index
    %c0_200 = arith.constant 0 : index
    %514 = vector.load %arg43[%c0_199, %c0_200] : memref<32x2048xf32, #tpu.memory_space<vmem>>, vector<32x2048xf32>
    %cst_201 = arith.constant dense<0.000000e+00> : vector<16x2048xf32>
    %515 = tpu.matmul %513, %514, %cst_201 {dimension_numbers = #tpu.dot_dimension_numbers<[1], [0], [0], [1], [0, 0, 1, 1], [], []>} : vector<16x32xf32>, vector<32x2048xf32>, vector<16x2048xf32> -> vector<16x2048xf32>
    %c0_202 = arith.constant 0 : index
    %c0_203 = arith.constant 0 : index
    %516 = vector.load %arg44[%c0_202, %c0_203] : memref<1x2048xf32, #tpu.memory_space<vmem>>, vector<1x2048xf32>
    %517 = vector.broadcast %516 : vector<1x2048xf32> to vector<16x2048xf32>
    %518 = arith.addf %515, %517 : vector<16x2048xf32>
    %cst_204 = arith.constant 0.000000e+00 : f32
    %519 = vector.broadcast %cst_204 : f32 to vector<16x2048xf32>
    %520 = arith.maximumf %518, %519 : vector<16x2048xf32>
    %c0_205 = arith.constant 0 : index
    %c0_206 = arith.constant 0 : index
    %521 = vector.load %arg45[%c0_205, %c0_206] : memref<2048x32xf32, #tpu.memory_space<vmem>>, vector<2048x32xf32>
    %cst_207 = arith.constant dense<0.000000e+00> : vector<16x32xf32>
    %522 = tpu.matmul %520, %521, %cst_207 {dimension_numbers = #tpu.dot_dimension_numbers<[1], [0], [0], [1], [0, 0, 1, 1], [], []>} : vector<16x2048xf32>, vector<2048x32xf32>, vector<16x32xf32> -> vector<16x32xf32>
    %c0_208 = arith.constant 0 : index
    %c0_209 = arith.constant 0 : index
    %523 = vector.load %arg46[%c0_208, %c0_209] : memref<1x32xf32, #tpu.memory_space<vmem>>, vector<1x32xf32>
    %524 = vector.broadcast %523 : vector<1x32xf32> to vector<16x32xf32>
    %525 = arith.addf %522, %524 : vector<16x32xf32>
    %526 = arith.addf %513, %525 : vector<16x32xf32>
    %c0_210 = arith.constant 0 : index
    %c0_211 = arith.constant 0 : index
    %527 = vector.load %arg41[%c0_210, %c0_211] : memref<1x32xf32, #tpu.memory_space<vmem>>, vector<1x32xf32>
    %c0_212 = arith.constant 0 : index
    %c0_213 = arith.constant 0 : index
    %528 = vector.load %arg42[%c0_212, %c0_213] : memref<1x32xf32, #tpu.memory_space<vmem>>, vector<1x32xf32>
    %cst_214 = arith.constant dense<0.000000e+00> : vector<16xf32>
    %529 = vector.multi_reduction <add>, %526, %cst_214 [1] : vector<16x32xf32> to vector<16xf32>
    %530 = vector.shape_cast %529 : vector<16xf32> to vector<16x1xf32>
    %cst_215 = arith.constant 3.200000e+01 : f32
    %531 = vector.broadcast %cst_215 : f32 to vector<16x1xf32>
    %532 = arith.divf %530, %531 : vector<16x1xf32>
    %533 = vector.broadcast %532 : vector<16x1xf32> to vector<16x32xf32>
    %534 = arith.subf %526, %533 : vector<16x32xf32>
    %535 = arith.mulf %534, %534 : vector<16x32xf32>
    %cst_216 = arith.constant dense<0.000000e+00> : vector<16xf32>
    %536 = vector.multi_reduction <add>, %535, %cst_216 [1] : vector<16x32xf32> to vector<16xf32>
    %537 = vector.shape_cast %536 : vector<16xf32> to vector<16x1xf32>
    %cst_217 = arith.constant 3.200000e+01 : f32
    %538 = vector.broadcast %cst_217 : f32 to vector<16x1xf32>
    %539 = arith.divf %537, %538 : vector<16x1xf32>
    %540 = vector.broadcast %532 : vector<16x1xf32> to vector<16x32xf32>
    %541 = arith.subf %526, %540 : vector<16x32xf32>
    %cst_218 = arith.constant 9.99999974E-6 : f32
    %542 = vector.broadcast %cst_218 : f32 to vector<16x1xf32>
    %543 = arith.addf %539, %542 : vector<16x1xf32>
    %544 = math.rsqrt %543 : vector<16x1xf32>
    %545 = vector.broadcast %544 : vector<16x1xf32> to vector<16x32xf32>
    %546 = arith.mulf %541, %545 : vector<16x32xf32>
    %547 = vector.broadcast %527 : vector<1x32xf32> to vector<16x32xf32>
    %548 = arith.mulf %546, %547 : vector<16x32xf32>
    %549 = vector.broadcast %528 : vector<1x32xf32> to vector<16x32xf32>
    %550 = arith.addf %548, %549 : vector<16x32xf32>
    %c0_219 = arith.constant 0 : index
    %c0_220 = arith.constant 0 : index
    %551 = vector.load %arg47[%c0_219, %c0_220] : memref<32x6xf32, #tpu.memory_space<vmem>>, vector<32x6xf32>
    %cst_221 = arith.constant dense<0.000000e+00> : vector<16x6xf32>
    %552 = tpu.matmul %550, %551, %cst_221 {dimension_numbers = #tpu.dot_dimension_numbers<[1], [0], [0], [1], [0, 0, 1, 1], [], []>} : vector<16x32xf32>, vector<32x6xf32>, vector<16x6xf32> -> vector<16x6xf32>
    %c0_222 = arith.constant 0 : index
    %c0_223 = arith.constant 0 : index
    %553 = vector.load %arg48[%c0_222, %c0_223] : memref<1x6xf32, #tpu.memory_space<vmem>>, vector<1x6xf32>
    %554 = vector.broadcast %553 : vector<1x6xf32> to vector<16x6xf32>
    %555 = arith.addf %552, %554 : vector<16x6xf32>
    %c0_224 = arith.constant 0 : index
    %c0_225 = arith.constant 0 : index
    %556 = vector.load %arg49[%c0_224, %c0_225] : memref<16x6xf32, #tpu.memory_space<vmem>>, vector<16x6xf32>
    tpu.vector_store %arg49[%c0_224, %c0_225], %555 {strides = array<i32>} : memref<16x6xf32, #tpu.memory_space<vmem>>, vector<16x6xf32>,
    return
  }
}

</mosaic_0001>

<bundles_post_ra>
// kernel: tpu_custom_call.1
= control target key start
LH: loop header
LB: loop body
LE: loop exit
PB: predicated region body
PF: predicated region fallthrough
CT: control target
= control target key end

     0   :  { %s12065_s6 = smov 1   ;;  %s12066_s10 = smov 2   ;;  %s14033_s0 = inlined_call_operand.smem [shape: u32[50], index: -1, kind: input, shape index: {}] }
   0x1   :  { %s12140_s5 = sld [smem:[%s14033_s0]]   ;;  %s12067_s14 = smov 3  }
   0x2   :  { %s12145_s9 = sld [smem:[%s14033_s0 + %s12065_s6]]   ;;  %s12068_s18 = smov 4  }
   0x3   :  { %s12150_s13 = sld [smem:[%s14033_s0 + %s12066_s10]]   ;;  %s12069_s22 = smov 5  }
   0x4   :  { %s12155_s17 = sld [smem:[%s14033_s0 + %s12067_s14]]   ;;  %s12070_s26 = smov 6  }
   0x5   :  { %s12160_s21 = sld [smem:[%s14033_s0 + %s12068_s18]]   ;;  %s12071_s30 = smov 7  }
   0x6   :  { %s12165_s25 = sld [smem:[%s14033_s0 + %s12069_s22]]   ;;  %s12072_s4 = smov 8  }
   0x7   :  { %s12170_s29 = sld [smem:[%s14033_s0 + %s12070_s26]]   ;;  %s12073_s10 = smov 9  }
   0x8   :  { %s12175_s3 = sld [smem:[%s14033_s0 + %s12071_s30]]   ;;  %s12074_s15 = smov 10  }
   0x9   :  { %s12180_s8 = sld [smem:[%s14033_s0 + %s12072_s4]]   ;;  %s12075_s20 = smov 11  }
   0xa   :  { %s12185_s14 = sld [smem:[%s14033_s0 + %s12073_s10]]   ;;  %s12076_s26 = smov 12  }
   0xb   :  { %s12190_s19 = sld [smem:[%s14033_s0 + %s12074_s15]]   ;;  %s12077_s1 = smov 13  }
   0xc   :  { %s12195_s24 = sld [smem:[%s14033_s0 + %s12075_s20]]   ;;  %s12078_s7 = smov 14  }
   0xd   :  { %14052 = sst [smem:[#allocation16_spill]] %s12170_s29  ;;  %s12079_s15 = smov 15  }
   0xe   :  { %s12200_s30 = sld [smem:[%s14033_s0 + %s12076_s26]]   ;;  %s12080_s22 = smov 16  }
   0xf   :  { %s12205_s6 = sld [smem:[%s14033_s0 + %s12077_s1]]   ;;  %s12081_s28 = smov 17  }
  0x10   :  { %s12210_s12 = sld [smem:[%s14033_s0 + %s12078_s7]]   ;;  %s12082_s7 = smov 18  }
  0x11   :  { %14053 = sst [smem:[#allocation17_spill]] %s12190_s19 }
  0x12   :  { %14054 = sst [smem:[#allocation18_spill]] %s12195_s24 }
  0x13   :  { %s12215_s20 = sld [smem:[%s14033_s0 + %s12079_s15]]   ;;  %s12083_s15 = smov 19  }
  0x14   :  { %14055 = sst [smem:[#allocation19_spill]] %s12200_s30 }
  0x15   :  { %s12220_s27 = sld [smem:[%s14033_s0 + %s12080_s22]]   ;;  %s12084_s22 = smov 20  }
  0x16   :  { %14056 = sst [smem:[#allocation20_spill]] %s12210_s12 }
  0x17   :  { %s12225_s4 = sld [smem:[%s14033_s0 + %s12081_s28]]   ;;  %s12085_s28 = smov 21  }
  0x18   :  { %s12230_s29 = sld [smem:[%s14033_s0 + %s12082_s7]]   ;;  %s12086_s7 = smov 22  }
  0x19   :  { %14057 = sst [smem:[#allocation21_spill]] %s12215_s20 }
  0x1a   :  { %s12235_s20 = sld [smem:[%s14033_s0 + %s12083_s15]]   ;;  %s12087_s15 = smov 23  }
  0x1b   :  { %14058 = sst [smem:[#allocation22_spill]] %s12220_s27 }
  0x1c   :  { %s12240_s27 = sld [smem:[%s14033_s0 + %s12084_s22]]   ;;  %s12088_s22 = smov 24  }
  0x1d   :  { %14059 = sst [smem:[#allocation23_spill]] %s12225_s4 }
  0x1e   :  { %14060 = sst [smem:[#allocation24_spill]] %s12230_s29 }
  0x1f   :  { %s12245_s30 = sld [smem:[%s14033_s0 + %s12085_s28]]   ;;  %s12089_s28 = smov 25  }
  0x20   :  { %14061 = sst [smem:[#allocation25_spill]] %s12235_s20 }
  0x21   :  { %s12250_s29 = sld [smem:[%s14033_s0 + %s12086_s7]]   ;;  %s12090_s7 = smov 26  }
  0x22   :  { %14062 = sst [smem:[#allocation26_spill]] %s12240_s27 }
  0x23   :  { %s12255_s20 = sld [smem:[%s14033_s0 + %s12087_s15]]   ;;  %s12091_s15 = smov 27  }
  0x24   :  { %s12260_s27 = sld [smem:[%s14033_s0 + %s12088_s22]]   ;;  %s12092_s22 = smov 28  }
  0x25   :  { %14063 = sst [smem:[#allocation27_spill]] %s12245_s30 }
  0x26   :  { %s12265_s30 = sld [smem:[%s14033_s0 + %s12089_s28]]   ;;  %s12093_s28 = smov 29  }
  0x27   :  { %14064 = sst [smem:[#allocation28_spill]] %s12250_s29 }
  0x28   :  { %s12270_s29 = sld [smem:[%s14033_s0 + %s12090_s7]]   ;;  %s12094_s7 = smov 30  }
  0x29   :  { %14065 = sst [smem:[#allocation29_spill]] %s12255_s20 }
  0x2a   :  { %14066 = sst [smem:[#allocation30_spill]] %s12260_s27 }
  0x2b   :  { %s12275_s20 = sld [smem:[%s14033_s0 + %s12091_s15]]   ;;  %s12095_s15 = smov 31  }
  0x2c   :  { %14067 = sst [smem:[#allocation31_spill]] %s12265_s30 }
  0x2d   :  { %s12280_s27 = sld [smem:[%s14033_s0 + %s12092_s22]]   ;;  %s12096_s22 = smov 32  }
  0x2e   :  { %14068 = sst [smem:[#allocation32_spill]] %s12270_s29 }
  0x2f   :  { %s12285_s30 = sld [smem:[%s14033_s0 + %s12093_s28]]   ;;  %s12097_s28 = smov 33  }
  0x30   :  { %s12290_s29 = sld [smem:[%s14033_s0 + %s12094_s7]]   ;;  %s12098_s7 = smov 34  }
  0x31   :  { %14069 = sst [smem:[#allocation33_spill]] %s12275_s20 }
  0x32   :  { %s12295_s20 = sld [smem:[%s14033_s0 + %s12095_s15]]   ;;  %s12099_s15 = smov 35  }
  0x33   :  { %14070 = sst [smem:[#allocation34_spill]] %s12280_s27 }
  0x34   :  { %s12300_s27 = sld [smem:[%s14033_s0 + %s12096_s22]]   ;;  %s12100_s22 = smov 36  }
  0x35   :  { %14071 = sst [smem:[#allocation35_spill]] %s12285_s30 }
  0x36   :  { %14072 = sst [smem:[#allocation36_spill]] %s12290_s29 }
  0x37   :  { %s12305_s30 = sld [smem:[%s14033_s0 + %s12097_s28]]   ;;  %s12101_s28 = smov 37  }
  0x38   :  { %14073 = sst [smem:[#allocation37_spill]] %s12295_s20 }
  0x39   :  { %s12310_s29 = sld [smem:[%s14033_s0 + %s12098_s7]]   ;;  %s12102_s7 = smov 38  }
  0x3a   :  { %14074 = sst [smem:[#allocation38_spill]] %s12300_s27 }
  0x3b   :  { %s12315_s20 = sld [smem:[%s14033_s0 + %s12099_s15]]   ;;  %s12103_s15 = smov 39  }
  0x3c   :  { %s12320_s27 = sld [smem:[%s14033_s0 + %s12100_s22]]   ;;  %s12104_s22 = smov 40  }
  0x3d   :  { %14075 = sst [smem:[#allocation39_spill]] %s12305_s30 }
  0x3e   :  { %s12325_s30 = sld [smem:[%s14033_s0 + %s12101_s28]]   ;;  %s12105_s28 = smov 41  }
  0x3f   :  { %14076 = sst [smem:[#allocation40_spill]] %s12310_s29 }
  0x40   :  { %s12330_s29 = sld [smem:[%s14033_s0 + %s12102_s7]]   ;;  %s12106_s7 = smov 42  }
  0x41   :  { %14077 = sst [smem:[#allocation41_spill]] %s12315_s20 }
  0x42   :  { %14078 = sst [smem:[#allocation42_spill]] %s12320_s27 }
  0x43   :  { %s12335_s20 = sld [smem:[%s14033_s0 + %s12103_s15]]   ;;  %s12107_s15 = smov 43  }
  0x44   :  { %14079 = sst [smem:[#allocation43_spill]] %s12325_s30 }
  0x45   :  { %s12340_s27 = sld [smem:[%s14033_s0 + %s12104_s22]]   ;;  %s12108_s22 = smov 44  }
  0x46   :  { %14080 = sst [smem:[#allocation44_spill]] %s12330_s29 }
  0x47   :  { %s12345_s30 = sld [smem:[%s14033_s0 + %s12105_s28]]   ;;  %s12109_s28 = smov 45  }
  0x48   :  { %s12350_s29 = sld [smem:[%s14033_s0 + %s12106_s7]]   ;;  %s12110_s7 = smov 46  }
  0x49   :  { %s12355_s4 = sld [smem:[%s14033_s0 + %s12107_s15]]   ;;  %s12111_s15 = smov 47  }
  0x4a   :  { %s12360_s12 = sld [smem:[%s14033_s0 + %s12108_s22]]   ;;  %s12112_s22 = smov 48  }
  0x4b   :  { %s12365_s19 = sld [smem:[%s14033_s0 + %s12109_s28]]   ;;  %s12113_s28 = smov 49  }
  0x4c   :  { %s12370_s24 = sld [smem:[%s14033_s0 + %s12110_s7]]  }
  0x4f   :  { %14081 = sst [smem:[#allocation45_spill]] %s12355_s4 }
  0x50   :  { %14082 = sst [smem:[#allocation46_spill]] %s12360_s12 }
  0x51   :  { %14083 = sst [smem:[#allocation47_spill]] %s12365_s19 }
  0x52   :  { %s12375_s4 = sld [smem:[%s14033_s0 + %s12111_s15]]  }
  0x53   :  { %s12380_s12 = sld [smem:[%s14033_s0 + %s12112_s22]]  }
  0x54   :  { %s12385_s19 = sld [smem:[%s14033_s0 + %s12113_s28]]  }
  0x55   :  { %104 = vsyncpa [#allocation3], 0 }
  0x56   :  { %105 = vsyncpa [#allocation5], 0 }
  0x57   :  { %106 = vsyncpa [#allocation8], 0 }
  0x58   :  { %107 = vsyncpa [#allocation11], 0  ;;  %s12114_s7 = smov [#allocation4]   ;;  %s12115_s11 = smov [#allocation7]  }
  0x59   :  { %s202_s10 = sshll.u32 %s12114_s7, 4  ;;  %s222_s15 = sshll.u32 %s12115_s11, 4  ;;  %s203_s10 = int_to_ptr.vmem [resolvable:$true] %s202_s10  ;;  %s223_s15 = int_to_ptr.vmem [resolvable:$true] %s222_s15 }
  0x5a   :  { %s11925_s16 = scalar_lea.hbm %s12340_s27, 16 }
  0x5b   :  { %p11926_p0 = scmp.ne.s32.totalorder %s12340_s27, %s11925_s16  ;;  %p11929_p1 = scmp.lt.u32.totalorder %s11925_s16, %s12340_s27 }
  0x5d   :  { %p11931_p2 = pnand %p11929_p1, %p11926_p0 }
  0x5f   :  { %11934 = shalt.err (!%p11931_p2)
}
  0x60   :  { %s11935_s0 = scalar_lea.vmem %s203_s10, 16  ;;  %s11939_s18 = scalar_lea.vmem %s203_s10, 32 }
  0x61   :  { %p11936_p3 = scmp.ne.s32.totalorder %s203_s10, %s11935_s0  ;;  %p11940_p4 = scmp.lt.s32.totalorder %s203_s10, %s203_s10 }
  0x62   :  { %p11941_p5 = scmp.lt.s32.totalorder %s11939_s18, %s11935_s0 }
  0x64   :  { %p11942_p6 = por %p11941_p5, %p11940_p4 }
  0x66   :  { %p11943_p7 = pnand %p11942_p6, %p11936_p3 }
  0x68   :  { %11946 = shalt.err (!%p11943_p7)
}
  0x69   :  { %205 = dma.hbm_to_vmem [thread:$0]  %s12340_s27, 16, %s203_s10, [#allocation5]  }
  0x6a   :  { %s11947_s22 = scalar_lea.hbm %s12350_s29, 16 }
  0x6b   :  { %p11948_p8 = scmp.ne.s32.totalorder %s12350_s29, %s11947_s22  ;;  %p11951_p9 = scmp.lt.u32.totalorder %s11947_s22, %s12350_s29 }
  0x6d   :  { %p11953_p10 = pnand %p11951_p9, %p11948_p8 }
  0x6f   :  { %11956 = shalt.err (!%p11953_p10)
}
  0x70   :  { %s11957_s23 = scalar_lea.vmem %s223_s15, 16  ;;  %s11961_s26 = scalar_lea.vmem %s223_s15, 32 }
  0x71   :  { %p11958_p11 = scmp.ne.s32.totalorder %s223_s15, %s11957_s23  ;;  %p11962_p12 = scmp.lt.s32.totalorder %s223_s15, %s223_s15 }
  0x72   :  { %p11963_p13 = scmp.lt.s32.totalorder %s11961_s26, %s11957_s23 }
  0x74   :  { %p11964_p0 = por %p11963_p13, %p11962_p12 }
  0x76   :  { %p11965_p1 = pnand %p11964_p0, %p11958_p11 }
  0x78   :  { %11968 = shalt.err (!%p11965_p1)
}
  0x79   :  { %225 = dma.hbm_to_vmem [thread:$0]  %s12350_s29, 16, %s223_s15, [#allocation8]  }
  0x7a   :  { %s12116_s28 = smov [#allocation2]   ;;  %s12117_s1 = smov [#allocation6]  }
  0x7b   :  { %s192_s27 = sshll.u32 %s12116_s28, 4  ;;  %s212_s2 = sshll.u32 %s12117_s1, 4  ;;  %s193_s27 = int_to_ptr.vmem [resolvable:$true] %s192_s27  ;;  %s213_s2 = int_to_ptr.vmem [resolvable:$true] %s212_s2 }
  0x7c   :  { %s11969_s7 = scalar_lea.hbm %s12335_s20, 16 }
  0x7d   :  { %p11970_p2 = scmp.ne.s32.totalorder %s12335_s20, %s11969_s7  ;;  %p11973_p3 = scmp.lt.u32.totalorder %s11969_s7, %s12335_s20 }
  0x7f   :  { %p11975_p4 = pnand %p11973_p3, %p11970_p2 }
  0x81   :  { %11978 = shalt.err (!%p11975_p4)
}
  0x82   :  { %s11979_s10 = scalar_lea.vmem %s193_s27, 16  ;;  %s11983_s11 = scalar_lea.vmem %s193_s27, 32 }
  0x83   :  { %p11980_p5 = scmp.ne.s32.totalorder %s193_s27, %s11979_s10  ;;  %p11984_p6 = scmp.lt.s32.totalorder %s193_s27, %s193_s27 }
  0x84   :  { %p11985_p7 = scmp.lt.s32.totalorder %s11983_s11, %s11979_s10 }
  0x86   :  { %p11986_p8 = por %p11985_p7, %p11984_p6 }
  0x88   :  { %p11987_p9 = pnand %p11986_p8, %p11980_p5 }
  0x8a   :  { %11990 = shalt.err (!%p11987_p9)
}
  0x8b   :  { %195 = dma.hbm_to_vmem [thread:$0]  %s12335_s20, 16, %s193_s27, [#allocation3]  }
  0x8c   :  { %s11991_s29 = scalar_lea.hbm %s12345_s30, 16 }
  0x8d   :  { %p11992_p10 = scmp.ne.s32.totalorder %s12345_s30, %s11991_s29  ;;  %p11995_p11 = scmp.lt.u32.totalorder %s11991_s29, %s12345_s30 }
  0x8f   :  { %p11997_p12 = pnand %p11995_p11, %p11992_p10 }
  0x91   :  { %12000 = shalt.err (!%p11997_p12)
}
  0x92   :  { %s12001_s15 = scalar_lea.vmem %s213_s2, 16  ;;  %s12005_s16 = scalar_lea.vmem %s213_s2, 32 }
  0x93   :  { %p12002_p13 = scmp.ne.s32.totalorder %s213_s2, %s12001_s15  ;;  %p12006_p0 = scmp.lt.s32.totalorder %s213_s2, %s213_s2 }
  0x94   :  { %p12007_p1 = scmp.lt.s32.totalorder %s12005_s16, %s12001_s15 }
  0x96   :  { %p12008_p2 = por %p12007_p1, %p12006_p0 }
  0x98   :  { %p12009_p3 = pnand %p12008_p2, %p12002_p13 }
  0x9a   :  { %12012 = shalt.err (!%p12009_p3)
}
  0x9b   :  { %215 = dma.hbm_to_vmem [thread:$0]  %s12345_s30, 16, %s213_s2, [#allocation5]  }
  0x9c   :  { %s12118_s0 = smov [#allocation9]   ;;  %s12119_s18 = smov [#allocation10]  }
  0x9d   :  { %s238_s20 = sshll.u32 %s12118_s0, 4  ;;  %s250_s22 = sshll.u32 %s12119_s18, 4  ;;  %s239_s20 = int_to_ptr.vmem [resolvable:$true] %s238_s20  ;;  %s251_s22 = int_to_ptr.vmem [resolvable:$true] %s250_s22 }
  0x9e   :  { %s12013_s23 = scalar_lea.hbm %s12370_s24, 16 }
  0x9f   :  { %p12014_p4 = scmp.ne.s32.totalorder %s12370_s24, %s12013_s23  ;;  %p12017_p5 = scmp.lt.u32.totalorder %s12013_s23, %s12370_s24 }
  0xa1   :  { %p12019_p6 = pnand %p12017_p5, %p12014_p4 }
  0xa3   :  { %12022 = shalt.err (!%p12019_p6)
}
  0xa4   :  { %s12023_s26 = scalar_lea.vmem %s239_s20, 16  ;;  %s12027_s28 = scalar_lea.vmem %s239_s20, 32 }
  0xa5   :  { %p12024_p7 = scmp.ne.s32.totalorder %s239_s20, %s12023_s26  ;;  %p12028_p8 = scmp.lt.s32.totalorder %s239_s20, %s239_s20 }
  0xa6   :  { %p12029_p9 = scmp.lt.s32.totalorder %s12027_s28, %s12023_s26 }
  0xa8   :  { %p12030_p10 = por %p12029_p9, %p12028_p8 }
  0xaa   :  { %p12031_p11 = pnand %p12030_p10, %p12024_p7 }
  0xac   :  { %12034 = shalt.err (!%p12031_p11)
}
  0xad   :  { %241 = dma.hbm_to_vmem [thread:$0]  %s12370_s24, 16, %s239_s20, [#allocation8]  }
  0xae   :  { %s12035_s30 = scalar_lea.hbm %s12380_s12, 16 }
  0xaf   :  { %p12036_p12 = scmp.ne.s32.totalorder %s12380_s12, %s12035_s30  ;;  %p12039_p13 = scmp.lt.u32.totalorder %s12035_s30, %s12380_s12 }
  0xb1   :  { %p12041_p0 = pnand %p12039_p13, %p12036_p12 }
  0xb3   :  { %12044 = shalt.err (!%p12041_p0)
}
  0xb4   :  { %s12045_s27 = scalar_lea.vmem %s251_s22, 16  ;;  %s12049_s1 = scalar_lea.vmem %s251_s22, 32 }
  0xb5   :  { %p12046_p1 = scmp.ne.s32.totalorder %s251_s22, %s12045_s27  ;;  %p12050_p2 = scmp.lt.s32.totalorder %s251_s22, %s251_s22 }
  0xb6   :  { %p12051_p3 = scmp.lt.s32.totalorder %s12049_s1, %s12045_s27 }
  0xb8   :  { %p12052_p4 = por %p12051_p3, %p12050_p2 }
  0xba   :  { %p12053_p5 = pnand %p12052_p4, %p12046_p1 }
  0xbc   :  { %12056 = shalt.err (!%p12053_p5)
}
  0xbd   :  { %253 = dma.hbm_to_vmem [thread:$0]  %s12380_s12, 16, %s251_s22, [#allocation11]  }
  0xbe   :  { %12057 = dma.done.wait [#allocation3], 16  }
  0xbf   :  { %12058 = vsyncadd [#allocation3], 4294967280 }
  0xc0   :  { %12059 = dma.done.wait [#allocation5], 32  }
  0xc1   :  { %12060 = vsyncadd [#allocation5], 4294967264 }
  0xc2   :  { %12061 = dma.done.wait [#allocation8], 32  }
  0xc3   :  { %12062 = vsyncadd [#allocation8], 4294967264 }
  0xc4   :  { %12063 = dma.done.wait [#allocation11], 16  }
  0xc5   :  { %12064 = vsyncadd [#allocation11], 4294967280  ;;  %vm390_vm0 = vcmask 261120   ;;  %v379_v0 = vld [vmem:[%s12175_s3] sm:$0xff]  ;;  %v380_v1 = vld [vmem:[%s12175_s3 + $0x8] sm:$0xff]  ;;  %vm282_vm1 = vcmask 64512  }
  0xc6   :  { %v381_v2 = vld [vmem:[%s12175_s3 + $0x10] sm:$0xff]  ;;  %v10664_v3 = vpack.c.bf16 %v380_v1, %v379_v0  ;;  %v382_v4 = vld [vmem:[%s12175_s3 + $0x18] sm:$0xff]  ;;  %v12416_v5 = vld [vmem:[%s12160_s21] ss:$0 sm:$0xff]  ;;  %vm569_vm3 = vcmask 130048   ;;  %s12122_s21 = smov 88  }
  0xc7   :  { %v10668_v6 = vpack.c.bf16 %v382_v4, %v381_v2  ;;  %10291 = vmatprep.mubr.msk.f32.mxu1 %vm390_vm0, %v12416_v5  ;;  %v274_v7 = vld [vmem:[%s12145_s9] sm:$0xff]  ;;  %v273_v9 = vld [vmem:[%s12140_s5 + $0x8] sm:$0xff]  ;;  %s12120_s9 = smov 96   ;;  %vm12446_vm2 = vmpackc.low %vm282_vm1, %vm282_vm1  ;;  %s12123_s3 = smov 120   ;;  %vm9186_vm4 = vcmask 48128  }
  0xc8   :  { %10665 = vmatprep.subr.bf16.mxu1 %v10664_v3  ;;  %10278 = vmatprep.subr.mxu0 %v274_v7  ;;  %v272_v8 = vld [vmem:[%s12140_s5] sm:$0xff]  ;;  %v12457_v23 = vld [vmem:[%s12165_s25 + $0x8] sm:$0xff]  ;;  %s12121_s5 = smov 64   ;;  %s12125_s24 = smov 112  }
  0xc9   :  { %10667 = vmatpush3.bf16.msra.mxu1 %v10664_v3  ;;  %10279 = vmatpush3.msra.mxu0 %v274_v7  ;;  %v9250_v10 = vld [vmem:[%s12180_s8] ss:$0 sm:$0xff]  ;;  %s12124_s8 = smov 80   ;;  %s12126_s12 = smov 56  }
  0xca   :  { %10669 = vmatprep.subr.bf16.mxu1 %v10668_v6  ;;  %10280 = vmatprep.mubr.msk.f32.mxu0 %vm282_vm1, %v272_v8  ;;  %v12460_v24 = vld [vmem:[%s12165_s25] sm:$0xff]  ;;  %s12127_s2 = smov 72   ;;  %s12128_s7 = smov 104  }
  0xcb   :  { %10281 = vmatmul.mubr.msk.f32.vlgmr.msra.gmra.mrb[0].mxu0 %vm282_vm1, %v273_v9  ;;  %v468_v63 = vld [vmem:[%s12185_s14] sm:$0xff]  ;;  %s12129_s10 = smov 48   ;;  %s12130_s11 = smov 40  }
  0xcc   :  { %s14092_s29 = sld [smem:[#allocation24_spill]]  ;;  %s14093_s15 = sld [smem:[#allocation19_spill]] }
  0xcd   :  { %10671 = vmatpush3.bf16.msra.mxu1 %v10668_v6  ;;  %s14094_s16 = sld [smem:[#allocation16_spill]]  ;;  %s14095_s0 = sld [smem:[#allocation21_spill]] }
  0xce   :  { %s14096_s20 = sld [smem:[#allocation22_spill]]  ;;  %s14097_s18 = sld [smem:[#allocation29_spill]] }
  0xcf   :  { %s14098_s22 = sld [smem:[#allocation25_spill]]  ;;  %s14099_s23 = sld [smem:[#allocation26_spill]] }
  0xd0   :  { %10292 = vmatmul.mubr.msk.f32.vlgmr.msra.gmra.mrb[0].mxu1 %vm390_vm0, %v12416_v5  ;;  %s14100_s26 = sld [smem:[#allocation31_spill]]  ;;  %s14101_s28 = sld [smem:[#allocation30_spill]] }
  0xd1   :  { %s14102_s30 = sld [smem:[#allocation32_spill]]  ;;  %s14103_s27 = sld [smem:[#allocation33_spill]] }
  0xd2   :  { %s14104_s1 = sld [smem:[#allocation27_spill]] }
 0x19e   :  { %v12440_v16 = vpop.f32.mrb[0].mxu0 }
 0x19f   :  { %v12442_v17 = vpop.f32.mrb[1].mxu0 }
 0x1a3   :  { %v10293_v11 = vpop.f32.mrb[0].mxu1 }
 0x1a4   :  { %v12428_v12 = vadd.f32 %v10293_v11, %v9250_v10  ;;  %v459_v13 = vpop.f32.mrb[1].mxu1 }
 0x1a5   :  { %v12430_v14 = vadd.f32 %v9250_v10, %v459_v13 }
 0x1a7   :  { %10298 = vmatprep.mubr.msk.f32.mxu0 %vm282_vm1, %v12430_v14  ;;  %v12436_v15 = vpack.i.bf16 %v12428_v12, %v12430_v14 }
 0x1a9   :  { %11620 = vrot.lane.b32.xlu0 %v12436_v15, %s12120_s9 }
 0x21b   :  { %v11621_v18 = vpop.permute.xlu0 %11620 }
 0x21c   :  { %v11623_v19 = vunpack.i.h.bf16 %v11621_v18  ;;  %v11622_v20 = vunpack.i.l.bf16 %v11621_v18 }
 0x21e   :  { %v10672_v22 = vpack.c.bf16 %v11623_v19, %v11622_v20 }
 0x220   :  { %10674 = vmatprep.subr.msk.bf16.mxu0 %vm12446_vm2, %v10672_v22 }
 0x221   :  { %10677 = vmatpush3.bf16.xpose.msk.msra.mxu0 %vm12446_vm2, %v10672_v22 }
 0x222   :  { %10308 = vmatprep.subr.mxu0 %v468_v63 }
 0x228   :  { %10299 = vmatmul.mubr.msk.f32.vlgmr.msra.gmra.mrb[2].mxu0 %vm282_vm1, %v12428_v12 }
 0x229   :  { %10309 = vmatpush3.msra.mxu0 %v468_v63 }
 0x2fb   :  { %v10300_v25 = vpop.f32.mrb[2].mxu0 }
 0x2fc   :  { %v566_v26 = vadd.f32 %v10300_v25, %v12457_v23  ;;  %v560_v27 = vpop.f32.mrb[3].mxu0 }
 0x2fd   :  { %v561_v28 = vadd.f32 %v560_v27, %v12460_v24 }
 0x2fe   :  { %v573_v29 = vsel %vm569_vm3, %v566_v26, -inf }
 0x2ff   :  { %574 = vmax.xlane.f32.xlu1 %v573_v29  ;;  %v570_v30 = vsel %vm569_vm3, %v561_v28, -inf }
 0x300   :  { %571 = vmax.xlane.f32.xlu0 %v570_v30 }
 0x310   :  { %11625 = vrot.lane.b32.xlu1 %v12436_v15, %s12121_s5 }
 0x314   :  { %11630 = vrot.lane.b32.xlu1 %v12436_v15, %s12122_s21 }
 0x316   :  { %764 = vrot.lane.b32.xlu0 %v12428_v12, %s12123_s3 }
 0x38c   :  { %v575_v31 = vpop.xlane.xlu1 %574 }
 0x38d   :  { %v577_v32 = vsub.f32 %v566_v26, %v575_v31  ;;  %v572_v33 = vpop.xlane.xlu0 %571 }
 0x38e   :  { %v576_v34 = vsub.f32 %v561_v28, %v572_v33 }
 0x38f   :  { %v580_v35 = vmul.f32 1.442695, %v577_v32 }
 0x390   :  { %v578_v36 = vmul.f32 1.442695, %v576_v34  ;;  %v11626_v37 = vpop.permute.xlu1 %11625 }
 0x391   :  { %11769 = vpow2.f32 %v580_v35  ;;  %v11628_v38 = vunpack.i.h.bf16 %v11626_v37  ;;  %v11627_v39 = vunpack.i.l.bf16 %v11626_v37  ;;  %v765_v60 = vpop.permute.xlu0 %764 }
 0x392   :  { %11771 = vpow2.f32 %v578_v36 }
 0x393   :  { %v10678_v40 = vpack.c.bf16 %v11628_v38, %v11627_v39 }
 0x394   :  { %v11631_v41 = vpop.permute.xlu1 %11630 }
 0x395   :  { %v11633_v42 = vunpack.i.h.bf16 %v11631_v41  ;;  %v11632_v43 = vunpack.i.l.bf16 %v11631_v41  ;;  %10679 = vmatprep.subr.bf16.mxu1 %v10678_v40 }
 0x396   :  { %10681 = vmatpush3.bf16.msra.mxu1 %v10678_v40 }
 0x397   :  { %v10682_v44 = vpack.c.bf16 %v11633_v42, %v11632_v43  ;;  %v469_v42 = vld [vmem:[%s12185_s14 + $0x8] sm:$0xff] }
 0x399   :  { %10684 = vmatprep.subr.msk.bf16.mxu1 %vm12446_vm2, %v10682_v44 }
 0x39b   :  { %v11770_v45 = vpop.eup %11769 }
 0x39c   :  { %v585_v46 = vsel %vm569_vm3, %v11770_v45, 0.0  ;;  %v11772_v47 = vpop.eup %11771 }
 0x39d   :  { %586 = vadd.xlane.f32.xlu1 %v585_v46  ;;  %v582_v48 = vsel %vm569_vm3, %v11772_v47, 0.0 }
 0x3a1   :  { %583 = vadd.xlane.f32.xlu1 %v582_v48 }
 0x3b2   :  { %762 = vrot.lane.b32.xlu1 %v12430_v14, %s12123_s3 }
 0x3b6   :  { %11635 = vrot.lane.b32.xlu1 %v12436_v15, %s12124_s8 }
 0x3ba   :  { %1045 = vrot.lane.b32.xlu1 %v12430_v14, %s12125_s24 }
 0x3be   :  { %1047 = vrot.lane.b32.xlu1 %v12428_v12, %s12125_s24 }
 0x42a   :  { %v587_v49 = vpop.xlane.xlu1 %586 }
 0x42b   :  { %11773 = vrcp.f32 %v587_v49 }
 0x42e   :  { %v584_v50 = vpop.xlane.xlu1 %583 }
 0x42f   :  { %11775 = vrcp.f32 %v584_v50 }
 0x432   :  { %v763_v51 = vpop.permute.xlu1 %762 }
 0x435   :  { %v11774_v53 = vpop.eup %11773 }
 0x436   :  { %v11636_v52 = vpop.permute.xlu1 %11635  ;;  %v591_v58 = vmul.f32 %v11774_v53, %v11770_v45 }
 0x437   :  { %v11638_v55 = vunpack.i.h.bf16 %v11636_v52  ;;  %v11637_v56 = vunpack.i.l.bf16 %v11636_v52 }
 0x439   :  { %v11776_v54 = vpop.eup %11775  ;;  %v10692_v59 = vpack.c.bf16 %v11638_v55, %v11637_v56 }
 0x43a   :  { %v590_v57 = vmul.f32 %v11776_v54, %v11772_v47  ;;  %v1046_v61 = vpop.permute.xlu1 %1045 }
 0x43c   :  { %10305 = vmatprep.mubr.msk.f32.mxu1 %vm569_vm3, %v590_v57 }
 0x43d   :  { %10306 = vmatmul.mubr.msk.f32.vlgmr.msra.gmra.mrb[2].mxu1 %vm569_vm3, %v591_v58 }
 0x43e   :  { %10687 = vmatpush3.bf16.xpose.msk.msra.mxu1 %vm12446_vm2, %v10682_v44  ;;  %10317 = vmatprep.mubr.msk.f32.mxu1 %vm282_vm1, %v763_v51  ;;  %v1048_v62 = vpop.permute.xlu1 %1047 }
 0x43f   :  { %10694 = vmatprep.subr.msk.bf16.mxu1 %vm12446_vm2, %v10692_v59 }
 0x445   :  { %10318 = vmatmul.mubr.msk.f32.vlgmr.msra.gmra.mrb[4].mxu1 %vm282_vm1, %v765_v60 }
 0x446   :  { %10697 = vmatpush3.bf16.xpose.msk.msra.mxu1 %vm12446_vm2, %v10692_v59  ;;  %10336 = vmatprep.mubr.msk.f32.mxu1 %vm282_vm1, %v1046_v61 }
 0x44d   :  { %10337 = vmatmul.mubr.msk.f32.vlgmr.msra.gmra.mrb[6].mxu1 %vm282_vm1, %v1048_v62 }
 0x510   :  { %v10307_v0 = vpop.f32.mrb[2].mxu1 }
 0x511   :  { %v670_v1 = vpop.f32.mrb[3].mxu1 }
 0x512   :  { %10310 = vmatprep.mubr.msk.f32.mxu0 %vm282_vm1, %v670_v1 }
 0x513   :  { %10311 = vmatmul.mubr.msk.f32.vlgmr.msra.gmra.mrb[4].mxu0 %vm282_vm1, %v10307_v0 }
 0x518   :  { %v10319_v2 = vpop.f32.mrb[4].mxu1 }
 0x519   :  { %v850_v3 = vadd.f32 %v10319_v2, %v12457_v23  ;;  %v844_v4 = vpop.f32.mrb[5].mxu1 }
 0x51a   :  { %v845_v6 = vadd.f32 %v844_v4, %v12460_v24 }
 0x51b   :  { %v856_v7 = vsel %vm569_vm3, %v850_v3, -inf }
 0x51c   :  { %857 = vmax.xlane.f32.xlu0 %v856_v7  ;;  %v853_v8 = vsel %vm569_vm3, %v845_v6, -inf  ;;  %v470_v7 = vld [vmem:[%s12185_s14 + $0x10] sm:$0xff] }
 0x51d   :  { %854 = vmax.xlane.f32.xlu1 %v853_v8 }
 0x520   :  { %v10338_v9 = vpop.f32.mrb[6].mxu1 }
 0x521   :  { %v1127_v10 = vpop.f32.mrb[7].mxu1  ;;  %v1133_v31 = vadd.f32 %v10338_v9, %v12457_v23 }
 0x522   :  { %v1128_v29 = vadd.f32 %v1127_v10, %v12460_v24 }
 0x523   :  { %v1139_v32 = vsel %vm569_vm3, %v1133_v31, -inf }
 0x524   :  { %v1136_v30 = vsel %vm569_vm3, %v1128_v29, -inf }
 0x5a9   :  { %v858_v11 = vpop.xlane.xlu0 %857 }
 0x5aa   :  { %v860_v13 = vsub.f32 %v850_v3, %v858_v11  ;;  %v855_v18 = vpop.xlane.xlu1 %854 }
 0x5ab   :  { %v859_v19 = vsub.f32 %v845_v6, %v855_v18 }
 0x5ac   :  { %v863_v20 = vmul.f32 1.442695, %v860_v13 }
 0x5ad   :  { %v861_v22 = vmul.f32 1.442695, %v859_v19 }
 0x5ae   :  { %11777 = vpow2.f32 %v863_v20 }
 0x5af   :  { %11779 = vpow2.f32 %v861_v22 }
 0x5b8   :  { %v11778_v25 = vpop.eup %11777 }
 0x5b9   :  { %v11780_v26 = vpop.eup %11779  ;;  %v868_v27 = vsel %vm569_vm3, %v11778_v25, 0.0 }
 0x5ba   :  { %869 = vadd.xlane.f32.xlu0 %v868_v27  ;;  %v865_v28 = vsel %vm569_vm3, %v11780_v26, 0.0 }
 0x5bb   :  { %866 = vadd.xlane.f32.xlu1 %v865_v28 }
 0x5cc   :  { %11640 = vrot.lane.b32.xlu1 %v12436_v15, %s12126_s12 }
 0x5d0   :  { %11645 = vrot.lane.b32.xlu0 %v12436_v15, %s12127_s2  ;;  %1328 = vrot.lane.b32.xlu1 %v12430_v14, %s12128_s7 }
 0x5d4   :  { %1330 = vrot.lane.b32.xlu1 %v12428_v12, %s12128_s7 }
 0x5ef   :  { %1137 = vmax.xlane.f32.xlu0 %v1136_v30 }
 0x5f8   :  { %1140 = vmax.xlane.f32.xlu1 %v1139_v32 }
 0x609   :  { %11650 = vrot.lane.b32.xlu1 %v12436_v15, %s12129_s10 }
 0x60d   :  { %11655 = vrot.lane.b32.xlu1 %v12436_v15, %s12130_s11 }
 0x647   :  { %v870_v12 = vpop.xlane.xlu0 %869 }
 0x648   :  { %11781 = vrcp.f32 %v870_v12  ;;  %v867_v14 = vpop.xlane.xlu1 %866 }
 0x649   :  { %11783 = vrcp.f32 %v867_v14 }
 0x64b   :  { %v11646_v33 = vpop.permute.xlu0 %11645 }
 0x64c   :  { %v11648_v34 = vunpack.i.h.bf16 %v11646_v33  ;;  %v11647_v35 = vunpack.i.l.bf16 %v11646_v33  ;;  %v11641_v36 = vpop.permute.xlu1 %11640  ;;  %v471_v33 = vld [vmem:[%s12185_s14 + $0x18] sm:$0xff]  ;;  %s14086_s14 = sld [smem:[#allocation18_spill]] }
 0x64d   :  { %v11643_v37 = vunpack.i.h.bf16 %v11641_v36  ;;  %v11642_v38 = vunpack.i.l.bf16 %v11641_v36 }
 0x64e   :  { %v10702_v39 = vpack.c.bf16 %v11648_v34, %v11647_v35 }
 0x64f   :  { %v10688_v40 = vpack.c.bf16 %v11643_v37, %v11642_v38 }
 0x650   :  { %10704 = vmatprep.subr.msk.bf16.mxu1 %vm12446_vm2, %v10702_v39  ;;  %v1329_v41 = vpop.permute.xlu1 %1328 }
 0x651   :  { %10689 = vmatprep.subr.bf16.mxu0 %v10688_v40  ;;  %10707 = vmatpush3.bf16.xpose.msk.msra.mxu1 %vm12446_vm2, %v10702_v39 }
 0x652   :  { %v11782_v15 = vpop.eup %11781  ;;  %10355 = vmatprep.mubr.msk.f32.mxu1 %vm282_vm1, %v1329_v41  ;;  %10691 = vmatpush3.bf16.msra.mxu0 %v10688_v40  ;;  %v1750_v40 = vld [vmem:[%s12205_s6] sm:$0xff]  ;;  %v1751_v41 = vld [vmem:[%s12205_s6 + $0x8] sm:$0xff] }
 0x653   :  { %v11784_v43 = vpop.eup %11783  ;;  %10327 = vmatprep.subr.mxu0 %v469_v42  ;;  %v874_v45 = vmul.f32 %v11782_v15, %v11778_v25  ;;  %v9246_v15 = vld [vmem:[%s12150_s13] ss:$0 sm:$0xff]  ;;  %s14088_s13 = sld [smem:[#allocation17_spill]] }
 0x654   :  { %v873_v44 = vmul.f32 %v11784_v43, %v11780_v26  ;;  %v1331_v46 = vpop.permute.xlu1 %1330  ;;  %v356_v43 = vadd.f32 %v9246_v15, %v12442_v17  ;;  %v361_v17 = vadd.f32 %v12440_v16, %v9246_v15 }
 0x656   :  { %10324 = vmatprep.mubr.msk.f32.mxu0 %vm569_vm3, %v873_v44  ;;  %v1752_v44 = vld [vmem:[%s12205_s6 + $0x10] sm:$0xff] }
 0x657   :  { %10325 = vmatmul.mubr.msk.f32.vlgmr.msra.gmra.mrb[6].mxu0 %vm569_vm3, %v874_v45  ;;  %v1753_v45 = vld [vmem:[%s12205_s6 + $0x18] sm:$0xff]  ;;  %s14090_s6 = sld [smem:[#allocation20_spill]] }
 0x658   :  { %10356 = vmatmul.mubr.msk.f32.vlgmr.msra.gmra.mrb[8].mxu1 %vm282_vm1, %v1331_v46  ;;  %10328 = vmatpush3.msra.mxu0 %v469_v42  ;;  %v10720_v42 = vpack.c.bf16 %v1751_v41, %v1750_v40  ;;  %v364_v46 = vld [vmem:[%s12155_s17] sm:$0xff] }
 0x659   :  { %v9253_v16 = vld [vmem:[%s14088_s13] ss:$0 sm:$0xff]  ;;  %s14106_s13 = sld [smem:[#allocation34_spill]] }
 0x67c   :  { %v1138_v47 = vpop.xlane.xlu0 %1137 }
 0x67d   :  { %v1142_v48 = vsub.f32 %v1128_v29, %v1138_v47 }
 0x67f   :  { %v1144_v49 = vmul.f32 1.442695, %v1142_v48 }
 0x681   :  { %11785 = vpow2.f32 %v1144_v49  ;;  %v10724_v49 = vpack.c.bf16 %v1753_v45, %v1752_v44 }
 0x685   :  { %v1141_v50 = vpop.xlane.xlu1 %1140 }
 0x686   :  { %v1143_v51 = vsub.f32 %v1133_v31, %v1141_v50  ;;  %v12555_v50 = vadd.f32 %v364_v46, %v356_v43  ;;  %v9288_v43 = vld [vmem:[%s14093_s15] ss:$0 sm:$0xff] }
 0x688   :  { %v1146_v52 = vmul.f32 1.442695, %v1143_v51  ;;  %14087 = vst [vmem:[#allocation48_spill] sm:$0xff] %v12555_v50  ;;  %v365_v51 = vld [vmem:[%s12155_s17 + $0x8] sm:$0xff]  ;;  %s14091_s17 = sld [smem:[#allocation23_spill]] }
 0x689   :  { %v11651_v53 = vpop.permute.xlu1 %11650 }
 0x68a   :  { %11787 = vpow2.f32 %v1146_v52  ;;  %v11653_v54 = vunpack.i.h.bf16 %v11651_v53  ;;  %v11652_v55 = vunpack.i.l.bf16 %v11651_v53  ;;  %v12563_v52 = vadd.f32 %v365_v51, %v361_v17  ;;  %v1658_v53 = vld [vmem:[%s14086_s14] sm:$0xff]  ;;  %v12617_v17 = vld [vmem:[%s14094_s16 + $0x8] sm:$0xff] }
 0x68b   :  { %v11786_v56 = vpop.eup %11785  ;;  %v12620_v51 = vld [vmem:[%s14094_s16] sm:$0xff] }
 0x68c   :  { %v1148_v57 = vsel %vm569_vm3, %v11786_v56, 0.0  ;;  %v10698_v58 = vpack.c.bf16 %v11653_v54, %v11652_v55  ;;  %14089 = vst [vmem:[#allocation49_spill] sm:$0xff] %v12563_v52  ;;  %v1659_v54 = vld [vmem:[%s14086_s14 + $0x8] sm:$0xff] }
 0x68d   :  { %1149 = vadd.xlane.f32.xlu0 %v1148_v57  ;;  %v11656_v0 = vpop.permute.xlu1 %11655  ;;  %v10712_v55 = vpack.c.bf16 %v1659_v54, %v1658_v53  ;;  %v1661_v57 = vld [vmem:[%s14086_s14 + $0x18] sm:$0xff] }
 0x68e   :  { %10699 = vmatprep.subr.bf16.mxu0 %v10698_v58  ;;  %v11658_v8 = vunpack.i.h.bf16 %v11656_v0  ;;  %v11657_v9 = vunpack.i.l.bf16 %v11656_v0 }
 0x68f   :  { %10713 = vmatprep.subr.bf16.mxu1 %v10712_v55 }
 0x690   :  { %v10708_v20 = vpack.c.bf16 %v11658_v8, %v11657_v9  ;;  %10715 = vmatpush3.bf16.msra.mxu1 %v10712_v55 }
 0x694   :  { %v11788_v59 = vpop.eup %11787 }
 0x695   :  { %v1151_v60 = vsel %vm569_vm3, %v11788_v59, 0.0 }
 0x696   :  { %1152 = vadd.xlane.f32.xlu0 %v1151_v60 }
 0x71a   :  { %v1150_v61 = vpop.xlane.xlu0 %1149 }
 0x71b   :  { %11789 = vrcp.f32 %v1150_v61 }
 0x723   :  { %v1153_v62 = vpop.xlane.xlu0 %1152 }
 0x724   :  { %11791 = vrcp.f32 %v1153_v62 }
 0x725   :  { %v11790_v63 = vpop.eup %11789 }
 0x726   :  { %v1156_v6 = vmul.f32 %v11790_v63, %v11786_v56  ;;  %v1660_v56 = vld [vmem:[%s14086_s14 + $0x10] sm:$0xff]  ;;  %s14105_s14 = sld [smem:[#allocation28_spill]] }
 0x72a   :  { %v10326_v1 = vpop.f32.mrb[6].mxu0 }
 0x72b   :  { %v953_v2 = vpop.f32.mrb[7].mxu0  ;;  %v10357_v3 = vpop.f32.mrb[8].mxu1 }
 0x72c   :  { %10329 = vmatprep.mubr.msk.f32.mxu0 %vm282_vm1, %v953_v2  ;;  %v1410_v4 = vpop.f32.mrb[9].mxu1  ;;  %v1416_v13 = vadd.f32 %v10357_v3, %v12457_v23  ;;  %v9291_v3 = vld [vmem:[%s14090_s6] ss:$0 sm:$0xff]  ;;  %s14114_s6 = sld [smem:[#allocation43_spill]] }
 0x72d   :  { %v1411_v10 = vadd.f32 %v1410_v4, %v12460_v24  ;;  %10330 = vmatmul.mubr.msk.f32.vlgmr.msra.gmra.mrb[4].mxu0 %vm282_vm1, %v10326_v1 }
 0x72e   :  { %v11792_v11 = vpop.eup %11791  ;;  %10701 = vmatpush3.bf16.msra.mxu0 %v10698_v58  ;;  %10343 = vmatprep.mubr.msk.f32.mxu0 %vm569_vm3, %v1156_v6  ;;  %v1422_v24 = vsel %vm569_vm3, %v1416_v13, -inf  ;;  %v10716_v58 = vpack.c.bf16 %v1661_v57, %v1660_v56 }
 0x72f   :  { %v1419_v18 = vsel %vm569_vm3, %v1411_v10, -inf  ;;  %10346 = vmatprep.subr.mxu0 %v470_v7  ;;  %v1157_v19 = vmul.f32 %v11792_v11, %v11788_v59 }
 0x730   :  { %1420 = vmax.xlane.f32.xlu0 %v1419_v18  ;;  %10717 = vmatprep.subr.bf16.mxu1 %v10716_v58 }
 0x731   :  { %10344 = vmatmul.mubr.msk.f32.vlgmr.msra.gmra.mrb[8].mxu0 %vm569_vm3, %v1157_v19  ;;  %10719 = vmatpush3.bf16.msra.mxu1 %v10716_v58 }
 0x732   :  { %10347 = vmatpush3.msra.mxu0 %v470_v7 }
 0x733   :  { %10709 = vmatprep.subr.bf16.mxu0 %v10708_v20 }
 0x734   :  { %1423 = vmax.xlane.f32.xlu0 %v1422_v24 }
 0x7bd   :  { %v1421_v22 = vpop.xlane.xlu0 %1420 }
 0x7be   :  { %v1425_v25 = vsub.f32 %v1411_v10, %v1421_v22 }
 0x7c0   :  { %v1427_v26 = vmul.f32 1.442695, %v1425_v25 }
 0x7c1   :  { %v1424_v27 = vpop.xlane.xlu0 %1423 }
 0x7c2   :  { %11793 = vpow2.f32 %v1427_v26  ;;  %v1426_v23 = vsub.f32 %v1416_v13, %v1424_v27 }
 0x7c4   :  { %v1429_v28 = vmul.f32 1.442695, %v1426_v23 }
 0x7c6   :  { %11795 = vpow2.f32 %v1429_v28 }
 0x7cc   :  { %v11794_v29 = vpop.eup %11793 }
 0x7cd   :  { %v1431_v30 = vsel %vm569_vm3, %v11794_v29, 0.0 }
 0x7ce   :  { %1432 = vadd.xlane.f32.xlu0 %v1431_v30 }
 0x7d0   :  { %v11796_v31 = vpop.eup %11795 }
 0x7d1   :  { %v1434_v32 = vsel %vm569_vm3, %v11796_v31, 0.0 }
 0x7d2   :  { %1435 = vadd.xlane.f32.xlu0 %v1434_v32 }
 0x804   :  { %v10345_v12 = vpop.f32.mrb[8].mxu0 }
 0x805   :  { %v1236_v14 = vpop.f32.mrb[9].mxu0 }
 0x806   :  { %10348 = vmatprep.mubr.msk.f32.mxu0 %vm282_vm1, %v1236_v14 }
 0x807   :  { %10349 = vmatmul.mubr.msk.f32.vlgmr.msra.gmra.mrb[4].mxu0 %vm282_vm1, %v10345_v12  ;;  %v9286_v12 = vld [vmem:[%s14091_s17] ss:$0 sm:$0xff]  ;;  %s14115_s17 = sld [smem:[#allocation44_spill]] }
 0x808   :  { %10711 = vmatpush3.bf16.msra.mxu0 %v10708_v20 }
 0x809   :  { %10365 = vmatprep.subr.mxu0 %v471_v33 }
 0x85b   :  { %v1433_v34 = vpop.xlane.xlu0 %1432 }
 0x85c   :  { %11797 = vrcp.f32 %v1433_v34 }
 0x85f   :  { %v1436_v35 = vpop.xlane.xlu0 %1435 }
 0x860   :  { %11799 = vrcp.f32 %v1436_v35 }
 0x866   :  { %v11798_v36 = vpop.eup %11797 }
 0x867   :  { %v1439_v37 = vmul.f32 %v11798_v36, %v11794_v29 }
 0x869   :  { %10362 = vmatprep.mubr.msk.f32.mxu0 %vm569_vm3, %v1439_v37 }
 0x86a   :  { %v11800_v38 = vpop.eup %11799 }
 0x86b   :  { %v1440_v39 = vmul.f32 %v11800_v38, %v11796_v31 }
 0x86d   :  { %10363 = vmatmul.mubr.msk.f32.vlgmr.msra.gmra.mrb[10].mxu0 %vm569_vm3, %v1440_v39 }
 0x86e   :  { %10366 = vmatpush3.msra.mxu0 %v471_v33  ;;  %v9287_v33 = vld [vmem:[%s14092_s29] ss:$0 sm:$0xff]  ;;  %s14116_s29 = sld [smem:[#allocation38_spill]] }
 0x86f   :  { %10721 = vmatprep.subr.bf16.mxu0 %v10720_v42 }
 0x940   :  { %v10364_v47 = vpop.f32.mrb[10].mxu0 }
 0x941   :  { %v1519_v48 = vpop.f32.mrb[11].mxu0 }
 0x942   :  { %10367 = vmatprep.mubr.msk.f32.mxu0 %vm282_vm1, %v1519_v48 }
 0x943   :  { %10368 = vmatmul.mubr.msk.f32.vlgmr.msra.gmra.mrb[4].mxu0 %vm282_vm1, %v10364_v47 }
 0x944   :  { %10723 = vmatpush3.bf16.msra.mxu0 %v10720_v42  ;;  %10389 = vmatprep.mubr.msk.f32.mxu0 %vm390_vm0, %v12555_v50  ;;  %v4009_v50 = vld [vmem:[%s14100_s26 + $0x598] sm:$0xff] }
 0x945   :  { %10725 = vmatprep.subr.bf16.mxu0 %v10724_v49 }
 0x948   :  { %10727 = vmatpush3.bf16.msra.mxu0 %v10724_v49 }
 0x94b   :  { %10390 = vmatmul.mubr.msk.f32.vlgmr.msra.gmra.mrb[12].mxu0 %vm390_vm0, %v12563_v52  ;;  %v4008_v52 = vld [vmem:[%s14100_s26 + $0x590] sm:$0xff] }
 0xa16   :  { %v10369_v59 = vpop.f32.mrb[4].mxu0 }
 0xa17   :  { %v11520_v60 = vadd.f32 %v10369_v59, %v9253_v16  ;;  %v1600_v61 = vpop.f32.mrb[5].mxu0 }
 0xa18   :  { %v11521_v62 = vadd.f32 %v9253_v16, %v1600_v61 }
 0xa19   :  { %v1612_v63 = vadd.f32 %v11520_v60, %v12416_v5 }
 0xa1a   :  { %v1611_v0 = vadd.f32 %v11521_v62, %v12416_v5 }
 0xa1b   :  { %v1618_v1 = vsel %vm390_vm0, %v1612_v63, 0.0 }
 0xa1c   :  { %1619 = vadd.xlane.f32.xlu1 %v1618_v1  ;;  %v1615_v2 = vsel %vm390_vm0, %v1611_v0, 0.0 }
 0xa1d   :  { %1616 = vadd.xlane.f32.xlu0 %v1615_v2 }
 0xa1e   :  { %v10391_v4 = vpop.f32.mrb[12].mxu0 }
 0xa1f   :  { %v1839_v6 = vadd.f32 %v10391_v4, %v9291_v3  ;;  %v1833_v7 = vpop.f32.mrb[13].mxu0 }
 0xa20   :  { %v1834_v8 = vadd.f32 %v9291_v3, %v1833_v7 }
 0xa22   :  { %v10728_v9 = vpack.c.bf16 %v1839_v6, %v1834_v8  ;;  %v12577_v10 = vpack.i.bf16 %v1839_v6, %v1834_v8 }
 0xa24   :  { %10730 = vmatprep.subr.msk.bf16.mxu1 %vm12446_vm2, %v10728_v9 }
 0xaa9   :  { %v1620_v11 = vpop.xlane.xlu1 %1619 }
 0xaaa   :  { %v1623_v13 = vmul.f32 0.03125, %v1620_v11  ;;  %v1617_v5 = vpop.xlane.xlu0 %1616 }
 0xaab   :  { %v1622_v18 = vmul.f32 0.03125, %v1617_v5 }
 0xaac   :  { %v1625_v19 = vsub.f32 %v1612_v63, %v1623_v13 }
 0xaad   :  { %v1624_v20 = vsub.f32 %v1611_v0, %v1622_v18 }
 0xaae   :  { %v1627_v25 = vmul.f32 %v1625_v19, %v1625_v19 }
 0xaaf   :  { %v1626_v24 = vmul.f32 %v1624_v20, %v1624_v20 }
 0xab0   :  { %v1631_v26 = vsel %vm390_vm0, %v1627_v25, 0.0 }
 0xab1   :  { %v1628_v22 = vsel %vm390_vm0, %v1626_v24, 0.0 }
 0xab2   :  { %1629 = vadd.xlane.f32.xlu0 %v1628_v22 }
 0xab6   :  { %1632 = vadd.xlane.f32.xlu0 %v1631_v26 }
 0xacc   :  { %11660 = vrot.lane.b32.xlu0 %v12577_v10, %s12123_s3 }
 0xb3f   :  { %v1630_v27 = vpop.xlane.xlu0 %1629 }
 0xb40   :  { %v1634_v23 = vmul.f32 0.03125, %v1630_v27 }
 0xb42   :  { %v1636_v28 = vadd.f32 1e-05, %v1634_v23 }
 0xb43   :  { %v1633_v29 = vpop.xlane.xlu0 %1632 }
 0xb44   :  { %11801 = vrsqrt.f32 %v1636_v28  ;;  %v1635_v30 = vmul.f32 0.03125, %v1633_v29 }
 0xb46   :  { %v1637_v31 = vadd.f32 1e-05, %v1635_v30 }
 0xb47   :  { %v11661_v36 = vpop.permute.xlu0 %11660 }
 0xb48   :  { %11803 = vrsqrt.f32 %v1637_v31  ;;  %v11663_v39 = vunpack.i.h.bf16 %v11661_v36  ;;  %v11662_v40 = vunpack.i.l.bf16 %v11661_v36 }
 0xb4a   :  { %v10738_v15 = vpack.c.bf16 %v11663_v39, %v11662_v40 }
 0xb4e   :  { %v11802_v32 = vpop.eup %11801 }
 0xb4f   :  { %v1640_v14 = vmul.f32 %v11802_v32, %v1624_v20 }
 0xb51   :  { %v1648_v34 = vmul.f32 %v9286_v12, %v1640_v14 }
 0xb52   :  { %v11804_v35 = vpop.eup %11803 }
 0xb53   :  { %v1641_v37 = vmul.f32 %v11804_v35, %v1625_v19  ;;  %v12587_v38 = vadd.f32 %v9287_v33, %v1648_v34 }
 0xb55   :  { %v1649_v41 = vmul.f32 %v9286_v12, %v1641_v37  ;;  %10378 = vmatprep.mubr.msk.f32.mxu1 %vm390_vm0, %v12587_v38 }
 0xb57   :  { %v12591_v42 = vadd.f32 %v9287_v33, %v1649_v41 }
 0xb59   :  { %10379 = vmatmul.mubr.msk.f32.vlgmr.msra.gmra.mrb[10].mxu1 %vm390_vm0, %v12591_v42 }
 0xb5a   :  { %10733 = vmatpush3.bf16.xpose.msk.msra.mxu1 %vm12446_vm2, %v10728_v9 }
 0xb5b   :  { %10740 = vmatprep.subr.msk.bf16.mxu1 %vm12446_vm2, %v10738_v15 }
 0xc2c   :  { %v10380_v44 = vpop.f32.mrb[10].mxu1 }
 0xc2d   :  { %v1741_v45 = vpop.f32.mrb[11].mxu1  ;;  %v12602_v47 = vadd.f32 %v10380_v44, %v9288_v43 }
 0xc2e   :  { %v12600_v46 = vadd.f32 %v9288_v43, %v1741_v45 }
 0xc30   :  { %10396 = vmatprep.mubr.msk.f32.mxu1 %vm282_vm1, %v12600_v46  ;;  %2133 = vrot.lane.b32.xlu0 %v12600_v46, %s12123_s3 }
 0xc31   :  { %10397 = vmatmul.mubr.msk.f32.vlgmr.msra.gmra.mrb[12].mxu1 %vm282_vm1, %v12602_v47 }
 0xc32   :  { %10743 = vmatpush3.bf16.xpose.msk.msra.mxu1 %vm12446_vm2, %v10738_v15 }
 0xc34   :  { %2135 = vrot.lane.b32.xlu0 %v12602_v47, %s12123_s3 }
 0xca2   :  { %v2134_v48 = vpop.permute.xlu0 %2133 }
 0xca3   :  { %10415 = vmatprep.mubr.msk.f32.mxu1 %vm282_vm1, %v2134_v48  ;;  %v1842_v48 = vld [vmem:[%s14095_s0] sm:$0xff] }
 0xca6   :  { %v2136_v49 = vpop.permute.xlu0 %2135 }
 0xca7   :  { %10416 = vmatmul.mubr.msk.f32.vlgmr.msra.gmra.mrb[14].mxu1 %vm282_vm1, %v2136_v49 }
 0xd04   :  { %v10398_v53 = vpop.f32.mrb[12].mxu1 }
 0xd05   :  { %v1938_v54 = vadd.f32 %v10398_v53, %v12617_v17  ;;  %v1932_v55 = vpop.f32.mrb[13].mxu1 }
 0xd06   :  { %v1933_v56 = vadd.f32 %v1932_v55, %v12620_v51 }
 0xd07   :  { %v1944_v57 = vsel %vm569_vm3, %v1938_v54, -inf }
 0xd08   :  { %1945 = vmax.xlane.f32.xlu0 %v1944_v57  ;;  %v1941_v58 = vsel %vm569_vm3, %v1933_v56, -inf }
 0xd09   :  { %1942 = vmax.xlane.f32.xlu1 %v1941_v58 }
 0xd1e   :  { %2418 = vrot.lane.b32.xlu0 %v12602_v47, %s12125_s24 }
 0xd7a   :  { %v10417_v16 = vpop.f32.mrb[14].mxu1 }
 0xd7b   :  { %v2221_v59 = vadd.f32 %v10417_v16, %v12617_v17  ;;  %v2215_v60 = vpop.f32.mrb[15].mxu1 }
 0xd7c   :  { %v2216_v9 = vadd.f32 %v2215_v60, %v12620_v51 }
 0xd7d   :  { %v2227_v61 = vsel %vm569_vm3, %v2221_v59, -inf }
 0xd7e   :  { %2228 = vmax.xlane.f32.xlu0 %v2227_v61  ;;  %v2224_v11 = vsel %vm569_vm3, %v2216_v9, -inf }
 0xd94   :  { %11680 = vrot.lane.b32.xlu0 %v12577_v10, %s12128_s7 }
 0xd95   :  { %v1946_v62 = vpop.xlane.xlu0 %1945 }
 0xd96   :  { %v1948_v63 = vsub.f32 %v1938_v54, %v1946_v62  ;;  %v1943_v0 = vpop.xlane.xlu1 %1942 }
 0xd97   :  { %v1947_v1 = vsub.f32 %v1933_v56, %v1943_v0 }
 0xd98   :  { %v1951_v2 = vmul.f32 1.442695, %v1948_v63 }
 0xd99   :  { %v1949_v3 = vmul.f32 1.442695, %v1947_v1  ;;  %v2419_v13 = vpop.permute.xlu0 %2418 }
 0xd9a   :  { %11805 = vpow2.f32 %v1951_v2 }
 0xd9b   :  { %11807 = vpow2.f32 %v1949_v3 }
 0xda4   :  { %v11806_v4 = vpop.eup %11805 }
 0xda5   :  { %v1956_v6 = vsel %vm569_vm3, %v11806_v4, 0.0  ;;  %v11808_v7 = vpop.eup %11807 }
 0xda6   :  { %1957 = vadd.xlane.f32.xlu1 %v1956_v6  ;;  %v1953_v8 = vsel %vm569_vm3, %v11808_v7, 0.0  ;;  %v1843_v6 = vld [vmem:[%s14095_s0 + $0x8] sm:$0xff] }
 0xdaa   :  { %1954 = vadd.xlane.f32.xlu1 %v1953_v8 }
 0xdbb   :  { %11665 = vrot.lane.b32.xlu1 %v12577_v10, %s12120_s9 }
 0xdbf   :  { %11670 = vrot.lane.b32.xlu1 %v12577_v10, %s12125_s24 }
 0xdc3   :  { %2416 = vrot.lane.b32.xlu1 %v12600_v46, %s12125_s24 }
 0xde7   :  { %2225 = vmax.xlane.f32.xlu1 %v2224_v11 }
 0xe0b   :  { %v2229_v5 = vpop.xlane.xlu0 %2228 }
 0xe0c   :  { %v2231_v18 = vsub.f32 %v2221_v59, %v2229_v5 }
 0xe0e   :  { %v2234_v19 = vmul.f32 1.442695, %v2231_v18 }
 0xe0f   :  { %v11681_v28 = vpop.permute.xlu0 %11680 }
 0xe10   :  { %11809 = vpow2.f32 %v2234_v19  ;;  %v11683_v31 = vunpack.i.h.bf16 %v11681_v28  ;;  %v11682_v32 = vunpack.i.l.bf16 %v11681_v28 }
 0xe12   :  { %v10758_v39 = vpack.c.bf16 %v11683_v31, %v11682_v32 }
 0xe1a   :  { %v12642_v20 = vpop.eup %11809 }
 0xe1b   :  { %v2239_v24 = vsel %vm569_vm3, %v12642_v20, 0.0 }
 0xe1c   :  { %2240 = vadd.xlane.f32.xlu1 %v2239_v24 }
 0xe33   :  { %v1958_v22 = vpop.xlane.xlu1 %1957 }
 0xe34   :  { %11811 = vrcp.f32 %v1958_v22 }
 0xe37   :  { %v1955_v25 = vpop.xlane.xlu1 %1954 }
 0xe38   :  { %11813 = vrcp.f32 %v1955_v25 }
 0xe3b   :  { %v11666_v26 = vpop.permute.xlu1 %11665 }
 0xe3c   :  { %v11668_v27 = vunpack.i.h.bf16 %v11666_v26  ;;  %v11667_v23 = vunpack.i.l.bf16 %v11666_v26 }
 0xe3e   :  { %v10734_v29 = vpack.c.bf16 %v11668_v27, %v11667_v23  ;;  %v11812_v33 = vpop.eup %11811 }
 0xe3f   :  { %v11671_v30 = vpop.permute.xlu1 %11670  ;;  %v1962_v40 = vmul.f32 %v11812_v33, %v11806_v4 }
 0xe40   :  { %v11673_v12 = vunpack.i.h.bf16 %v11671_v30  ;;  %v11672_v14 = vunpack.i.l.bf16 %v11671_v30  ;;  %10735 = vmatprep.subr.bf16.mxu0 %v10734_v29 }
 0xe41   :  { %10737 = vmatpush3.bf16.msra.mxu0 %v10734_v29 }
 0xe42   :  { %v11814_v34 = vpop.eup %11813  ;;  %v10748_v35 = vpack.c.bf16 %v11673_v12, %v11672_v14  ;;  %10406 = vmatprep.subr.mxu0 %v1842_v48 }
 0xe43   :  { %v2417_v36 = vpop.permute.xlu1 %2416  ;;  %v1961_v37 = vmul.f32 %v11814_v34, %v11808_v7 }
 0xe44   :  { %10750 = vmatprep.subr.msk.bf16.mxu1 %vm12446_vm2, %v10748_v35  ;;  %10434 = vmatprep.mubr.msk.f32.mxu1 %vm282_vm1, %v2417_v36 }
 0xe45   :  { %10403 = vmatprep.mubr.msk.f32.mxu0 %vm569_vm3, %v1961_v37  ;;  %10753 = vmatpush3.bf16.xpose.msk.msra.mxu1 %vm12446_vm2, %v10748_v35 }
 0xe46   :  { %10404 = vmatmul.mubr.msk.f32.vlgmr.msra.gmra.mrb[14].mxu0 %vm569_vm3, %v1962_v40  ;;  %10760 = vmatprep.subr.msk.bf16.mxu1 %vm12446_vm2, %v10758_v39 }
 0xe47   :  { %10407 = vmatpush3.msra.mxu0 %v1842_v48 }
 0xe4c   :  { %10435 = vmatmul.mubr.msk.f32.vlgmr.msra.gmra.mrb[16].mxu1 %vm282_vm1, %v2419_v13 }
 0xe4d   :  { %10763 = vmatpush3.bf16.xpose.msk.msra.mxu1 %vm12446_vm2, %v10758_v39 }
 0xe74   :  { %v2226_v41 = vpop.xlane.xlu1 %2225 }
 0xe75   :  { %v2230_v15 = vsub.f32 %v2216_v9, %v2226_v41 }
 0xe77   :  { %v2232_v43 = vmul.f32 1.442695, %v2230_v15 }
 0xe79   :  { %11815 = vpow2.f32 %v2232_v43 }
 0xe83   :  { %v11816_v44 = vpop.eup %11815 }
 0xe84   :  { %v2236_v45 = vsel %vm569_vm3, %v11816_v44, 0.0 }
 0xe85   :  { %2237 = vadd.xlane.f32.xlu1 %v2236_v45 }
 0xe96   :  { %11675 = vrot.lane.b32.xlu1 %v12577_v10, %s12122_s21 }
 0xe9a   :  { %2699 = vrot.lane.b32.xlu1 %v12600_v46, %s12128_s7 }
 0xe9e   :  { %2701 = vrot.lane.b32.xlu1 %v12602_v47, %s12128_s7 }
 0xea9   :  { %v2241_v49 = vpop.xlane.xlu1 %2240 }
 0xeaa   :  { %11817 = vrcp.f32 %v2241_v49 }
 0xeb4   :  { %v11818_v46 = vpop.eup %11817 }
 0xeb5   :  { %v2245_v62 = vmul.f32 %v11818_v46, %v12642_v20 }
 0xf12   :  { %v2238_v53 = vpop.xlane.xlu1 %2237 }
 0xf13   :  { %11819 = vrcp.f32 %v2238_v53  ;;  %v1844_v53 = vld [vmem:[%s14095_s0 + $0x10] sm:$0xff] }
 0xf16   :  { %v11676_v54 = vpop.permute.xlu1 %11675 }
 0xf17   :  { %v11678_v55 = vunpack.i.h.bf16 %v11676_v54  ;;  %v11677_v56 = vunpack.i.l.bf16 %v11676_v54 }
 0xf19   :  { %v10744_v57 = vpack.c.bf16 %v11678_v55, %v11677_v56  ;;  %v10405_v58 = vpop.f32.mrb[14].mxu0 }
 0xf1a   :  { %v2700_v16 = vpop.permute.xlu1 %2699  ;;  %v2041_v59 = vpop.f32.mrb[15].mxu0 }
 0xf1b   :  { %10408 = vmatprep.mubr.msk.f32.mxu0 %vm282_vm1, %v2041_v59  ;;  %10745 = vmatprep.subr.bf16.mxu0 %v10744_v57 }
 0xf1c   :  { %10453 = vmatprep.mubr.msk.f32.mxu1 %vm282_vm1, %v2700_v16  ;;  %10409 = vmatmul.mubr.msk.f32.vlgmr.msra.gmra.mrb[16].mxu0 %vm282_vm1, %v10405_v58 }
 0xf1d   :  { %v11820_v47 = vpop.eup %11819  ;;  %10747 = vmatpush3.bf16.msra.mxu0 %v10744_v57 }
 0xf1e   :  { %v2702_v60 = vpop.permute.xlu1 %2701  ;;  %v2244_v61 = vmul.f32 %v11820_v47, %v11816_v44  ;;  %10425 = vmatprep.subr.mxu0 %v1843_v6  ;;  %v1845_v47 = vld [vmem:[%s14095_s0 + $0x18] sm:$0xff] }
 0xf1f   :  { %v10436_v63 = vpop.f32.mrb[16].mxu1  ;;  %10454 = vmatmul.mubr.msk.f32.vlgmr.msra.gmra.mrb[18].mxu1 %vm282_vm1, %v2702_v60 }
 0xf20   :  { %v2504_v0 = vadd.f32 %v10436_v63, %v12617_v17  ;;  %10422 = vmatprep.mubr.msk.f32.mxu0 %vm569_vm3, %v2244_v61  ;;  %v2498_v1 = vpop.f32.mrb[17].mxu1 }
 0xf21   :  { %v2499_v2 = vadd.f32 %v2498_v1, %v12620_v51  ;;  %10423 = vmatmul.mubr.msk.f32.vlgmr.msra.gmra.mrb[18].mxu0 %vm569_vm3, %v2245_v62  ;;  %v9294_v1 = vld [vmem:[%s14096_s20] ss:$0 sm:$0xff] }
 0xf22   :  { %v2510_v3 = vsel %vm569_vm3, %v2504_v0, -inf  ;;  %10426 = vmatpush3.msra.mxu0 %v1843_v6 }
 0xf23   :  { %2511 = vmax.xlane.f32.xlu0 %v2510_v3  ;;  %v2507_v4 = vsel %vm569_vm3, %v2499_v2, -inf }
 0xf24   :  { %2508 = vmax.xlane.f32.xlu1 %v2507_v4 }
 0xfb0   :  { %v2512_v7 = vpop.xlane.xlu0 %2511 }
 0xfb1   :  { %v2514_v8 = vsub.f32 %v2504_v0, %v2512_v7  ;;  %v2509_v9 = vpop.xlane.xlu1 %2508 }
 0xfb2   :  { %v2513_v11 = vsub.f32 %v2499_v2, %v2509_v9 }
 0xfb3   :  { %v2517_v13 = vmul.f32 1.442695, %v2514_v8 }
 0xfb4   :  { %v2515_v5 = vmul.f32 1.442695, %v2513_v11 }
 0xfb5   :  { %11821 = vpow2.f32 %v2517_v13 }
 0xfb6   :  { %11823 = vpow2.f32 %v2515_v5 }
 0xfbf   :  { %v11822_v18 = vpop.eup %11821 }
 0xfc0   :  { %v11824_v19 = vpop.eup %11823  ;;  %v2522_v20 = vsel %vm569_vm3, %v11822_v18, 0.0 }
 0xfc1   :  { %2523 = vadd.xlane.f32.xlu1 %v2522_v20  ;;  %v2519_v24 = vsel %vm569_vm3, %v11824_v19, 0.0 }
 0xfc2   :  { %2520 = vadd.xlane.f32.xlu0 %v2519_v24 }
 0xfd8   :  { %11685 = vrot.lane.b32.xlu0 %v12577_v10, %s12124_s8 }
 0xff2   :  { %v10455_v22 = vpop.f32.mrb[18].mxu1 }
 0xff3   :  { %v2781_v25 = vpop.f32.mrb[19].mxu1  ;;  %v2787_v28 = vadd.f32 %v10455_v22, %v12617_v17 }
 0xff4   :  { %v2782_v26 = vadd.f32 %v2781_v25, %v12620_v51  ;;  %v10424_v27 = vpop.f32.mrb[18].mxu0 }
 0xff5   :  { %v2324_v23 = vpop.f32.mrb[19].mxu0  ;;  %v2793_v30 = vsel %vm569_vm3, %v2787_v28, -inf }
 0xff6   :  { %10427 = vmatprep.mubr.msk.f32.mxu0 %vm282_vm1, %v2324_v23  ;;  %v2790_v29 = vsel %vm569_vm3, %v2782_v26, -inf  ;;  %v3031_v23 = vld [vmem:[%s14097_s18 + $0x18] sm:$0xff] }
 0xff7   :  { %2791 = vmax.xlane.f32.xlu1 %v2790_v29  ;;  %10428 = vmatmul.mubr.msk.f32.vlgmr.msra.gmra.mrb[16].mxu0 %vm282_vm1, %v10424_v27  ;;  %v3045_v27 = vld [vmem:[%s14097_s18 + $0x88] sm:$0xff]  ;;  %v3047_v29 = vld [vmem:[%s14097_s18 + $0x98] sm:$0xff] }
 0xffb   :  { %2794 = vmax.xlane.f32.xlu1 %v2793_v30  ;;  %v3028_v30 = vld [vmem:[%s14097_s18] sm:$0xff] }
0x104e   :  { %v2524_v31 = vpop.xlane.xlu1 %2523 }
0x104f   :  { %11825 = vrcp.f32 %v2524_v31  ;;  %v2521_v32 = vpop.xlane.xlu0 %2520  ;;  %v3044_v31 = vld [vmem:[%s14097_s18 + $0x80] sm:$0xff] }
0x1050   :  { %11827 = vrcp.f32 %v2521_v32  ;;  %v10776_v32 = vpack.c.bf16 %v3047_v29, %v3031_v23  ;;  %v3039_v29 = vld [vmem:[%s14097_s18 + $0x58] sm:$0xff] }
0x1053   :  { %v11686_v12 = vpop.permute.xlu0 %11685 }
0x1054   :  { %v11688_v51 = vunpack.i.h.bf16 %v11686_v12  ;;  %v11687_v14 = vunpack.i.l.bf16 %v11686_v12  ;;  %v10770_v12 = vpack.c.bf16 %v3044_v31, %v3028_v30 }
0x1056   :  { %v10754_v33 = vpack.c.bf16 %v11688_v51, %v11687_v14  ;;  %v3030_v51 = vld [vmem:[%s14097_s18 + $0x10] sm:$0xff] }
0x1057   :  { %v3046_v14 = vld [vmem:[%s14097_s18 + $0x90] sm:$0xff] }
0x1058   :  { %10755 = vmatprep.subr.bf16.mxu0 %v10754_v33 }
0x1059   :  { %v11826_v17 = vpop.eup %11825  ;;  %10757 = vmatpush3.bf16.msra.mxu0 %v10754_v33  ;;  %v10778_v33 = vpack.c.bf16 %v3046_v14, %v3030_v51  ;;  %v3052_v51 = vld [vmem:[%s14097_s18 + $0xc0] sm:$0xff]  ;;  %v3038_v14 = vld [vmem:[%s14097_s18 + $0x50] sm:$0xff] }
0x105a   :  { %v11828_v34 = vpop.eup %11827  ;;  %v2528_v36 = vmul.f32 %v11826_v17, %v11822_v18  ;;  %10444 = vmatprep.subr.mxu0 %v1844_v53  ;;  %v3061_v17 = vld [vmem:[%s14097_s18 + $0x108] sm:$0xff] }
0x105b   :  { %v2527_v35 = vmul.f32 %v11828_v34, %v11824_v19  ;;  %v3077_v34 = vld [vmem:[%s14097_s18 + $0x188] sm:$0xff] }
0x105d   :  { %10441 = vmatprep.mubr.msk.f32.mxu0 %vm569_vm3, %v2527_v35  ;;  %v3063_v35 = vld [vmem:[%s14097_s18 + $0x118] sm:$0xff] }
0x105e   :  { %10442 = vmatmul.mubr.msk.f32.vlgmr.msra.gmra.mrb[20].mxu0 %vm569_vm3, %v2528_v36  ;;  %v10772_v36 = vpack.c.bf16 %v3077_v34, %v3061_v17 }
0x105f   :  { %10445 = vmatpush3.msra.mxu0 %v1844_v53  ;;  %v3035_v53 = vld [vmem:[%s14097_s18 + $0x38] sm:$0xff] }
0x1084   :  { %v2792_v37 = vpop.xlane.xlu1 %2791 }
0x1085   :  { %v2796_v39 = vsub.f32 %v2782_v26, %v2792_v37  ;;  %v3029_v26 = vld [vmem:[%s14097_s18 + $0x8] sm:$0xff]  ;;  %v3079_v37 = vld [vmem:[%s14097_s18 + $0x198] sm:$0xff] }
0x1087   :  { %v2798_v15 = vmul.f32 1.442695, %v2796_v39  ;;  %v3060_v39 = vld [vmem:[%s14097_s18 + $0x100] sm:$0xff] }
0x1088   :  { %v2795_v40 = vpop.xlane.xlu1 %2794 }
0x1089   :  { %v2797_v41 = vsub.f32 %v2787_v28, %v2795_v40  ;;  %v10768_v28 = vpack.c.bf16 %v3045_v27, %v3029_v26  ;;  %v3076_v40 = vld [vmem:[%s14097_s18 + $0x180] sm:$0xff]  ;;  %v3037_v27 = vld [vmem:[%s14097_s18 + $0x48] sm:$0xff] }
0x108b   :  { %v2800_v43 = vmul.f32 1.442695, %v2797_v41  ;;  %10769 = vmatprep.subr.bf16.mxu1 %v10768_v28  ;;  %v10780_v41 = vpack.c.bf16 %v3079_v37, %v3063_v35  ;;  %v3053_v28 = vld [vmem:[%s14097_s18 + $0xc8] sm:$0xff]  ;;  %v3071_v37 = vld [vmem:[%s14097_s18 + $0x158] sm:$0xff] }
0x108c   :  { %10771 = vmatpush1.bf16.msra.mxu1 %v10770_v12  ;;  %v10800_v17 = vpack.c.bf16 %v3053_v28, %v3037_v27  ;;  %v3069_v35 = vld [vmem:[%s14097_s18 + $0x148] sm:$0xff] }
0x108d   :  { %11829 = vpow2.f32 %v2800_v43  ;;  %v3062_v43 = vld [vmem:[%s14097_s18 + $0x110] sm:$0xff]  ;;  %10773 = vmatprep.subr.bf16.mxu1 %v10772_v36  ;;  %v3085_v36 = vld [vmem:[%s14097_s18 + $0x1c8] sm:$0xff] }
0x108e   :  { %11831 = vpow2.f32 %v2798_v15  ;;  %v10774_v15 = vpack.c.bf16 %v3076_v40, %v3060_v39  ;;  %v3087_v39 = vld [vmem:[%s14097_s18 + $0x1d8] sm:$0xff]  ;;  %v3863_v28 = vld [vmem:[%s14100_s26 + $0x108] sm:$0xff] }
0x1090   :  { %10775 = vmatpush1.bf16.msra.mxu1 %v10774_v15  ;;  %v3068_v15 = vld [vmem:[%s14097_s18 + $0x140] sm:$0xff] }
0x1097   :  { %v11830_v44 = vpop.eup %11829 }
0x1098   :  { %v2805_v45 = vsel %vm569_vm3, %v11830_v44, 0.0  ;;  %v11832_v48 = vpop.eup %11831 }
0x1099   :  { %2806 = vadd.xlane.f32.xlu1 %v2805_v45  ;;  %v2802_v49 = vsel %vm569_vm3, %v11832_v48, 0.0 }
0x109d   :  { %2803 = vadd.xlane.f32.xlu1 %v2802_v49  ;;  %v3049_v49 = vld [vmem:[%s14097_s18 + $0xa8] sm:$0xff] }
0x10ae   :  { %11690 = vrot.lane.b32.xlu1 %v12577_v10, %s12127_s2 }
0x1126   :  { %v2807_v54 = vpop.xlane.xlu1 %2806 }
0x1127   :  { %11833 = vrcp.f32 %v2807_v54 }
0x112a   :  { %v2804_v55 = vpop.xlane.xlu1 %2803 }
0x112b   :  { %11835 = vrcp.f32 %v2804_v55  ;;  %v3051_v55 = vld [vmem:[%s14097_s18 + $0xb8] sm:$0xff] }
0x112e   :  { %v11691_v56 = vpop.permute.xlu1 %11690 }
0x112f   :  { %v11693_v57 = vunpack.i.h.bf16 %v11691_v56  ;;  %v11692_v58 = vunpack.i.l.bf16 %v11691_v56  ;;  %v14048_v56 = vmov 0.0  }
0x1130   :  { %3246 = vmatprep.mubr.f32.mxu1 %v14048_v56 }
0x1131   :  { %v10764_v16 = vpack.c.bf16 %v11693_v57, %v11692_v58  ;;  %v10443_v59 = vpop.f32.mrb[20].mxu0  ;;  %v11834_v10 = vpop.eup %11833  ;;  %v10792_v57 = vpack.c.bf16 %v3051_v55, %v3035_v53  ;;  %v3041_v53 = vld [vmem:[%s14097_s18 + $0x68] sm:$0xff]  ;;  %v3043_v55 = vld [vmem:[%s14097_s18 + $0x78] sm:$0xff] }
0x1132   :  { %v2607_v46 = vpop.f32.mrb[21].mxu0  ;;  %v2811_v62 = vmul.f32 %v11834_v10, %v11830_v44  ;;  %v3078_v44 = vld [vmem:[%s14097_s18 + $0x190] sm:$0xff] }
0x1133   :  { %10446 = vmatprep.mubr.msk.f32.mxu0 %vm282_vm1, %v2607_v46  ;;  %10765 = vmatprep.subr.bf16.mxu0 %v10764_v16  ;;  %v10782_v45 = vpack.c.bf16 %v3078_v44, %v3062_v43  ;;  %v3084_v43 = vld [vmem:[%s14097_s18 + $0x1c0] sm:$0xff]  ;;  %v3070_v44 = vld [vmem:[%s14097_s18 + $0x150] sm:$0xff] }
0x1134   :  { %10447 = vmatmul.mubr.msk.f32.vlgmr.msra.gmra.mrb[16].mxu0 %vm282_vm1, %v10443_v59 }
0x1135   :  { %v11836_v60 = vpop.eup %11835  ;;  %10767 = vmatpush3.bf16.msra.mxu0 %v10764_v16 }
0x1136   :  { %v2810_v61 = vmul.f32 %v11836_v60, %v11832_v48  ;;  %10463 = vmatprep.subr.mxu0 %v1845_v47  ;;  %v3033_v48 = vld [vmem:[%s14097_s18 + $0x28] sm:$0xff] }
0x1137   :  { %v10784_v54 = vpack.c.bf16 %v3049_v49, %v3033_v48  ;;  %v10804_v48 = vpack.c.bf16 %v3085_v36, %v3069_v35  ;;  %v10812_v49 = vpack.c.bf16 %v3087_v39, %v3071_v37  ;;  %v3864_v35 = vld [vmem:[%s14100_s26 + $0x110] sm:$0xff]  ;;  %v3865_v36 = vld [vmem:[%s14100_s26 + $0x118] sm:$0xff]  ;;  %v3850_v37 = vld [vmem:[%s14100_s26 + $0xa0] sm:$0xff] }
0x1138   :  { %10460 = vmatprep.mubr.msk.f32.mxu0 %vm569_vm3, %v2810_v61  ;;  %v9327_v61 = vld [vmem:[%s14098_s22] ss:$0 sm:$0xff]  ;;  %v3851_v39 = vld [vmem:[%s14100_s26 + $0xa8] sm:$0xff] }
0x1139   :  { %10461 = vmatmul.mubr.msk.f32.vlgmr.msra.gmra.mrb[22].mxu0 %vm569_vm3, %v2811_v62  ;;  %10785 = vmatprep.subr.bf16.mxu1 %v10784_v54  ;;  %v3032_v62 = vld [vmem:[%s14097_s18 + $0x20] sm:$0xff]  ;;  %v3057_v54 = vld [vmem:[%s14097_s18 + $0xe8] sm:$0xff] }
0x113a   :  { %10464 = vmatpush3.msra.mxu0 %v1845_v47 }
0x113b   :  { %10777 = vmatprep.subr.bf16.mxu0 %v10776_v32  ;;  %v3036_v32 = vld [vmem:[%s14097_s18 + $0x40] sm:$0xff] }
0x113c   :  { %v10802_v40 = vpack.c.bf16 %v3052_v51, %v3036_v32 }
0x120c   :  { %v10462_v63 = vpop.f32.mrb[22].mxu0 }
0x120d   :  { %v2890_v0 = vpop.f32.mrb[23].mxu0 }
0x120e   :  { %10465 = vmatprep.mubr.msk.f32.mxu0 %vm282_vm1, %v2890_v0  ;;  %v3048_v0 = vld [vmem:[%s14097_s18 + $0xa0] sm:$0xff] }
0x120f   :  { %10466 = vmatmul.mubr.msk.f32.vlgmr.msra.gmra.mrb[16].mxu0 %vm282_vm1, %v10462_v63 }
0x1210   :  { %10779 = vmatpush1.bf16.msra.mxu0 %v10778_v33  ;;  %3323 = vmatprep.mubr.f32.mxu0 %v14048_v56  ;;  %v3054_v33 = vld [vmem:[%s14097_s18 + $0xd0] sm:$0xff] }
0x1211   :  { %10781 = vmatprep.subr.bf16.mxu0 %v10780_v41  ;;  %v10810_v41 = vpack.c.bf16 %v3054_v33, %v3038_v14  ;;  %v3832_v14 = vld [vmem:[%s14100_s26 + $0x10] sm:$0xff]  ;;  %v3833_v33 = vld [vmem:[%s14100_s26 + $0x18] sm:$0xff] }
0x1214   :  { %10783 = vmatpush1.bf16.msra.mxu0 %v10782_v45  ;;  %v3086_v45 = vld [vmem:[%s14097_s18 + $0x1d0] sm:$0xff] }
0x1215   :  { %10793 = vmatprep.subr.bf16.mxu0 %v10792_v57  ;;  %v3059_v57 = vld [vmem:[%s14097_s18 + $0xf8] sm:$0xff] }
0x12e2   :  { %v10467_v2 = vpop.f32.mrb[16].mxu0 }
0x12e3   :  { %v11522_v3 = vadd.f32 %v10467_v2, %v9294_v1  ;;  %v2971_v4 = vpop.f32.mrb[17].mxu0  ;;  %v3050_v2 = vld [vmem:[%s14097_s18 + $0xb0] sm:$0xff] }
0x12e4   :  { %v11523_v6 = vadd.f32 %v9294_v1, %v2971_v4  ;;  %v3034_v1 = vld [vmem:[%s14097_s18 + $0x30] sm:$0xff]  ;;  %v3065_v4 = vld [vmem:[%s14097_s18 + $0x128] sm:$0xff] }
0x12e5   :  { %v2983_v7 = vadd.f32 %v11522_v3, %v12591_v42  ;;  %v9328_v3 = vld [vmem:[%s14099_s23] ss:$0 sm:$0xff] }
0x12e6   :  { %v2982_v8 = vadd.f32 %v11523_v6, %v12587_v38 }
0x12e7   :  { %v2989_v9 = vsel %vm390_vm0, %v2983_v7, 0.0 }
0x12e8   :  { %2990 = vadd.xlane.f32.xlu1 %v2989_v9  ;;  %v2986_v11 = vsel %vm390_vm0, %v2982_v8, 0.0  ;;  %v3083_v9 = vld [vmem:[%s14097_s18 + $0x1b8] sm:$0xff] }
0x12e9   :  { %2987 = vadd.xlane.f32.xlu0 %v2986_v11 }
0x1375   :  { %v2991_v13 = vpop.xlane.xlu1 %2990 }
0x1376   :  { %v2993_v5 = vmul.f32 0.03125, %v2991_v13  ;;  %v2988_v18 = vpop.xlane.xlu0 %2987  ;;  %v10786_v13 = vpack.c.bf16 %v3048_v0, %v3032_v62  ;;  %v3073_v62 = vld [vmem:[%s14097_s18 + $0x168] sm:$0xff]  ;;  %v3075_v0 = vld [vmem:[%s14097_s18 + $0x178] sm:$0xff] }
0x1377   :  { %v2992_v19 = vmul.f32 0.03125, %v2988_v18  ;;  %v3064_v18 = vld [vmem:[%s14097_s18 + $0x120] sm:$0xff] }
0x1378   :  { %v12707_v20 = vsub.f32 %v2983_v7, %v2993_v5  ;;  %v3081_v7 = vld [vmem:[%s14097_s18 + $0x1a8] sm:$0xff]  ;;  %v10794_v5 = vpack.c.bf16 %v3050_v2, %v3034_v1  ;;  %v3091_v1 = vld [vmem:[%s14097_s18 + $0x1f8] sm:$0xff] }
0x1379   :  { %v2994_v42 = vsub.f32 %v2982_v8, %v2992_v19  ;;  %v3067_v8 = vld [vmem:[%s14097_s18 + $0x138] sm:$0xff] }
0x137a   :  { %v2997_v22 = vmul.f32 %v12707_v20, %v12707_v20  ;;  %v10796_v26 = vpack.c.bf16 %v3083_v9, %v3067_v8  ;;  %v3090_v8 = vld [vmem:[%s14097_s18 + $0x1f0] sm:$0xff] }
0x137b   :  { %v2996_v38 = vmul.f32 %v2994_v42, %v2994_v42 }
0x137c   :  { %v3001_v25 = vsel %vm390_vm0, %v2997_v22, 0.0  ;;  %v3082_v22 = vld [vmem:[%s14097_s18 + $0x1b0] sm:$0xff] }
0x137d   :  { %v2998_v24 = vsel %vm390_vm0, %v2996_v38, 0.0  ;;  %v3080_v38 = vld [vmem:[%s14097_s18 + $0x1a0] sm:$0xff] }
0x137e   :  { %2999 = vadd.xlane.f32.xlu0 %v2998_v24  ;;  %v3066_v24 = vld [vmem:[%s14097_s18 + $0x130] sm:$0xff]  ;;  %v10790_v30 = vpack.c.bf16 %v3080_v38, %v3064_v18  ;;  %v3878_v18 = vld [vmem:[%s14100_s26 + $0x180] sm:$0xff] }
0x137f   :  { %v10798_v31 = vpack.c.bf16 %v3082_v22, %v3066_v24  ;;  %v3830_v22 = vld [vmem:[%s14100_s26] sm:$0xff] }
0x1382   :  { %3002 = vadd.xlane.f32.xlu0 %v3001_v25  ;;  %v10788_v25 = vpack.c.bf16 %v3081_v7, %v3065_v4  ;;  %v3072_v4 = vld [vmem:[%s14097_s18 + $0x160] sm:$0xff]  ;;  %v3074_v7 = vld [vmem:[%s14097_s18 + $0x170] sm:$0xff] }
0x1383   :  { %v10830_v24 = vpack.c.bf16 %v3090_v8, %v3074_v7  ;;  %v3838_v7 = vld [vmem:[%s14100_s26 + $0x40] sm:$0xff]  ;;  %v3839_v8 = vld [vmem:[%s14100_s26 + $0x48] sm:$0xff] }
0x140b   :  { %v3000_v58 = vpop.xlane.xlu0 %2999 }
0x140c   :  { %v3004_v16 = vmul.f32 0.03125, %v3000_v58  ;;  %v10806_v58 = vpack.c.bf16 %v3084_v43, %v3068_v15  ;;  %v10838_v15 = vpack.c.bf16 %v3833_v33, %v3832_v14  ;;  %v10870_v43 = vpack.c.bf16 %v3865_v36, %v3864_v35  ;;  %v3843_v36 = vld [vmem:[%s14100_s26 + $0x68] sm:$0xff] }
0x140e   :  { %v3006_v59 = vadd.f32 1e-05, %v3004_v16  ;;  %v10814_v16 = vpack.c.bf16 %v3086_v45, %v3070_v44  ;;  %v3834_v44 = vld [vmem:[%s14100_s26 + $0x20] sm:$0xff]  ;;  %v3835_v45 = vld [vmem:[%s14100_s26 + $0x28] sm:$0xff] }
0x140f   :  { %v3003_v46 = vpop.xlane.xlu0 %3002 }
0x1410   :  { %11837 = vrsqrt.f32 %v3006_v59  ;;  %v3005_v47 = vmul.f32 0.03125, %v3003_v46  ;;  %v3040_v59 = vld [vmem:[%s14097_s18 + $0x60] sm:$0xff] }
0x1411   :  { %v3056_v46 = vld [vmem:[%s14097_s18 + $0xe0] sm:$0xff] }
0x1412   :  { %v3007_v10 = vadd.f32 1e-05, %v3005_v47  ;;  %v3042_v47 = vld [vmem:[%s14097_s18 + $0x70] sm:$0xff]  ;;  %v10818_v2 = vpack.c.bf16 %v3056_v46, %v3040_v59  ;;  %v10842_v59 = vpack.c.bf16 %v3835_v45, %v3834_v44 }
0x1413   :  { %v3892_v44 = vld [vmem:[%s14100_s26 + $0x1f0] sm:$0xff] }
0x1414   :  { %11839 = vrsqrt.f32 %v3007_v10  ;;  %v3058_v10 = vld [vmem:[%s14097_s18 + $0xf0] sm:$0xff] }
0x141a   :  { %v11838_v60 = vpop.eup %11837 }
0x141b   :  { %v3010_v63 = vmul.f32 %v11838_v60, %v2994_v42  ;;  %v10816_v60 = vpack.c.bf16 %v3057_v54, %v3041_v53  ;;  %v3866_v53 = vld [vmem:[%s14100_s26 + $0x120] sm:$0xff]  ;;  %v3867_v54 = vld [vmem:[%s14100_s26 + $0x128] sm:$0xff] }
0x141c   :  { %v10874_v46 = vpack.c.bf16 %v3867_v54, %v3866_v53  ;;  %v3845_v53 = vld [vmem:[%s14100_s26 + $0x78] sm:$0xff] }
0x141d   :  { %v3018_v6 = vmul.f32 %v9327_v61, %v3010_v63  ;;  %v3089_v63 = vld [vmem:[%s14097_s18 + $0x1e8] sm:$0xff] }
0x141e   :  { %v11840_v11 = vpop.eup %11839  ;;  %v10820_v9 = vpack.c.bf16 %v3089_v63, %v3073_v62  ;;  %v3868_v62 = vld [vmem:[%s14100_s26 + $0x130] sm:$0xff]  ;;  %v3869_v63 = vld [vmem:[%s14100_s26 + $0x138] sm:$0xff] }
0x141f   :  { %v12746_v19 = vadd.f32 %v9328_v3, %v3018_v6  ;;  %v3011_v42 = vmul.f32 %v11840_v11, %v12707_v20  ;;  %v3055_v20 = vld [vmem:[%s14097_s18 + $0xd8] sm:$0xff]  ;;  %v3088_v6 = vld [vmem:[%s14097_s18 + $0x1e0] sm:$0xff]  ;;  %v10828_v11 = vpack.c.bf16 %v3091_v1, %v3075_v0  ;;  %v3855_v1 = vld [vmem:[%s14100_s26 + $0xc8] sm:$0xff] }
0x1420   :  { %v10808_v34 = vpack.c.bf16 %v3055_v20, %v3039_v29  ;;  %v10822_v38 = vpack.c.bf16 %v3088_v6, %v3072_v4  ;;  %v3848_v29 = vld [vmem:[%s14100_s26 + $0x90] sm:$0xff]  ;;  %v3849_v20 = vld [vmem:[%s14100_s26 + $0x98] sm:$0xff]  ;;  %v3854_v0 = vld [vmem:[%s14100_s26 + $0xc0] sm:$0xff]  ;;  %v10878_v6 = vpack.c.bf16 %v3869_v63, %v3868_v62  ;;  %v3096_v62 = vlaneseq }
0x1421   :  { %v3019_v23 = vmul.f32 %v9327_v61, %v3011_v42  ;;  %9329 = vmatmul.mubr.msk.f32.vlgmr.msra.gmra.mrb[20].mxu1 %vm390_vm0, %v12746_v19  ;;  %9331 = vmatmul.mubr.msk.f32.vlgmr.msra.gmra.mrb[24].mxu0 %vm390_vm0, %v12746_v19  ;;  %v10824_v61 = vpack.c.bf16 %v3059_v57, %v3043_v55  ;;  %v3879_v42 = vld [vmem:[%s14100_s26 + $0x188] sm:$0xff]  ;;  %v3852_v55 = vld [vmem:[%s14100_s26 + $0xb0] sm:$0xff]  ;;  %v3853_v57 = vld [vmem:[%s14100_s26 + $0xb8] sm:$0xff] }
0x1422   :  { %10787 = vmatpush1.bf16.msra.mxu1 %v10786_v13  ;;  %10795 = vmatpush1.bf16.msra.mxu0 %v10794_v5  ;;  %v3846_v13 = vld [vmem:[%s14100_s26 + $0x80] sm:$0xff]  ;;  %v3847_v5 = vld [vmem:[%s14100_s26 + $0x88] sm:$0xff]  ;;  %v10864_v27 = vpack.c.bf16 %v3879_v42, %v3878_v18  ;;  %v3856_v18 = vld [vmem:[%s14100_s26 + $0xd0] sm:$0xff]  ;;  %v12900_v63 = vshrl.u32 %v3096_v62, 7 }
0x1423   :  { %v12761_v12 = vadd.f32 %v9328_v3, %v3019_v23  ;;  %3252 = vmatprep.mubr.f32.mxu1 %v14048_v56  ;;  %3329 = vmatprep.mubr.f32.mxu0 %v14048_v56  ;;  %v10826_v3 = vpack.c.bf16 %v3058_v10, %v3042_v47  ;;  %v3862_v23 = vld [vmem:[%s14100_s26 + $0x100] sm:$0xff]  ;;  %v3836_v47 = vld [vmem:[%s14100_s26 + $0x30] sm:$0xff]  ;;  %v3837_v10 = vld [vmem:[%s14100_s26 + $0x38] sm:$0xff] }
0x1424   :  { %10789 = vmatprep.subr.bf16.mxu1 %v10788_v25  ;;  %10797 = vmatprep.subr.bf16.mxu0 %v10796_v26  ;;  %v3831_v25 = vld [vmem:[%s14100_s26 + $0x8] sm:$0xff]  ;;  %v10832_v26 = vpack.c.bf16 %v3847_v5, %v3846_v13  ;;  %v10866_v51 = vpack.c.bf16 %v3863_v28, %v3862_v23  ;;  %v10846_v4 = vpack.c.bf16 %v3837_v10, %v3836_v47  ;;  %v3870_v13 = vld [vmem:[%s14100_s26 + $0x140] sm:$0xff]  ;;  %v3857_v42 = vld [vmem:[%s14100_s26 + $0xd8] sm:$0xff] }
0x1425   :  { %9330 = vmatmul.mubr.msk.f32.gmra.mrb[22].mxu1 %vm390_vm0, %v12761_v12  ;;  %9332 = vmatmul.mubr.msk.f32.gmra.mrb[26].mxu0 %vm390_vm0, %v12761_v12  ;;  %v10834_v32 = vpack.c.bf16 %v3831_v25, %v3830_v22  ;;  %v3871_v5 = vld [vmem:[%s14100_s26 + $0x148] sm:$0xff]  ;;  %v10850_v22 = vpack.c.bf16 %v3839_v8, %v3838_v7  ;;  %v10852_v23 = vpack.c.bf16 %v3857_v42, %v3856_v18  ;;  %v3942_v47 = vld [vmem:[%s14100_s26 + $0x380] sm:$0xff] }
0x1426   :  { %10791 = vmatpush1.bf16.msra.mxu1 %v10790_v30  ;;  %10799 = vmatpush1.bf16.msra.mxu0 %v10798_v31  ;;  %v3880_v30 = vld [vmem:[%s14100_s26 + $0x190] sm:$0xff]  ;;  %v3881_v31 = vld [vmem:[%s14100_s26 + $0x198] sm:$0xff]  ;;  %v10882_v25 = vpack.c.bf16 %v3871_v5, %v3870_v13  ;;  %v3895_v13 = vld [vmem:[%s14100_s26 + $0x208] sm:$0xff]  ;;  %v12928_v5 = vsub.s32 5, %v12900_v63 }
0x1427   :  { %3400 = vmatprep.mubr.f32.mxu1 %v14048_v56  ;;  %3477 = vmatprep.mubr.f32.mxu0 %v14048_v56 }
0x1428   :  { %10801 = vmatprep.subr.bf16.mxu1 %v10800_v17  ;;  %10809 = vmatprep.subr.bf16.mxu0 %v10808_v34  ;;  %v10836_v17 = vpack.c.bf16 %v3849_v20, %v3848_v29  ;;  %v10868_v34 = vpack.c.bf16 %v3881_v31, %v3880_v30  ;;  %v3872_v29 = vld [vmem:[%s14100_s26 + $0x150] sm:$0xff]  ;;  %v3873_v20 = vld [vmem:[%s14100_s26 + $0x158] sm:$0xff]  ;;  %v3858_v30 = vld [vmem:[%s14100_s26 + $0xe0] sm:$0xff] }
0x1429   :  { %9333 = vmatmul.mubr.msk.f32.vlgmr.msra.gmra.mrb[24].mxu1 %vm390_vm0, %v12746_v19  ;;  %9335 = vmatmul.mubr.msk.f32.vlgmr.msra.gmra.mrb[28].mxu0 %vm390_vm0, %v12746_v19  ;;  %v3859_v31 = vld [vmem:[%s14100_s26 + $0xe8] sm:$0xff]  ;;  %v10886_v33 = vpack.c.bf16 %v3873_v20, %v3872_v29  ;;  %v3944_v29 = vld [vmem:[%s14100_s26 + $0x390] sm:$0xff]  ;;  %v3945_v20 = vld [vmem:[%s14100_s26 + $0x398] sm:$0xff] }
0x142a   :  { %10803 = vmatpush1.bf16.msra.mxu1 %v10802_v40  ;;  %10811 = vmatpush1.bf16.msra.mxu0 %v10810_v41  ;;  %v3882_v40 = vld [vmem:[%s14100_s26 + $0x1a0] sm:$0xff]  ;;  %v3883_v41 = vld [vmem:[%s14100_s26 + $0x1a8] sm:$0xff] }
0x142b   :  { %3406 = vmatprep.mubr.f32.mxu1 %v14048_v56  ;;  %3483 = vmatprep.mubr.f32.mxu0 %v14048_v56 }
0x142c   :  { %10805 = vmatprep.subr.bf16.mxu1 %v10804_v48  ;;  %10813 = vmatprep.subr.bf16.mxu0 %v10812_v49  ;;  %v10840_v48 = vpack.c.bf16 %v3851_v39, %v3850_v37  ;;  %v10872_v49 = vpack.c.bf16 %v3883_v41, %v3882_v40  ;;  %v3874_v37 = vld [vmem:[%s14100_s26 + $0x160] sm:$0xff]  ;;  %v3875_v39 = vld [vmem:[%s14100_s26 + $0x168] sm:$0xff] }
0x142d   :  { %9334 = vmatmul.mubr.msk.f32.gmra.mrb[26].mxu1 %vm390_vm0, %v12761_v12  ;;  %9336 = vmatmul.mubr.msk.f32.gmra.mrb[30].mxu0 %vm390_vm0, %v12761_v12  ;;  %v10890_v41 = vpack.c.bf16 %v3875_v39, %v3874_v37 }
0x142e   :  { %10807 = vmatpush1.bf16.msra.mxu1 %v10806_v58  ;;  %10815 = vmatpush1.bf16.msra.mxu0 %v10814_v16  ;;  %v3884_v58 = vld [vmem:[%s14100_s26 + $0x1b0] sm:$0xff]  ;;  %v3885_v16 = vld [vmem:[%s14100_s26 + $0x1b8] sm:$0xff] }
0x142f   :  { %3554 = vmatprep.mubr.f32.mxu1 %v14048_v56  ;;  %3631 = vmatprep.mubr.f32.mxu0 %v14048_v56 }
0x1430   :  { %10817 = vmatprep.subr.bf16.mxu1 %v10816_v60  ;;  %10825 = vmatprep.subr.bf16.mxu0 %v10824_v61  ;;  %v10844_v60 = vpack.c.bf16 %v3853_v57, %v3852_v55  ;;  %v10876_v61 = vpack.c.bf16 %v3885_v16, %v3884_v58  ;;  %v3876_v57 = vld [vmem:[%s14100_s26 + $0x170] sm:$0xff]  ;;  %v3877_v58 = vld [vmem:[%s14100_s26 + $0x178] sm:$0xff] }
0x1431   :  { %9337 = vmatmul.mubr.msk.f32.vlgmr.msra.gmra.mrb[28].mxu1 %vm390_vm0, %v12746_v19  ;;  %9339 = vmatmul.mubr.msk.f32.vlgmr.msra.gmra.mrb[32].mxu0 %vm390_vm0, %v12746_v19  ;;  %v10894_v16 = vpack.c.bf16 %v3877_v58, %v3876_v57 }
0x1432   :  { %10819 = vmatpush1.bf16.msra.mxu1 %v10818_v2  ;;  %10827 = vmatpush1.bf16.msra.mxu0 %v10826_v3  ;;  %v3886_v2 = vld [vmem:[%s14100_s26 + $0x1c0] sm:$0xff]  ;;  %v3887_v3 = vld [vmem:[%s14100_s26 + $0x1c8] sm:$0xff] }
0x1433   :  { %3560 = vmatprep.mubr.f32.mxu1 %v14048_v56  ;;  %3637 = vmatprep.mubr.f32.mxu0 %v14048_v56 }
0x1434   :  { %10821 = vmatprep.subr.bf16.mxu1 %v10820_v9  ;;  %10829 = vmatprep.subr.bf16.mxu0 %v10828_v11  ;;  %v10848_v9 = vpack.c.bf16 %v3855_v1, %v3854_v0  ;;  %v10880_v11 = vpack.c.bf16 %v3887_v3, %v3886_v2  ;;  %v12903_v0 = vsub.s32 0, %v12900_v63  ;;  %v12906_v1 = vsub.s32 2, %v12900_v63  ;;  %v12909_v2 = vld [vmem:[%s14101_s28] sm:$0xff] }
0x1435   :  { %9338 = vmatmul.mubr.msk.f32.gmra.mrb[30].mxu1 %vm390_vm0, %v12761_v12  ;;  %9340 = vmatmul.mubr.msk.f32.gmra.mrb[34].mxu0 %vm390_vm0, %v12761_v12  ;;  %v12912_v3 = vsub.s32 1, %v12900_v63 }
0x1436   :  { %10823 = vmatpush1.bf16.msra.mxu1 %v10822_v38  ;;  %10831 = vmatpush1.bf16.msra.mxu0 %v10830_v24  ;;  %v3888_v38 = vld [vmem:[%s14100_s26 + $0x1d0] sm:$0xff]  ;;  %v3889_v24 = vld [vmem:[%s14100_s26 + $0x1d8] sm:$0xff]  ;;  %v3107_v7 = vrot.slane %v12909_v2, %v12906_v1 }
0x1437   :  { %3708 = vmatprep.mubr.f32.mxu1 %v14048_v56  ;;  %3785 = vmatprep.mubr.f32.mxu0 %v14048_v56  ;;  %v10884_v28 = vpack.c.bf16 %v3889_v24, %v3888_v38  ;;  %v3103_v8 = vrot.slane %v12909_v2, %v12912_v3  ;;  %v3926_v38 = vld [vmem:[%s14100_s26 + $0x300] sm:$0xff]  ;;  %v3927_v24 = vld [vmem:[%s14100_s26 + $0x308] sm:$0xff] }
0x1438   :  { %10833 = vmatprep.subr.bf16.mxu1 %v10832_v26  ;;  %10865 = vmatprep.subr.bf16.mxu0 %v10864_v27  ;;  %v3840_v26 = vld [vmem:[%s14100_s26 + $0x50] sm:$0xff]  ;;  %v3841_v27 = vld [vmem:[%s14100_s26 + $0x58] sm:$0xff] }
0x1439   :  { %9341 = vmatmul.mubr.msk.f32.vlgmr.msra.gmra.mrb[32].mxu1 %vm390_vm0, %v12746_v19  ;;  %9343 = vmatmul.mubr.msk.f32.vlgmr.msra.gmra.mrb[36].mxu0 %vm390_vm0, %v12746_v19  ;;  %v10854_v14 = vpack.c.bf16 %v3841_v27, %v3840_v26 }
0x143a   :  { %3714 = vmatprep.mubr.f32.mxu1 %v14048_v56  ;;  %3791 = vmatprep.mubr.f32.mxu0 %v14048_v56  ;;  %v3977_v56 = vld [vmem:[%s14100_s26 + $0x498] sm:$0xff] }
0x143b   :  { %10835 = vmatpush3.bf16.msra.mxu1 %v10834_v32  ;;  %10867 = vmatpush3.bf16.msra.mxu0 %v10866_v51  ;;  %v3890_v32 = vld [vmem:[%s14100_s26 + $0x1e0] sm:$0xff]  ;;  %v3891_v51 = vld [vmem:[%s14100_s26 + $0x1e8] sm:$0xff] }
0x143c   :  { %10837 = vmatprep.subr.bf16.mxu1 %v10836_v17  ;;  %10869 = vmatprep.subr.bf16.mxu0 %v10868_v34  ;;  %v3842_v17 = vld [vmem:[%s14100_s26 + $0x60] sm:$0xff]  ;;  %v10856_v34 = vpack.c.bf16 %v3859_v31, %v3858_v30  ;;  %v10888_v35 = vpack.c.bf16 %v3891_v51, %v3890_v32  ;;  %v12937_v32 = vsub.s32 7, %v12900_v63 }
0x143d   :  { %9342 = vmatmul.mubr.msk.f32.gmra.mrb[34].mxu1 %vm390_vm0, %v12761_v12  ;;  %9344 = vmatmul.mubr.msk.f32.gmra.mrb[38].mxu0 %vm390_vm0, %v12761_v12  ;;  %v10858_v40 = vpack.c.bf16 %v3843_v36, %v3842_v17  ;;  %v3896_v17 = vld [vmem:[%s14100_s26 + $0x210] sm:$0xff] }
0x143f   :  { %10839 = vmatpush3.bf16.msra.mxu1 %v10838_v15  ;;  %10871 = vmatpush3.bf16.msra.mxu0 %v10870_v43  ;;  %v3860_v15 = vld [vmem:[%s14100_s26 + $0xf0] sm:$0xff]  ;;  %v3861_v43 = vld [vmem:[%s14100_s26 + $0xf8] sm:$0xff] }
0x1440   :  { %10841 = vmatprep.subr.bf16.mxu1 %v10840_v48  ;;  %10873 = vmatprep.subr.bf16.mxu0 %v10872_v49  ;;  %v10860_v45 = vpack.c.bf16 %v3861_v43, %v3860_v15  ;;  %v3893_v48 = vld [vmem:[%s14100_s26 + $0x1f8] sm:$0xff]  ;;  %v3844_v49 = vld [vmem:[%s14100_s26 + $0x70] sm:$0xff] }
0x1441   :  { %v10892_v54 = vpack.c.bf16 %v3893_v48, %v3892_v44  ;;  %v10862_v55 = vpack.c.bf16 %v3845_v53, %v3844_v49  ;;  %v3928_v15 = vld [vmem:[%s14100_s26 + $0x310] sm:$0xff] }
0x1443   :  { %10843 = vmatpush3.bf16.msra.mxu1 %v10842_v59  ;;  %10875 = vmatpush3.bf16.msra.mxu0 %v10874_v46  ;;  %v3910_v59 = vld [vmem:[%s14100_s26 + $0x280] sm:$0xff]  ;;  %v3911_v46 = vld [vmem:[%s14100_s26 + $0x288] sm:$0xff] }
0x1444   :  { %10845 = vmatprep.subr.bf16.mxu1 %v10844_v60  ;;  %10877 = vmatprep.subr.bf16.mxu0 %v10876_v61  ;;  %v10896_v10 = vpack.c.bf16 %v3911_v46, %v3910_v59  ;;  %v3943_v60 = vld [vmem:[%s14100_s26 + $0x388] sm:$0xff]  ;;  %v3946_v46 = vld [vmem:[%s14100_s26 + $0x3a0] sm:$0xff] }
0x1445   :  { %v10928_v61 = vpack.c.bf16 %v3943_v60, %v3942_v47  ;;  %v3915_v59 = vld [vmem:[%s14100_s26 + $0x2a8] sm:$0xff] }
0x1446   :  { %v3947_v47 = vld [vmem:[%s14100_s26 + $0x3a8] sm:$0xff] }
0x1447   :  { %10847 = vmatpush3.bf16.msra.mxu1 %v10846_v4  ;;  %10879 = vmatpush3.bf16.msra.mxu0 %v10878_v6  ;;  %v12915_v4 = vsub.s32 3, %v12900_v63  ;;  %v3099_v6 = vrot.slane %v12909_v2, %v12903_v0 }
0x1448   :  { %10849 = vmatprep.subr.bf16.mxu1 %v10848_v9  ;;  %10881 = vmatprep.subr.bf16.mxu0 %v10880_v11  ;;  %v3894_v11 = vld [vmem:[%s14100_s26 + $0x200] sm:$0xff] }
0x1449   :  { %v3111_v9 = vrot.slane %v12909_v2, %v12915_v4  ;;  %v10898_v51 = vpack.c.bf16 %v3895_v13, %v3894_v11  ;;  %v3930_v11 = vld [vmem:[%s14100_s26 + $0x320] sm:$0xff] }
0x144b   :  { %10851 = vmatpush3.bf16.msra.mxu1 %v10850_v22  ;;  %10883 = vmatpush3.bf16.msra.mxu0 %v10882_v25  ;;  %v3912_v22 = vld [vmem:[%s14100_s26 + $0x290] sm:$0xff] }
0x144c   :  { %10853 = vmatprep.subr.bf16.mxu1 %v10852_v23  ;;  %10885 = vmatprep.subr.bf16.mxu0 %v10884_v28  ;;  %v3913_v28 = vld [vmem:[%s14100_s26 + $0x298] sm:$0xff] }
0x144d   :  { %v10900_v39 = vpack.c.bf16 %v3913_v28, %v3912_v22  ;;  %v10936_v22 = vpack.c.bf16 %v3947_v47, %v3946_v46  ;;  %v3917_v28 = vld [vmem:[%s14100_s26 + $0x2b8] sm:$0xff] }
0x144f   :  { %10855 = vmatpush3.bf16.msra.mxu1 %v10854_v14  ;;  %10887 = vmatpush3.bf16.msra.mxu0 %v10886_v33  ;;  %v10930_v14 = vpack.c.bf16 %v3927_v24, %v3926_v38  ;;  %v12941_v33 = vrot.slane %v12909_v2, %v12928_v5 }
0x1450   :  { %10857 = vmatprep.subr.bf16.mxu1 %v10856_v34  ;;  %10889 = vmatprep.subr.bf16.mxu0 %v10888_v35 }
0x1453   :  { %10859 = vmatpush3.bf16.msra.mxu1 %v10858_v40  ;;  %10891 = vmatpush3.bf16.msra.mxu0 %v10890_v41  ;;  %v10932_v40 = vpack.c.bf16 %v3945_v20, %v3944_v29  ;;  %v3897_v41 = vld [vmem:[%s14100_s26 + $0x218] sm:$0xff]  ;;  %v3948_v29 = vld [vmem:[%s14100_s26 + $0x3b0] sm:$0xff] }
0x1454   :  { %10861 = vmatprep.subr.bf16.mxu1 %v10860_v45  ;;  %10893 = vmatprep.subr.bf16.mxu0 %v10892_v54  ;;  %v3929_v54 = vld [vmem:[%s14100_s26 + $0x318] sm:$0xff] }
0x1455   :  { %v3949_v20 = vld [vmem:[%s14100_s26 + $0x3b8] sm:$0xff] }
0x1457   :  { %10863 = vmatpush3.bf16.msra.mxu1 %v10862_v55  ;;  %10895 = vmatpush3.bf16.msra.mxu0 %v10894_v16  ;;  %v3914_v55 = vld [vmem:[%s14100_s26 + $0x2a0] sm:$0xff]  ;;  %v12950_v16 = vrot.slane %v12909_v2, %v12937_v32 }
0x1458   :  { %10897 = vmatprep.subr.bf16.mxu1 %v10896_v10  ;;  %10929 = vmatprep.subr.bf16.mxu0 %v10928_v61  ;;  %v3898_v10 = vld [vmem:[%s14100_s26 + $0x220] sm:$0xff]  ;;  %v10904_v24 = vpack.c.bf16 %v3915_v59, %v3914_v55  ;;  %v3903_v59 = vld [vmem:[%s14100_s26 + $0x248] sm:$0xff] }
0x14f4   :  { %v3248_v18 = vpop.f32.mrb[20].mxu1  ;;  %v3325_v42 = vpop.f32.mrb[24].mxu0 }
0x14f5   :  { %v3249_v25 = vadd.f32 %v3248_v18, %v3099_v6  ;;  %v3326_v26 = vadd.f32 %v3325_v42, %v3107_v7  ;;  %v3250_v27 = vpop.f32.mrb[21].mxu1  ;;  %v3327_v23 = vpop.f32.mrb[25].mxu0 }
0x14f6   :  { %v3251_v30 = vadd.f32 %v3250_v27, %v3103_v8  ;;  %v3328_v31 = vadd.f32 %v3327_v23, %v3111_v9 }
0x14f7   :  { %v3798_v43 = vmax.f32 %v3249_v25, 0.0  ;;  %v3800_v44 = vmax.f32 %v3326_v26, 0.0  ;;  %v3931_v25 = vld [vmem:[%s14100_s26 + $0x328] sm:$0xff]  ;;  %v3916_v26 = vld [vmem:[%s14100_s26 + $0x2b0] sm:$0xff] }
0x14f8   :  { %v3799_v34 = vmax.f32 %v3251_v30, 0.0  ;;  %v3801_v35 = vmax.f32 %v3328_v31, 0.0  ;;  %v3254_v36 = vpop.f32.mrb[22].mxu1  ;;  %v3331_v37 = vpop.f32.mrb[26].mxu0 }
0x14f9   :  { %v3255_v45 = vadd.f32 %v3254_v36, %v3099_v6  ;;  %v3332_v48 = vadd.f32 %v3331_v37, %v3107_v7  ;;  %v3256_v49 = vpop.f32.mrb[23].mxu1  ;;  %v3333_v53 = vpop.f32.mrb[27].mxu0  ;;  %v10902_v7 = vpack.c.bf16 %v3897_v41, %v3896_v17  ;;  %v3901_v36 = vld [vmem:[%s14100_s26 + $0x238] sm:$0xff]  ;;  %v10940_v41 = vpack.c.bf16 %v3949_v20, %v3948_v29  ;;  %v3936_v29 = vld [vmem:[%s14100_s26 + $0x350] sm:$0xff] }
0x14fa   :  { %v3257_v57 = vadd.f32 %v3256_v49, %v3103_v8  ;;  %v3334_v58 = vadd.f32 %v3333_v53, %v3111_v9  ;;  %4157 = vmatprep.mubr.f32.mxu1 %v3799_v34  ;;  %4232 = vmatprep.mubr.f32.mxu0 %v3801_v35  ;;  %v10934_v8 = vpack.c.bf16 %v3929_v54, %v3928_v15  ;;  %v3899_v9 = vld [vmem:[%s14100_s26 + $0x228] sm:$0xff]  ;;  %v3900_v35 = vld [vmem:[%s14100_s26 + $0x230] sm:$0xff]  ;;  %v3937_v20 = vld [vmem:[%s14100_s26 + $0x358] sm:$0xff] }
0x14fb   :  { %4158 = vmatmul.mubr.f32.vlgmr.msra.gmra.mrb[36].mxu1 %v3798_v43  ;;  %4233 = vmatmul.mubr.f32.vlgmr.msra.gmra.mrb[40].mxu0 %v3800_v44  ;;  %v3814_v13 = vmax.f32 %v3255_v45, 0.0  ;;  %v3816_v18 = vmax.f32 %v3332_v48, 0.0  ;;  %v10906_v17 = vpack.c.bf16 %v3899_v9, %v3898_v10  ;;  %v10938_v34 = vpack.c.bf16 %v3931_v25, %v3930_v11  ;;  %v3932_v15 = vld [vmem:[%s14100_s26 + $0x330] sm:$0xff]  ;;  %v3933_v43 = vld [vmem:[%s14100_s26 + $0x338] sm:$0xff]  ;;  %v3918_v44 = vld [vmem:[%s14100_s26 + $0x2c0] sm:$0xff] }
0x14fc   :  { %v3815_v60 = vmax.f32 %v3257_v57, 0.0  ;;  %v3817_v61 = vmax.f32 %v3334_v58, 0.0  ;;  %10899 = vmatpush3.bf16.msra.mxu1 %v10898_v51  ;;  %10931 = vmatpush3.bf16.msra.mxu0 %v10930_v14  ;;  %v12956_v62 = vpop.f32.mrb[24].mxu1  ;;  %v12958_v6 = vpop.f32.mrb[28].mxu0  ;;  %v3919_v45 = vld [vmem:[%s14100_s26 + $0x2c8] sm:$0xff]  ;;  %v3950_v48 = vld [vmem:[%s14100_s26 + $0x3c0] sm:$0xff]  ;;  %v10910_v55 = vpack.c.bf16 %v3901_v36, %v3900_v35  ;;  %v10942_v57 = vpack.c.bf16 %v3933_v43, %v3932_v15 }
0x14fd   :  { %v3404_v42 = vpop.f32.mrb[25].mxu1  ;;  %v3481_v38 = vpop.f32.mrb[29].mxu0  ;;  %10901 = vmatprep.subr.bf16.mxu1 %v10900_v39  ;;  %10933 = vmatprep.subr.bf16.mxu0 %v10932_v40  ;;  %v10908_v40 = vpack.c.bf16 %v3917_v28, %v3916_v26  ;;  %v3951_v49 = vld [vmem:[%s14100_s26 + $0x3c8] sm:$0xff]  ;;  %v3902_v58 = vld [vmem:[%s14100_s26 + $0x240] sm:$0xff]  ;;  %v10912_v10 = vpack.c.bf16 %v3919_v45, %v3918_v44  ;;  %v3921_v9 = vld [vmem:[%s14100_s26 + $0x2d8] sm:$0xff]  ;;  %v13018_v35 = vsub.s32 4, %v12900_v63  ;;  %v10950_v15 = vpack.c.bf16 %v3937_v20, %v3936_v29 }
0x14fe   :  { %v3405_v27 = vadd.f32 %v3404_v42, %v12941_v33  ;;  %v3482_v23 = vadd.f32 %v3481_v38, %v12950_v16  ;;  %4162 = vmatprep.mubr.f32.mxu1 %v3815_v60  ;;  %4237 = vmatprep.mubr.f32.mxu0 %v3817_v61  ;;  %v10944_v60 = vpack.c.bf16 %v3951_v49, %v3950_v48  ;;  %v3934_v61 = vld [vmem:[%s14100_s26 + $0x340] sm:$0xff]  ;;  %v3952_v11 = vld [vmem:[%s14100_s26 + $0x3d0] sm:$0xff]  ;;  %v3905_v25 = vld [vmem:[%s14100_s26 + $0x258] sm:$0xff]  ;;  %v13027_v45 = vsub.s32 6, %v12900_v63 }
0x14ff   :  { %4163 = vmatmul.mubr.f32.gmra.mrb[38].mxu1 %v3814_v13  ;;  %4238 = vmatmul.mubr.f32.gmra.mrb[42].mxu0 %v3816_v18  ;;  %v3953_v13 = vld [vmem:[%s14100_s26 + $0x3d8] sm:$0xff]  ;;  %v10914_v38 = vpack.c.bf16 %v3903_v59, %v3902_v58  ;;  %v3906_v43 = vld [vmem:[%s14100_s26 + $0x260] sm:$0xff]  ;;  %v3907_v44 = vld [vmem:[%s14100_s26 + $0x268] sm:$0xff]  ;;  %v3115_v63 = vrot.slane %v12909_v2, %v13018_v35 }
0x1500   :  { %v3803_v30 = vmax.f32 %v3405_v27, 0.0  ;;  %v3805_v31 = vmax.f32 %v3482_v23, 0.0  ;;  %10903 = vmatpush3.bf16.msra.mxu1 %v10902_v7  ;;  %10935 = vmatpush3.bf16.msra.mxu0 %v10934_v8  ;;  %v12969_v51 = vpop.f32.mrb[26].mxu1  ;;  %v12971_v14 = vpop.f32.mrb[30].mxu0  ;;  %v3935_v7 = vld [vmem:[%s14100_s26 + $0x348] sm:$0xff]  ;;  %v3920_v8 = vld [vmem:[%s14100_s26 + $0x2d0] sm:$0xff]  ;;  %v10948_v28 = vpack.c.bf16 %v3953_v13, %v3952_v11  ;;  %v10922_v11 = vpack.c.bf16 %v3907_v44, %v3906_v43 }
0x1501   :  { %v12975_v37 = vpop.f32.mrb[27].mxu1  ;;  %v12977_v39 = vpop.f32.mrb[31].mxu0  ;;  %10905 = vmatprep.subr.bf16.mxu1 %v10904_v24  ;;  %10937 = vmatprep.subr.bf16.mxu0 %v10936_v22  ;;  %v10946_v24 = vpack.c.bf16 %v3935_v7, %v3934_v61  ;;  %v3904_v22 = vld [vmem:[%s14100_s26 + $0x250] sm:$0xff]  ;;  %v10916_v23 = vpack.c.bf16 %v3921_v9, %v3920_v8  ;;  %v3938_v58 = vld [vmem:[%s14100_s26 + $0x360] sm:$0xff]  ;;  %v3939_v59 = vld [vmem:[%s14100_s26 + $0x368] sm:$0xff] }
0x1502   :  { %4307 = vmatprep.mubr.f32.mxu1 %v3803_v30  ;;  %4382 = vmatprep.mubr.f32.mxu0 %v3805_v31  ;;  %v3922_v30 = vld [vmem:[%s14100_s26 + $0x2e0] sm:$0xff]  ;;  %v3923_v31 = vld [vmem:[%s14100_s26 + $0x2e8] sm:$0xff]  ;;  %v3956_v61 = vld [vmem:[%s14100_s26 + $0x3f0] sm:$0xff]  ;;  %v10954_v13 = vpack.c.bf16 %v3939_v59, %v3938_v58 }
0x1503   :  { %v3957_v7 = vld [vmem:[%s14100_s26 + $0x3f8] sm:$0xff]  ;;  %v3959_v43 = vld [vmem:[%s14100_s26 + $0x408] sm:$0xff]  ;;  %v3990_v58 = vld [vmem:[%s14100_s26 + $0x500] sm:$0xff] }
0x1504   :  { %10907 = vmatpush3.bf16.msra.mxu1 %v10906_v17  ;;  %10939 = vmatpush3.bf16.msra.mxu0 %v10938_v34  ;;  %v12985_v53 = vpop.f32.mrb[28].mxu1  ;;  %v12987_v54 = vpop.f32.mrb[32].mxu0  ;;  %v3954_v17 = vld [vmem:[%s14100_s26 + $0x3e0] sm:$0xff]  ;;  %v3955_v34 = vld [vmem:[%s14100_s26 + $0x3e8] sm:$0xff]  ;;  %v10956_v20 = vpack.c.bf16 %v3957_v7, %v3956_v61 }
0x1505   :  { %v12991_v46 = vpop.f32.mrb[29].mxu1  ;;  %v12993_v47 = vpop.f32.mrb[33].mxu0  ;;  %10909 = vmatprep.subr.bf16.mxu1 %v10908_v40  ;;  %10941 = vmatprep.subr.bf16.mxu0 %v10940_v41  ;;  %v10918_v41 = vpack.c.bf16 %v3905_v25, %v3904_v22  ;;  %v3940_v22 = vld [vmem:[%s14100_s26 + $0x370] sm:$0xff]  ;;  %v3123_v25 = vrot.slane %v12909_v2, %v13027_v45  ;;  %v3958_v2 = vld [vmem:[%s14100_s26 + $0x400] sm:$0xff]  ;;  %v3991_v59 = vld [vmem:[%s14100_s26 + $0x508] sm:$0xff] }
0x1507   :  { %v3480_v61 = vadd.f32 %v12958_v6, %v3123_v25  ;;  %v10962_v6 = vpack.c.bf16 %v3959_v43, %v3958_v2  ;;  %v3962_v43 = vld [vmem:[%s14100_s26 + $0x420] sm:$0xff] }
0x1508   :  { %10911 = vmatpush3.bf16.msra.mxu1 %v10910_v55  ;;  %10943 = vmatpush3.bf16.msra.mxu0 %v10942_v57  ;;  %v13001_v18 = vpop.f32.mrb[30].mxu1  ;;  %v13003_v42 = vpop.f32.mrb[34].mxu0  ;;  %v10920_v55 = vpack.c.bf16 %v3923_v31, %v3922_v30  ;;  %v10952_v57 = vpack.c.bf16 %v3955_v34, %v3954_v17  ;;  %v3941_v30 = vld [vmem:[%s14100_s26 + $0x378] sm:$0xff]  ;;  %v3974_v31 = vld [vmem:[%s14100_s26 + $0x480] sm:$0xff]  ;;  %v3975_v17 = vld [vmem:[%s14100_s26 + $0x488] sm:$0xff] }
0x1509   :  { %v13007_v26 = vpop.f32.mrb[31].mxu1  ;;  %v13009_v27 = vpop.f32.mrb[35].mxu0  ;;  %10913 = vmatprep.subr.bf16.mxu1 %v10912_v10  ;;  %10945 = vmatprep.subr.bf16.mxu0 %v10944_v60  ;;  %v3924_v10 = vld [vmem:[%s14100_s26 + $0x2f0] sm:$0xff]  ;;  %v3925_v60 = vld [vmem:[%s14100_s26 + $0x2f8] sm:$0xff]  ;;  %v4006_v34 = vld [vmem:[%s14100_s26 + $0x580] sm:$0xff] }
0x150a   :  { %v10924_v29 = vpack.c.bf16 %v3925_v60, %v3924_v10  ;;  %v3976_v10 = vld [vmem:[%s14100_s26 + $0x490] sm:$0xff]  ;;  %v3403_v60 = vadd.f32 %v12956_v62, %v3115_v63 }
0x150c   :  { %10915 = vmatpush3.bf16.msra.mxu1 %v10914_v38  ;;  %10947 = vmatpush3.bf16.msra.mxu0 %v10946_v24  ;;  %v13020_v36 = vpop.f32.mrb[32].mxu1  ;;  %v13022_v40 = vpop.f32.mrb[36].mxu0  ;;  %v3908_v38 = vld [vmem:[%s14100_s26 + $0x270] sm:$0xff]  ;;  %v3909_v24 = vld [vmem:[%s14100_s26 + $0x278] sm:$0xff] }
0x150d   :  { %v13029_v48 = vpop.f32.mrb[33].mxu1  ;;  %v13031_v49 = vpop.f32.mrb[37].mxu0  ;;  %10917 = vmatprep.subr.bf16.mxu1 %v10916_v23  ;;  %10949 = vmatprep.subr.bf16.mxu0 %v10948_v28  ;;  %v10926_v44 = vpack.c.bf16 %v3909_v24, %v3908_v38  ;;  %v10994_v24 = vpack.c.bf16 %v3991_v59, %v3990_v58 }
0x1510   :  { %10919 = vmatpush3.bf16.msra.mxu1 %v10918_v41  ;;  %10951 = vmatpush3.bf16.msra.mxu0 %v10950_v15  ;;  %v13041_v8 = vpop.f32.mrb[34].mxu1  ;;  %v13043_v9 = vpop.f32.mrb[38].mxu0  ;;  %v4007_v41 = vld [vmem:[%s14100_s26 + $0x588] sm:$0xff] }
0x1511   :  { %v13050_v23 = vpop.f32.mrb[35].mxu1  ;;  %v13052_v28 = vpop.f32.mrb[39].mxu0  ;;  %10921 = vmatprep.subr.bf16.mxu1 %v10920_v55  ;;  %10953 = vmatprep.subr.bf16.mxu0 %v10952_v57  ;;  %v13060_v15 = vld [vmem:[%s14101_s28 + $0x8] sm:$0xff]  ;;  %v10958_v55 = vpack.c.bf16 %v3941_v30, %v3940_v22  ;;  %v10960_v57 = vpack.c.bf16 %v3975_v17, %v3974_v31  ;;  %v10992_v7 = vpack.c.bf16 %v4007_v41, %v4006_v34  ;;  %v3802_v22 = vmax.f32 %v3403_v60, 0.0  ;;  %v3961_v30 = vld [vmem:[%s14100_s26 + $0x418] sm:$0xff] }
0x1512   :  { %v13078_v38 = vrot.slane %v13060_v15, %v12912_v3  ;;  %v13082_v62 = vrot.slane %v13060_v15, %v12915_v4  ;;  %v3993_v34 = vld [vmem:[%s14100_s26 + $0x518] sm:$0xff]  ;;  %v3995_v60 = vld [vmem:[%s14100_s26 + $0x528] sm:$0xff] }
0x1514   :  { %10923 = vmatpush3.bf16.msra.mxu1 %v10922_v11  ;;  %10955 = vmatpush3.bf16.msra.mxu0 %v10954_v13  ;;  %v3411_v11 = vadd.f32 %v12975_v37, %v12941_v33  ;;  %v3488_v13 = vadd.f32 %v12977_v39, %v12950_v16  ;;  %v10964_v33 = vpack.c.bf16 %v3977_v56, %v3976_v10  ;;  %v3804_v16 = vmax.f32 %v3480_v61, 0.0  ;;  %v3994_v10 = vld [vmem:[%s14100_s26 + $0x520] sm:$0xff]  ;;  %v3980_v61 = vld [vmem:[%s14100_s26 + $0x4b0] sm:$0xff] }
0x1515   :  { %10925 = vmatprep.subr.bf16.mxu1 %v10924_v29  ;;  %10957 = vmatprep.subr.bf16.mxu0 %v10956_v20  ;;  %v10996_v37 = vpack.c.bf16 %v4009_v50, %v4008_v52  ;;  %v3409_v39 = vadd.f32 %v12969_v51, %v3115_v63  ;;  %v3486_v29 = vadd.f32 %v12971_v14, %v3123_v25  ;;  %v3960_v20 = vld [vmem:[%s14100_s26 + $0x410] sm:$0xff]  ;;  %v3978_v51 = vld [vmem:[%s14100_s26 + $0x4a0] sm:$0xff]  ;;  %v3979_v14 = vld [vmem:[%s14100_s26 + $0x4a8] sm:$0xff] }
0x1516   :  { %v3819_v31 = vmax.f32 %v3411_v11, 0.0  ;;  %v3821_v17 = vmax.f32 %v3488_v13, 0.0  ;;  %v3559_v56 = vadd.f32 %v12991_v46, %v13078_v38  ;;  %v3636_v50 = vadd.f32 %v12993_v47, %v13082_v62  ;;  %v3992_v52 = vld [vmem:[%s14100_s26 + $0x510] sm:$0xff]  ;;  %v4010_v63 = vld [vmem:[%s14100_s26 + $0x5a0] sm:$0xff]  ;;  %v4011_v25 = vld [vmem:[%s14100_s26 + $0x5a8] sm:$0xff] }
0x1517   :  { %v3818_v41 = vmax.f32 %v3409_v39, 0.0  ;;  %v3820_v46 = vmax.f32 %v3486_v29, 0.0  ;;  %v10966_v47 = vpack.c.bf16 %v3961_v30, %v3960_v20  ;;  %v10998_v2 = vpack.c.bf16 %v3993_v34, %v3992_v52  ;;  %v4012_v11 = vld [vmem:[%s14100_s26 + $0x5b0] sm:$0xff]  ;;  %v4013_v13 = vld [vmem:[%s14100_s26 + $0x5b8] sm:$0xff]  ;;  %v3982_v20 = vld [vmem:[%s14100_s26 + $0x4c0] sm:$0xff] }
0x1518   :  { %10927 = vmatpush3.bf16.msra.mxu1 %v10926_v44  ;;  %10959 = vmatpush3.bf16.msra.mxu0 %v10958_v55  ;;  %v3963_v44 = vld [vmem:[%s14100_s26 + $0x428] sm:$0xff]  ;;  %v3807_v55 = vmax.f32 %v3559_v56, 0.0  ;;  %v10968_v58 = vpack.c.bf16 %v3979_v14, %v3978_v51  ;;  %v11000_v59 = vpack.c.bf16 %v4011_v25, %v4010_v63  ;;  %v3996_v39 = vld [vmem:[%s14100_s26 + $0x530] sm:$0xff]  ;;  %v3997_v29 = vld [vmem:[%s14100_s26 + $0x538] sm:$0xff] }
0x1519   :  { %10961 = vmatprep.subr.bf16.mxu1 %v10960_v57  ;;  %10993 = vmatprep.subr.bf16.mxu0 %v10992_v7  ;;  %v3809_v57 = vmax.f32 %v3636_v50, 0.0  ;;  %v3981_v7 = vld [vmem:[%s14100_s26 + $0x4b8] sm:$0xff]  ;;  %v3983_v30 = vld [vmem:[%s14100_s26 + $0x4c8] sm:$0xff]  ;;  %v11006_v50 = vpack.c.bf16 %v3997_v29, %v3996_v39  ;;  %v3966_v52 = vld [vmem:[%s14100_s26 + $0x440] sm:$0xff] }
0x151a   :  { %v3967_v34 = vld [vmem:[%s14100_s26 + $0x448] sm:$0xff]  ;;  %v10976_v51 = vpack.c.bf16 %v3983_v30, %v3982_v20  ;;  %v3998_v63 = vld [vmem:[%s14100_s26 + $0x540] sm:$0xff]  ;;  %v3988_v20 = vld [vmem:[%s14100_s26 + $0x4f0] sm:$0xff] }
0x151b   :  { %4308 = vmatmul.mubr.f32.vlgmr.msra.gmra.mrb[40].mxu1 %v3802_v22  ;;  %4383 = vmatmul.mubr.f32.vlgmr.msra.gmra.mrb[44].mxu0 %v3804_v16  ;;  %v10972_v22 = vpack.c.bf16 %v3981_v7, %v3980_v61  ;;  %v11004_v16 = vpack.c.bf16 %v4013_v13, %v4012_v11  ;;  %v3999_v25 = vld [vmem:[%s14100_s26 + $0x548] sm:$0xff]  ;;  %v3986_v61 = vld [vmem:[%s14100_s26 + $0x4e0] sm:$0xff]  ;;  %v3989_v30 = vld [vmem:[%s14100_s26 + $0x4f8] sm:$0xff] }
0x151c   :  { %4312 = vmatprep.mubr.f32.mxu1 %v3819_v31  ;;  %4387 = vmatprep.mubr.f32.mxu0 %v3821_v17  ;;  %v4014_v31 = vld [vmem:[%s14100_s26 + $0x5c0] sm:$0xff]  ;;  %v4015_v17 = vld [vmem:[%s14100_s26 + $0x5c8] sm:$0xff] }
0x151d   :  { %10963 = vmatpush3.bf16.msra.mxu1 %v10962_v6  ;;  %10995 = vmatpush3.bf16.msra.mxu0 %v10994_v24  ;;  %v10970_v6 = vpack.c.bf16 %v3963_v44, %v3962_v43  ;;  %v11002_v24 = vpack.c.bf16 %v3995_v60, %v3994_v10  ;;  %v11008_v14 = vpack.c.bf16 %v4015_v17, %v4014_v31  ;;  %v4000_v10 = vld [vmem:[%s14100_s26 + $0x550] sm:$0xff]  ;;  %v4001_v60 = vld [vmem:[%s14100_s26 + $0x558] sm:$0xff]  ;;  %v3987_v7 = vld [vmem:[%s14100_s26 + $0x4e8] sm:$0xff] }
0x151e   :  { %10965 = vmatprep.subr.bf16.mxu1 %v10964_v33  ;;  %10997 = vmatprep.subr.bf16.mxu0 %v10996_v37  ;;  %v3964_v33 = vld [vmem:[%s14100_s26 + $0x430] sm:$0xff]  ;;  %v3965_v37 = vld [vmem:[%s14100_s26 + $0x438] sm:$0xff]  ;;  %v10978_v43 = vpack.c.bf16 %v3967_v34, %v3966_v52  ;;  %v11010_v44 = vpack.c.bf16 %v3999_v25, %v3998_v63  ;;  %v4018_v11 = vld [vmem:[%s14100_s26 + $0x5e0] sm:$0xff]  ;;  %v3139_v63 = vrot.slane %v13060_v15, %v12906_v1 }
0x151f   :  { %4313 = vmatmul.mubr.f32.gmra.mrb[42].mxu1 %v3818_v41  ;;  %4388 = vmatmul.mubr.f32.gmra.mrb[46].mxu0 %v3820_v46  ;;  %v10974_v56 = vpack.c.bf16 %v3965_v37, %v3964_v33  ;;  %v3984_v41 = vld [vmem:[%s14100_s26 + $0x4d0] sm:$0xff]  ;;  %v3985_v46 = vld [vmem:[%s14100_s26 + $0x4d8] sm:$0xff]  ;;  %v4019_v13 = vld [vmem:[%s14100_s26 + $0x5e8] sm:$0xff]  ;;  %v10988_v25 = vpack.c.bf16 %v3989_v30, %v3988_v20 }
0x1520   :  { %4457 = vmatprep.mubr.f32.mxu1 %v3807_v55  ;;  %4532 = vmatprep.mubr.f32.mxu0 %v3809_v57  ;;  %v3968_v55 = vld [vmem:[%s14100_s26 + $0x450] sm:$0xff]  ;;  %v3969_v57 = vld [vmem:[%s14100_s26 + $0x458] sm:$0xff]  ;;  %v3970_v33 = vld [vmem:[%s14100_s26 + $0x460] sm:$0xff]  ;;  %v3640_v30 = vadd.f32 %v13003_v42, %v3139_v63 }
0x1521   :  { %10967 = vmatpush3.bf16.msra.mxu1 %v10966_v47  ;;  %10999 = vmatpush3.bf16.msra.mxu0 %v10998_v2  ;;  %v4016_v47 = vld [vmem:[%s14100_s26 + $0x5d0] sm:$0xff]  ;;  %v4017_v2 = vld [vmem:[%s14100_s26 + $0x5d8] sm:$0xff]  ;;  %v3971_v37 = vld [vmem:[%s14100_s26 + $0x468] sm:$0xff] }
0x1522   :  { %10969 = vmatprep.subr.bf16.mxu1 %v10968_v58  ;;  %11001 = vmatprep.subr.bf16.mxu0 %v11000_v59  ;;  %v10980_v58 = vpack.c.bf16 %v3985_v46, %v3984_v41  ;;  %v11012_v59 = vpack.c.bf16 %v4017_v2, %v4016_v47  ;;  %v4002_v39 = vld [vmem:[%s14100_s26 + $0x560] sm:$0xff]  ;;  %v4003_v29 = vld [vmem:[%s14100_s26 + $0x568] sm:$0xff]  ;;  %v4020_v31 = vld [vmem:[%s14100_s26 + $0x5f0] sm:$0xff] }
0x1523   :  { %v4021_v17 = vld [vmem:[%s14100_s26 + $0x5f8] sm:$0xff]  ;;  %v11018_v52 = vpack.c.bf16 %v4003_v29, %v4002_v39  ;;  %v3972_v34 = vld [vmem:[%s14100_s26 + $0x470] sm:$0xff]  ;;  %v4038_v47 = vld [vmem:[%s14100_s26 + $0x680] sm:$0xff]  ;;  %v13166_v39 = vrot.slane %v13060_v15, %v12928_v5 }
0x1524   :  { %v11020_v41 = vpack.c.bf16 %v4021_v17, %v4020_v31  ;;  %v4005_v46 = vld [vmem:[%s14100_s26 + $0x578] sm:$0xff]  ;;  %v4039_v2 = vld [vmem:[%s14100_s26 + $0x688] sm:$0xff]  ;;  %v4024_v31 = vld [vmem:[%s14100_s26 + $0x610] sm:$0xff] }
0x1525   :  { %10971 = vmatpush3.bf16.msra.mxu1 %v10970_v6  ;;  %11003 = vmatpush3.bf16.msra.mxu0 %v11002_v24  ;;  %v10982_v6 = vpack.c.bf16 %v3969_v57, %v3968_v55  ;;  %v11014_v24 = vpack.c.bf16 %v4001_v60, %v4000_v10  ;;  %v4022_v55 = vld [vmem:[%s14100_s26 + $0x600] sm:$0xff]  ;;  %v4023_v57 = vld [vmem:[%s14100_s26 + $0x608] sm:$0xff]  ;;  %v11024_v10 = vpack.c.bf16 %v4039_v2, %v4038_v47  ;;  %v4025_v17 = vld [vmem:[%s14100_s26 + $0x618] sm:$0xff] }
0x1526   :  { %10973 = vmatprep.subr.bf16.mxu1 %v10972_v22  ;;  %11005 = vmatprep.subr.bf16.mxu0 %v11004_v16  ;;  %v10984_v22 = vpack.c.bf16 %v3987_v7, %v3986_v61  ;;  %v11016_v16 = vpack.c.bf16 %v4019_v13, %v4018_v11  ;;  %v4054_v60 = vld [vmem:[%s14100_s26 + $0x700] sm:$0xff]  ;;  %v4055_v61 = vld [vmem:[%s14100_s26 + $0x708] sm:$0xff]  ;;  %v4040_v7 = vld [vmem:[%s14100_s26 + $0x690] sm:$0xff]  ;;  %v3634_v13 = vadd.f32 %v12987_v54, %v3139_v63 }
0x1527   :  { %v11026_v54 = vpack.c.bf16 %v4023_v57, %v4022_v55  ;;  %v11058_v29 = vpack.c.bf16 %v4055_v61, %v4054_v60  ;;  %v4043_v42 = vld [vmem:[%s14100_s26 + $0x6a8] sm:$0xff]  ;;  %v4026_v47 = vld [vmem:[%s14100_s26 + $0x620] sm:$0xff]  ;;  %v4045_v60 = vld [vmem:[%s14100_s26 + $0x6b8] sm:$0xff] }
0x1528   :  { %v4075_v63 = vld [vmem:[%s14100_s26 + $0x7a8] sm:$0xff]  ;;  %v4076_v61 = vld [vmem:[%s14100_s26 + $0x7b0] sm:$0xff] }
0x1529   :  { %10975 = vmatpush3.bf16.msra.mxu1 %v10974_v56  ;;  %11007 = vmatpush3.bf16.msra.mxu0 %v11006_v50  ;;  %v3131_v56 = vrot.slane %v13060_v15, %v12903_v0  ;;  %v10986_v50 = vpack.c.bf16 %v3971_v37, %v3970_v33  ;;  %v4072_v33 = vld [vmem:[%s14100_s26 + $0x790] sm:$0xff]  ;;  %v4073_v37 = vld [vmem:[%s14100_s26 + $0x798] sm:$0xff]  ;;  %v4027_v2 = vld [vmem:[%s14100_s26 + $0x628] sm:$0xff] }
0x152a   :  { %10977 = vmatprep.subr.bf16.mxu1 %v10976_v51  ;;  %11009 = vmatprep.subr.bf16.mxu0 %v11008_v14  ;;  %v3973_v51 = vld [vmem:[%s14100_s26 + $0x478] sm:$0xff]  ;;  %v4004_v14 = vld [vmem:[%s14100_s26 + $0x570] sm:$0xff] }
0x152b   :  { %v3557_v11 = vadd.f32 %v12985_v53, %v3131_v56  ;;  %v13170_v53 = vrot.slane %v13060_v15, %v12937_v32 }
0x152d   :  { %10979 = vmatpush3.bf16.msra.mxu1 %v10978_v43  ;;  %11011 = vmatpush3.bf16.msra.mxu0 %v11010_v44  ;;  %v4070_v43 = vld [vmem:[%s14100_s26 + $0x780] sm:$0xff]  ;;  %v4071_v44 = vld [vmem:[%s14100_s26 + $0x788] sm:$0xff]  ;;  %v3806_v20 = vmax.f32 %v3557_v11, 0.0  ;;  %v11034_v11 = vpack.c.bf16 %v4027_v2, %v4026_v47 }
0x152e   :  { %10981 = vmatprep.subr.bf16.mxu1 %v10980_v58  ;;  %11013 = vmatprep.subr.bf16.mxu0 %v11012_v59  ;;  %v10990_v58 = vpack.c.bf16 %v3973_v51, %v3972_v34  ;;  %v11022_v59 = vpack.c.bf16 %v4005_v46, %v4004_v14  ;;  %v3713_v34 = vadd.f32 %v13029_v48, %v13166_v39  ;;  %v4056_v14 = vld [vmem:[%s14100_s26 + $0x710] sm:$0xff]  ;;  %v3824_v48 = vmax.f32 %v3640_v30, 0.0  ;;  %v4031_v30 = vld [vmem:[%s14100_s26 + $0x648] sm:$0xff]  ;;  %v4050_v47 = vld [vmem:[%s14100_s26 + $0x6e0] sm:$0xff] }
0x152f   :  { %v3790_v51 = vadd.f32 %v13031_v49, %v13170_v53  ;;  %v11030_v49 = vpack.c.bf16 %v4025_v17, %v4024_v31  ;;  %v4051_v2 = vld [vmem:[%s14100_s26 + $0x6e8] sm:$0xff] }
0x1531   :  { %10983 = vmatpush3.bf16.msra.mxu1 %v10982_v6  ;;  %11015 = vmatpush3.bf16.msra.mxu0 %v11014_v24  ;;  %v11056_v6 = vpack.c.bf16 %v4071_v44, %v4070_v43  ;;  %v4041_v24 = vld [vmem:[%s14100_s26 + $0x698] sm:$0xff]  ;;  %v3811_v43 = vmax.f32 %v3713_v34, 0.0  ;;  %v3813_v44 = vmax.f32 %v3790_v51, 0.0  ;;  %v4048_v34 = vld [vmem:[%s14100_s26 + $0x6d0] sm:$0xff] }
0x1532   :  { %10985 = vmatprep.subr.bf16.mxu1 %v10984_v22  ;;  %11017 = vmatprep.subr.bf16.mxu0 %v11016_v16  ;;  %v3565_v22 = vadd.f32 %v13007_v26, %v13078_v38  ;;  %v3642_v16 = vadd.f32 %v13009_v27, %v13082_v62  ;;  %v11028_v26 = vpack.c.bf16 %v4041_v24, %v4040_v7  ;;  %v3808_v27 = vmax.f32 %v3634_v13, 0.0  ;;  %v4077_v7 = vld [vmem:[%s14100_s26 + $0x7b8] sm:$0xff] }
0x1533   :  { %v11060_v38 = vpack.c.bf16 %v4073_v37, %v4072_v33  ;;  %v3563_v62 = vadd.f32 %v13001_v18, %v3131_v56  ;;  %v4042_v18 = vld [vmem:[%s14100_s26 + $0x6a0] sm:$0xff]  ;;  %v4029_v24 = vld [vmem:[%s14100_s26 + $0x638] sm:$0xff]  ;;  %v11068_v37 = vpack.c.bf16 %v4077_v7, %v4076_v61  ;;  %v4067_v7 = vld [vmem:[%s14100_s26 + $0x768] sm:$0xff] }
0x1534   :  { %v4074_v56 = vld [vmem:[%s14100_s26 + $0x7a0] sm:$0xff]  ;;  %v11032_v55 = vpack.c.bf16 %v4043_v42, %v4042_v18  ;;  %v4049_v51 = vld [vmem:[%s14100_s26 + $0x6d8] sm:$0xff] }
0x1535   :  { %10987 = vmatpush3.bf16.msra.mxu1 %v10986_v50  ;;  %11019 = vmatpush3.bf16.msra.mxu0 %v11018_v52  ;;  %v3823_v50 = vmax.f32 %v3565_v22, 0.0  ;;  %v3825_v52 = vmax.f32 %v3642_v16, 0.0  ;;  %v11064_v57 = vpack.c.bf16 %v4075_v63, %v4074_v56  ;;  %v4060_v22 = vld [vmem:[%s14100_s26 + $0x730] sm:$0xff]  ;;  %v4061_v16 = vld [vmem:[%s14100_s26 + $0x738] sm:$0xff]  ;;  %v4066_v61 = vld [vmem:[%s14100_s26 + $0x760] sm:$0xff] }
0x1536   :  { %10989 = vmatprep.subr.bf16.mxu1 %v10988_v25  ;;  %11021 = vmatprep.subr.bf16.mxu0 %v11020_v41  ;;  %v4057_v25 = vld [vmem:[%s14100_s26 + $0x718] sm:$0xff]  ;;  %v3822_v41 = vmax.f32 %v3563_v62, 0.0  ;;  %v4030_v62 = vld [vmem:[%s14100_s26 + $0x640] sm:$0xff]  ;;  %v4032_v56 = vld [vmem:[%s14100_s26 + $0x650] sm:$0xff] }
0x1537   :  { %v11062_v46 = vpack.c.bf16 %v4057_v25, %v4056_v14  ;;  %v4080_v14 = vld [vmem:[%s14100_s26 + $0x7d0] sm:$0xff]  ;;  %v4081_v25 = vld [vmem:[%s14100_s26 + $0x7d8] sm:$0xff]  ;;  %v11042_v18 = vpack.c.bf16 %v4031_v30, %v4030_v62 }
0x1538   :  { %v4033_v63 = vld [vmem:[%s14100_s26 + $0x658] sm:$0xff] }
0x1539   :  { %10991 = vmatpush3.bf16.msra.mxu1 %v10990_v58  ;;  %11023 = vmatpush3.bf16.msra.mxu0 %v11022_v59  ;;  %v4058_v58 = vld [vmem:[%s14100_s26 + $0x720] sm:$0xff]  ;;  %v4059_v59 = vld [vmem:[%s14100_s26 + $0x728] sm:$0xff] }
0x153a   :  { %11025 = vmatprep.subr.bf16.mxu1 %v11024_v10  ;;  %11057 = vmatprep.subr.bf16.mxu0 %v11056_v6  ;;  %v4044_v10 = vld [vmem:[%s14100_s26 + $0x6b0] sm:$0xff]  ;;  %v11066_v13 = vpack.c.bf16 %v4059_v59, %v4058_v58  ;;  %v4034_v58 = vld [vmem:[%s14100_s26 + $0x660] sm:$0xff]  ;;  %v4035_v59 = vld [vmem:[%s14100_s26 + $0x668] sm:$0xff] }
0x153b   :  { %v4028_v6 = vld [vmem:[%s14100_s26 + $0x630] sm:$0xff]  ;;  %v11036_v33 = vpack.c.bf16 %v4045_v60, %v4044_v10  ;;  %v11048_v10 = vpack.c.bf16 %v4051_v2, %v4050_v47 }
0x153c   :  { %4458 = vmatmul.mubr.f32.vlgmr.msra.gmra.mrb[44].mxu1 %v3806_v20  ;;  %4533 = vmatmul.mubr.f32.vlgmr.msra.gmra.mrb[48].mxu0 %v3808_v27  ;;  %v11038_v20 = vpack.c.bf16 %v4029_v24, %v4028_v6  ;;  %v11070_v27 = vpack.c.bf16 %v4061_v16, %v4060_v22  ;;  %v4084_v6 = vld [vmem:[%s14100_s26 + $0x7f0] sm:$0xff]  ;;  %v4085_v24 = vld [vmem:[%s14100_s26 + $0x7f8] sm:$0xff]  ;;  %v11082_v22 = vpack.c.bf16 %v4067_v7, %v4066_v61 }
0x153d   :  { %4462 = vmatprep.mubr.f32.mxu1 %v3823_v50  ;;  %4537 = vmatprep.mubr.f32.mxu0 %v3825_v52  ;;  %v4062_v50 = vld [vmem:[%s14100_s26 + $0x740] sm:$0xff]  ;;  %v4063_v52 = vld [vmem:[%s14100_s26 + $0x748] sm:$0xff]  ;;  %v4036_v16 = vld [vmem:[%s14100_s26 + $0x670] sm:$0xff] }
0x153e   :  { %11027 = vmatpush3.bf16.msra.mxu1 %v11026_v54  ;;  %11059 = vmatpush3.bf16.msra.mxu0 %v11058_v29  ;;  %v4046_v54 = vld [vmem:[%s14100_s26 + $0x6c0] sm:$0xff]  ;;  %v4047_v29 = vld [vmem:[%s14100_s26 + $0x6c8] sm:$0xff]  ;;  %v11074_v42 = vpack.c.bf16 %v4063_v52, %v4062_v50  ;;  %v3796_v50 = vadd.f32 %v13052_v28, %v13170_v53 }
0x153f   :  { %11029 = vmatprep.subr.bf16.mxu1 %v11028_v26  ;;  %11061 = vmatprep.subr.bf16.mxu0 %v11060_v38  ;;  %v4078_v26 = vld [vmem:[%s14100_s26 + $0x7c0] sm:$0xff]  ;;  %v4079_v38 = vld [vmem:[%s14100_s26 + $0x7c8] sm:$0xff]  ;;  %v11040_v31 = vpack.c.bf16 %v4047_v29, %v4046_v54  ;;  %v3155_v54 = vrot.slane %v13060_v15, %v13027_v45 }
0x1540   :  { %4463 = vmatmul.mubr.f32.gmra.mrb[46].mxu1 %v3822_v41  ;;  %4538 = vmatmul.mubr.f32.gmra.mrb[50].mxu0 %v3824_v48  ;;  %v11072_v17 = vpack.c.bf16 %v4079_v38, %v4078_v26  ;;  %v11044_v41 = vpack.c.bf16 %v4049_v51, %v4048_v34  ;;  %v11076_v48 = vpack.c.bf16 %v4081_v25, %v4080_v14  ;;  %v4037_v38 = vld [vmem:[%s14100_s26 + $0x678] sm:$0xff]  ;;  %v3829_v25 = vmax.f32 %v3796_v50, 0.0  ;;  %v9345_v53 = vld [vmem:[%s14102_s30] ss:$0 sm:$0xff] }
0x1541   :  { %4607 = vmatprep.mubr.f32.mxu1 %v3811_v43  ;;  %4682 = vmatprep.mubr.f32.mxu0 %v3813_v44  ;;  %v4082_v43 = vld [vmem:[%s14100_s26 + $0x7e0] sm:$0xff]  ;;  %v4083_v44 = vld [vmem:[%s14100_s26 + $0x7e8] sm:$0xff]  ;;  %v11084_v26 = vpack.c.bf16 %v4085_v24, %v4084_v6  ;;  %v11054_v62 = vpack.c.bf16 %v4037_v38, %v4036_v16  ;;  %v3794_v14 = vadd.f32 %v13043_v9, %v3155_v54 }
0x1542   :  { %11031 = vmatpush3.bf16.msra.mxu1 %v11030_v49  ;;  %11063 = vmatpush3.bf16.msra.mxu0 %v11062_v46  ;;  %v4064_v49 = vld [vmem:[%s14100_s26 + $0x750] sm:$0xff]  ;;  %v4065_v46 = vld [vmem:[%s14100_s26 + $0x758] sm:$0xff]  ;;  %v11080_v60 = vpack.c.bf16 %v4083_v44, %v4082_v43 }
0x1543   :  { %11033 = vmatprep.subr.bf16.mxu1 %v11032_v55  ;;  %11065 = vmatprep.subr.bf16.mxu0 %v11064_v57  ;;  %v11046_v55 = vpack.c.bf16 %v4033_v63, %v4032_v56  ;;  %v11078_v57 = vpack.c.bf16 %v4065_v46, %v4064_v49 }
0x1546   :  { %11035 = vmatpush3.bf16.msra.mxu1 %v11034_v11  ;;  %11067 = vmatpush3.bf16.msra.mxu0 %v11066_v13  ;;  %v4052_v11 = vld [vmem:[%s14100_s26 + $0x6f0] sm:$0xff]  ;;  %v4053_v13 = vld [vmem:[%s14100_s26 + $0x6f8] sm:$0xff] }
0x1547   :  { %11037 = vmatprep.subr.bf16.mxu1 %v11036_v33  ;;  %11069 = vmatprep.subr.bf16.mxu0 %v11068_v37  ;;  %v3147_v33 = vrot.slane %v13060_v15, %v13018_v35  ;;  %v11050_v37 = vpack.c.bf16 %v4035_v59, %v4034_v58  ;;  %v11052_v29 = vpack.c.bf16 %v4053_v13, %v4052_v11 }
0x1548   :  { %v3719_v15 = vadd.f32 %v13050_v23, %v13166_v39  ;;  %v3828_v23 = vmax.f32 %v3794_v14, 0.0 }
0x1549   :  { %v3717_v51 = vadd.f32 %v13041_v8, %v3147_v33 }
0x154a   :  { %11039 = vmatpush3.bf16.msra.mxu1 %v11038_v20  ;;  %11071 = vmatpush3.bf16.msra.mxu0 %v11070_v27  ;;  %v4068_v20 = vld [vmem:[%s14100_s26 + $0x770] sm:$0xff]  ;;  %v4069_v27 = vld [vmem:[%s14100_s26 + $0x778] sm:$0xff] }
0x154b   :  { %11041 = vmatprep.subr.bf16.mxu1 %v11040_v31  ;;  %11073 = vmatprep.subr.bf16.mxu0 %v11072_v17  ;;  %v11086_v30 = vpack.c.bf16 %v4069_v27, %v4068_v20  ;;  %v3711_v31 = vadd.f32 %v13020_v36, %v3147_v33  ;;  %v3788_v17 = vadd.f32 %v13022_v40, %v3155_v54  ;;  %v3827_v36 = vmax.f32 %v3719_v15, 0.0 }
0x154c   :  { %v3826_v40 = vmax.f32 %v3717_v51, 0.0 }
0x154d   :  { %v3810_v52 = vmax.f32 %v3711_v31, 0.0  ;;  %v3812_v34 = vmax.f32 %v3788_v17, 0.0 }
0x154e   :  { %11043 = vmatpush3.bf16.msra.mxu1 %v11042_v18  ;;  %11075 = vmatpush3.bf16.msra.mxu0 %v11074_v42 }
0x154f   :  { %11045 = vmatprep.subr.bf16.mxu1 %v11044_v41  ;;  %11077 = vmatprep.subr.bf16.mxu0 %v11076_v48 }
0x1552   :  { %11047 = vmatpush3.bf16.msra.mxu1 %v11046_v55  ;;  %11079 = vmatpush3.bf16.msra.mxu0 %v11078_v57 }
0x1553   :  { %11049 = vmatprep.subr.bf16.mxu1 %v11048_v10  ;;  %11081 = vmatprep.subr.bf16.mxu0 %v11080_v60 }
0x1556   :  { %11051 = vmatpush3.bf16.msra.mxu1 %v11050_v37  ;;  %11083 = vmatpush3.bf16.msra.mxu0 %v11082_v22 }
0x1557   :  { %11053 = vmatprep.subr.bf16.mxu1 %v11052_v29  ;;  %11085 = vmatprep.subr.bf16.mxu0 %v11084_v26 }
0x155a   :  { %11055 = vmatpush3.bf16.msra.mxu1 %v11054_v62  ;;  %11087 = vmatpush3.bf16.msra.mxu0 %v11086_v30 }
0x155d   :  { %4608 = vmatmul.mubr.f32.vlgmr.msra.gmra.mrb[48].mxu1 %v3810_v52  ;;  %4683 = vmatmul.mubr.f32.vlgmr.msra.gmra.mrb[52].mxu0 %v3812_v34 }
0x155e   :  { %4612 = vmatprep.mubr.f32.mxu1 %v3827_v36  ;;  %4687 = vmatprep.mubr.f32.mxu0 %v3829_v25 }
0x1561   :  { %4613 = vmatmul.mubr.f32.gmra.mrb[50].mxu1 %v3826_v40  ;;  %4688 = vmatmul.mubr.f32.gmra.mrb[54].mxu0 %v3828_v23 }
0x15ce   :  { %v9590_v28 = vpop.f32.mrb[36].mxu1  ;;  %v9628_v39 = vpop.f32.mrb[40].mxu0 }
0x15cf   :  { %v9591_v18 = vpop.f32.mrb[37].mxu1  ;;  %v9629_v42 = vpop.f32.mrb[41].mxu0 }
0x15d0   :  { %v9592_v56 = vadd.f32 %v9591_v18, %v9590_v28  ;;  %v9630_v63 = vadd.f32 %v9629_v42, %v9628_v39 }
0x15d2   :  { %v4160_v8 = vadd.f32 %v9592_v56, %v9345_v53  ;;  %v9593_v41 = vpop.f32.mrb[38].mxu1  ;;  %v9631_v9 = vpop.f32.mrb[42].mxu0 }
0x15d3   :  { %v9594_v48 = vpop.f32.mrb[39].mxu1  ;;  %v9632_v49 = vpop.f32.mrb[43].mxu0 }
0x15d4   :  { %v4235_v46 = vadd.f32 %v9630_v63, %v4160_v8  ;;  %v9595_v47 = vadd.f32 %v9594_v48, %v9593_v41  ;;  %v9633_v2 = vadd.f32 %v9632_v49, %v9631_v9 }
0x15d6   :  { %v4165_v43 = vadd.f32 %v9595_v47, %v9345_v53 }
0x15d8   :  { %v4240_v44 = vadd.f32 %v9633_v2, %v4165_v43 }
0x15ee   :  { %v9666_v55 = vpop.f32.mrb[40].mxu1  ;;  %v9704_v57 = vpop.f32.mrb[44].mxu0 }
0x15ef   :  { %v9667_v58 = vpop.f32.mrb[41].mxu1  ;;  %v9705_v59 = vpop.f32.mrb[45].mxu0 }
0x15f0   :  { %v9668_v10 = vadd.f32 %v9667_v58, %v9666_v55  ;;  %v9706_v60 = vadd.f32 %v9705_v59, %v9704_v57 }
0x15f2   :  { %v4310_v61 = vadd.f32 %v9668_v10, %v4235_v46  ;;  %v9669_v7 = vpop.f32.mrb[42].mxu1  ;;  %v9707_v11 = vpop.f32.mrb[46].mxu0 }
0x15f3   :  { %v9670_v13 = vpop.f32.mrb[43].mxu1  ;;  %v9708_v6 = vpop.f32.mrb[47].mxu0 }
0x15f4   :  { %v4385_v24 = vadd.f32 %v9706_v60, %v4310_v61  ;;  %v9671_v33 = vadd.f32 %v9670_v13, %v9669_v7  ;;  %v9709_v37 = vadd.f32 %v9708_v6, %v9707_v11  ;;  %v4740_v11 = vld [vmem:[%s14103_s27 + $0x8] sm:$0xff]  ;;  %v4741_v6 = vld [vmem:[%s14103_s27 + $0x10] sm:$0xff] }
0x15f6   :  { %v4315_v22 = vadd.f32 %v9671_v33, %v4240_v44 }
0x15f8   :  { %v4390_v16 = vadd.f32 %v9709_v37, %v4315_v22 }
0x160f   :  { %v9742_v54 = vpop.f32.mrb[44].mxu1  ;;  %v9780_v29 = vpop.f32.mrb[48].mxu0 }
0x1610   :  { %v9743_v26 = vpop.f32.mrb[45].mxu1  ;;  %v9781_v38 = vpop.f32.mrb[49].mxu0 }
0x1611   :  { %v9744_v20 = vadd.f32 %v9743_v26, %v9742_v54  ;;  %v9782_v27 = vadd.f32 %v9781_v38, %v9780_v29 }
0x1613   :  { %v4460_v62 = vadd.f32 %v9744_v20, %v4385_v24  ;;  %v9745_v30 = vpop.f32.mrb[46].mxu1  ;;  %v9783_v31 = vpop.f32.mrb[50].mxu0  ;;  %v4742_v24 = vld [vmem:[%s14103_s27 + $0x18] sm:$0xff]  ;;  %v9346_v20 = vld [vmem:[%s14104_s1] ss:$0 sm:$0xff] }
0x1614   :  { %v9746_v17 = vpop.f32.mrb[47].mxu1  ;;  %v9784_v15 = vpop.f32.mrb[51].mxu0  ;;  %v11092_v33 = vpack.c.bf16 %v4742_v24, %v4741_v6 }
0x1615   :  { %v4535_v50 = vadd.f32 %v9782_v27, %v4460_v62  ;;  %v9747_v52 = vadd.f32 %v9746_v17, %v9745_v30  ;;  %v9785_v34 = vadd.f32 %v9784_v15, %v9783_v31  ;;  %v9347_v62 = vld [vmem:[%s14105_s14] ss:$0 sm:$0xff] }
0x1617   :  { %v4465_v51 = vadd.f32 %v9747_v52, %v4390_v16 }
0x1619   :  { %v4540_v14 = vadd.f32 %v9785_v34, %v4465_v51  ;;  %v9348_v34 = vld [vmem:[%s14106_s13] ss:$0 sm:$0xff] }
0x1630   :  { %v9818_v36 = vpop.f32.mrb[48].mxu1  ;;  %v9856_v25 = vpop.f32.mrb[52].mxu0 }
0x1631   :  { %v9819_v40 = vpop.f32.mrb[49].mxu1  ;;  %v9857_v23 = vpop.f32.mrb[53].mxu0 }
0x1632   :  { %v9820_v28 = vadd.f32 %v9819_v40, %v9818_v36  ;;  %v9858_v39 = vadd.f32 %v9857_v23, %v9856_v25 }
0x1634   :  { %v4610_v53 = vadd.f32 %v9820_v28, %v4535_v50  ;;  %v9821_v18 = vpop.f32.mrb[50].mxu1  ;;  %v9859_v42 = vpop.f32.mrb[54].mxu0 }
0x1635   :  { %v9822_v56 = vpop.f32.mrb[51].mxu1  ;;  %v9860_v63 = vpop.f32.mrb[55].mxu0 }
0x1636   :  { %v4685_v8 = vadd.f32 %v9858_v39, %v4610_v53  ;;  %v9823_v41 = vadd.f32 %v9822_v56, %v9821_v18  ;;  %v9861_v9 = vadd.f32 %v9860_v63, %v9859_v42  ;;  %v13293_v56 = vld [vmem:[%s12165_s25] sm:$0xff] }
0x1638   :  { %v4615_v48 = vadd.f32 %v9823_v41, %v4540_v14  ;;  %v4693_v49 = vadd.f32 %v4685_v8, %v12746_v19  ;;  %v13297_v8 = vld [vmem:[%s12165_s25 + $0x8] sm:$0xff]  ;;  %s14107_s25 = sld [smem:[#allocation35_spill]] }
0x163a   :  { %v4690_v46 = vadd.f32 %v9861_v9, %v4615_v48  ;;  %v4697_v47 = vsel %vm390_vm0, %v4693_v49, 0.0 }
0x163b   :  { %4698 = vadd.xlane.f32.xlu0 %v4697_v47 }
0x163c   :  { %v4694_v2 = vadd.f32 %v4690_v46, %v12761_v12  ;;  %v4739_v12 = vld [vmem:[%s14103_s27] sm:$0xff] }
0x163d   :  { %v11088_v13 = vpack.c.bf16 %v4740_v11, %v4739_v12 }
0x163e   :  { %v4700_v43 = vsel %vm390_vm0, %v4694_v2, 0.0 }
0x163f   :  { %4701 = vadd.xlane.f32.xlu0 %v4700_v43  ;;  %11089 = vmatprep.subr.bf16.mxu1 %v11088_v13 }
0x1640   :  { %11091 = vmatpush3.bf16.msra.mxu1 %v11088_v13 }
0x1641   :  { %11093 = vmatprep.subr.bf16.mxu1 %v11092_v33 }
0x1644   :  { %11095 = vmatpush3.bf16.msra.mxu1 %v11092_v33 }
0x16c8   :  { %v4699_v44 = vpop.xlane.xlu0 %4698 }
0x16c9   :  { %v4703_v55 = vmul.f32 0.03125, %v4699_v44 }
0x16cb   :  { %v4705_v57 = vsub.f32 %v4693_v49, %v4703_v55 }
0x16cc   :  { %v4702_v58 = vpop.xlane.xlu0 %4701 }
0x16cd   :  { %v4704_v59 = vmul.f32 0.03125, %v4702_v58  ;;  %v4707_v10 = vmul.f32 %v4705_v57, %v4705_v57 }
0x16cf   :  { %v4706_v19 = vsub.f32 %v4694_v2, %v4704_v59  ;;  %v4709_v60 = vsel %vm390_vm0, %v4707_v10, 0.0 }
0x16d0   :  { %4710 = vadd.xlane.f32.xlu0 %v4709_v60 }
0x16d1   :  { %v4708_v61 = vmul.f32 %v4706_v19, %v4706_v19 }
0x16d3   :  { %v4712_v7 = vsel %vm390_vm0, %v4708_v61, 0.0 }
0x16d4   :  { %4713 = vadd.xlane.f32.xlu1 %v4712_v7 }
0x175d   :  { %v4711_v37 = vpop.xlane.xlu0 %4710 }
0x175e   :  { %v4715_v22 = vmul.f32 0.03125, %v4711_v37 }
0x1760   :  { %v4717_v16 = vadd.f32 1e-05, %v4715_v22 }
0x1761   :  { %v4714_v54 = vpop.xlane.xlu1 %4713 }
0x1762   :  { %11841 = vrsqrt.f32 %v4717_v16  ;;  %v4716_v29 = vmul.f32 0.03125, %v4714_v54 }
0x1764   :  { %v4718_v26 = vadd.f32 1e-05, %v4716_v29 }
0x1766   :  { %11843 = vrsqrt.f32 %v4718_v26 }
0x176c   :  { %v11842_v38 = vpop.eup %11841 }
0x176d   :  { %v4721_v27 = vmul.f32 %v11842_v38, %v4705_v57 }
0x176f   :  { %v4729_v30 = vmul.f32 %v9346_v20, %v4721_v27 }
0x1770   :  { %v11844_v31 = vpop.eup %11843 }
0x1771   :  { %v4722_v17 = vmul.f32 %v11844_v31, %v4706_v19  ;;  %v13255_v15 = vadd.f32 %v9347_v62, %v4729_v30  ;;  %v4831_v31 = vld [vmem:[%s14107_s25] sm:$0xff] }
0x1773   :  { %v4730_v50 = vmul.f32 %v9346_v20, %v4722_v17  ;;  %10476 = vmatprep.mubr.msk.f32.mxu1 %vm390_vm0, %v13255_v15 }
0x1775   :  { %v13259_v52 = vadd.f32 %v9347_v62, %v4730_v50 }
0x1777   :  { %10477 = vmatmul.mubr.msk.f32.vlgmr.msra.gmra.mrb[52].mxu1 %vm390_vm0, %v13259_v52 }
0x184a   :  { %v10478_v51 = vpop.f32.mrb[52].mxu1 }
0x184b   :  { %v13264_v14 = vadd.f32 %v10478_v51, %v9348_v34  ;;  %v4822_v36 = vpop.f32.mrb[53].mxu1 }
0x184c   :  { %v13266_v25 = vadd.f32 %v9348_v34, %v4822_v36 }
0x184e   :  { %10483 = vmatprep.mubr.msk.f32.mxu0 %vm282_vm1, %v13266_v25  ;;  %v13272_v40 = vpack.i.bf16 %v13264_v14, %v13266_v25 }
0x1850   :  { %11695 = vrot.lane.b32.xlu0 %v13272_v40, %s12120_s9 }
0x1854   :  { %11705 = vrot.lane.b32.xlu0 %v13272_v40, %s12122_s21 }
0x1858   :  { %5124 = vrot.lane.b32.xlu0 %v13266_v25, %s12123_s3 }
0x185c   :  { %5126 = vrot.lane.b32.xlu0 %v13264_v14, %s12123_s3 }
0x1860   :  { %11710 = vrot.lane.b32.xlu0 %v13272_v40, %s12124_s8 }
0x1864   :  { %5409 = vrot.lane.b32.xlu0 %v13264_v14, %s12125_s24 }
0x18c2   :  { %v11696_v23 = vpop.permute.xlu0 %11695 }
0x18c3   :  { %v11698_v28 = vunpack.i.h.bf16 %v11696_v23  ;;  %v11697_v39 = vunpack.i.l.bf16 %v11696_v23 }
0x18c5   :  { %v11096_v53 = vpack.c.bf16 %v11698_v28, %v11697_v39 }
0x18c6   :  { %v11706_v10 = vpop.permute.xlu0 %11705 }
0x18c7   :  { %11098 = vmatprep.subr.msk.bf16.mxu0 %vm12446_vm2, %v11096_v53  ;;  %v11708_v12 = vunpack.i.h.bf16 %v11706_v10  ;;  %v11707_v11 = vunpack.i.l.bf16 %v11706_v10 }
0x18c8   :  { %11101 = vmatpush3.bf16.xpose.msk.msra.mxu0 %vm12446_vm2, %v11096_v53 }
0x18c9   :  { %v11106_v37 = vpack.c.bf16 %v11708_v12, %v11707_v11  ;;  %10493 = vmatprep.subr.mxu0 %v4831_v31 }
0x18ca   :  { %v5125_v60 = vpop.permute.xlu0 %5124 }
0x18ce   :  { %v5127_v13 = vpop.permute.xlu0 %5126 }
0x18cf   :  { %10484 = vmatmul.mubr.msk.f32.vlgmr.msra.gmra.mrb[56].mxu0 %vm282_vm1, %v13264_v14 }
0x18d0   :  { %10494 = vmatpush3.msra.mxu0 %v4831_v31 }
0x18d2   :  { %v11711_v54 = vpop.permute.xlu0 %11710 }
0x18d3   :  { %v11713_v38 = vunpack.i.h.bf16 %v11711_v54  ;;  %v11712_v20 = vunpack.i.l.bf16 %v11711_v54 }
0x18d5   :  { %v11116_v27 = vpack.c.bf16 %v11713_v38, %v11712_v20 }
0x18d6   :  { %v5410_v30 = vpop.permute.xlu0 %5409 }
0x19a2   :  { %v10485_v18 = vpop.f32.mrb[56].mxu0 }
0x19a3   :  { %v4923_v42 = vpop.f32.mrb[57].mxu0  ;;  %v4929_v41 = vadd.f32 %v13297_v8, %v10485_v18 }
0x19a4   :  { %v4924_v63 = vadd.f32 %v13293_v56, %v4923_v42 }
0x19a5   :  { %v4935_v48 = vsel %vm569_vm3, %v4929_v41, -inf }
0x19a6   :  { %v4932_v9 = vsel %vm569_vm3, %v4924_v63, -inf }
0x19a7   :  { %4933 = vmax.xlane.f32.xlu1 %v4932_v9 }
0x19ab   :  { %4936 = vmax.xlane.f32.xlu1 %v4935_v48 }
0x1a34   :  { %v4934_v49 = vpop.xlane.xlu1 %4933 }
0x1a35   :  { %v4938_v46 = vsub.f32 %v4924_v63, %v4934_v49 }
0x1a37   :  { %v4940_v43 = vmul.f32 1.442695, %v4938_v46 }
0x1a38   :  { %v4937_v47 = vpop.xlane.xlu1 %4936 }
0x1a39   :  { %v4939_v2 = vsub.f32 %v4929_v41, %v4937_v47 }
0x1a3b   :  { %v4942_v44 = vmul.f32 1.442695, %v4939_v2 }
0x1a3d   :  { %11845 = vpow2.f32 %v4942_v44 }
0x1a3e   :  { %11847 = vpow2.f32 %v4940_v43 }
0x1a47   :  { %v11846_v55 = vpop.eup %11845 }
0x1a48   :  { %v4947_v57 = vsel %vm569_vm3, %v11846_v55, 0.0  ;;  %v11848_v58 = vpop.eup %11847 }
0x1a49   :  { %4948 = vadd.xlane.f32.xlu1 %v4947_v57  ;;  %v4944_v59 = vsel %vm569_vm3, %v11848_v58, 0.0 }
0x1a4d   :  { %4945 = vadd.xlane.f32.xlu1 %v4944_v59 }
0x1a5e   :  { %11700 = vrot.lane.b32.xlu1 %v13272_v40, %s12121_s5  ;;  %s14108_s5 = sld [smem:[#allocation39_spill]] }
0x1a62   :  { %5407 = vrot.lane.b32.xlu1 %v13266_v25, %s12125_s24 }
0x1ad6   :  { %v4949_v19 = vpop.xlane.xlu1 %4948 }
0x1ad7   :  { %11849 = vrcp.f32 %v4949_v19 }
0x1ada   :  { %v4946_v61 = vpop.xlane.xlu1 %4945 }
0x1adb   :  { %11851 = vrcp.f32 %v4946_v61 }
0x1ade   :  { %v11701_v7 = vpop.permute.xlu1 %11700 }
0x1adf   :  { %v11703_v6 = vunpack.i.h.bf16 %v11701_v7  ;;  %v11702_v24 = vunpack.i.l.bf16 %v11701_v7 }
0x1ae1   :  { %v11102_v33 = vpack.c.bf16 %v11703_v6, %v11702_v24  ;;  %v11850_v22 = vpop.eup %11849 }
0x1ae2   :  { %v4953_v26 = vmul.f32 %v11850_v22, %v11846_v55  ;;  %v5408_v62 = vpop.permute.xlu1 %5407 }
0x1ae3   :  { %11103 = vmatprep.subr.bf16.mxu1 %v11102_v33 }
0x1ae4   :  { %11105 = vmatpush3.bf16.msra.mxu1 %v11102_v33 }
0x1ae5   :  { %v11852_v16 = vpop.eup %11851  ;;  %11108 = vmatprep.subr.msk.bf16.mxu1 %vm12446_vm2, %v11106_v37 }
0x1ae6   :  { %v4952_v29 = vmul.f32 %v11852_v16, %v11848_v58 }
0x1ae8   :  { %10490 = vmatprep.mubr.msk.f32.mxu1 %vm569_vm3, %v4952_v29 }
0x1ae9   :  { %10491 = vmatmul.mubr.msk.f32.vlgmr.msra.gmra.mrb[54].mxu1 %vm569_vm3, %v4953_v26 }
0x1aea   :  { %10502 = vmatprep.mubr.msk.f32.mxu1 %vm282_vm1, %v5125_v60 }
0x1aed   :  { %11111 = vmatpush3.bf16.xpose.msk.msra.mxu1 %vm12446_vm2, %v11106_v37 }
0x1aee   :  { %11118 = vmatprep.subr.msk.bf16.mxu1 %vm12446_vm2, %v11116_v27 }
0x1af4   :  { %10503 = vmatmul.mubr.msk.f32.vlgmr.msra.gmra.mrb[56].mxu1 %vm282_vm1, %v5127_v13 }
0x1af5   :  { %11121 = vmatpush3.bf16.xpose.msk.msra.mxu1 %vm12446_vm2, %v11116_v27  ;;  %10521 = vmatprep.mubr.msk.f32.mxu1 %vm282_vm1, %v5408_v62 }
0x1afc   :  { %10522 = vmatmul.mubr.msk.f32.vlgmr.msra.gmra.mrb[58].mxu1 %vm282_vm1, %v5410_v30 }
0x1bbc   :  { %v10492_v17 = vpop.f32.mrb[54].mxu1 }
0x1bbd   :  { %v5032_v50 = vpop.f32.mrb[55].mxu1 }
0x1bbe   :  { %10495 = vmatprep.mubr.msk.f32.mxu0 %vm282_vm1, %v5032_v50 }
0x1bbf   :  { %10496 = vmatmul.mubr.msk.f32.vlgmr.msra.gmra.mrb[58].mxu0 %vm282_vm1, %v10492_v17  ;;  %v4832_v17 = vld [vmem:[%s14107_s25 + $0x8] sm:$0xff] }
0x1bc7   :  { %v10504_v34 = vpop.f32.mrb[56].mxu1 }
0x1bc8   :  { %v5212_v51 = vadd.f32 %v13297_v8, %v10504_v34  ;;  %v5206_v36 = vpop.f32.mrb[57].mxu1 }
0x1bc9   :  { %v5207_v23 = vadd.f32 %v13293_v56, %v5206_v36 }
0x1bca   :  { %v5218_v28 = vsel %vm569_vm3, %v5212_v51, -inf }
0x1bcb   :  { %5219 = vmax.xlane.f32.xlu0 %v5218_v28  ;;  %v5215_v39 = vsel %vm569_vm3, %v5207_v23, -inf }
0x1bcc   :  { %5216 = vmax.xlane.f32.xlu1 %v5215_v39 }
0x1bcf   :  { %v10523_v53 = vpop.f32.mrb[58].mxu1 }
0x1bd0   :  { %v5489_v18 = vpop.f32.mrb[59].mxu1  ;;  %v5495_v55 = vadd.f32 %v13297_v8, %v10523_v53 }
0x1bd1   :  { %v5490_v44 = vadd.f32 %v13293_v56, %v5489_v18 }
0x1bd2   :  { %v5501_v58 = vsel %vm569_vm3, %v5495_v55, -inf }
0x1bd3   :  { %v5498_v57 = vsel %vm569_vm3, %v5490_v44, -inf }
0x1c58   :  { %v5220_v42 = vpop.xlane.xlu0 %5219 }
0x1c59   :  { %v5222_v63 = vsub.f32 %v5212_v51, %v5220_v42  ;;  %v5217_v41 = vpop.xlane.xlu1 %5216 }
0x1c5a   :  { %v5221_v9 = vsub.f32 %v5207_v23, %v5217_v41 }
0x1c5b   :  { %v5225_v48 = vmul.f32 1.442695, %v5222_v63 }
0x1c5c   :  { %v5223_v49 = vmul.f32 1.442695, %v5221_v9 }
0x1c5d   :  { %11853 = vpow2.f32 %v5225_v48 }
0x1c5e   :  { %11855 = vpow2.f32 %v5223_v49 }
0x1c67   :  { %v11854_v46 = vpop.eup %11853 }
0x1c68   :  { %v11856_v47 = vpop.eup %11855  ;;  %v5230_v2 = vsel %vm569_vm3, %v11854_v46, 0.0 }
0x1c69   :  { %5231 = vadd.xlane.f32.xlu1 %v5230_v2  ;;  %v5227_v43 = vsel %vm569_vm3, %v11856_v47, 0.0 }
0x1c6a   :  { %5228 = vadd.xlane.f32.xlu0 %v5227_v43  ;;  %v4833_v43 = vld [vmem:[%s14107_s25 + $0x10] sm:$0xff] }
0x1c7a   :  { %11720 = vrot.lane.b32.xlu1 %v13272_v40, %s12127_s2 }
0x1c7e   :  { %5690 = vrot.lane.b32.xlu1 %v13266_v25, %s12128_s7 }
0x1c80   :  { %11715 = vrot.lane.b32.xlu0 %v13272_v40, %s12126_s12  ;;  %s14109_s12 = sld [smem:[#allocation37_spill]] }
0x1c84   :  { %5692 = vrot.lane.b32.xlu0 %v13264_v14, %s12128_s7 }
0x1ca2   :  { %5499 = vmax.xlane.f32.xlu1 %v5498_v57 }
0x1ca3   :  { %5502 = vmax.xlane.f32.xlu0 %v5501_v58 }
0x1cf6   :  { %v5232_v59 = vpop.xlane.xlu1 %5231 }
0x1cf7   :  { %11857 = vrcp.f32 %v5232_v59  ;;  %v5229_v10 = vpop.xlane.xlu0 %5228 }
0x1cf8   :  { %11859 = vrcp.f32 %v5229_v10 }
0x1cfa   :  { %v11721_v25 = vpop.permute.xlu1 %11720 }
0x1cfb   :  { %v11723_v19 = vunpack.i.h.bf16 %v11721_v25  ;;  %v11722_v60 = vunpack.i.l.bf16 %v11721_v25  ;;  %v11716_v61 = vpop.permute.xlu0 %11715 }
0x1cfc   :  { %v11718_v7 = vunpack.i.h.bf16 %v11716_v61  ;;  %v11717_v14 = vunpack.i.l.bf16 %v11716_v61 }
0x1cfd   :  { %v11126_v12 = vpack.c.bf16 %v11723_v19, %v11722_v60 }
0x1cfe   :  { %v11112_v11 = vpack.c.bf16 %v11718_v7, %v11717_v14  ;;  %v5691_v13 = vpop.permute.xlu1 %5690 }
0x1cff   :  { %11128 = vmatprep.subr.msk.bf16.mxu1 %vm12446_vm2, %v11126_v12  ;;  %10540 = vmatprep.mubr.msk.f32.mxu1 %vm282_vm1, %v5691_v13  ;;  %v5693_v22 = vpop.permute.xlu0 %5692 }
0x1d00   :  { %11113 = vmatprep.subr.bf16.mxu0 %v11112_v11  ;;  %11131 = vmatpush3.bf16.xpose.msk.msra.mxu1 %vm12446_vm2, %v11126_v12 }
0x1d01   :  { %v11858_v6 = vpop.eup %11857  ;;  %11115 = vmatpush3.bf16.msra.mxu0 %v11112_v11 }
0x1d02   :  { %v11860_v24 = vpop.eup %11859  ;;  %v5236_v37 = vmul.f32 %v11858_v6, %v11854_v46  ;;  %10512 = vmatprep.subr.mxu0 %v4832_v17 }
0x1d03   :  { %v5235_v33 = vmul.f32 %v11860_v24, %v11856_v47  ;;  %v4834_v24 = vld [vmem:[%s14107_s25 + $0x18] sm:$0xff] }
0x1d05   :  { %10509 = vmatprep.mubr.msk.f32.mxu0 %vm569_vm3, %v5235_v33 }
0x1d06   :  { %10510 = vmatmul.mubr.msk.f32.vlgmr.msra.gmra.mrb[60].mxu0 %vm569_vm3, %v5236_v37 }
0x1d07   :  { %10541 = vmatmul.mubr.msk.f32.vlgmr.msra.gmra.mrb[60].mxu1 %vm282_vm1, %v5693_v22  ;;  %10513 = vmatpush3.msra.mxu0 %v4832_v17  ;;  %v6019_v17 = vld [vmem:[%s14109_s12] sm:$0xff] }
0x1d2f   :  { %v5500_v16 = vpop.xlane.xlu1 %5499 }
0x1d30   :  { %v5504_v54 = vsub.f32 %v5490_v44, %v5500_v16  ;;  %v5503_v29 = vpop.xlane.xlu0 %5502  ;;  %v6111_v16 = vld [vmem:[%s14108_s5] sm:$0xff] }
0x1d31   :  { %v5505_v26 = vsub.f32 %v5495_v55, %v5503_v29 }
0x1d32   :  { %v5506_v38 = vmul.f32 1.442695, %v5504_v54  ;;  %v6112_v54 = vld [vmem:[%s14108_s5 + $0x8] sm:$0xff] }
0x1d33   :  { %v5508_v20 = vmul.f32 1.442695, %v5505_v26  ;;  %v11144_v29 = vpack.c.bf16 %v6112_v54, %v6111_v16  ;;  %v6113_v26 = vld [vmem:[%s14108_s5 + $0x10] sm:$0xff] }
0x1d34   :  { %11861 = vpow2.f32 %v5506_v38  ;;  %v6114_v38 = vld [vmem:[%s14108_s5 + $0x18] sm:$0xff] }
0x1d35   :  { %11863 = vpow2.f32 %v5508_v20 }
0x1d3e   :  { %v11862_v27 = vpop.eup %11861 }
0x1d3f   :  { %v11864_v62 = vpop.eup %11863  ;;  %v5510_v30 = vsel %vm569_vm3, %v11862_v27, 0.0 }
0x1d40   :  { %5511 = vadd.xlane.f32.xlu0 %v5510_v30  ;;  %v5513_v31 = vsel %vm569_vm3, %v11864_v62, 0.0  ;;  %v14111_v30 = vld [vmem:[#allocation48_spill] sm:$0xff] }
0x1d41   :  { %5514 = vadd.xlane.f32.xlu1 %v5513_v31  ;;  %v14112_v31 = vld [vmem:[#allocation49_spill] sm:$0xff] }
0x1d56   :  { %11725 = vrot.lane.b32.xlu0 %v13272_v40, %s12129_s10  ;;  %s14110_s10 = sld [smem:[#allocation36_spill]] }
0x1dcd   :  { %v5512_v50 = vpop.xlane.xlu0 %5511 }
0x1dce   :  { %11865 = vrcp.f32 %v5512_v50  ;;  %v5515_v34 = vpop.xlane.xlu1 %5514  ;;  %v6020_v50 = vld [vmem:[%s14109_s12 + $0x8] sm:$0xff] }
0x1dcf   :  { %11867 = vrcp.f32 %v5515_v34  ;;  %v11136_v34 = vpack.c.bf16 %v6020_v50, %v6019_v17 }
0x1dd1   :  { %v11726_v51 = vpop.permute.xlu0 %11725  ;;  %11137 = vmatprep.subr.bf16.mxu1 %v11136_v34 }
0x1dd2   :  { %v11728_v36 = vunpack.i.h.bf16 %v11726_v51  ;;  %v11727_v23 = vunpack.i.l.bf16 %v11726_v51  ;;  %11139 = vmatpush3.bf16.msra.mxu1 %v11136_v34  ;;  %v6021_v51 = vld [vmem:[%s14109_s12 + $0x10] sm:$0xff] }
0x1dd4   :  { %v11122_v28 = vpack.c.bf16 %v11728_v36, %v11727_v23  ;;  %v6022_v36 = vld [vmem:[%s14109_s12 + $0x18] sm:$0xff] }
0x1dd5   :  { %v11140_v23 = vpack.c.bf16 %v6022_v36, %v6021_v51 }
0x1dd6   :  { %11123 = vmatprep.subr.bf16.mxu0 %v11122_v28 }
0x1dd7   :  { %11141 = vmatprep.subr.bf16.mxu1 %v11140_v23 }
0x1dd8   :  { %v11866_v39 = vpop.eup %11865  ;;  %11143 = vmatpush3.bf16.msra.mxu1 %v11140_v23  ;;  %v13426_v23 = vld [vmem:[%s14094_s16 + $0x8] sm:$0xff] }
0x1dd9   :  { %v10511_v53 = vpop.f32.mrb[60].mxu0  ;;  %v11868_v63 = vpop.eup %11867  ;;  %v5518_v9 = vmul.f32 %v11866_v39, %v11862_v27 }
0x1dda   :  { %v5315_v18 = vpop.f32.mrb[61].mxu0  ;;  %v10542_v42 = vpop.f32.mrb[60].mxu1  ;;  %v5519_v49 = vmul.f32 %v11868_v63, %v11864_v62  ;;  %v11148_v62 = vpack.c.bf16 %v6114_v38, %v6113_v26 }
0x1ddb   :  { %10514 = vmatprep.mubr.msk.f32.mxu0 %vm282_vm1, %v5315_v18  ;;  %v5772_v41 = vpop.f32.mrb[61].mxu1  ;;  %v5778_v46 = vadd.f32 %v13297_v8, %v10542_v42 }
0x1ddc   :  { %v5773_v48 = vadd.f32 %v13293_v56, %v5772_v41  ;;  %10515 = vmatmul.mubr.msk.f32.vlgmr.msra.gmra.mrb[58].mxu0 %vm282_vm1, %v10511_v53 }
0x1ddd   :  { %11125 = vmatpush3.bf16.msra.mxu0 %v11122_v28  ;;  %10528 = vmatprep.mubr.msk.f32.mxu0 %vm569_vm3, %v5518_v9  ;;  %v5784_v2 = vsel %vm569_vm3, %v5778_v46, -inf  ;;  %v9351_v28 = vld [vmem:[%s14110_s10] ss:$0 sm:$0xff] }
0x1dde   :  { %v5781_v47 = vsel %vm569_vm3, %v5773_v48, -inf  ;;  %10531 = vmatprep.subr.mxu0 %v4833_v43 }
0x1ddf   :  { %5782 = vmax.xlane.f32.xlu1 %v5781_v47 }
0x1de0   :  { %10529 = vmatmul.mubr.msk.f32.vlgmr.msra.gmra.mrb[62].mxu0 %vm569_vm3, %v5519_v49 }
0x1de1   :  { %10532 = vmatpush3.msra.mxu0 %v4833_v43 }
0x1de3   :  { %5785 = vmax.xlane.f32.xlu1 %v5784_v2 }
0x1e6c   :  { %v5783_v56 = vpop.xlane.xlu1 %5782 }
0x1e6d   :  { %v5787_v44 = vsub.f32 %v5773_v48, %v5783_v56 }
0x1e6f   :  { %v5789_v58 = vmul.f32 1.442695, %v5787_v44 }
0x1e70   :  { %v5786_v55 = vpop.xlane.xlu1 %5785 }
0x1e71   :  { %v5788_v57 = vsub.f32 %v5778_v46, %v5786_v55 }
0x1e73   :  { %v5791_v59 = vmul.f32 1.442695, %v5788_v57 }
0x1e75   :  { %11869 = vpow2.f32 %v5791_v59 }
0x1e76   :  { %11871 = vpow2.f32 %v5789_v58 }
0x1e7f   :  { %v11870_v8 = vpop.eup %11869 }
0x1e80   :  { %v5796_v10 = vsel %vm569_vm3, %v11870_v8, 0.0  ;;  %v11872_v25 = vpop.eup %11871 }
0x1e81   :  { %5797 = vadd.xlane.f32.xlu1 %v5796_v10  ;;  %v5793_v19 = vsel %vm569_vm3, %v11872_v25, 0.0 }
0x1e85   :  { %5794 = vadd.xlane.f32.xlu1 %v5793_v19 }
0x1e96   :  { %11730 = vrot.lane.b32.xlu1 %v13272_v40, %s12130_s11  ;;  %s14113_s11 = sld [smem:[#allocation40_spill]] }
0x1e9c   :  { %v9389_v48 = vld [vmem:[%s14113_s11] ss:$0 sm:$0xff] }
0x1eb3   :  { %v10530_v60 = vpop.f32.mrb[62].mxu0 }
0x1eb4   :  { %v5598_v61 = vpop.f32.mrb[63].mxu0 }
0x1eb5   :  { %10533 = vmatprep.mubr.msk.f32.mxu0 %vm282_vm1, %v5598_v61 }
0x1eb6   :  { %10534 = vmatmul.mubr.msk.f32.vlgmr.msra.gmra.mrb[58].mxu0 %vm282_vm1, %v10530_v60 }
0x1f0e   :  { %v5798_v7 = vpop.xlane.xlu1 %5797 }
0x1f0f   :  { %11873 = vrcp.f32 %v5798_v7 }
0x1f12   :  { %v5795_v14 = vpop.xlane.xlu1 %5794 }
0x1f13   :  { %11875 = vrcp.f32 %v5795_v14 }
0x1f16   :  { %v11731_v12 = vpop.permute.xlu1 %11730 }
0x1f17   :  { %v11733_v11 = vunpack.i.h.bf16 %v11731_v12  ;;  %v11732_v13 = vunpack.i.l.bf16 %v11731_v12 }
0x1f19   :  { %v11132_v6 = vpack.c.bf16 %v11733_v11, %v11732_v13  ;;  %v11874_v40 = vpop.eup %11873 }
0x1f1a   :  { %v5802_v22 = vmul.f32 %v11874_v40, %v11870_v8  ;;  %v9385_v40 = vld [vmem:[%s14115_s17] ss:$0 sm:$0xff] }
0x1f1b   :  { %11133 = vmatprep.subr.bf16.mxu0 %v11132_v6 }
0x1f1c   :  { %11135 = vmatpush3.bf16.msra.mxu0 %v11132_v6  ;;  %v9384_v6 = vld [vmem:[%s14114_s6] ss:$0 sm:$0xff] }
0x1f1d   :  { %v11876_v33 = vpop.eup %11875  ;;  %10550 = vmatprep.subr.mxu0 %v4834_v24 }
0x1f1e   :  { %v5801_v37 = vmul.f32 %v11876_v33, %v11872_v25 }
0x1f20   :  { %10547 = vmatprep.mubr.msk.f32.mxu0 %vm569_vm3, %v5801_v37 }
0x1f21   :  { %10548 = vmatmul.mubr.msk.f32.vlgmr.msra.gmra.mrb[64].mxu0 %vm569_vm3, %v5802_v22 }
0x1f22   :  { %10551 = vmatpush3.msra.mxu0 %v4834_v24 }
0x1f23   :  { %11145 = vmatprep.subr.bf16.mxu0 %v11144_v29 }
0x1ff4   :  { %v10549_v20 = vpop.f32.mrb[64].mxu0 }
0x1ff5   :  { %v5881_v27 = vpop.f32.mrb[65].mxu0 }
0x1ff6   :  { %10552 = vmatprep.mubr.msk.f32.mxu0 %vm282_vm1, %v5881_v27 }
0x1ff7   :  { %10553 = vmatmul.mubr.msk.f32.vlgmr.msra.gmra.mrb[58].mxu0 %vm282_vm1, %v10549_v20 }
0x1ff8   :  { %11147 = vmatpush3.bf16.msra.mxu0 %v11144_v29  ;;  %10574 = vmatprep.mubr.msk.f32.mxu0 %vm390_vm0, %v14111_v30 }
0x1ff9   :  { %11149 = vmatprep.subr.bf16.mxu0 %v11148_v62 }
0x1ffc   :  { %11151 = vmatpush3.bf16.msra.mxu0 %v11148_v62  ;;  %v9386_v62 = vld [vmem:[%s14116_s29] ss:$0 sm:$0xff] }
0x1fff   :  { %10575 = vmatmul.mubr.msk.f32.vlgmr.msra.gmra.mrb[66].mxu0 %vm390_vm0, %v14112_v31 }
0x20ca   :  { %v10554_v39 = vpop.f32.mrb[58].mxu0 }
0x20cb   :  { %v11524_v53 = vadd.f32 %v10554_v39, %v9351_v28  ;;  %v5962_v18 = vpop.f32.mrb[59].mxu0 }
0x20cc   :  { %v11525_v42 = vadd.f32 %v9351_v28, %v5962_v18 }
0x20cd   :  { %v5974_v63 = vadd.f32 %v11524_v53, %v13259_v52  ;;  %v13430_v53 = vld [vmem:[%s14094_s16] sm:$0xff] }
0x20ce   :  { %v5973_v41 = vadd.f32 %v11525_v42, %v13255_v15 }
0x20cf   :  { %v5980_v9 = vsel %vm390_vm0, %v5974_v63, 0.0 }
0x20d0   :  { %5981 = vadd.xlane.f32.xlu1 %v5980_v9  ;;  %v5977_v49 = vsel %vm390_vm0, %v5973_v41, 0.0 }
0x20d1   :  { %5978 = vadd.xlane.f32.xlu0 %v5977_v49 }
0x20d2   :  { %v10576_v46 = vpop.f32.mrb[66].mxu0 }
0x20d3   :  { %v6194_v47 = vadd.f32 %v10576_v46, %v9389_v48  ;;  %v6188_v2 = vpop.f32.mrb[67].mxu0 }
0x20d4   :  { %v6189_v43 = vadd.f32 %v9389_v48, %v6188_v2 }
0x20d6   :  { %v11152_v56 = vpack.c.bf16 %v6194_v47, %v6189_v43  ;;  %v13394_v44 = vpack.i.bf16 %v6194_v47, %v6189_v43 }
0x20d8   :  { %11154 = vmatprep.subr.msk.bf16.mxu1 %vm12446_vm2, %v11152_v56 }
0x215d   :  { %v5982_v52 = vpop.xlane.xlu1 %5981 }
0x215e   :  { %v5984_v55 = vmul.f32 0.03125, %v5982_v52  ;;  %v5979_v15 = vpop.xlane.xlu0 %5978 }
0x215f   :  { %v5983_v57 = vmul.f32 0.03125, %v5979_v15 }
0x2160   :  { %v5986_v58 = vsub.f32 %v5974_v63, %v5984_v55 }
0x2161   :  { %v5985_v59 = vsub.f32 %v5973_v41, %v5983_v57 }
0x2162   :  { %v5988_v25 = vmul.f32 %v5986_v58, %v5986_v58 }
0x2163   :  { %v5987_v8 = vmul.f32 %v5985_v59, %v5985_v59 }
0x2164   :  { %v5992_v19 = vsel %vm390_vm0, %v5988_v25, 0.0 }
0x2165   :  { %v5989_v10 = vsel %vm390_vm0, %v5987_v8, 0.0 }
0x2166   :  { %5990 = vadd.xlane.f32.xlu0 %v5989_v10 }
0x216a   :  { %5993 = vadd.xlane.f32.xlu0 %v5992_v19 }
0x2180   :  { %11735 = vrot.lane.b32.xlu0 %v13394_v44, %s12123_s3 }
0x21f3   :  { %v5991_v60 = vpop.xlane.xlu0 %5990 }
0x21f4   :  { %v5995_v61 = vmul.f32 0.03125, %v5991_v60 }
0x21f6   :  { %v5997_v7 = vadd.f32 1e-05, %v5995_v61 }
0x21f7   :  { %v5994_v14 = vpop.xlane.xlu0 %5993 }
0x21f8   :  { %11877 = vrsqrt.f32 %v5997_v7  ;;  %v5996_v12 = vmul.f32 0.03125, %v5994_v14 }
0x21fa   :  { %v5998_v11 = vadd.f32 1e-05, %v5996_v12 }
0x21fb   :  { %v11736_v22 = vpop.permute.xlu0 %11735 }
0x21fc   :  { %11879 = vrsqrt.f32 %v5998_v11  ;;  %v11738_v29 = vunpack.i.h.bf16 %v11736_v22  ;;  %v11737_v26 = vunpack.i.l.bf16 %v11736_v22 }
0x21fe   :  { %v11162_v27 = vpack.c.bf16 %v11738_v29, %v11737_v26 }
0x2202   :  { %v11878_v13 = vpop.eup %11877 }
0x2203   :  { %v6001_v24 = vmul.f32 %v11878_v13, %v5985_v59 }
0x2205   :  { %v6009_v33 = vmul.f32 %v9384_v6, %v6001_v24 }
0x2206   :  { %v11880_v37 = vpop.eup %11879 }
0x2207   :  { %v6002_v16 = vmul.f32 %v11880_v37, %v5986_v58  ;;  %v13404_v54 = vadd.f32 %v9385_v40, %v6009_v33 }
0x2209   :  { %v6010_v38 = vmul.f32 %v9384_v6, %v6002_v16  ;;  %10563 = vmatprep.mubr.msk.f32.mxu1 %vm390_vm0, %v13404_v54 }
0x220b   :  { %v13408_v20 = vadd.f32 %v9385_v40, %v6010_v38 }
0x220d   :  { %10564 = vmatmul.mubr.msk.f32.vlgmr.msra.gmra.mrb[62].mxu1 %vm390_vm0, %v13408_v20 }
0x220e   :  { %11157 = vmatpush3.bf16.xpose.msk.msra.mxu1 %vm12446_vm2, %v11152_v56 }
0x220f   :  { %11164 = vmatprep.subr.msk.bf16.mxu1 %vm12446_vm2, %v11162_v27 }
0x22e0   :  { %v10565_v30 = vpop.f32.mrb[62].mxu1 }
0x22e1   :  { %v6108_v31 = vadd.f32 %v10565_v30, %v9386_v62  ;;  %v6102_v17 = vpop.f32.mrb[63].mxu1 }
0x22e2   :  { %v6103_v50 = vadd.f32 %v9386_v62, %v6102_v17 }
0x22e3   :  { %6490 = vrot.lane.b32.xlu0 %v6108_v31, %s12123_s3 }
0x22e4   :  { %6488 = vrot.lane.b32.xlu1 %v6103_v50, %s12123_s3  ;;  %10581 = vmatprep.mubr.msk.f32.mxu1 %vm282_vm1, %v6103_v50  ;;  %s14120_s3 = sld [smem:[#allocation45_spill]] }
0x22e5   :  { %10582 = vmatmul.mubr.msk.f32.vlgmr.msra.gmra.mrb[64].mxu1 %vm282_vm1, %v6108_v31 }
0x22e6   :  { %11167 = vmatpush3.bf16.xpose.msk.msra.mxu1 %vm12446_vm2, %v11162_v27 }
0x2355   :  { %v6491_v51 = vpop.permute.xlu0 %6490 }
0x2356   :  { %v6489_v34 = vpop.permute.xlu1 %6488 }
0x2357   :  { %10600 = vmatprep.mubr.msk.f32.mxu1 %vm282_vm1, %v6489_v34 }
0x2358   :  { %10601 = vmatmul.mubr.msk.f32.vlgmr.msra.gmra.mrb[66].mxu1 %vm282_vm1, %v6491_v51 }
0x23b8   :  { %v10583_v36 = vpop.f32.mrb[64].mxu1 }
0x23b9   :  { %v6293_v28 = vadd.f32 %v13426_v23, %v10583_v36  ;;  %v6287_v39 = vpop.f32.mrb[65].mxu1 }
0x23ba   :  { %v6288_v18 = vadd.f32 %v13430_v53, %v6287_v39 }
0x23bb   :  { %v6299_v42 = vsel %vm569_vm3, %v6293_v28, -inf }
0x23bc   :  { %6300 = vmax.xlane.f32.xlu1 %v6299_v42  ;;  %v6296_v63 = vsel %vm569_vm3, %v6288_v18, -inf }
0x23bd   :  { %6297 = vmax.xlane.f32.xlu0 %v6296_v63 }
0x23cd   :  { %11740 = vrot.lane.b32.xlu1 %v13394_v44, %s12120_s9  ;;  %s14117_s9 = sld [smem:[#allocation41_spill]] }
0x23d1   :  { %6771 = vrot.lane.b32.xlu1 %v6103_v50, %s12125_s24 }
0x23d3   :  { %v6197_v60 = vld [vmem:[%s14117_s9] sm:$0xff] }
0x23d5   :  { %6773 = vrot.lane.b32.xlu1 %v6108_v31, %s12125_s24 }
0x242b   :  { %v10602_v41 = vpop.f32.mrb[66].mxu1 }
0x242c   :  { %v13440_v9 = vadd.f32 %v13426_v23, %v10602_v41  ;;  %v6570_v48 = vpop.f32.mrb[67].mxu1 }
0x242d   :  { %v6571_v61 = vadd.f32 %v13430_v53, %v6570_v48 }
0x242e   :  { %v6582_v49 = vsel %vm569_vm3, %v13440_v9, -inf }
0x242f   :  { %6583 = vmax.xlane.f32.xlu1 %v6582_v49  ;;  %v6579_v7 = vsel %vm569_vm3, %v6571_v61, -inf }
0x2440   :  { %11750 = vrot.lane.b32.xlu1 %v13394_v44, %s12122_s21  ;;  %s14119_s21 = sld [smem:[#allocation42_spill]] }
0x2444   :  { %7054 = vrot.lane.b32.xlu1 %v6103_v50, %s12128_s7 }
0x2448   :  { %7056 = vrot.lane.b32.xlu1 %v6108_v31, %s12128_s7 }
0x2449   :  { %v6301_v46 = vpop.xlane.xlu1 %6300 }
0x244a   :  { %v6303_v47 = vsub.f32 %v6293_v28, %v6301_v46  ;;  %v6298_v2 = vpop.xlane.xlu0 %6297 }
0x244b   :  { %v6302_v43 = vsub.f32 %v6288_v18, %v6298_v2 }
0x244c   :  { %v6306_v56 = vmul.f32 1.442695, %v6303_v47 }
0x244d   :  { %v6304_v52 = vmul.f32 1.442695, %v6302_v43  ;;  %v11741_v55 = vpop.permute.xlu1 %11740 }
0x244e   :  { %v11743_v15 = vunpack.i.h.bf16 %v11741_v55  ;;  %v11742_v57 = vunpack.i.l.bf16 %v11741_v55 }
0x244f   :  { %11881 = vpow2.f32 %v6304_v52 }
0x2450   :  { %v11158_v58 = vpack.c.bf16 %v11743_v15, %v11742_v57  ;;  %11883 = vpow2.f32 %v6306_v56 }
0x2451   :  { %v6772_v59 = vpop.permute.xlu1 %6771 }
0x2452   :  { %11159 = vmatprep.subr.bf16.mxu0 %v11158_v58  ;;  %10619 = vmatprep.mubr.msk.f32.mxu1 %vm282_vm1, %v6772_v59 }
0x2453   :  { %11161 = vmatpush3.bf16.msra.mxu0 %v11158_v58 }
0x2454   :  { %10591 = vmatprep.subr.mxu0 %v6197_v60 }
0x2455   :  { %v6774_v12 = vpop.permute.xlu1 %6773 }
0x2459   :  { %v11882_v8 = vpop.eup %11881 }
0x245a   :  { %v6308_v10 = vsel %vm569_vm3, %v11882_v8, 0.0  ;;  %v11884_v25 = vpop.eup %11883 }
0x245b   :  { %6309 = vadd.xlane.f32.xlu0 %v6308_v10  ;;  %v6311_v19 = vsel %vm569_vm3, %v11884_v25, 0.0  ;;  %v14118_v10 = vmov 0.0  }
0x245f   :  { %6312 = vadd.xlane.f32.xlu0 %v6311_v19 }
0x2475   :  { %11745 = vrot.lane.b32.xlu0 %v13394_v44, %s12125_s24  ;;  %s14122_s24 = sld [smem:[#allocation46_spill]] }
0x2494   :  { %6580 = vmax.xlane.f32.xlu0 %v6579_v7 }
0x24bc   :  { %v6584_v13 = vpop.xlane.xlu1 %6583 }
0x24bd   :  { %v6586_v31 = vsub.f32 %v13440_v9, %v6584_v13 }
0x24bf   :  { %v6589_v34 = vmul.f32 1.442695, %v6586_v31 }
0x24c0   :  { %v11751_v37 = vpop.permute.xlu1 %11750 }
0x24c1   :  { %v11753_v29 = vunpack.i.h.bf16 %v11751_v37  ;;  %v11752_v26 = vunpack.i.l.bf16 %v11751_v37 }
0x24c3   :  { %v11168_v62 = vpack.c.bf16 %v11753_v29, %v11752_v26 }
0x24c4   :  { %v7055_v30 = vpop.permute.xlu1 %7054 }
0x24c8   :  { %v7057_v59 = vpop.permute.xlu1 %7056 }
0x24e8   :  { %v6310_v14 = vpop.xlane.xlu0 %6309 }
0x24e9   :  { %11885 = vrcp.f32 %v6310_v14 }
0x24ec   :  { %v6313_v11 = vpop.xlane.xlu0 %6312 }
0x24ed   :  { %11887 = vrcp.f32 %v6313_v11 }
0x24f0   :  { %v11746_v6 = vpop.permute.xlu0 %11745 }
0x24f1   :  { %v11748_v24 = vunpack.i.h.bf16 %v11746_v6  ;;  %v11747_v40 = vunpack.i.l.bf16 %v11746_v6 }
0x24f3   :  { %v11886_v33 = vpop.eup %11885  ;;  %v11172_v22 = vpack.c.bf16 %v11748_v24, %v11747_v40 }
0x24f4   :  { %v6316_v16 = vmul.f32 %v11886_v33, %v11882_v8 }
0x24f5   :  { %11174 = vmatprep.subr.msk.bf16.mxu1 %vm12446_vm2, %v11172_v22 }
0x24f6   :  { %10588 = vmatprep.mubr.msk.f32.mxu0 %vm569_vm3, %v6316_v16  ;;  %11177 = vmatpush3.bf16.xpose.msk.msra.mxu1 %vm12446_vm2, %v11172_v22 }
0x24f7   :  { %v11888_v38 = vpop.eup %11887 }
0x24f8   :  { %v6317_v27 = vmul.f32 %v11888_v38, %v11884_v25  ;;  %v6198_v25 = vld [vmem:[%s14117_s9 + $0x8] sm:$0xff]  ;;  %v6199_v38 = vld [vmem:[%s14117_s9 + $0x10] sm:$0xff] }
0x24fa   :  { %10589 = vmatmul.mubr.msk.f32.vlgmr.msra.gmra.mrb[68].mxu0 %vm569_vm3, %v6317_v27 }
0x24fb   :  { %10592 = vmatpush3.msra.mxu0 %v6197_v60 }
0x24fc   :  { %11169 = vmatprep.subr.bf16.mxu0 %v11168_v62 }
0x24fd   :  { %10620 = vmatmul.mubr.msk.f32.vlgmr.msra.gmra.mrb[68].mxu1 %vm282_vm1, %v6774_v12 }
0x24fe   :  { %10638 = vmatprep.mubr.msk.f32.mxu1 %vm282_vm1, %v7055_v30 }
0x2521   :  { %v6581_v17 = vpop.xlane.xlu0 %6580 }
0x2522   :  { %v6585_v50 = vsub.f32 %v6571_v61, %v6581_v17 }
0x2524   :  { %v6587_v51 = vmul.f32 1.442695, %v6585_v50 }
0x2526   :  { %11889 = vpow2.f32 %v6587_v51 }
0x2527   :  { %11891 = vpow2.f32 %v6589_v34 }
0x2530   :  { %v11890_v36 = vpop.eup %11889 }
0x2531   :  { %v6591_v28 = vsel %vm569_vm3, %v11890_v36, 0.0  ;;  %v11892_v39 = vpop.eup %11891 }
0x2532   :  { %6592 = vadd.xlane.f32.xlu0 %v6591_v28  ;;  %v6594_v18 = vsel %vm569_vm3, %v11892_v39, 0.0 }
0x2536   :  { %6595 = vadd.xlane.f32.xlu0 %v6594_v18 }
0x254c   :  { %11755 = vrot.lane.b32.xlu0 %v13394_v44, %s12128_s7 }
0x25bf   :  { %v6593_v42 = vpop.xlane.xlu0 %6592 }
0x25c0   :  { %11893 = vrcp.f32 %v6593_v42 }
0x25c3   :  { %v6596_v63 = vpop.xlane.xlu0 %6595 }
0x25c4   :  { %11895 = vrcp.f32 %v6596_v63 }
0x25c7   :  { %v11756_v41 = vpop.permute.xlu0 %11755 }
0x25c8   :  { %v11758_v9 = vunpack.i.h.bf16 %v11756_v41  ;;  %v11757_v48 = vunpack.i.l.bf16 %v11756_v41 }
0x25ca   :  { %v11182_v49 = vpack.c.bf16 %v11758_v9, %v11757_v48  ;;  %v11894_v46 = vpop.eup %11893 }
0x25cb   :  { %v6599_v56 = vmul.f32 %v11894_v46, %v11890_v36 }
0x25cc   :  { %11184 = vmatprep.subr.msk.bf16.mxu1 %vm12446_vm2, %v11182_v49 }
0x25cd   :  { %v10590_v47 = vpop.f32.mrb[68].mxu0  ;;  %11187 = vmatpush3.bf16.xpose.msk.msra.mxu1 %vm12446_vm2, %v11182_v49 }
0x25ce   :  { %v6396_v2 = vpop.f32.mrb[69].mxu0  ;;  %v11896_v43 = vpop.eup %11895 }
0x25cf   :  { %10593 = vmatprep.mubr.msk.f32.mxu0 %vm282_vm1, %v6396_v2  ;;  %v6600_v57 = vmul.f32 %v11896_v43, %v11892_v39 }
0x25d0   :  { %10594 = vmatmul.mubr.msk.f32.vlgmr.msra.gmra.mrb[70].mxu0 %vm282_vm1, %v10590_v47  ;;  %v10621_v52 = vpop.f32.mrb[68].mxu1 }
0x25d1   :  { %11171 = vmatpush3.bf16.msra.mxu0 %v11168_v62  ;;  %v6859_v55 = vadd.f32 %v13426_v23, %v10621_v52  ;;  %10607 = vmatprep.mubr.msk.f32.mxu0 %vm569_vm3, %v6599_v56  ;;  %v6853_v15 = vpop.f32.mrb[69].mxu1 }
0x25d2   :  { %v6854_v58 = vadd.f32 %v13430_v53, %v6853_v15  ;;  %10610 = vmatprep.subr.mxu0 %v6198_v25 }
0x25d3   :  { %v6865_v21 = vsel %vm569_vm3, %v6859_v55, -inf }
0x25d4   :  { %6866 = vmax.xlane.f32.xlu1 %v6865_v21  ;;  %10608 = vmatmul.mubr.msk.f32.vlgmr.msra.gmra.mrb[72].mxu0 %vm569_vm3, %v6600_v57  ;;  %v6862_v8 = vsel %vm569_vm3, %v6854_v58, -inf }
0x25d5   :  { %10639 = vmatmul.mubr.msk.f32.vlgmr.msra.gmra.mrb[70].mxu1 %vm282_vm1, %v7057_v59  ;;  %6863 = vmax.xlane.f32.xlu0 %v6862_v8  ;;  %v6200_v59 = vld [vmem:[%s14117_s9 + $0x18] sm:$0xff] }
0x25d6   :  { %7601 = vmatprep.mubr.f32.mxu1 %v14118_v10  ;;  %10611 = vmatpush3.msra.mxu0 %v6198_v25 }
0x25e5   :  { %11760 = vrot.lane.b32.xlu1 %v13394_v44, %s12124_s8  ;;  %s14121_s8 = sld [smem:[#allocation47_spill]] }
0x25e9   :  { %11765 = vrot.lane.b32.xlu1 %v13394_v44, %s12127_s2 }
0x2661   :  { %v6867_v19 = vpop.xlane.xlu1 %6866 }
0x2662   :  { %v6869_v60 = vsub.f32 %v6859_v55, %v6867_v19  ;;  %v6864_v61 = vpop.xlane.xlu0 %6863 }
0x2663   :  { %v6868_v7 = vsub.f32 %v6854_v58, %v6864_v61 }
0x2664   :  { %v6872_v14 = vmul.f32 1.442695, %v6869_v60  ;;  %v9392_v60 = vld [vmem:[%s14119_s21] ss:$0 sm:$0xff] }
0x2665   :  { %v6870_v12 = vmul.f32 1.442695, %v6868_v7  ;;  %v11761_v11 = vpop.permute.xlu1 %11760 }
0x2666   :  { %v11763_v13 = vunpack.i.h.bf16 %v11761_v11  ;;  %v11762_v6 = vunpack.i.l.bf16 %v11761_v11 }
0x2667   :  { %11897 = vpow2.f32 %v6870_v12 }
0x2668   :  { %v11178_v24 = vpack.c.bf16 %v11763_v13, %v11762_v6  ;;  %11899 = vpow2.f32 %v6872_v14 }
0x2669   :  { %v11766_v51 = vpop.permute.xlu1 %11765 }
0x266a   :  { %11179 = vmatprep.subr.bf16.mxu0 %v11178_v24  ;;  %v11767_v28 = vunpack.i.l.bf16 %v11766_v51 }
0x2671   :  { %v11898_v40 = vpop.eup %11897 }
0x2672   :  { %v6874_v33 = vsel %vm569_vm3, %v11898_v40, 0.0  ;;  %v11900_v44 = vpop.eup %11899 }
0x2673   :  { %6875 = vadd.xlane.f32.xlu0 %v6874_v33  ;;  %v6877_v37 = vsel %vm569_vm3, %v11900_v44, 0.0 }
0x2677   :  { %6878 = vadd.xlane.f32.xlu0 %v6877_v37 }
0x26a7   :  { %v10609_v22 = vpop.f32.mrb[72].mxu0 }
0x26a8   :  { %v10640_v16 = vpop.f32.mrb[70].mxu1  ;;  %v6679_v29 = vpop.f32.mrb[73].mxu0 }
0x26a9   :  { %v7136_v26 = vpop.f32.mrb[71].mxu1  ;;  %10612 = vmatprep.mubr.msk.f32.mxu0 %vm282_vm1, %v6679_v29  ;;  %v7142_v62 = vadd.f32 %v13426_v23, %v10640_v16 }
0x26aa   :  { %v7137_v27 = vadd.f32 %v13430_v53, %v7136_v26  ;;  %10613 = vmatmul.mubr.msk.f32.vlgmr.msra.gmra.mrb[70].mxu0 %vm282_vm1, %v10609_v22  ;;  %v11768_v53 = vunpack.i.h.bf16 %v11766_v51 }
0x26ab   :  { %11181 = vmatpush3.bf16.msra.mxu0 %v11178_v24  ;;  %v7148_v31 = vsel %vm569_vm3, %v7142_v62, -inf }
0x26ac   :  { %v7145_v30 = vsel %vm569_vm3, %v7137_v27, -inf  ;;  %10629 = vmatprep.subr.mxu0 %v6199_v38  ;;  %v11188_v18 = vpack.c.bf16 %v11768_v53, %v11767_v28  ;;  %v7401_v53 = vld [vmem:[%s14120_s3 + $0x90] sm:$0xff] }
0x26ad   :  { %7146 = vmax.xlane.f32.xlu0 %v7145_v30 }
0x26b1   :  { %7149 = vmax.xlane.f32.xlu0 %v7148_v31  ;;  %v7402_v31 = vld [vmem:[%s14120_s3 + $0x98] sm:$0xff] }
0x2700   :  { %v6876_v17 = vpop.xlane.xlu0 %6875 }
0x2701   :  { %11901 = vrcp.f32 %v6876_v17  ;;  %v7383_v17 = vld [vmem:[%s14120_s3] sm:$0xff] }
0x2704   :  { %v6879_v50 = vpop.xlane.xlu0 %6878 }
0x2705   :  { %11903 = vrcp.f32 %v6879_v50  ;;  %v7399_v50 = vld [vmem:[%s14120_s3 + $0x80] sm:$0xff] }
0x2706   :  { %v11194_v51 = vpack.c.bf16 %v7399_v50, %v7383_v17  ;;  %v7392_v50 = vld [vmem:[%s14120_s3 + $0x48] sm:$0xff] }
0x270b   :  { %v11902_v34 = vpop.eup %11901 }
0x270c   :  { %v6882_v36 = vmul.f32 %v11902_v34, %v11898_v40 }
0x270e   :  { %10626 = vmatprep.mubr.msk.f32.mxu0 %vm569_vm3, %v6882_v36  ;;  %v7385_v36 = vld [vmem:[%s14120_s3 + $0x10] sm:$0xff] }
0x270f   :  { %v11904_v39 = vpop.eup %11903  ;;  %v11202_v28 = vpack.c.bf16 %v7401_v53, %v7385_v36  ;;  %v7394_v36 = vld [vmem:[%s14120_s3 + $0x58] sm:$0xff] }
0x2710   :  { %v6883_v23 = vmul.f32 %v11904_v39, %v11900_v44  ;;  %v7416_v39 = vld [vmem:[%s14120_s3 + $0x108] sm:$0xff] }
0x2712   :  { %10627 = vmatmul.mubr.msk.f32.vlgmr.msra.gmra.mrb[74].mxu0 %vm569_vm3, %v6883_v23  ;;  %v7432_v23 = vld [vmem:[%s14120_s3 + $0x188] sm:$0xff] }
0x2713   :  { %10630 = vmatpush3.msra.mxu0 %v6199_v38  ;;  %v7384_v38 = vld [vmem:[%s14120_s3 + $0x8] sm:$0xff] }
0x2714   :  { %11189 = vmatprep.subr.bf16.mxu0 %v11188_v18 }
0x273a   :  { %v7147_v42 = vpop.xlane.xlu0 %7146 }
0x273b   :  { %v7151_v63 = vsub.f32 %v7137_v27, %v7147_v42  ;;  %v7400_v27 = vld [vmem:[%s14120_s3 + $0x88] sm:$0xff]  ;;  %v11196_v42 = vpack.c.bf16 %v7432_v23, %v7416_v39  ;;  %v7391_v39 = vld [vmem:[%s14120_s3 + $0x40] sm:$0xff] }
0x273c   :  { %v11192_v30 = vpack.c.bf16 %v7400_v27, %v7384_v38  ;;  %v7435_v27 = vld [vmem:[%s14120_s3 + $0x1a0] sm:$0xff] }
0x273d   :  { %v7153_v41 = vmul.f32 1.442695, %v7151_v63  ;;  %v7434_v63 = vld [vmem:[%s14120_s3 + $0x198] sm:$0xff] }
0x273e   :  { %v7150_v9 = vpop.xlane.xlu0 %7149  ;;  %11193 = vmatprep.subr.bf16.mxu1 %v11192_v30  ;;  %v7437_v30 = vld [vmem:[%s14120_s3 + $0x1b0] sm:$0xff] }
0x273f   :  { %11905 = vpow2.f32 %v7153_v41  ;;  %v7152_v48 = vsub.f32 %v7142_v62, %v7150_v9  ;;  %v7386_v62 = vld [vmem:[%s14120_s3 + $0x18] sm:$0xff]  ;;  %11195 = vmatpush1.bf16.msra.mxu1 %v11194_v51  ;;  %v7415_v41 = vld [vmem:[%s14120_s3 + $0x100] sm:$0xff]  ;;  %v7408_v51 = vld [vmem:[%s14120_s3 + $0xc8] sm:$0xff] }
0x2740   :  { %v11200_v34 = vpack.c.bf16 %v7402_v31, %v7386_v62  ;;  %v7431_v9 = vld [vmem:[%s14120_s3 + $0x180] sm:$0xff]  ;;  %11197 = vmatprep.subr.bf16.mxu1 %v11196_v42  ;;  %v7421_v62 = vld [vmem:[%s14120_s3 + $0x130] sm:$0xff] }
0x2741   :  { %v7155_v49 = vmul.f32 1.442695, %v7152_v48  ;;  %v7393_v42 = vld [vmem:[%s14120_s3 + $0x50] sm:$0xff] }
0x2743   :  { %11907 = vpow2.f32 %v7155_v49  ;;  %v11198_v49 = vpack.c.bf16 %v7431_v9, %v7415_v41  ;;  %v11224_v41 = vpack.c.bf16 %v7408_v51, %v7392_v50  ;;  %v8185_v51 = vld [vmem:[%s14121_s8] sm:$0xff] }
0x2745   :  { %11199 = vmatpush1.bf16.msra.mxu1 %v11198_v49  ;;  %v7440_v49 = vld [vmem:[%s14120_s3 + $0x1c8] sm:$0xff] }
0x2749   :  { %v11906_v46 = vpop.eup %11905 }
0x274a   :  { %v7157_v47 = vsel %vm569_vm3, %v11906_v46, 0.0 }
0x274b   :  { %7158 = vadd.xlane.f32.xlu0 %v7157_v47  ;;  %v7433_v47 = vld [vmem:[%s14120_s3 + $0x190] sm:$0xff] }
0x274d   :  { %v11908_v2 = vpop.eup %11907 }
0x274e   :  { %v7160_v43 = vsel %vm569_vm3, %v11908_v2, 0.0 }
0x274f   :  { %7161 = vadd.xlane.f32.xlu0 %v7160_v43  ;;  %v7388_v43 = vld [vmem:[%s14120_s3 + $0x28] sm:$0xff] }
0x27d8   :  { %v7159_v56 = vpop.xlane.xlu0 %7158 }
0x27d9   :  { %11909 = vrcp.f32 %v7159_v56  ;;  %v7404_v56 = vld [vmem:[%s14120_s3 + $0xa8] sm:$0xff] }
0x27dc   :  { %v7162_v52 = vpop.xlane.xlu0 %7161 }
0x27dd   :  { %11911 = vrcp.f32 %v7162_v52  ;;  %v7390_v52 = vld [vmem:[%s14120_s3 + $0x38] sm:$0xff] }
0x27e3   :  { %v11910_v55 = vpop.eup %11909 }
0x27e4   :  { %v7165_v21 = vmul.f32 %v11910_v55, %v11906_v46  ;;  %v7417_v46 = vld [vmem:[%s14120_s3 + $0x110] sm:$0xff]  ;;  %v11208_v55 = vpack.c.bf16 %v7404_v56, %v7388_v43  ;;  %v7423_v56 = vld [vmem:[%s14120_s3 + $0x140] sm:$0xff] }
0x27e5   :  { %v10628_v15 = vpop.f32.mrb[74].mxu0 }
0x27e6   :  { %v6962_v57 = vpop.f32.mrb[75].mxu0  ;;  %11209 = vmatprep.subr.bf16.mxu1 %v11208_v55  ;;  %v7425_v55 = vld [vmem:[%s14120_s3 + $0x150] sm:$0xff] }
0x27e7   :  { %v11912_v58 = vpop.eup %11911  ;;  %10631 = vmatprep.mubr.msk.f32.mxu0 %vm282_vm1, %v6962_v57 }
0x27e8   :  { %10632 = vmatmul.mubr.msk.f32.vlgmr.msra.gmra.mrb[70].mxu0 %vm282_vm1, %v10628_v15  ;;  %v7166_v8 = vmul.f32 %v11912_v58, %v11908_v2  ;;  %v11206_v2 = vpack.c.bf16 %v7433_v47, %v7417_v46  ;;  %v7406_v15 = vld [vmem:[%s14120_s3 + $0xb8] sm:$0xff] }
0x27e9   :  { %11191 = vmatpush3.bf16.msra.mxu0 %v11188_v18  ;;  %10645 = vmatprep.mubr.msk.f32.mxu0 %vm569_vm3, %v7165_v21  ;;  %v7418_v18 = vld [vmem:[%s14120_s3 + $0x118] sm:$0xff]  ;;  %v11216_v57 = vpack.c.bf16 %v7406_v15, %v7390_v52  ;;  %v7439_v52 = vld [vmem:[%s14120_s3 + $0x1c0] sm:$0xff]  ;;  %v7441_v15 = vld [vmem:[%s14120_s3 + $0x1d0] sm:$0xff] }
0x27ea   :  { %10648 = vmatprep.subr.mxu0 %v6200_v59  ;;  %v11204_v48 = vpack.c.bf16 %v7434_v63, %v7418_v18  ;;  %v7407_v18 = vld [vmem:[%s14120_s3 + $0xc0] sm:$0xff]  ;;  %v7409_v63 = vld [vmem:[%s14120_s3 + $0xd0] sm:$0xff]  ;;  %v7426_v46 = vld [vmem:[%s14120_s3 + $0x158] sm:$0xff] }
0x27eb   :  { %v7442_v47 = vld [vmem:[%s14120_s3 + $0x1d8] sm:$0xff]  ;;  %v11234_v43 = vpack.c.bf16 %v7409_v63, %v7393_v42  ;;  %v8235_v63 = vld [vmem:[%s14121_s8 + $0x190] sm:$0xff] }
0x27ec   :  { %10646 = vmatmul.mubr.msk.f32.vlgmr.msra.gmra.mrb[76].mxu0 %vm569_vm3, %v7166_v8  ;;  %v8204_v42 = vld [vmem:[%s14121_s8 + $0x98] sm:$0xff] }
0x27ed   :  { %10649 = vmatpush3.msra.mxu0 %v6200_v59 }
0x27ee   :  { %11201 = vmatprep.subr.bf16.mxu0 %v11200_v34 }
0x28bf   :  { %v10647_v25 = vpop.f32.mrb[76].mxu0 }
0x28c0   :  { %v7245_v19 = vpop.f32.mrb[77].mxu0 }
0x28c1   :  { %10650 = vmatprep.mubr.msk.f32.mxu0 %vm282_vm1, %v7245_v19 }
0x28c2   :  { %10651 = vmatmul.mubr.msk.f32.vlgmr.msra.gmra.mrb[70].mxu0 %vm282_vm1, %v10647_v25 }
0x28c3   :  { %7678 = vmatprep.mubr.f32.mxu0 %v14118_v10  ;;  %11203 = vmatpush1.bf16.msra.mxu0 %v11202_v28  ;;  %v11222_v28 = vpack.c.bf16 %v7437_v30, %v7421_v62  ;;  %v8201_v62 = vld [vmem:[%s14121_s8 + $0x80] sm:$0xff]  ;;  %v8202_v30 = vld [vmem:[%s14121_s8 + $0x88] sm:$0xff] }
0x28c4   :  { %11205 = vmatprep.subr.bf16.mxu0 %v11204_v48  ;;  %v7424_v48 = vld [vmem:[%s14120_s3 + $0x148] sm:$0xff] }
0x28c7   :  { %11207 = vmatpush1.bf16.msra.mxu0 %v11206_v2  ;;  %v11226_v2 = vpack.c.bf16 %v7407_v18, %v7391_v39  ;;  %v8218_v39 = vld [vmem:[%s14121_s8 + $0x108] sm:$0xff]  ;;  %v8203_v18 = vld [vmem:[%s14121_s8 + $0x90] sm:$0xff] }
0x28c8   :  { %11217 = vmatprep.subr.bf16.mxu0 %v11216_v57  ;;  %v11228_v57 = vpack.c.bf16 %v7440_v49, %v7424_v48  ;;  %v8187_v49 = vld [vmem:[%s14121_s8 + $0x10] sm:$0xff] }
0x2995   :  { %v10652_v61 = vpop.f32.mrb[70].mxu0 }
0x2996   :  { %v11526_v7 = vadd.f32 %v10652_v61, %v9392_v60  ;;  %v7326_v14 = vpop.f32.mrb[71].mxu0  ;;  %v9425_v61 = vld [vmem:[#allocation2] ss:$0 sm:$0xff] }
0x2997   :  { %v11527_v12 = vadd.f32 %v9392_v60, %v7326_v14 }
0x2998   :  { %v7338_v11 = vadd.f32 %v11526_v7, %v13408_v20  ;;  %v7387_v7 = vld [vmem:[%s14120_s3 + $0x20] sm:$0xff] }
0x2999   :  { %v7337_v13 = vadd.f32 %v11527_v12, %v13404_v54  ;;  %v7403_v12 = vld [vmem:[%s14120_s3 + $0xa0] sm:$0xff] }
0x299a   :  { %v7344_v6 = vsel %vm390_vm0, %v7338_v11, 0.0 }
0x299b   :  { %7345 = vadd.xlane.f32.xlu1 %v7344_v6  ;;  %v7341_v24 = vsel %vm390_vm0, %v7337_v13, 0.0  ;;  %v9426_v6 = vld [vmem:[#allocation4] ss:$0 sm:$0xff] }
0x299c   :  { %7342 = vadd.xlane.f32.xlu0 %v7341_v24  ;;  %v7420_v24 = vld [vmem:[%s14120_s3 + $0x128] sm:$0xff] }
0x2a28   :  { %v7346_v40 = vpop.xlane.xlu1 %7345 }
0x2a29   :  { %v7348_v33 = vmul.f32 0.03125, %v7346_v40  ;;  %v7343_v44 = vpop.xlane.xlu0 %7342 }
0x2a2a   :  { %v7347_v37 = vmul.f32 0.03125, %v7343_v44  ;;  %v7422_v44 = vld [vmem:[%s14120_s3 + $0x138] sm:$0xff] }
0x2a2b   :  { %v13514_v22 = vsub.f32 %v7338_v11, %v7348_v33  ;;  %v7389_v11 = vld [vmem:[%s14120_s3 + $0x30] sm:$0xff]  ;;  %v7436_v33 = vld [vmem:[%s14120_s3 + $0x1a8] sm:$0xff] }
0x2a2c   :  { %v7349_v20 = vsub.f32 %v7337_v13, %v7347_v37  ;;  %v7405_v13 = vld [vmem:[%s14120_s3 + $0xb0] sm:$0xff]  ;;  %v7438_v37 = vld [vmem:[%s14120_s3 + $0x1b8] sm:$0xff]  ;;  %v11212_v31 = vpack.c.bf16 %v7436_v33, %v7420_v24  ;;  %v7444_v24 = vld [vmem:[%s14120_s3 + $0x1e8] sm:$0xff] }
0x2a2d   :  { %v7352_v29 = vmul.f32 %v13514_v22, %v13514_v22  ;;  %v11220_v17 = vpack.c.bf16 %v7438_v37, %v7422_v44  ;;  %v7446_v33 = vld [vmem:[%s14120_s3 + $0x1f8] sm:$0xff] }
0x2a2e   :  { %v7351_v54 = vmul.f32 %v7349_v20, %v7349_v20 }
0x2a2f   :  { %v7356_v26 = vsel %vm390_vm0, %v7352_v29, 0.0  ;;  %v11218_v29 = vpack.c.bf16 %v7405_v13, %v7389_v11 }
0x2a30   :  { %v7353_v16 = vsel %vm390_vm0, %v7351_v54, 0.0 }
0x2a31   :  { %7354 = vadd.xlane.f32.xlu0 %v7353_v16  ;;  %v11210_v16 = vpack.c.bf16 %v7403_v12, %v7387_v7  ;;  %v7411_v7 = vld [vmem:[%s14120_s3 + $0xe0] sm:$0xff]  ;;  %v7413_v12 = vld [vmem:[%s14120_s3 + $0xf0] sm:$0xff] }
0x2a35   :  { %7357 = vadd.xlane.f32.xlu0 %v7356_v26 }
0x2abe   :  { %v7355_v58 = vpop.xlane.xlu0 %7354 }
0x2abf   :  { %v7359_v21 = vmul.f32 0.03125, %v7355_v58  ;;  %v11236_v58 = vpack.c.bf16 %v7442_v47, %v7426_v46  ;;  %v8188_v46 = vld [vmem:[%s14121_s8 + $0x18] sm:$0xff]  ;;  %v11260_v47 = vpack.c.bf16 %v8204_v42, %v8203_v18  ;;  %v8195_v18 = vld [vmem:[%s14121_s8 + $0x50] sm:$0xff] }
0x2ac0   :  { %v8196_v42 = vld [vmem:[%s14121_s8 + $0x58] sm:$0xff] }
0x2ac1   :  { %v7361_v59 = vadd.f32 1e-05, %v7359_v21  ;;  %v7396_v21 = vld [vmem:[%s14120_s3 + $0x68] sm:$0xff] }
0x2ac2   :  { %v7358_v8 = vpop.xlane.xlu0 %7357 }
0x2ac3   :  { %11913 = vrsqrt.f32 %v7361_v59  ;;  %v7360_v25 = vmul.f32 0.03125, %v7358_v8  ;;  %v7412_v59 = vld [vmem:[%s14120_s3 + $0xe8] sm:$0xff]  ;;  %v7398_v8 = vld [vmem:[%s14120_s3 + $0x78] sm:$0xff] }
0x2ac4   :  { %v11240_v11 = vpack.c.bf16 %v7412_v59, %v7396_v21  ;;  %v8189_v59 = vld [vmem:[%s14121_s8 + $0x20] sm:$0xff] }
0x2ac5   :  { %v7362_v19 = vadd.f32 1e-05, %v7360_v25  ;;  %v7414_v25 = vld [vmem:[%s14120_s3 + $0xf8] sm:$0xff] }
0x2ac6   :  { %v11248_v13 = vpack.c.bf16 %v7414_v25, %v7398_v8  ;;  %v8190_v8 = vld [vmem:[%s14121_s8 + $0x28] sm:$0xff] }
0x2ac7   :  { %11915 = vrsqrt.f32 %v7362_v19  ;;  %v11230_v19 = vpack.c.bf16 %v7439_v52, %v7423_v56  ;;  %v8220_v56 = vld [vmem:[%s14121_s8 + $0x118] sm:$0xff]  ;;  %v8205_v52 = vld [vmem:[%s14121_s8 + $0xa0] sm:$0xff] }
0x2acd   :  { %v11914_v60 = vpop.eup %11913 }
0x2ace   :  { %v7365_v14 = vmul.f32 %v11914_v60, %v7349_v20  ;;  %v7419_v20 = vld [vmem:[%s14120_s3 + $0x120] sm:$0xff]  ;;  %v11238_v60 = vpack.c.bf16 %v7441_v15, %v7425_v55  ;;  %v8206_v55 = vld [vmem:[%s14121_s8 + $0xa8] sm:$0xff] }
0x2acf   :  { %v11214_v53 = vpack.c.bf16 %v7435_v27, %v7419_v20  ;;  %v7445_v20 = vld [vmem:[%s14120_s3 + $0x1f0] sm:$0xff]  ;;  %v8237_v15 = vld [vmem:[%s14121_s8 + $0x1a0] sm:$0xff]  ;;  %v11264_v25 = vpack.c.bf16 %v8206_v55, %v8205_v52 }
0x2ad0   :  { %v7373_v40 = vmul.f32 %v9425_v61, %v7365_v14  ;;  %v7397_v14 = vld [vmem:[%s14120_s3 + $0x70] sm:$0xff]  ;;  %v8197_v52 = vld [vmem:[%s14121_s8 + $0x60] sm:$0xff] }
0x2ad1   :  { %v11916_v54 = vpop.eup %11915  ;;  %v11250_v37 = vpack.c.bf16 %v7413_v12, %v7397_v14  ;;  %v8239_v14 = vld [vmem:[%s14121_s8 + $0x1b0] sm:$0xff]  ;;  %v8240_v12 = vld [vmem:[%s14121_s8 + $0x1b8] sm:$0xff] }
0x2ad2   :  { %v13549_v26 = vadd.f32 %v9426_v6, %v7373_v40  ;;  %v7366_v38 = vmul.f32 %v11916_v54, %v13514_v22  ;;  %v7410_v22 = vld [vmem:[%s14120_s3 + $0xd8] sm:$0xff]  ;;  %v7427_v54 = vld [vmem:[%s14120_s3 + $0x160] sm:$0xff] }
0x2ad3   :  { %v11232_v9 = vpack.c.bf16 %v7410_v22, %v7394_v36  ;;  %v7430_v40 = vld [vmem:[%s14120_s3 + $0x178] sm:$0xff]  ;;  %v8186_v36 = vld [vmem:[%s14121_s8 + $0x8] sm:$0xff]  ;;  %v11256_v22 = vpack.c.bf16 %v8202_v30, %v8201_v62  ;;  %v8193_v62 = vld [vmem:[%s14121_s8 + $0x40] sm:$0xff] }
0x2ad4   :  { %v7374_v34 = vmul.f32 %v9425_v61, %v7366_v38  ;;  %9427 = vmatmul.mubr.msk.f32.vlgmr.msra.gmra.mrb[72].mxu1 %vm390_vm0, %v13549_v26  ;;  %9429 = vmatmul.mubr.msk.f32.vlgmr.msra.gmra.mrb[78].mxu0 %vm390_vm0, %v13549_v26  ;;  %v7395_v61 = vld [vmem:[%s14120_s3 + $0x60] sm:$0xff]  ;;  %v11252_v27 = vpack.c.bf16 %v7446_v33, %v7430_v40  ;;  %v11300_v33 = vpack.c.bf16 %v8240_v12, %v8239_v14  ;;  %v8194_v30 = vld [vmem:[%s14121_s8 + $0x48] sm:$0xff]  ;;  %v8200_v14 = vld [vmem:[%s14121_s8 + $0x78] sm:$0xff] }
0x2ad5   :  { %11211 = vmatpush1.bf16.msra.mxu1 %v11210_v16  ;;  %11219 = vmatpush1.bf16.msra.mxu0 %v11218_v29  ;;  %v11242_v44 = vpack.c.bf16 %v7411_v7, %v7395_v61  ;;  %v7443_v16 = vld [vmem:[%s14120_s3 + $0x1e0] sm:$0xff]  ;;  %v7429_v29 = vld [vmem:[%s14120_s3 + $0x170] sm:$0xff]  ;;  %v8222_v61 = vld [vmem:[%s14121_s8 + $0x128] sm:$0xff] }
0x2ad6   :  { %v13564_v23 = vadd.f32 %v9426_v6, %v7374_v34  ;;  %7607 = vmatprep.mubr.f32.mxu1 %v14118_v10  ;;  %7684 = vmatprep.mubr.f32.mxu0 %v14118_v10  ;;  %v7428_v6 = vld [vmem:[%s14120_s3 + $0x168] sm:$0xff]  ;;  %v11246_v50 = vpack.c.bf16 %v7443_v16, %v7427_v54  ;;  %v11254_v34 = vpack.c.bf16 %v7445_v20, %v7429_v29  ;;  %v8207_v7 = vld [vmem:[%s14121_s8 + $0xb0] sm:$0xff]  ;;  %v8209_v54 = vld [vmem:[%s14121_s8 + $0xc0] sm:$0xff] }
0x2ad7   :  { %11213 = vmatprep.subr.bf16.mxu1 %v11212_v31  ;;  %11221 = vmatprep.subr.bf16.mxu0 %v11220_v17  ;;  %v11244_v38 = vpack.c.bf16 %v7444_v24, %v7428_v6  ;;  %v8233_v31 = vld [vmem:[%s14121_s8 + $0x180] sm:$0xff]  ;;  %v8234_v17 = vld [vmem:[%s14121_s8 + $0x188] sm:$0xff]  ;;  %v8191_v6 = vld [vmem:[%s14121_s8 + $0x30] sm:$0xff] }
0x2ad8   :  { %9428 = vmatmul.mubr.msk.f32.gmra.mrb[74].mxu1 %vm390_vm0, %v13564_v23  ;;  %9430 = vmatmul.mubr.msk.f32.gmra.mrb[80].mxu0 %vm390_vm0, %v13564_v23  ;;  %v8192_v24 = vld [vmem:[%s14121_s8 + $0x38] sm:$0xff]  ;;  %v8210_v16 = vld [vmem:[%s14121_s8 + $0xc8] sm:$0xff]  ;;  %v8241_v29 = vld [vmem:[%s14121_s8 + $0x1c0] sm:$0xff] }
0x2ad9   :  { %11215 = vmatpush1.bf16.msra.mxu1 %v11214_v53  ;;  %11223 = vmatpush1.bf16.msra.mxu0 %v11222_v28  ;;  %v11288_v53 = vpack.c.bf16 %v8234_v17, %v8233_v31  ;;  %v8217_v28 = vld [vmem:[%s14121_s8 + $0x100] sm:$0xff]  ;;  %v8242_v20 = vld [vmem:[%s14121_s8 + $0x1c8] sm:$0xff]  ;;  %v11272_v31 = vpack.c.bf16 %v8210_v16, %v8209_v54 }
0x2ada   :  { %7755 = vmatprep.mubr.f32.mxu1 %v14118_v10  ;;  %7832 = vmatprep.mubr.f32.mxu0 %v14118_v10  ;;  %v11290_v48 = vpack.c.bf16 %v8218_v39, %v8217_v28  ;;  %v11304_v17 = vpack.c.bf16 %v8242_v20, %v8241_v29  ;;  %v11274_v28 = vpack.c.bf16 %v8194_v30, %v8193_v62  ;;  %v8298_v54 = vld [vmem:[%s14121_s8 + $0x388] sm:$0xff]  ;;  %v13704_v29 = vld [vmem:[%s14122_s24] sm:$0xff] }
0x2adb   :  { %11225 = vmatprep.subr.bf16.mxu1 %v11224_v41  ;;  %11233 = vmatprep.subr.bf16.mxu0 %v11232_v9  ;;  %v8236_v41 = vld [vmem:[%s14121_s8 + $0x198] sm:$0xff]  ;;  %v11258_v9 = vpack.c.bf16 %v8186_v36, %v8185_v51  ;;  %v8211_v51 = vld [vmem:[%s14121_s8 + $0xd0] sm:$0xff]  ;;  %v7454_v20 = vrot.slane %v13704_v29, %v12903_v0  ;;  %v7466_v62 = vrot.slane %v13704_v29, %v12915_v4  ;;  %v8249_v30 = vld [vmem:[%s14121_s8 + $0x200] sm:$0xff] }
0x2adc   :  { %9431 = vmatmul.mubr.msk.f32.vlgmr.msra.gmra.mrb[76].mxu1 %vm390_vm0, %v13549_v26  ;;  %9433 = vmatmul.mubr.msk.f32.vlgmr.msra.gmra.mrb[82].mxu0 %vm390_vm0, %v13549_v26  ;;  %v8212_v36 = vld [vmem:[%s14121_s8 + $0xd8] sm:$0xff] }
0x2add   :  { %11227 = vmatpush1.bf16.msra.mxu1 %v11226_v2  ;;  %11235 = vmatpush1.bf16.msra.mxu0 %v11234_v43  ;;  %v11292_v2 = vpack.c.bf16 %v8236_v41, %v8235_v63  ;;  %v8219_v43 = vld [vmem:[%s14121_s8 + $0x110] sm:$0xff]  ;;  %v11276_v63 = vpack.c.bf16 %v8212_v36, %v8211_v51  ;;  %v8282_v51 = vld [vmem:[%s14121_s8 + $0x308] sm:$0xff] }
0x2ade   :  { %7761 = vmatprep.mubr.f32.mxu1 %v14118_v10  ;;  %7838 = vmatprep.mubr.f32.mxu0 %v14118_v10  ;;  %v11294_v21 = vpack.c.bf16 %v8220_v56, %v8219_v43  ;;  %v11278_v43 = vpack.c.bf16 %v8196_v42, %v8195_v18  ;;  %v8267_v36 = vld [vmem:[%s14121_s8 + $0x290] sm:$0xff]  ;;  %v8268_v18 = vld [vmem:[%s14121_s8 + $0x298] sm:$0xff] }
0x2adf   :  { %11229 = vmatprep.subr.bf16.mxu1 %v11228_v57  ;;  %11237 = vmatprep.subr.bf16.mxu0 %v11236_v58  ;;  %v8238_v57 = vld [vmem:[%s14121_s8 + $0x1a8] sm:$0xff]  ;;  %v11262_v58 = vpack.c.bf16 %v8188_v46, %v8187_v49  ;;  %v8213_v49 = vld [vmem:[%s14121_s8 + $0xe0] sm:$0xff]  ;;  %v8299_v42 = vld [vmem:[%s14121_s8 + $0x390] sm:$0xff] }
0x2ae0   :  { %9432 = vmatmul.mubr.msk.f32.gmra.mrb[78].mxu1 %vm390_vm0, %v13564_v23  ;;  %9434 = vmatmul.mubr.msk.f32.gmra.mrb[84].mxu0 %vm390_vm0, %v13564_v23  ;;  %v8214_v46 = vld [vmem:[%s14121_s8 + $0xe8] sm:$0xff] }
0x2ae1   :  { %11231 = vmatpush1.bf16.msra.mxu1 %v11230_v19  ;;  %11239 = vmatpush1.bf16.msra.mxu0 %v11238_v60  ;;  %v11296_v19 = vpack.c.bf16 %v8238_v57, %v8237_v15  ;;  %v8221_v60 = vld [vmem:[%s14121_s8 + $0x120] sm:$0xff]  ;;  %v11280_v55 = vpack.c.bf16 %v8214_v46, %v8213_v49  ;;  %v8198_v57 = vld [vmem:[%s14121_s8 + $0x68] sm:$0xff]  ;;  %v13724_v46 = vrot.slane %v13704_v29, %v12928_v5 }
0x2ae2   :  { %7909 = vmatprep.mubr.f32.mxu1 %v14118_v10  ;;  %7986 = vmatprep.mubr.f32.mxu0 %v14118_v10 }
0x2ae3   :  { %11241 = vmatprep.subr.bf16.mxu1 %v11240_v11  ;;  %11249 = vmatprep.subr.bf16.mxu0 %v11248_v13  ;;  %v11266_v11 = vpack.c.bf16 %v8190_v8, %v8189_v59  ;;  %v11298_v13 = vpack.c.bf16 %v8222_v61, %v8221_v60  ;;  %v11282_v59 = vpack.c.bf16 %v8198_v57, %v8197_v52  ;;  %v8247_v60 = vld [vmem:[%s14121_s8 + $0x1f0] sm:$0xff]  ;;  %v8252_v57 = vld [vmem:[%s14121_s8 + $0x218] sm:$0xff] }
0x2ae4   :  { %9435 = vmatmul.mubr.msk.f32.vlgmr.msra.gmra.mrb[80].mxu1 %vm390_vm0, %v13549_v26  ;;  %9437 = vmatmul.mubr.msk.f32.vlgmr.msra.gmra.mrb[86].mxu0 %vm390_vm0, %v13549_v26 }
0x2ae5   :  { %11243 = vmatpush1.bf16.msra.mxu1 %v11242_v44  ;;  %11251 = vmatpush1.bf16.msra.mxu0 %v11250_v37  ;;  %v8223_v44 = vld [vmem:[%s14121_s8 + $0x130] sm:$0xff]  ;;  %v8224_v37 = vld [vmem:[%s14121_s8 + $0x138] sm:$0xff] }
0x2ae6   :  { %7915 = vmatprep.mubr.f32.mxu1 %v14118_v10  ;;  %7992 = vmatprep.mubr.f32.mxu0 %v14118_v10 }
0x2ae7   :  { %11245 = vmatprep.subr.bf16.mxu1 %v11244_v38  ;;  %11253 = vmatprep.subr.bf16.mxu0 %v11252_v27  ;;  %v11270_v38 = vpack.c.bf16 %v8192_v24, %v8191_v6  ;;  %v11302_v27 = vpack.c.bf16 %v8224_v37, %v8223_v44  ;;  %v8232_v6 = vld [vmem:[%s14121_s8 + $0x178] sm:$0xff]  ;;  %v8297_v44 = vld [vmem:[%s14121_s8 + $0x380] sm:$0xff] }
0x2ae8   :  { %9436 = vmatmul.mubr.msk.f32.gmra.mrb[82].mxu1 %vm390_vm0, %v13564_v23  ;;  %9438 = vmatmul.mubr.msk.f32.gmra.mrb[88].mxu0 %vm390_vm0, %v13564_v23  ;;  %v11352_v16 = vpack.c.bf16 %v8298_v54, %v8297_v44 }
0x2ae9   :  { %11247 = vmatpush1.bf16.msra.mxu1 %v11246_v50  ;;  %11255 = vmatpush1.bf16.msra.mxu0 %v11254_v34  ;;  %v8225_v50 = vld [vmem:[%s14121_s8 + $0x140] sm:$0xff]  ;;  %v8226_v34 = vld [vmem:[%s14121_s8 + $0x148] sm:$0xff] }
0x2aea   :  { %8063 = vmatprep.mubr.f32.mxu1 %v14118_v10  ;;  %8140 = vmatprep.mubr.f32.mxu0 %v14118_v10  ;;  %v11306_v39 = vpack.c.bf16 %v8226_v34, %v8225_v50  ;;  %v8281_v34 = vld [vmem:[%s14121_s8 + $0x300] sm:$0xff] }
0x2aeb   :  { %11257 = vmatprep.subr.bf16.mxu1 %v11256_v22  ;;  %11289 = vmatprep.subr.bf16.mxu0 %v11288_v53  ;;  %v8243_v22 = vld [vmem:[%s14121_s8 + $0x1d0] sm:$0xff]  ;;  %v8244_v53 = vld [vmem:[%s14121_s8 + $0x1d8] sm:$0xff]  ;;  %v11354_v49 = vpack.c.bf16 %v8282_v51, %v8281_v34  ;;  %v8286_v34 = vld [vmem:[%s14121_s8 + $0x328] sm:$0xff] }
0x2aec   :  { %9439 = vmatmul.mubr.msk.f32.vlgmr.msra.gmra.mrb[84].mxu1 %vm390_vm0, %v13549_v26  ;;  %9441 = vmatmul.mubr.msk.f32.vlgmr.msra.gmra.mrb[90].mxu0 %vm390_vm0, %v13549_v26  ;;  %v11308_v41 = vpack.c.bf16 %v8244_v53, %v8243_v22  ;;  %v8271_v51 = vld [vmem:[%s14121_s8 + $0x2b0] sm:$0xff] }
0x2aed   :  { %8069 = vmatprep.mubr.f32.mxu1 %v14118_v10  ;;  %8146 = vmatprep.mubr.f32.mxu0 %v14118_v10  ;;  %v8208_v10 = vld [vmem:[%s14121_s8 + $0xb8] sm:$0xff] }
0x2aee   :  { %11259 = vmatpush3.bf16.msra.mxu1 %v11258_v9  ;;  %11291 = vmatpush3.bf16.msra.mxu0 %v11290_v48  ;;  %v11268_v40 = vpack.c.bf16 %v8208_v10, %v8207_v7  ;;  %v8227_v9 = vld [vmem:[%s14121_s8 + $0x150] sm:$0xff]  ;;  %v8228_v48 = vld [vmem:[%s14121_s8 + $0x158] sm:$0xff] }
0x2aef   :  { %11261 = vmatprep.subr.bf16.mxu1 %v11260_v47  ;;  %11293 = vmatprep.subr.bf16.mxu0 %v11292_v2  ;;  %v8245_v47 = vld [vmem:[%s14121_s8 + $0x1e0] sm:$0xff]  ;;  %v8246_v2 = vld [vmem:[%s14121_s8 + $0x1e8] sm:$0xff]  ;;  %v11310_v56 = vpack.c.bf16 %v8228_v48, %v8227_v9  ;;  %v8248_v7 = vld [vmem:[%s14121_s8 + $0x1f8] sm:$0xff] }
0x2af0   :  { %9440 = vmatmul.mubr.msk.f32.gmra.mrb[86].mxu1 %vm390_vm0, %v13564_v23  ;;  %9442 = vmatmul.mubr.msk.f32.gmra.mrb[92].mxu0 %vm390_vm0, %v13564_v23  ;;  %v11312_v15 = vpack.c.bf16 %v8246_v2, %v8245_v47  ;;  %v8199_v10 = vld [vmem:[%s14121_s8 + $0x70] sm:$0xff]  ;;  %v11316_v12 = vpack.c.bf16 %v8248_v7, %v8247_v60  ;;  %v8269_v7 = vld [vmem:[%s14121_s8 + $0x2a0] sm:$0xff] }
0x2af1   :  { %v8251_v47 = vld [vmem:[%s14121_s8 + $0x210] sm:$0xff] }
0x2af2   :  { %11263 = vmatpush3.bf16.msra.mxu1 %v11262_v58  ;;  %11295 = vmatpush3.bf16.msra.mxu0 %v11294_v21  ;;  %v8229_v58 = vld [vmem:[%s14121_s8 + $0x160] sm:$0xff]  ;;  %v8230_v21 = vld [vmem:[%s14121_s8 + $0x168] sm:$0xff]  ;;  %v11326_v54 = vpack.c.bf16 %v8252_v57, %v8251_v47  ;;  %v8256_v47 = vld [vmem:[%s14121_s8 + $0x238] sm:$0xff] }
0x2af3   :  { %11265 = vmatprep.subr.bf16.mxu1 %v11264_v25  ;;  %11297 = vmatprep.subr.bf16.mxu0 %v11296_v19  ;;  %v11314_v8 = vpack.c.bf16 %v8230_v21, %v8229_v58  ;;  %v8215_v25 = vld [vmem:[%s14121_s8 + $0xf0] sm:$0xff]  ;;  %v8216_v19 = vld [vmem:[%s14121_s8 + $0xf8] sm:$0xff]  ;;  %v8273_v57 = vld [vmem:[%s14121_s8 + $0x2c0] sm:$0xff] }
0x2af4   :  { %v11284_v61 = vpack.c.bf16 %v8216_v19, %v8215_v25  ;;  %v8283_v58 = vld [vmem:[%s14121_s8 + $0x310] sm:$0xff] }
0x2af6   :  { %11267 = vmatpush3.bf16.msra.mxu1 %v11266_v11  ;;  %11299 = vmatpush3.bf16.msra.mxu0 %v11298_v13  ;;  %v11286_v11 = vpack.c.bf16 %v8200_v14, %v8199_v10  ;;  %v8231_v13 = vld [vmem:[%s14121_s8 + $0x170] sm:$0xff] }
0x2af7   :  { %11269 = vmatprep.subr.bf16.mxu1 %v11268_v40  ;;  %11301 = vmatprep.subr.bf16.mxu0 %v11300_v33  ;;  %v11318_v24 = vpack.c.bf16 %v8232_v6, %v8231_v13  ;;  %v8265_v40 = vld [vmem:[%s14121_s8 + $0x280] sm:$0xff]  ;;  %v8266_v33 = vld [vmem:[%s14121_s8 + $0x288] sm:$0xff] }
0x2af8   :  { %v11320_v37 = vpack.c.bf16 %v8266_v33, %v8265_v40  ;;  %v8301_v13 = vld [vmem:[%s14121_s8 + $0x3a0] sm:$0xff]  ;;  %v8302_v6 = vld [vmem:[%s14121_s8 + $0x3a8] sm:$0xff] }
0x2afa   :  { %11271 = vmatpush3.bf16.msra.mxu1 %v11270_v38  ;;  %11303 = vmatpush3.bf16.msra.mxu0 %v11302_v27  ;;  %v7462_v38 = vrot.slane %v13704_v29, %v12906_v1  ;;  %v7458_v27 = vrot.slane %v13704_v29, %v12912_v3 }
0x2afb   :  { %11273 = vmatprep.subr.bf16.mxu1 %v11272_v31  ;;  %11305 = vmatprep.subr.bf16.mxu0 %v11304_v17  ;;  %v8250_v31 = vld [vmem:[%s14121_s8 + $0x208] sm:$0xff] }
0x2afc   :  { %v11322_v48 = vpack.c.bf16 %v8250_v31, %v8249_v30 }
0x2afe   :  { %11275 = vmatpush3.bf16.msra.mxu1 %v11274_v28  ;;  %11307 = vmatpush3.bf16.msra.mxu0 %v11306_v39 }
0x2aff   :  { %11277 = vmatprep.subr.bf16.mxu1 %v11276_v63  ;;  %11309 = vmatprep.subr.bf16.mxu0 %v11308_v41  ;;  %v8300_v63 = vld [vmem:[%s14121_s8 + $0x398] sm:$0xff] }
0x2b02   :  { %11279 = vmatpush3.bf16.msra.mxu1 %v11278_v43  ;;  %11311 = vmatpush3.bf16.msra.mxu0 %v11310_v56 }
0x2b03   :  { %11281 = vmatprep.subr.bf16.mxu1 %v11280_v55  ;;  %11313 = vmatprep.subr.bf16.mxu0 %v11312_v15  ;;  %v11324_v55 = vpack.c.bf16 %v8268_v18, %v8267_v36  ;;  %v11356_v15 = vpack.c.bf16 %v8300_v63, %v8299_v42 }
0x2b06   :  { %11283 = vmatpush3.bf16.msra.mxu1 %v11282_v59  ;;  %11315 = vmatpush3.bf16.msra.mxu0 %v11314_v8 }
0x2b07   :  { %11285 = vmatprep.subr.bf16.mxu1 %v11284_v61  ;;  %11317 = vmatprep.subr.bf16.mxu0 %v11316_v12  ;;  %v8284_v61 = vld [vmem:[%s14121_s8 + $0x318] sm:$0xff]  ;;  %v13733_v12 = vrot.slane %v13704_v29, %v12937_v32 }
0x2b0a   :  { %11287 = vmatpush3.bf16.msra.mxu1 %v11286_v11  ;;  %11319 = vmatpush3.bf16.msra.mxu0 %v11318_v24  ;;  %v8270_v11 = vld [vmem:[%s14121_s8 + $0x2a8] sm:$0xff]  ;;  %v8253_v24 = vld [vmem:[%s14121_s8 + $0x220] sm:$0xff] }
0x2b0b   :  { %11321 = vmatprep.subr.bf16.mxu1 %v11320_v37  ;;  %11353 = vmatprep.subr.bf16.mxu0 %v11352_v16  ;;  %v11358_v16 = vpack.c.bf16 %v8284_v61, %v8283_v58  ;;  %v8274_v58 = vld [vmem:[%s14121_s8 + $0x2c8] sm:$0xff]  ;;  %v8257_v61 = vld [vmem:[%s14121_s8 + $0x240] sm:$0xff] }
0x2ba7   :  { %v7603_v17 = vpop.f32.mrb[72].mxu1  ;;  %v7680_v50 = vpop.f32.mrb[78].mxu0 }
0x2ba8   :  { %v7604_v22 = vadd.f32 %v7603_v17, %v7454_v20  ;;  %v7681_v53 = vadd.f32 %v7680_v50, %v7462_v38  ;;  %v7605_v28 = vpop.f32.mrb[73].mxu1  ;;  %v7682_v39 = vpop.f32.mrb[79].mxu0  ;;  %v11328_v17 = vpack.c.bf16 %v8270_v11, %v8269_v7  ;;  %v11360_v50 = vpack.c.bf16 %v8302_v6, %v8301_v13  ;;  %v8258_v7 = vld [vmem:[%s14121_s8 + $0x248] sm:$0xff]  ;;  %v8289_v6 = vld [vmem:[%s14121_s8 + $0x340] sm:$0xff] }
0x2ba9   :  { %v7606_v41 = vadd.f32 %v7605_v28, %v7458_v27  ;;  %v7683_v9 = vadd.f32 %v7682_v39, %v7466_v62  ;;  %v8303_v28 = vld [vmem:[%s14121_s8 + $0x3b0] sm:$0xff]  ;;  %v8304_v39 = vld [vmem:[%s14121_s8 + $0x3b8] sm:$0xff]  ;;  %v11336_v11 = vpack.c.bf16 %v8274_v58, %v8273_v57  ;;  %v8293_v58 = vld [vmem:[%s14121_s8 + $0x360] sm:$0xff] }
0x2baa   :  { %v8153_v21 = vmax.f32 %v7604_v22, 0.0  ;;  %v8155_v59 = vmax.f32 %v7681_v53, 0.0  ;;  %v8272_v53 = vld [vmem:[%s14121_s8 + $0x2b8] sm:$0xff] }
0x2bab   :  { %v8154_v2 = vmax.f32 %v7606_v41, 0.0  ;;  %v8156_v43 = vmax.f32 %v7683_v9, 0.0  ;;  %v7609_v56 = vpop.f32.mrb[74].mxu1  ;;  %v7686_v52 = vpop.f32.mrb[80].mxu0 }
0x2bac   :  { %v7610_v8 = vadd.f32 %v7609_v56, %v7454_v20  ;;  %v7687_v25 = vadd.f32 %v7686_v52, %v7462_v38  ;;  %v7611_v19 = vpop.f32.mrb[75].mxu1  ;;  %v7688_v60 = vpop.f32.mrb[81].mxu0  ;;  %v8254_v20 = vld [vmem:[%s14121_s8 + $0x228] sm:$0xff]  ;;  %v8285_v38 = vld [vmem:[%s14121_s8 + $0x320] sm:$0xff]  ;;  %v11332_v56 = vpack.c.bf16 %v8272_v53, %v8271_v51  ;;  %v11364_v52 = vpack.c.bf16 %v8304_v39, %v8303_v28 }
0x2bad   :  { %v7612_v10 = vadd.f32 %v7611_v19, %v7458_v27  ;;  %v7689_v14 = vadd.f32 %v7688_v60, %v7466_v62  ;;  %8512 = vmatprep.mubr.f32.mxu1 %v8154_v2  ;;  %8587 = vmatprep.mubr.f32.mxu0 %v8156_v43  ;;  %v11330_v9 = vpack.c.bf16 %v8254_v20, %v8253_v24  ;;  %v8290_v24 = vld [vmem:[%s14121_s8 + $0x348] sm:$0xff]  ;;  %v8277_v53 = vld [vmem:[%s14121_s8 + $0x2e0] sm:$0xff] }
0x2bae   :  { %8513 = vmatmul.mubr.f32.vlgmr.msra.gmra.mrb[88].mxu1 %v8153_v21  ;;  %8588 = vmatmul.mubr.f32.vlgmr.msra.gmra.mrb[94].mxu0 %v8155_v59  ;;  %v8169_v27 = vmax.f32 %v7610_v8, 0.0  ;;  %v8171_v62 = vmax.f32 %v7687_v25, 0.0  ;;  %v8305_v21 = vld [vmem:[%s14121_s8 + $0x3c0] sm:$0xff]  ;;  %v8306_v59 = vld [vmem:[%s14121_s8 + $0x3c8] sm:$0xff] }
0x2baf   :  { %v8170_v40 = vmax.f32 %v7612_v10, 0.0  ;;  %v8172_v33 = vmax.f32 %v7689_v14, 0.0  ;;  %11323 = vmatpush3.bf16.msra.mxu1 %v11322_v48  ;;  %11355 = vmatpush3.bf16.msra.mxu0 %v11354_v49  ;;  %v13739_v44 = vpop.f32.mrb[76].mxu1  ;;  %v13741_v37 = vpop.f32.mrb[82].mxu0  ;;  %v11362_v48 = vpack.c.bf16 %v8286_v34, %v8285_v38  ;;  %v8255_v49 = vld [vmem:[%s14121_s8 + $0x230] sm:$0xff]  ;;  %v11368_v13 = vpack.c.bf16 %v8306_v59, %v8305_v21  ;;  %v8278_v28 = vld [vmem:[%s14121_s8 + $0x2e8] sm:$0xff] }
0x2bb0   :  { %v7759_v30 = vpop.f32.mrb[77].mxu1  ;;  %v7836_v31 = vpop.f32.mrb[83].mxu0  ;;  %11325 = vmatprep.subr.bf16.mxu1 %v11324_v55  ;;  %11357 = vmatprep.subr.bf16.mxu0 %v11356_v15  ;;  %v8287_v55 = vld [vmem:[%s14121_s8 + $0x330] sm:$0xff]  ;;  %v8288_v15 = vld [vmem:[%s14121_s8 + $0x338] sm:$0xff]  ;;  %v11334_v19 = vpack.c.bf16 %v8256_v47, %v8255_v49  ;;  %v8309_v39 = vld [vmem:[%s14121_s8 + $0x3e0] sm:$0xff] }
0x2bb1   :  { %v7760_v36 = vadd.f32 %v7759_v30, %v13724_v46  ;;  %v7837_v22 = vadd.f32 %v7836_v31, %v13733_v12  ;;  %8517 = vmatprep.mubr.f32.mxu1 %v8170_v40  ;;  %8592 = vmatprep.mubr.f32.mxu0 %v8172_v33  ;;  %v11366_v60 = vpack.c.bf16 %v8288_v15, %v8287_v55  ;;  %v8275_v40 = vld [vmem:[%s14121_s8 + $0x2d0] sm:$0xff]  ;;  %v8276_v33 = vld [vmem:[%s14121_s8 + $0x2d8] sm:$0xff]  ;;  %v8261_v47 = vld [vmem:[%s14121_s8 + $0x260] sm:$0xff] }
0x2bb2   :  { %8518 = vmatmul.mubr.f32.gmra.mrb[90].mxu1 %v8169_v27  ;;  %8593 = vmatmul.mubr.f32.gmra.mrb[96].mxu0 %v8171_v62  ;;  %v11338_v27 = vpack.c.bf16 %v8258_v7, %v8257_v61  ;;  %v11370_v62 = vpack.c.bf16 %v8290_v24, %v8289_v6  ;;  %v8259_v30 = vld [vmem:[%s14121_s8 + $0x250] sm:$0xff]  ;;  %v8260_v31 = vld [vmem:[%s14121_s8 + $0x258] sm:$0xff]  ;;  %v11340_v34 = vpack.c.bf16 %v8276_v33, %v8275_v40  ;;  %v8294_v21 = vld [vmem:[%s14121_s8 + $0x368] sm:$0xff] }
0x2bb3   :  { %v8158_v18 = vmax.f32 %v7760_v36, 0.0  ;;  %v8160_v42 = vmax.f32 %v7837_v22, 0.0  ;;  %11327 = vmatpush3.bf16.msra.mxu1 %v11326_v54  ;;  %11359 = vmatpush3.bf16.msra.mxu0 %v11358_v16  ;;  %v13752_v63 = vpop.f32.mrb[78].mxu1  ;;  %v13754_v41 = vpop.f32.mrb[84].mxu0  ;;  %v8307_v54 = vld [vmem:[%s14121_s8 + $0x3d0] sm:$0xff]  ;;  %v8308_v16 = vld [vmem:[%s14121_s8 + $0x3d8] sm:$0xff]  ;;  %v11344_v15 = vpack.c.bf16 %v8278_v28, %v8277_v53  ;;  %v7470_v7 = vrot.slane %v13704_v29, %v13018_v35 }
0x2bb4   :  { %v13758_v2 = vpop.f32.mrb[79].mxu1  ;;  %v13760_v43 = vpop.f32.mrb[85].mxu0  ;;  %11329 = vmatprep.subr.bf16.mxu1 %v11328_v17  ;;  %11361 = vmatprep.subr.bf16.mxu0 %v11360_v50  ;;  %v11372_v51 = vpack.c.bf16 %v8308_v16, %v8307_v54  ;;  %v8291_v36 = vld [vmem:[%s14121_s8 + $0x350] sm:$0xff]  ;;  %v8292_v22 = vld [vmem:[%s14121_s8 + $0x358] sm:$0xff]  ;;  %v11378_v24 = vpack.c.bf16 %v8294_v21, %v8293_v58  ;;  %v7478_v16 = vrot.slane %v13704_v29, %v13027_v45  ;;  %v8362_v53 = vld [vmem:[%s14121_s8 + $0x588] sm:$0xff] }
0x2bb5   :  { %8662 = vmatprep.mubr.f32.mxu1 %v8158_v18  ;;  %8737 = vmatprep.mubr.f32.mxu0 %v8160_v42  ;;  %v8310_v18 = vld [vmem:[%s14121_s8 + $0x3e8] sm:$0xff]  ;;  %v11374_v49 = vpack.c.bf16 %v8292_v22, %v8291_v36  ;;  %v8279_v59 = vld [vmem:[%s14121_s8 + $0x2f0] sm:$0xff]  ;;  %v8312_v61 = vld [vmem:[%s14121_s8 + $0x3f8] sm:$0xff] }
0x2bb6   :  { %v11376_v57 = vpack.c.bf16 %v8310_v18, %v8309_v39  ;;  %v8263_v40 = vld [vmem:[%s14121_s8 + $0x270] sm:$0xff]  ;;  %v8264_v33 = vld [vmem:[%s14121_s8 + $0x278] sm:$0xff]  ;;  %v8330_v36 = vld [vmem:[%s14121_s8 + $0x488] sm:$0xff]  ;;  %v7835_v58 = vadd.f32 %v13741_v37, %v7478_v16 }
0x2bb7   :  { %11331 = vmatpush3.bf16.msra.mxu1 %v11330_v9  ;;  %11363 = vmatpush3.bf16.msra.mxu0 %v11362_v48  ;;  %v13768_v8 = vpop.f32.mrb[80].mxu1  ;;  %v13770_v25 = vpop.f32.mrb[86].mxu0  ;;  %v11342_v48 = vpack.c.bf16 %v8260_v31, %v8259_v30  ;;  %v8295_v54 = vld [vmem:[%s14121_s8 + $0x370] sm:$0xff]  ;;  %v8361_v22 = vld [vmem:[%s14121_s8 + $0x580] sm:$0xff]  ;;  %v13837_v28 = vld [vmem:[%s14122_s24 + $0x8] sm:$0xff]  ;;  %v11350_v18 = vpack.c.bf16 %v8264_v33, %v8263_v40 }
0x2bb8   :  { %v13774_v10 = vpop.f32.mrb[81].mxu1  ;;  %v13776_v14 = vpop.f32.mrb[87].mxu0  ;;  %11333 = vmatprep.subr.bf16.mxu1 %v11332_v56  ;;  %11365 = vmatprep.subr.bf16.mxu0 %v11364_v52  ;;  %v8262_v56 = vld [vmem:[%s14121_s8 + $0x268] sm:$0xff]  ;;  %v8313_v29 = vld [vmem:[%s14121_s8 + $0x400] sm:$0xff]  ;;  %v11416_v21 = vpack.c.bf16 %v8362_v53, %v8361_v22  ;;  %v8348_v22 = vld [vmem:[%s14121_s8 + $0x518] sm:$0xff] }
0x2bb9   :  { %v11346_v6 = vpack.c.bf16 %v8262_v56, %v8261_v47  ;;  %v8314_v39 = vld [vmem:[%s14121_s8 + $0x408] sm:$0xff]  ;;  %v8345_v47 = vld [vmem:[%s14121_s8 + $0x500] sm:$0xff] }
0x2bba   :  { %v8346_v56 = vld [vmem:[%s14121_s8 + $0x508] sm:$0xff]  ;;  %v11386_v37 = vpack.c.bf16 %v8314_v39, %v8313_v29  ;;  %v8317_v39 = vld [vmem:[%s14121_s8 + $0x420] sm:$0xff] }
0x2bbb   :  { %11335 = vmatpush3.bf16.msra.mxu1 %v11334_v19  ;;  %11367 = vmatpush3.bf16.msra.mxu0 %v11366_v60  ;;  %v13784_v20 = vpop.f32.mrb[82].mxu1  ;;  %v13786_v38 = vpop.f32.mrb[88].mxu0  ;;  %v8280_v19 = vld [vmem:[%s14121_s8 + $0x2f8] sm:$0xff]  ;;  %v8311_v60 = vld [vmem:[%s14121_s8 + $0x3f0] sm:$0xff]  ;;  %v11418_v40 = vpack.c.bf16 %v8346_v56, %v8345_v47 }
0x2bbc   :  { %v13790_v17 = vpop.f32.mrb[83].mxu1  ;;  %v13792_v50 = vpop.f32.mrb[89].mxu0  ;;  %11337 = vmatprep.subr.bf16.mxu1 %v11336_v11  ;;  %11369 = vmatprep.subr.bf16.mxu0 %v11368_v13  ;;  %v11348_v30 = vpack.c.bf16 %v8280_v19, %v8279_v59  ;;  %v11380_v31 = vpack.c.bf16 %v8312_v61, %v8311_v60  ;;  %v8332_v59 = vld [vmem:[%s14121_s8 + $0x498] sm:$0xff]  ;;  %v8363_v19 = vld [vmem:[%s14121_s8 + $0x590] sm:$0xff]  ;;  %v7766_v61 = vadd.f32 %v13758_v2, %v13724_v46 }
0x2bbd   :  { %v8364_v60 = vld [vmem:[%s14121_s8 + $0x598] sm:$0xff] }
0x2bbe   :  { %v11420_v2 = vpack.c.bf16 %v8364_v60, %v8363_v19  ;;  %v8368_v19 = vld [vmem:[%s14121_s8 + $0x5b8] sm:$0xff] }
0x2bbf   :  { %11339 = vmatpush3.bf16.msra.mxu1 %v11338_v27  ;;  %11371 = vmatpush3.bf16.msra.mxu0 %v11370_v62  ;;  %v13800_v42 = vpop.f32.mrb[84].mxu1  ;;  %v13802_v9 = vpop.f32.mrb[90].mxu0 }
0x2bc0   :  { %v13806_v52 = vpop.f32.mrb[85].mxu1  ;;  %v13808_v55 = vpop.f32.mrb[91].mxu0  ;;  %11341 = vmatprep.subr.bf16.mxu1 %v11340_v34  ;;  %11373 = vmatprep.subr.bf16.mxu0 %v11372_v51  ;;  %v8296_v34 = vld [vmem:[%s14121_s8 + $0x378] sm:$0xff]  ;;  %v8329_v51 = vld [vmem:[%s14121_s8 + $0x480] sm:$0xff] }
0x2bc3   :  { %11343 = vmatpush3.bf16.msra.mxu1 %v11342_v48  ;;  %11375 = vmatpush3.bf16.msra.mxu0 %v11374_v49  ;;  %v13818_v11 = vpop.f32.mrb[86].mxu1  ;;  %v13820_v13 = vpop.f32.mrb[92].mxu0  ;;  %v11382_v48 = vpack.c.bf16 %v8296_v34, %v8295_v54  ;;  %v11384_v49 = vpack.c.bf16 %v8330_v36, %v8329_v51  ;;  %v8316_v54 = vld [vmem:[%s14121_s8 + $0x418] sm:$0xff]  ;;  %v8347_v36 = vld [vmem:[%s14121_s8 + $0x510] sm:$0xff] }
0x2bc4   :  { %v13827_v27 = vpop.f32.mrb[87].mxu1  ;;  %v13829_v62 = vpop.f32.mrb[93].mxu0  ;;  %11345 = vmatprep.subr.bf16.mxu1 %v11344_v15  ;;  %11377 = vmatprep.subr.bf16.mxu0 %v11376_v57  ;;  %v8331_v15 = vld [vmem:[%s14121_s8 + $0x490] sm:$0xff]  ;;  %v7758_v57 = vadd.f32 %v13739_v44, %v7470_v7  ;;  %v13859_v44 = vrot.slane %v13837_v28, %v12915_v4  ;;  %v11422_v29 = vpack.c.bf16 %v8348_v22, %v8347_v36  ;;  %v8353_v22 = vld [vmem:[%s14121_s8 + $0x540] sm:$0xff] }
0x2bc5   :  { %v11388_v46 = vpack.c.bf16 %v8332_v59, %v8331_v15  ;;  %v8315_v4 = vld [vmem:[%s14121_s8 + $0x410] sm:$0xff]  ;;  %v8349_v15 = vld [vmem:[%s14121_s8 + $0x520] sm:$0xff] }
0x2bc6   :  { %v8157_v33 = vmax.f32 %v7758_v57, 0.0  ;;  %v7991_v51 = vadd.f32 %v13776_v14, %v13859_v44  ;;  %v11390_v14 = vpack.c.bf16 %v8316_v54, %v8315_v4  ;;  %v8350_v57 = vld [vmem:[%s14121_s8 + $0x528] sm:$0xff]  ;;  %v8367_v59 = vld [vmem:[%s14121_s8 + $0x5b0] sm:$0xff] }
0x2bc7   :  { %11347 = vmatpush3.bf16.msra.mxu1 %v11346_v6  ;;  %11379 = vmatpush3.bf16.msra.mxu0 %v11378_v24  ;;  %v7843_v6 = vadd.f32 %v13760_v43, %v13733_v12  ;;  %v13855_v24 = vrot.slane %v13837_v28, %v12912_v3  ;;  %v8159_v12 = vmax.f32 %v7835_v58, 0.0  ;;  %v7764_v43 = vadd.f32 %v13752_v63, %v7470_v7  ;;  %v8333_v63 = vld [vmem:[%s14121_s8 + $0x4a0] sm:$0xff]  ;;  %v8335_v58 = vld [vmem:[%s14121_s8 + $0x4b0] sm:$0xff]  ;;  %v8370_v4 = vld [vmem:[%s14121_s8 + $0x5c8] sm:$0xff] }
0x2bc8   :  { %11349 = vmatprep.subr.bf16.mxu1 %v11348_v30  ;;  %11381 = vmatprep.subr.bf16.mxu0 %v11380_v31  ;;  %v7841_v3 = vadd.f32 %v13754_v41, %v7478_v16  ;;  %v8174_v30 = vmax.f32 %v7766_v61, 0.0  ;;  %v8334_v41 = vld [vmem:[%s14121_s8 + $0x4a8] sm:$0xff]  ;;  %v8365_v7 = vld [vmem:[%s14121_s8 + $0x5a0] sm:$0xff]  ;;  %v11426_v61 = vpack.c.bf16 %v8350_v57, %v8349_v15 }
0x2bc9   :  { %v8176_v31 = vmax.f32 %v7843_v6, 0.0  ;;  %v7914_v34 = vadd.f32 %v13774_v10, %v13855_v24  ;;  %v8366_v16 = vld [vmem:[%s14121_s8 + $0x5a8] sm:$0xff]  ;;  %v8173_v53 = vmax.f32 %v7764_v43, 0.0  ;;  %v11392_v47 = vpack.c.bf16 %v8334_v41, %v8333_v63  ;;  %v8319_v6 = vld [vmem:[%s14121_s8 + $0x430] sm:$0xff]  ;;  %v8373_v57 = vld [vmem:[%s14121_s8 + $0x5e0] sm:$0xff] }
0x2bca   :  { %v8175_v10 = vmax.f32 %v7841_v3, 0.0  ;;  %v11424_v56 = vpack.c.bf16 %v8366_v16, %v8365_v7  ;;  %v8338_v43 = vld [vmem:[%s14121_s8 + $0x4c8] sm:$0xff]  ;;  %v8369_v3 = vld [vmem:[%s14121_s8 + $0x5c0] sm:$0xff]  ;;  %v8339_v41 = vld [vmem:[%s14121_s8 + $0x4d0] sm:$0xff] }
0x2bcb   :  { %11351 = vmatpush3.bf16.msra.mxu1 %v11350_v18  ;;  %11383 = vmatpush3.bf16.msra.mxu0 %v11382_v48  ;;  %v8318_v18 = vld [vmem:[%s14121_s8 + $0x428] sm:$0xff]  ;;  %v8162_v48 = vmax.f32 %v7914_v34, 0.0  ;;  %v11432_v36 = vpack.c.bf16 %v8370_v4, %v8369_v3  ;;  %v8340_v7 = vld [vmem:[%s14121_s8 + $0x4d8] sm:$0xff]  ;;  %v8371_v16 = vld [vmem:[%s14121_s8 + $0x5d0] sm:$0xff] }
0x2bcc   :  { %11385 = vmatprep.subr.bf16.mxu1 %v11384_v49  ;;  %11417 = vmatprep.subr.bf16.mxu0 %v11416_v21  ;;  %v8164_v49 = vmax.f32 %v7991_v51, 0.0  ;;  %v8336_v21 = vld [vmem:[%s14121_s8 + $0x4b8] sm:$0xff]  ;;  %v11394_v60 = vpack.c.bf16 %v8318_v18, %v8317_v39  ;;  %v8322_v34 = vld [vmem:[%s14121_s8 + $0x448] sm:$0xff]  ;;  %v11404_v18 = vpack.c.bf16 %v8340_v7, %v8339_v41  ;;  %v8425_v41 = vld [vmem:[%s14121_s8 + $0x780] sm:$0xff] }
0x2bcd   :  { %v8354_v63 = vld [vmem:[%s14121_s8 + $0x548] sm:$0xff]  ;;  %v8324_v39 = vld [vmem:[%s14121_s8 + $0x458] sm:$0xff] }
0x2bce   :  { %8663 = vmatmul.mubr.f32.vlgmr.msra.gmra.mrb[92].mxu1 %v8157_v33  ;;  %8738 = vmatmul.mubr.f32.vlgmr.msra.gmra.mrb[98].mxu0 %v8159_v12  ;;  %v8352_v33 = vld [vmem:[%s14121_s8 + $0x538] sm:$0xff]  ;;  %v8337_v12 = vld [vmem:[%s14121_s8 + $0x4c0] sm:$0xff]  ;;  %v8342_v15 = vld [vmem:[%s14121_s8 + $0x4e8] sm:$0xff] }
0x2bcf   :  { %8667 = vmatprep.mubr.f32.mxu1 %v8174_v30  ;;  %8742 = vmatprep.mubr.f32.mxu0 %v8176_v31  ;;  %v8321_v31 = vld [vmem:[%s14121_s8 + $0x440] sm:$0xff]  ;;  %v11400_v51 = vpack.c.bf16 %v8338_v43, %v8337_v12  ;;  %v8376_v12 = vld [vmem:[%s14121_s8 + $0x5f8] sm:$0xff]  ;;  %v7486_v43 = vrot.slane %v13837_v28, %v12903_v0  ;;  %v8426_v7 = vld [vmem:[%s14121_s8 + $0x788] sm:$0xff] }
0x2bd0   :  { %11387 = vmatpush3.bf16.msra.mxu1 %v11386_v37  ;;  %11419 = vmatpush3.bf16.msra.mxu0 %v11418_v40  ;;  %v8320_v37 = vld [vmem:[%s14121_s8 + $0x438] sm:$0xff]  ;;  %v11396_v40 = vpack.c.bf16 %v8336_v21, %v8335_v58  ;;  %v8374_v58 = vld [vmem:[%s14121_s8 + $0x5e8] sm:$0xff] }
0x2bd1   :  { %11389 = vmatprep.subr.bf16.mxu1 %v11388_v46  ;;  %11421 = vmatprep.subr.bf16.mxu0 %v11420_v2  ;;  %v11428_v46 = vpack.c.bf16 %v8368_v19, %v8367_v59  ;;  %v8351_v2 = vld [vmem:[%s14121_s8 + $0x530] sm:$0xff]  ;;  %v11398_v54 = vpack.c.bf16 %v8320_v37, %v8319_v6  ;;  %v8325_v19 = vld [vmem:[%s14121_s8 + $0x460] sm:$0xff]  ;;  %v11440_v6 = vpack.c.bf16 %v8374_v58, %v8373_v57  ;;  %v8428_v57 = vld [vmem:[%s14121_s8 + $0x798] sm:$0xff] }
0x2bd2   :  { %8668 = vmatmul.mubr.f32.gmra.mrb[94].mxu1 %v8173_v53  ;;  %8743 = vmatmul.mubr.f32.gmra.mrb[100].mxu0 %v8175_v10  ;;  %v11430_v30 = vpack.c.bf16 %v8352_v33, %v8351_v2  ;;  %v8372_v53 = vld [vmem:[%s14121_s8 + $0x5d8] sm:$0xff]  ;;  %v11402_v10 = vpack.c.bf16 %v8322_v34, %v8321_v31  ;;  %v8357_v37 = vld [vmem:[%s14121_s8 + $0x560] sm:$0xff]  ;;  %v8375_v33 = vld [vmem:[%s14121_s8 + $0x5f0] sm:$0xff]  ;;  %v7494_v34 = vrot.slane %v13837_v28, %v12906_v1 }
0x2bd3   :  { %8812 = vmatprep.mubr.f32.mxu1 %v8162_v48  ;;  %8887 = vmatprep.mubr.f32.mxu0 %v8164_v49  ;;  %v11436_v48 = vpack.c.bf16 %v8372_v53, %v8371_v16  ;;  %v8355_v49 = vld [vmem:[%s14121_s8 + $0x550] sm:$0xff]  ;;  %v8344_v2 = vld [vmem:[%s14121_s8 + $0x4f8] sm:$0xff]  ;;  %v11444_v0 = vpack.c.bf16 %v8376_v12, %v8375_v33  ;;  %v8377_v16 = vld [vmem:[%s14121_s8 + $0x600] sm:$0xff]  ;;  %v7920_v58 = vadd.f32 %v13790_v17, %v13855_v24 }
0x2bd4   :  { %11391 = vmatpush3.bf16.msra.mxu1 %v11390_v14  ;;  %11423 = vmatpush3.bf16.msra.mxu0 %v11422_v29  ;;  %v11434_v14 = vpack.c.bf16 %v8354_v63, %v8353_v22  ;;  %v8323_v29 = vld [vmem:[%s14121_s8 + $0x450] sm:$0xff]  ;;  %v8393_v22 = vld [vmem:[%s14121_s8 + $0x680] sm:$0xff]  ;;  %v8394_v63 = vld [vmem:[%s14121_s8 + $0x688] sm:$0xff] }
0x2bd5   :  { %11393 = vmatprep.subr.bf16.mxu1 %v11392_v47  ;;  %11425 = vmatprep.subr.bf16.mxu0 %v11424_v56  ;;  %v8356_v47 = vld [vmem:[%s14121_s8 + $0x558] sm:$0xff]  ;;  %v8341_v56 = vld [vmem:[%s14121_s8 + $0x4e0] sm:$0xff]  ;;  %v11406_v21 = vpack.c.bf16 %v8324_v39, %v8323_v29  ;;  %v8359_v31 = vld [vmem:[%s14121_s8 + $0x570] sm:$0xff] }
0x2bd6   :  { %v11438_v59 = vpack.c.bf16 %v8356_v47, %v8355_v49  ;;  %v8378_v53 = vld [vmem:[%s14121_s8 + $0x608] sm:$0xff]  ;;  %v8409_v29 = vld [vmem:[%s14121_s8 + $0x700] sm:$0xff]  ;;  %v7989_v49 = vadd.f32 %v13770_v25, %v7494_v34  ;;  %v11480_v47 = vpack.c.bf16 %v8426_v7, %v8425_v41  ;;  %v8412_v33 = vld [vmem:[%s14121_s8 + $0x718] sm:$0xff] }
0x2bd7   :  { %v8410_v39 = vld [vmem:[%s14121_s8 + $0x708] sm:$0xff]  ;;  %v11450_v25 = vpack.c.bf16 %v8378_v53, %v8377_v16  ;;  %v8429_v12 = vld [vmem:[%s14121_s8 + $0x7a0] sm:$0xff]  ;;  %v8400_v41 = vld [vmem:[%s14121_s8 + $0x6b8] sm:$0xff] }
0x2bd8   :  { %11395 = vmatpush3.bf16.msra.mxu1 %v11394_v60  ;;  %11427 = vmatpush3.bf16.msra.mxu0 %v11426_v61  ;;  %v8326_v60 = vld [vmem:[%s14121_s8 + $0x468] sm:$0xff]  ;;  %v11408_v61 = vpack.c.bf16 %v8342_v15, %v8341_v56  ;;  %v8396_v56 = vld [vmem:[%s14121_s8 + $0x698] sm:$0xff]  ;;  %v8427_v15 = vld [vmem:[%s14121_s8 + $0x790] sm:$0xff] }
0x2bd9   :  { %11397 = vmatprep.subr.bf16.mxu1 %v11396_v40  ;;  %11429 = vmatprep.subr.bf16.mxu0 %v11428_v46  ;;  %v8358_v40 = vld [vmem:[%s14121_s8 + $0x568] sm:$0xff]  ;;  %v8343_v46 = vld [vmem:[%s14121_s8 + $0x4f0] sm:$0xff]  ;;  %v11410_v3 = vpack.c.bf16 %v8326_v60, %v8325_v19  ;;  %v11482_v19 = vpack.c.bf16 %v8410_v39, %v8409_v29  ;;  %v11484_v24 = vpack.c.bf16 %v8428_v57, %v8427_v15  ;;  %v8432_v16 = vld [vmem:[%s14121_s8 + $0x7b8] sm:$0xff] }
0x2bda   :  { %v11442_v4 = vpack.c.bf16 %v8358_v40, %v8357_v37  ;;  %v8431_v7 = vld [vmem:[%s14121_s8 + $0x7b0] sm:$0xff]  ;;  %v8434_v15 = vld [vmem:[%s14121_s8 + $0x7c8] sm:$0xff] }
0x2bdb   :  { %v11492_v39 = vpack.c.bf16 %v8432_v16, %v8431_v7 }
0x2bdc   :  { %11399 = vmatpush3.bf16.msra.mxu1 %v11398_v54  ;;  %11431 = vmatpush3.bf16.msra.mxu0 %v11430_v30  ;;  %v8327_v54 = vld [vmem:[%s14121_s8 + $0x470] sm:$0xff]  ;;  %v8328_v30 = vld [vmem:[%s14121_s8 + $0x478] sm:$0xff] }
0x2bdd   :  { %11401 = vmatprep.subr.bf16.mxu1 %v11400_v51  ;;  %11433 = vmatprep.subr.bf16.mxu0 %v11432_v36  ;;  %v11412_v51 = vpack.c.bf16 %v8344_v2, %v8343_v46  ;;  %v8360_v36 = vld [vmem:[%s14121_s8 + $0x578] sm:$0xff]  ;;  %v11414_v1 = vpack.c.bf16 %v8328_v30, %v8327_v54  ;;  %v8411_v2 = vld [vmem:[%s14121_s8 + $0x710] sm:$0xff]  ;;  %v8381_v54 = vld [vmem:[%s14121_s8 + $0x620] sm:$0xff] }
0x2bde   :  { %v8382_v30 = vld [vmem:[%s14121_s8 + $0x628] sm:$0xff] }
0x2bdf   :  { %v11458_v53 = vpack.c.bf16 %v8382_v30, %v8381_v54  ;;  %v8390_v54 = vld [vmem:[%s14121_s8 + $0x668] sm:$0xff] }
0x2be0   :  { %11403 = vmatpush3.bf16.msra.mxu1 %v11402_v10  ;;  %11435 = vmatpush3.bf16.msra.mxu0 %v11434_v14  ;;  %v11446_v10 = vpack.c.bf16 %v8360_v36, %v8359_v31  ;;  %v11448_v14 = vpack.c.bf16 %v8394_v63, %v8393_v22  ;;  %v8413_v36 = vld [vmem:[%s14121_s8 + $0x720] sm:$0xff]  ;;  %v8414_v22 = vld [vmem:[%s14121_s8 + $0x728] sm:$0xff]  ;;  %v8399_v63 = vld [vmem:[%s14121_s8 + $0x6b0] sm:$0xff] }
0x2be1   :  { %11405 = vmatprep.subr.bf16.mxu1 %v11404_v18  ;;  %11437 = vmatprep.subr.bf16.mxu0 %v11436_v48  ;;  %v8395_v18 = vld [vmem:[%s14121_s8 + $0x690] sm:$0xff]  ;;  %v7912_v48 = vadd.f32 %v13768_v8, %v7486_v43  ;;  %v13947_v8 = vrot.slane %v13837_v28, %v12937_v32  ;;  %v11460_v29 = vpack.c.bf16 %v8400_v41, %v8399_v63  ;;  %v8440_v63 = vld [vmem:[%s14121_s8 + $0x7f8] sm:$0xff] }
0x2be2   :  { %v11452_v17 = vpack.c.bf16 %v8396_v56, %v8395_v18  ;;  %v8379_v32 = vld [vmem:[%s14121_s8 + $0x610] sm:$0xff]  ;;  %v8433_v56 = vld [vmem:[%s14121_s8 + $0x7c0] sm:$0xff]  ;;  %v7502_v41 = vrot.slane %v13837_v28, %v13018_v35 }
0x2be3   :  { %v8161_v60 = vmax.f32 %v7912_v48, 0.0  ;;  %v8145_v46 = vadd.f32 %v13808_v55, %v13947_v8  ;;  %v8415_v18 = vld [vmem:[%s14121_s8 + $0x730] sm:$0xff]  ;;  %v8416_v48 = vld [vmem:[%s14121_s8 + $0x738] sm:$0xff] }
0x2be4   :  { %11407 = vmatpush3.bf16.msra.mxu1 %v11406_v21  ;;  %11439 = vmatpush3.bf16.msra.mxu0 %v11438_v59  ;;  %v7997_v21 = vadd.f32 %v13792_v50, %v13859_v44  ;;  %v13943_v59 = vrot.slane %v13837_v28, %v12928_v5  ;;  %v8163_v50 = vmax.f32 %v7989_v49, 0.0  ;;  %v7918_v44 = vadd.f32 %v13784_v20, %v7486_v43  ;;  %v8397_v20 = vld [vmem:[%s14121_s8 + $0x6a0] sm:$0xff]  ;;  %v8430_v43 = vld [vmem:[%s14121_s8 + $0x7a8] sm:$0xff] }
0x2be5   :  { %11409 = vmatprep.subr.bf16.mxu1 %v11408_v61  ;;  %11441 = vmatprep.subr.bf16.mxu0 %v11440_v6  ;;  %v7995_v5 = vadd.f32 %v13786_v38, %v7494_v34  ;;  %v8380_v61 = vld [vmem:[%s14121_s8 + $0x618] sm:$0xff]  ;;  %v8178_v6 = vmax.f32 %v7920_v58, 0.0  ;;  %v8398_v38 = vld [vmem:[%s14121_s8 + $0x6a8] sm:$0xff]  ;;  %v8168_v34 = vmax.f32 %v8145_v46, 0.0  ;;  %v8401_v49 = vld [vmem:[%s14121_s8 + $0x6c0] sm:$0xff]  ;;  %v11494_v58 = vpack.c.bf16 %v8416_v48, %v8415_v18 }
0x2be6   :  { %v8180_v37 = vmax.f32 %v7997_v21, 0.0  ;;  %v8068_v40 = vadd.f32 %v13806_v52, %v13943_v59  ;;  %v11454_v55 = vpack.c.bf16 %v8380_v61, %v8379_v32  ;;  %v8385_v21 = vld [vmem:[%s14121_s8 + $0x640] sm:$0xff]  ;;  %v8436_v32 = vld [vmem:[%s14121_s8 + $0x7d8] sm:$0xff]  ;;  %v8066_v35 = vadd.f32 %v13800_v42, %v7502_v41 }
0x2be7   :  { %v8179_v52 = vmax.f32 %v7995_v5, 0.0  ;;  %v8435_v5 = vld [vmem:[%s14121_s8 + $0x7d0] sm:$0xff]  ;;  %v8424_v18 = vld [vmem:[%s14121_s8 + $0x778] sm:$0xff] }
0x2be8   :  { %11411 = vmatpush3.bf16.msra.mxu1 %v11410_v3  ;;  %11443 = vmatpush3.bf16.msra.mxu0 %v11442_v4  ;;  %v8177_v3 = vmax.f32 %v7918_v44, 0.0  ;;  %v11486_v4 = vpack.c.bf16 %v8412_v33, %v8411_v2  ;;  %v8166_v31 = vmax.f32 %v8068_v40, 0.0  ;;  %v8404_v44 = vld [vmem:[%s14121_s8 + $0x6d8] sm:$0xff]  ;;  %v11500_v2 = vpack.c.bf16 %v8436_v32, %v8435_v5  ;;  %v8419_v33 = vld [vmem:[%s14121_s8 + $0x750] sm:$0xff] }
0x2be9   :  { %11413 = vmatprep.subr.bf16.mxu1 %v11412_v51  ;;  %11445 = vmatprep.subr.bf16.mxu0 %v11444_v0  ;;  %v11456_v51 = vpack.c.bf16 %v8398_v38, %v8397_v20  ;;  %v11488_v0 = vpack.c.bf16 %v8430_v43, %v8429_v12  ;;  %v8388_v40 = vld [vmem:[%s14121_s8 + $0x658] sm:$0xff]  ;;  %v8405_v38 = vld [vmem:[%s14121_s8 + $0x6e0] sm:$0xff]  ;;  %v8406_v12 = vld [vmem:[%s14121_s8 + $0x6e8] sm:$0xff] }
0x2bea   :  { %v8420_v20 = vld [vmem:[%s14121_s8 + $0x758] sm:$0xff]  ;;  %v8437_v43 = vld [vmem:[%s14121_s8 + $0x7e0] sm:$0xff]  ;;  %v11472_v30 = vpack.c.bf16 %v8406_v12, %v8405_v38 }
0x2bec   :  { %11415 = vmatpush3.bf16.msra.mxu1 %v11414_v1  ;;  %11447 = vmatpush3.bf16.msra.mxu0 %v11446_v10  ;;  %v11490_v1 = vpack.c.bf16 %v8414_v22, %v8413_v36  ;;  %v8383_v10 = vld [vmem:[%s14121_s8 + $0x630] sm:$0xff]  ;;  %v8408_v36 = vld [vmem:[%s14121_s8 + $0x6f8] sm:$0xff] }
0x2bed   :  { %11449 = vmatprep.subr.bf16.mxu1 %v11448_v14  ;;  %11481 = vmatprep.subr.bf16.mxu0 %v11480_v47  ;;  %v8384_v14 = vld [vmem:[%s14121_s8 + $0x638] sm:$0xff]  ;;  %v8402_v47 = vld [vmem:[%s14121_s8 + $0x6c8] sm:$0xff]  ;;  %v8439_v22 = vld [vmem:[%s14121_s8 + $0x7f0] sm:$0xff] }
0x2bee   :  { %v11462_v57 = vpack.c.bf16 %v8384_v14, %v8383_v10  ;;  %v11508_v14 = vpack.c.bf16 %v8440_v63, %v8439_v22 }
0x2bef   :  { %8813 = vmatmul.mubr.f32.vlgmr.msra.gmra.mrb[96].mxu1 %v8161_v60  ;;  %8888 = vmatmul.mubr.f32.vlgmr.msra.gmra.mrb[102].mxu0 %v8163_v50  ;;  %v8418_v60 = vld [vmem:[%s14121_s8 + $0x748] sm:$0xff]  ;;  %v8403_v50 = vld [vmem:[%s14121_s8 + $0x6d0] sm:$0xff] }
0x2bf0   :  { %8817 = vmatprep.mubr.f32.mxu1 %v8178_v6  ;;  %8892 = vmatprep.mubr.f32.mxu0 %v8180_v37  ;;  %v8387_v37 = vld [vmem:[%s14121_s8 + $0x650] sm:$0xff]  ;;  %v11468_v46 = vpack.c.bf16 %v8404_v44, %v8403_v50 }
0x2bf1   :  { %11451 = vmatpush3.bf16.msra.mxu1 %v11450_v25  ;;  %11483 = vmatpush3.bf16.msra.mxu0 %v11482_v19  ;;  %v8386_v25 = vld [vmem:[%s14121_s8 + $0x648] sm:$0xff]  ;;  %v11464_v19 = vpack.c.bf16 %v8402_v47, %v8401_v49 }
0x2bf2   :  { %11453 = vmatprep.subr.bf16.mxu1 %v11452_v17  ;;  %11485 = vmatprep.subr.bf16.mxu0 %v11484_v24  ;;  %v11496_v17 = vpack.c.bf16 %v8434_v15, %v8433_v56  ;;  %v8417_v24 = vld [vmem:[%s14121_s8 + $0x740] sm:$0xff]  ;;  %v11466_v61 = vpack.c.bf16 %v8386_v25, %v8385_v21  ;;  %v8165_v56 = vmax.f32 %v8066_v35, 0.0 }
0x2bf3   :  { %8818 = vmatmul.mubr.f32.gmra.mrb[98].mxu1 %v8177_v3  ;;  %8893 = vmatmul.mubr.f32.gmra.mrb[104].mxu0 %v8179_v52  ;;  %v11498_v6 = vpack.c.bf16 %v8418_v60, %v8417_v24  ;;  %v8438_v3 = vld [vmem:[%s14121_s8 + $0x7e8] sm:$0xff]  ;;  %v11470_v52 = vpack.c.bf16 %v8388_v40, %v8387_v37 }
0x2bf4   :  { %8962 = vmatprep.mubr.f32.mxu1 %v8166_v31  ;;  %9037 = vmatprep.mubr.f32.mxu0 %v8168_v34  ;;  %v11504_v31 = vpack.c.bf16 %v8438_v3, %v8437_v43  ;;  %v8421_v34 = vld [vmem:[%s14121_s8 + $0x760] sm:$0xff] }
0x2bf5   :  { %11455 = vmatpush3.bf16.msra.mxu1 %v11454_v55  ;;  %11487 = vmatpush3.bf16.msra.mxu0 %v11486_v4  ;;  %v11502_v55 = vpack.c.bf16 %v8420_v20, %v8419_v33  ;;  %v8389_v4 = vld [vmem:[%s14121_s8 + $0x660] sm:$0xff] }
0x2bf6   :  { %11457 = vmatprep.subr.bf16.mxu1 %v11456_v51  ;;  %11489 = vmatprep.subr.bf16.mxu0 %v11488_v0  ;;  %v8422_v51 = vld [vmem:[%s14121_s8 + $0x768] sm:$0xff]  ;;  %v8407_v0 = vld [vmem:[%s14121_s8 + $0x6f0] sm:$0xff]  ;;  %v11474_v7 = vpack.c.bf16 %v8390_v54, %v8389_v4 }
0x2bf7   :  { %v11506_v16 = vpack.c.bf16 %v8422_v51, %v8421_v34  ;;  %v11476_v10 = vpack.c.bf16 %v8408_v36, %v8407_v0 }
0x2bf9   :  { %11459 = vmatpush3.bf16.msra.mxu1 %v11458_v53  ;;  %11491 = vmatpush3.bf16.msra.mxu0 %v11490_v1  ;;  %v8391_v53 = vld [vmem:[%s14121_s8 + $0x670] sm:$0xff]  ;;  %v7510_v1 = vrot.slane %v13837_v28, %v13027_v45  ;;  %v8074_v45 = vadd.f32 %v13827_v27, %v13943_v59  ;;  %v8151_v28 = vadd.f32 %v13829_v62, %v13947_v8  ;;  %v9443_v59 = vld [vmem:[#allocation9] ss:$0 sm:$0xff] }
0x2bfa   :  { %11461 = vmatprep.subr.bf16.mxu1 %v11460_v29  ;;  %11493 = vmatprep.subr.bf16.mxu0 %v11492_v39  ;;  %v8392_v29 = vld [vmem:[%s14121_s8 + $0x678] sm:$0xff]  ;;  %v8423_v39 = vld [vmem:[%s14121_s8 + $0x770] sm:$0xff] }
0x2bfb   :  { %v11478_v48 = vpack.c.bf16 %v8392_v29, %v8391_v53  ;;  %v11510_v49 = vpack.c.bf16 %v8424_v18, %v8423_v39  ;;  %v8143_v47 = vadd.f32 %v13802_v9, %v7510_v1  ;;  %v8182_v21 = vmax.f32 %v8074_v45, 0.0 }
0x2bfc   :  { %v8184_v42 = vmax.f32 %v8151_v28, 0.0 }
0x2bfd   :  { %11463 = vmatpush3.bf16.msra.mxu1 %v11462_v57  ;;  %11495 = vmatpush3.bf16.msra.mxu0 %v11494_v58  ;;  %v8167_v15 = vmax.f32 %v8143_v47, 0.0  ;;  %v8072_v57 = vadd.f32 %v13818_v11, %v7502_v41  ;;  %v8149_v58 = vadd.f32 %v13820_v13, %v7510_v1 }
0x2bfe   :  { %11465 = vmatprep.subr.bf16.mxu1 %v11464_v19  ;;  %11497 = vmatprep.subr.bf16.mxu0 %v11496_v17 }
0x2bff   :  { %v8181_v9 = vmax.f32 %v8072_v57, 0.0  ;;  %v8183_v25 = vmax.f32 %v8149_v58, 0.0 }
0x2c01   :  { %11467 = vmatpush3.bf16.msra.mxu1 %v11466_v61  ;;  %11499 = vmatpush3.bf16.msra.mxu0 %v11498_v6 }
0x2c02   :  { %11469 = vmatprep.subr.bf16.mxu1 %v11468_v46  ;;  %11501 = vmatprep.subr.bf16.mxu0 %v11500_v2 }
0x2c05   :  { %11471 = vmatpush3.bf16.msra.mxu1 %v11470_v52  ;;  %11503 = vmatpush3.bf16.msra.mxu0 %v11502_v55 }
0x2c06   :  { %11473 = vmatprep.subr.bf16.mxu1 %v11472_v30  ;;  %11505 = vmatprep.subr.bf16.mxu0 %v11504_v31 }
0x2c09   :  { %11475 = vmatpush3.bf16.msra.mxu1 %v11474_v7  ;;  %11507 = vmatpush3.bf16.msra.mxu0 %v11506_v16 }
0x2c0a   :  { %11477 = vmatprep.subr.bf16.mxu1 %v11476_v10  ;;  %11509 = vmatprep.subr.bf16.mxu0 %v11508_v14 }
0x2c0d   :  { %11479 = vmatpush3.bf16.msra.mxu1 %v11478_v48  ;;  %11511 = vmatpush3.bf16.msra.mxu0 %v11510_v49 }
0x2c10   :  { %8963 = vmatmul.mubr.f32.vlgmr.msra.gmra.mrb[100].mxu1 %v8165_v56  ;;  %9038 = vmatmul.mubr.f32.vlgmr.msra.gmra.mrb[106].mxu0 %v8167_v15 }
0x2c11   :  { %8967 = vmatprep.mubr.f32.mxu1 %v8182_v21  ;;  %9042 = vmatprep.mubr.f32.mxu0 %v8184_v42 }
0x2c14   :  { %8968 = vmatmul.mubr.f32.gmra.mrb[102].mxu1 %v8181_v9  ;;  %9043 = vmatmul.mubr.f32.gmra.mrb[108].mxu0 %v8183_v25 }
0x2c81   :  { %v10000_v27 = vpop.f32.mrb[88].mxu1  ;;  %v10038_v62 = vpop.f32.mrb[94].mxu0 }
0x2c82   :  { %v10001_v8 = vpop.f32.mrb[89].mxu1  ;;  %v10039_v19 = vpop.f32.mrb[95].mxu0 }
0x2c83   :  { %v10002_v17 = vadd.f32 %v10001_v8, %v10000_v27  ;;  %v10040_v24 = vadd.f32 %v10039_v19, %v10038_v62 }
0x2c85   :  { %v8515_v11 = vadd.f32 %v10002_v17, %v9443_v59  ;;  %v10003_v60 = vpop.f32.mrb[90].mxu1  ;;  %v10041_v13 = vpop.f32.mrb[96].mxu0 }
0x2c86   :  { %v10004_v50 = vpop.f32.mrb[91].mxu1  ;;  %v10042_v44 = vpop.f32.mrb[97].mxu0 }
0x2c87   :  { %v8590_v5 = vadd.f32 %v10040_v24, %v8515_v11  ;;  %v10005_v32 = vadd.f32 %v10004_v50, %v10003_v60  ;;  %v10043_v61 = vadd.f32 %v10042_v44, %v10041_v13 }
0x2c89   :  { %v8520_v6 = vadd.f32 %v10005_v32, %v9443_v59 }
0x2c8b   :  { %v8595_v37 = vadd.f32 %v10043_v61, %v8520_v6 }
0x2ca1   :  { %v10076_v40 = vpop.f32.mrb[92].mxu1  ;;  %v10114_v46 = vpop.f32.mrb[98].mxu0 }
0x2ca2   :  { %v10077_v2 = vpop.f32.mrb[93].mxu1  ;;  %v10115_v33 = vpop.f32.mrb[99].mxu0 }
0x2ca3   :  { %v10078_v20 = vadd.f32 %v10077_v2, %v10076_v40  ;;  %v10116_v38 = vadd.f32 %v10115_v33, %v10114_v46  ;;  %v9096_v46 = vld [vmem:[%s12375_s4 + $0x10] sm:$0xff]  ;;  %v9097_v2 = vld [vmem:[%s12375_s4 + $0x18] sm:$0xff] }
0x2ca4   :  { %v11516_v33 = vpack.c.bf16 %v9097_v2, %v9096_v46 }
0x2ca5   :  { %v8665_v12 = vadd.f32 %v10078_v20, %v8590_v5  ;;  %v10079_v43 = vpop.f32.mrb[94].mxu1  ;;  %v10117_v3 = vpop.f32.mrb[100].mxu0 }
0x2ca6   :  { %v10080_v52 = vpop.f32.mrb[95].mxu1  ;;  %v10118_v55 = vpop.f32.mrb[101].mxu0 }
0x2ca7   :  { %v8740_v4 = vadd.f32 %v10116_v38, %v8665_v12  ;;  %v10081_v54 = vadd.f32 %v10080_v52, %v10079_v43  ;;  %v10119_v30 = vadd.f32 %v10118_v55, %v10117_v3 }
0x2ca9   :  { %v8670_v31 = vadd.f32 %v10081_v54, %v8595_v37  ;;  %v9095_v37 = vld [vmem:[%s12375_s4 + $0x8] sm:$0xff] }
0x2cab   :  { %v8745_v34 = vadd.f32 %v10119_v30, %v8670_v31  ;;  %v9445_v30 = vld [vmem:[#allocation7] ss:$0 sm:$0xff] }
0x2cc2   :  { %v10152_v51 = vpop.f32.mrb[96].mxu1  ;;  %v10190_v0 = vpop.f32.mrb[102].mxu0 }
0x2cc3   :  { %v10153_v36 = vpop.f32.mrb[97].mxu1  ;;  %v10191_v22 = vpop.f32.mrb[103].mxu0 }
0x2cc4   :  { %v10154_v63 = vadd.f32 %v10153_v36, %v10152_v51  ;;  %v10192_v41 = vadd.f32 %v10191_v22, %v10190_v0 }
0x2cc6   :  { %v8815_v7 = vadd.f32 %v10154_v63, %v8740_v4  ;;  %v10155_v16 = vpop.f32.mrb[98].mxu1  ;;  %v10193_v53 = vpop.f32.mrb[104].mxu0  ;;  %v9444_v4 = vld [vmem:[#allocation6] ss:$0 sm:$0xff]  ;;  %v9446_v63 = vld [vmem:[#allocation10] ss:$0 sm:$0xff] }
0x2cc7   :  { %v10156_v1 = vpop.f32.mrb[99].mxu1  ;;  %v10194_v10 = vpop.f32.mrb[105].mxu0 }
0x2cc8   :  { %v8890_v14 = vadd.f32 %v10192_v41, %v8815_v7  ;;  %v10157_v29 = vadd.f32 %v10156_v1, %v10155_v16  ;;  %v10195_v39 = vadd.f32 %v10194_v10, %v10193_v53 }
0x2cca   :  { %v8820_v18 = vadd.f32 %v10157_v29, %v8745_v34 }
0x2ccc   :  { %v8895_v48 = vadd.f32 %v10195_v39, %v8820_v18 }
0x2ce3   :  { %v10228_v49 = vpop.f32.mrb[100].mxu1  ;;  %v10266_v35 = vpop.f32.mrb[106].mxu0 }
0x2ce4   :  { %v10229_v47 = vpop.f32.mrb[101].mxu1  ;;  %v10267_v45 = vpop.f32.mrb[107].mxu0 }
0x2ce5   :  { %v10230_v28 = vadd.f32 %v10229_v47, %v10228_v49  ;;  %v10268_v56 = vadd.f32 %v10267_v45, %v10266_v35 }
0x2ce7   :  { %v8965_v15 = vadd.f32 %v10230_v28, %v8890_v14  ;;  %v10231_v57 = vpop.f32.mrb[102].mxu1  ;;  %v10269_v58 = vpop.f32.mrb[108].mxu0 }
0x2ce8   :  { %v10232_v21 = vpop.f32.mrb[103].mxu1  ;;  %v10270_v42 = vpop.f32.mrb[109].mxu0 }
0x2ce9   :  { %v9040_v9 = vadd.f32 %v10268_v56, %v8965_v15  ;;  %v10233_v25 = vadd.f32 %v10232_v21, %v10231_v57  ;;  %v10271_v27 = vadd.f32 %v10270_v42, %v10269_v58 }
0x2ceb   :  { %v8970_v62 = vadd.f32 %v10233_v25, %v8895_v48  ;;  %v9048_v59 = vadd.f32 %v9040_v9, %v13549_v26 }
0x2ced   :  { %v9045_v8 = vadd.f32 %v10271_v27, %v8970_v62  ;;  %v9052_v19 = vsel %vm390_vm0, %v9048_v59, 0.0 }
0x2cee   :  { %9053 = vadd.xlane.f32.xlu0 %v9052_v19 }
0x2cef   :  { %v9049_v17 = vadd.f32 %v9045_v8, %v13564_v23  ;;  %v9094_v23 = vld [vmem:[%s12375_s4] sm:$0xff] }
0x2cf0   :  { %v11512_v40 = vpack.c.bf16 %v9095_v37, %v9094_v23 }
0x2cf1   :  { %v9055_v24 = vsel %vm390_vm0, %v9049_v17, 0.0 }
0x2cf2   :  { %9056 = vadd.xlane.f32.xlu0 %v9055_v24  ;;  %11513 = vmatprep.subr.bf16.mxu1 %v11512_v40 }
0x2cf3   :  { %11515 = vmatpush3.bf16.msra.mxu1 %v11512_v40 }
0x2cf4   :  { %11517 = vmatprep.subr.bf16.mxu1 %v11516_v33 }
0x2cf7   :  { %11519 = vmatpush3.bf16.msra.mxu1 %v11516_v33 }
0x2d7b   :  { %v9054_v11 = vpop.xlane.xlu0 %9053 }
0x2d7c   :  { %v9058_v60 = vmul.f32 0.03125, %v9054_v11 }
0x2d7e   :  { %v9060_v13 = vsub.f32 %v9048_v59, %v9058_v60 }
0x2d7f   :  { %v9057_v50 = vpop.xlane.xlu0 %9056 }
0x2d80   :  { %v9059_v44 = vmul.f32 0.03125, %v9057_v50  ;;  %v9062_v5 = vmul.f32 %v9060_v13, %v9060_v13 }
0x2d82   :  { %v9061_v26 = vsub.f32 %v9049_v17, %v9059_v44  ;;  %v9064_v32 = vsel %vm390_vm0, %v9062_v5, 0.0 }
0x2d83   :  { %9065 = vadd.xlane.f32.xlu0 %v9064_v32 }
0x2d84   :  { %v9063_v61 = vmul.f32 %v9061_v26, %v9061_v26 }
0x2d86   :  { %v9067_v6 = vsel %vm390_vm0, %v9063_v61, 0.0 }
0x2d87   :  { %9068 = vadd.xlane.f32.xlu0 %v9067_v6 }
0x2e10   :  { %v9066_v20 = vpop.xlane.xlu0 %9065 }
0x2e11   :  { %v9070_v38 = vmul.f32 0.03125, %v9066_v20 }
0x2e13   :  { %v9072_v12 = vadd.f32 1e-05, %v9070_v38 }
0x2e14   :  { %v9069_v43 = vpop.xlane.xlu0 %9068 }
0x2e15   :  { %11917 = vrsqrt.f32 %v9072_v12  ;;  %v9071_v3 = vmul.f32 0.03125, %v9069_v43 }
0x2e17   :  { %v9073_v52 = vadd.f32 1e-05, %v9071_v3 }
0x2e19   :  { %11919 = vrsqrt.f32 %v9073_v52 }
0x2e1f   :  { %v11918_v55 = vpop.eup %11917 }
0x2e20   :  { %v9076_v54 = vmul.f32 %v11918_v55, %v9060_v13 }
0x2e22   :  { %v9084_v31 = vmul.f32 %v9444_v4, %v9076_v54 }
0x2e23   :  { %v11920_v34 = vpop.eup %11919 }
0x2e24   :  { %v9077_v51 = vmul.f32 %v11920_v34, %v9061_v26  ;;  %v9092_v0 = vadd.f32 %v9445_v30, %v9084_v31 }
0x2e26   :  { %v9085_v36 = vmul.f32 %v9444_v4, %v9077_v51  ;;  %10661 = vmatprep.mubr.msk.f32.mxu1 %vm390_vm0, %v9092_v0 }
0x2e28   :  { %v9093_v22 = vadd.f32 %v9445_v30, %v9085_v36 }
0x2e2a   :  { %10662 = vmatmul.mubr.msk.f32.vlgmr.msra.gmra.mrb[104].mxu1 %vm390_vm0, %v9093_v22 }
0x2efd   :  { %v10663_v41 = vpop.f32.mrb[104].mxu1 }
0x2efe   :  { %v9183_v7 = vadd.f32 %v10663_v41, %v9446_v63  ;;  %v9177_v16 = vpop.f32.mrb[105].mxu1 }
0x2eff   :  { %v9178_v53 = vadd.f32 %v9446_v63, %v9177_v16 }
0x2f00   :  { %9188 = vst.msk [vmem:[%s12385_s19 + $0x8] sm:$0xff] %vm9186_vm4, %v9183_v7 }
0x2f01   :  { %9187 = vst.msk [vmem:[%s12385_s19] sm:$0xff] %vm9186_vm4, %v9178_v53 }
0x2f02   :  { %9193 = vsyncpa [#allocation3], 1 }
0x2f03   :  { %9194 = vsyncpa [#allocation5], 1 }
0x2f04   :  { %9195 = vsyncpa [#allocation8], 1 }
0x2f05   :  { %9196 = vsyncpa [#allocation11], 1 }

</bundles_post_ra>
